<compile_context>
chip_gen: v5e
topology: v5e:2x2
jax: 0.10.0
libtpu: 0.0.40
codegen_flags: <defaults>
</compile_context>

<pallas_src>
import functools

import numpy as np
import jax
import jax.numpy as jnp
from jax.experimental import pallas as pl
from jax.experimental.pallas import tpu as pltpu

L = 60               # sequence length implied by dense1 (17 * 60 = 1020)
C = 16               # conv1 output channels
NCHUNK = C + 1       # 16 conv channels + raw xi
KP = 64              # lane-padded chunk width (60 -> 64)
D1 = 1024            # dense1 out features
NEG_SLOPE = 0.01


def _lrelu(x):
    # maximum(x, a*x) == leaky_relu(x) exactly for 0 < a < 1 (2 VALU ops).
    return jnp.maximum(x, NEG_SLOPE * x)


def _round_up(x, m):
    return (x + m - 1) // m * m


def _conv_dtype():
    """bf16 conv arithmetic only on chips with a bf16 VPU (v6e / v7x)."""
    try:
        kind = jax.devices()[0].device_kind.lower()
    except Exception:
        return jnp.float32
    if any(tag in kind for tag in ("v2", "v3", "v4", "v5")):
        return jnp.float32
    return jnp.bfloat16


def net2_kernel(cw_ref, cb_ref, xt_ref,
                w1_ref, b1_ref,
                w2_ref, b2_ref,
                w3_ref, b3_ref,
                w4_ref, b4_ref,
                w5_ref, b5_ref,
                out_ref, feat_ref, *, conv_dtype):
    # xt_ref: (3, Bt, 64) taps [x_{l-1}, x_l, x_{l+1}], zero padded at the
    # sequence edges and in lanes 60..63.
    x_m1 = xt_ref[0].astype(conv_dtype)
    x_0 = xt_ref[1].astype(conv_dtype)
    x_p1 = xt_ref[2].astype(conv_dtype)

    def row(scalar):
        # 32-bit splat of a dynamic SMEM scalar to a (1, KP) row, then convert
        # to the conv compute dtype; sublane-broadcasts inside the multiply.
        return jnp.full((1, KP), scalar, jnp.float32).astype(conv_dtype)

    # Conv1d(1, 16, k=3, pad=1) + leaky_relu, one 64-lane chunk per channel,
    # scattered (bf16) into the (Bt, 17*64) feature buffer at 64-aligned
    # offsets.  Garbage in padded lanes 60..63 of each chunk multiplies the
    # all-zero rows of the padded dense1 weight, so it never contributes.
    for c in range(C):
        k0 = row(cw_ref[3 * c])
        k1 = row(cw_ref[3 * c + 1])
        k2 = row(cw_ref[3 * c + 2])
        bc = row(cb_ref[c])
        a_c = _lrelu(k0 * x_m1 + k1 * x_0 + k2 * x_p1 + bc)
        feat_ref[:, c * KP:(c + 1) * KP] = a_c.astype(jnp.bfloat16)
    # torch.cat((flattened, xi), 1): raw-input chunk.
    feat_ref[:, C * KP:(C + 1) * KP] = x_0.astype(jnp.bfloat16)

    # dense1..dense4: single K-aligned bf16 MXU matmuls, f32 accumulation.
    feat = feat_ref[...]                                      # bf16 (Bt, 1088)
    h1 = _lrelu(jnp.dot(feat, w1_ref[...],
                        preferred_element_type=jnp.float32) + b1_ref[...])
    h2 = _lrelu(jnp.dot(h1.astype(jnp.bfloat16), w2_ref[...],
                        preferred_element_type=jnp.float32) + b2_ref[...])
    h3 = _lrelu(jnp.dot(h2.astype(jnp.bfloat16), w3_ref[...],
                        preferred_element_type=jnp.float32) + b3_ref[...])
    h4 = _lrelu(jnp.dot(h3.astype(jnp.bfloat16), w4_ref[...],
                        preferred_element_type=jnp.float32) + b4_ref[...])

    # dense5 (out_features = 1): VPU multiply + lane reduction (no N=1 MXU
    # dot), then a tiny (Bt,1)->(1,Bt) XLU transpose so the output block is
    # lane-dense (unmasked stores, dense HBM writeback).
    z5 = jnp.sum(h4 * w5_ref[...], axis=-1, keepdims=True) + b5_ref[...]
    out_ref[...] = jax.nn.sigmoid(z5).T


def init_params(key):
    def unif(k, shape, fan_in):
        bound = 1.0 / np.sqrt(fan_in)
        return jax.random.uniform(k, shape, jnp.float32, -bound, bound)

    ks = jax.random.split(key, 12)
    return dict(
        conv_w=unif(ks[0], (C, 1, 3), 3),
        conv_b=unif(ks[1], (C,), 3),
        w1=unif(ks[2], (1024, 1020), 1020), b1=unif(ks[3], (1024,), 1020),
        w2=unif(ks[4], (512, 1024), 1024),  b2=unif(ks[5], (512,), 1024),
        w3=unif(ks[6], (256, 512), 512),    b3=unif(ks[7], (256,), 512),
        w4=unif(ks[8], (128, 256), 256),    b4=unif(ks[9], (128,), 256),
        w5=unif(ks[10], (1, 128), 128),     b5=unif(ks[11], (1,), 128),
    )


def prepare_params(params):
    """One-time weight preprocessing (transpose / pad / cast), hoisted out of
    the per-call forward path.  Call once and reuse the result."""
    # dense1 weight, chunked by flatten group (chunk c = conv channel c,
    # chunk 16 = raw xi); each 60-row group is zero-padded to 64 rows so it
    # lines up with the 64-lane feature chunks -> single (1088, 1024) dot.
    w1t = params["w1"].T.reshape(NCHUNK, L, D1)             # (17, 60, 1024)
    w1p = jnp.pad(w1t, ((0, 0), (0, KP - L), (0, 0)))
    w1p = w1p.reshape(NCHUNK * KP, D1)

    return dict(
        conv_w=params["conv_w"].reshape(C * 3).astype(jnp.float32),   # flat SMEM
        conv_b=params["conv_b"].astype(jnp.float32),
        w1p=w1p.astype(jnp.bfloat16),
        b1=params["b1"].reshape(1, -1).astype(jnp.float32),
        w2t=params["w2"].T.astype(jnp.bfloat16),
        b2=params["b2"].reshape(1, -1).astype(jnp.float32),
        w3t=params["w3"].T.astype(jnp.bfloat16),
        b3=params["b3"].reshape(1, -1).astype(jnp.float32),
        w4t=params["w4"].T.astype(jnp.bfloat16),
        b4=params["b4"].reshape(1, -1).astype(jnp.float32),
        w5r=params["w5"].reshape(1, -1).astype(jnp.float32),          # (1, 128)
        b5=params["b5"].reshape(1, 1).astype(jnp.float32),
    )


@jax.jit
def net2_forward(xi, prep):
    b = xi.shape[0]
    assert xi.shape[1] == L

    # im2col-style conv taps (k=3, padding=1), lane-padded 60 -> 64 with zeros.
    zcol = jnp.zeros((b, 1), xi.dtype)
    x_m1 = jnp.concatenate([zcol, xi[:, :-1]], axis=1)
    x_p1 = jnp.concatenate([xi[:, 1:], zcol], axis=1)
    taps = jnp.stack([x_m1, xi, x_p1], axis=0)                     # (3, B, 60)
    taps = jnp.pad(taps, ((0, 0), (0, 0), (0, KP - L)))            # (3, B, 64)

    # Batch tile: big enough (<=512) to amortize the ~0.35us/step overhead,
    # but >= 2 grid steps whenever b > 8 so the "parallel" batch axis can
    # shard across both TensorCores on v7x.
    bt = max(8, min(512, _round_up((b + 1) // 2, 8)))
    bp = _round_up(b, bt)
    n_steps = bp // bt
    taps = jnp.pad(taps, ((0, 0), (0, bp - b), (0, 0))).astype(jnp.float32)

    def resident(shape):
        # Full-array block, same block index every grid step -> fetched once
        # and kept VMEM-resident; Buffered(1) drops the useless second buffer.
        return pl.BlockSpec(shape, lambda i: (0,) * len(shape),
                            pipeline_mode=pl.Buffered(1))

    smem = pltpu.MemorySpace.SMEM

    # Advisory cost for XLA's scheduler around this custom call.
    weight_bytes = sum(int(v.size) * v.dtype.itemsize for v in prep.values())
    flops = 2 * bp * (NCHUNK * KP * D1 + D1 * 512 + 512 * 256 + 256 * 128
                      + 128 + 3 * C * L)
    cost = pl.CostEstimate(flops=flops, transcendentals=bp,
                           bytes_accessed=weight_bytes + taps.size * 4 + bp * 4)

    kernel = functools.partial(net2_kernel, conv_dtype=_conv_dtype())

    out = pl.pallas_call(
        kernel,
        out_shape=jax.ShapeDtypeStruct((n_steps, bt), jnp.float32),
        grid_spec=pltpu.PrefetchScalarGridSpec(
            num_scalar_prefetch=0,
            grid=(n_steps,),
            in_specs=[
                pl.BlockSpec((3 * C,), lambda i: (0,), memory_space=smem),  # conv_w
                pl.BlockSpec((C,), lambda i: (0,), memory_space=smem),      # conv_b
                pl.BlockSpec((3, bt, KP), lambda i: (0, i, 0)),             # taps
                resident(prep["w1p"].shape), resident(prep["b1"].shape),
                resident(prep["w2t"].shape), resident(prep["b2"].shape),
                resident(prep["w3t"].shape), resident(prep["b3"].shape),
                resident(prep["w4t"].shape), resident(prep["b4"].shape),
                resident(prep["w5r"].shape), resident(prep["b5"].shape),
            ],
            out_specs=pl.BlockSpec((1, bt), lambda i: (i, 0)),              # lane-dense
            scratch_shapes=[pltpu.VMEM((bt, NCHUNK * KP), jnp.bfloat16)],
        ),
        compiler_params=pltpu.CompilerParams(
            dimension_semantics=("parallel",),          # batch axis -> 2 TCs on v7x
            vmem_limit_bytes=32 * 1024 * 1024,          # safe on v7x's 64 MiB VMEM
        ),
        cost_estimate=cost,
    )(prep["conv_w"], prep["conv_b"], taps,
      prep["w1p"], prep["b1"], prep["w2t"], prep["b2"],
      prep["w3t"], prep["b3"], prep["w4t"], prep["b4"],
      prep["w5r"], prep["b5"])

    # (n_steps, bt) row-major == batch order; drop padded rows, back to (b, 1).
    return out.reshape(-1)[:b].reshape(b, 1)


def net2_reference(xi, params):
    """Pure-JAX f32 reference of the PyTorch forward (for verification)."""
    x = xi[:, None, :]                                     # (B, 1, L) NCH
    conv = jax.lax.conv_general_dilated(
        x, params["conv_w"], window_strides=(1,), padding=[(1, 1)],
        dimension_numbers=("NCH", "OIH", "NCH"))
    conv = conv + params["conv_b"][None, :, None]
    h = jax.nn.leaky_relu(conv, NEG_SLOPE)
    h = h.reshape(xi.shape[0], -1)                         # flatten(1, 2)
    feat = jnp.concatenate([h, xi], axis=1)                # (B, 1020)

    def dense(v, w, bias):
        return v @ w.T + bias

    h = jax.nn.leaky_relu(dense(feat, params["w1"], params["b1"]), NEG_SLOPE)
    h = jax.nn.leaky_relu(dense(h, params["w2"], params["b2"]), NEG_SLOPE)
    h = jax.nn.leaky_relu(dense(h, params["w3"], params["b3"]), NEG_SLOPE)
    h = jax.nn.leaky_relu(dense(h, params["w4"], params["b4"]), NEG_SLOPE)
    z = dense(h, params["w5"], params["b5"])
    return jax.nn.sigmoid(z)


if __name__ == "__main__":
    key = jax.random.PRNGKey(0)
    pkey, xkey = jax.random.split(key)
    params = init_params(pkey)
    prep = prepare_params(params)        # one-time preprocessing, reused per call

    B = 8
    xi = jax.random.uniform(xkey, (B, L), jnp.float32)

    out = net2_forward(xi, prep)
    out = jax.block_until_ready(out)

    ref = net2_reference(xi, params)
    assert out.shape == (B, 1)
    np.testing.assert_allclose(np.asarray(out), np.asarray(ref),
                               rtol=2e-2, atol=2e-2)
    print("KERNEL_OK")
</pallas_src>

<mosaic_0001>
module attributes {stable_mosaic.version = 11 : i64} {
  func.func @net2_kernel(%arg0: i32, %arg1: memref<48xf32, #tpu.memory_space<smem>>, %arg2: memref<16xf32, #tpu.memory_space<smem>>, %arg3: memref<3x8x64xf32, #tpu.memory_space<vmem>>, %arg4: memref<1088x1024xbf16, #tpu.memory_space<vmem>>, %arg5: memref<1x1024xf32, #tpu.memory_space<vmem>>, %arg6: memref<1024x512xbf16, #tpu.memory_space<vmem>>, %arg7: memref<1x512xf32, #tpu.memory_space<vmem>>, %arg8: memref<512x256xbf16, #tpu.memory_space<vmem>>, %arg9: memref<1x256xf32, #tpu.memory_space<vmem>>, %arg10: memref<256x128xbf16, #tpu.memory_space<vmem>>, %arg11: memref<1x128xf32, #tpu.memory_space<vmem>>, %arg12: memref<1x128xf32, #tpu.memory_space<vmem>>, %arg13: memref<1x1xf32, #tpu.memory_space<vmem>>, %arg14: memref<1x8xf32, #tpu.memory_space<vmem>>, %arg15: memref<8x1088xbf16, #tpu.memory_space<vmem>>) attributes {dimension_semantics = [#tpu.dimension_semantics<parallel>], iteration_bounds = array<i64: 1>, scalar_prefetch = 0 : i64, scratch_operands = 1 : i64, tpu.core_type = #tpu.core_type<tc>, window_params = [{transform_indices = @transform_0, window_bounds = array<i64: 48>}, {transform_indices = @transform_1, window_bounds = array<i64: 16>}, {transform_indices = @transform_2, window_bounds = array<i64: 3, 8, 64>}, {pipeline_mode = #tpu.pipeline_mode<synchronous>, transform_indices = @transform_3, window_bounds = array<i64: 1088, 1024>}, {pipeline_mode = #tpu.pipeline_mode<synchronous>, transform_indices = @transform_4, window_bounds = array<i64: 1, 1024>}, {pipeline_mode = #tpu.pipeline_mode<synchronous>, transform_indices = @transform_5, window_bounds = array<i64: 1024, 512>}, {pipeline_mode = #tpu.pipeline_mode<synchronous>, transform_indices = @transform_6, window_bounds = array<i64: 1, 512>}, {pipeline_mode = #tpu.pipeline_mode<synchronous>, transform_indices = @transform_7, window_bounds = array<i64: 512, 256>}, {pipeline_mode = #tpu.pipeline_mode<synchronous>, transform_indices = @transform_8, window_bounds = array<i64: 1, 256>}, {pipeline_mode = #tpu.pipeline_mode<synchronous>, transform_indices = @transform_9, window_bounds = array<i64: 256, 128>}, {pipeline_mode = #tpu.pipeline_mode<synchronous>, transform_indices = @transform_10, window_bounds = array<i64: 1, 128>}, {pipeline_mode = #tpu.pipeline_mode<synchronous>, transform_indices = @transform_11, window_bounds = array<i64: 1, 128>}, {pipeline_mode = #tpu.pipeline_mode<synchronous>, transform_indices = @transform_12, window_bounds = array<i64: 1, 1>}, {transform_indices = @transform_13, window_bounds = array<i64: 1, 8>}]} {
    %c0 = arith.constant 0 : index
    %c0_0 = arith.constant 0 : index
    %c0_1 = arith.constant 0 : index
    %0 = vector.load %arg3[%c0, %c0_0, %c0_1] : memref<3x8x64xf32, #tpu.memory_space<vmem>>, vector<1x8x64xf32>
    %1 = vector.shape_cast %0 : vector<1x8x64xf32> to vector<8x64xf32>
    %2 = arith.truncf %1 : vector<8x64xf32> to vector<8x64xbf16>
    %c1 = arith.constant 1 : index
    %c0_2 = arith.constant 0 : index
    %c0_3 = arith.constant 0 : index
    %3 = vector.load %arg3[%c1, %c0_2, %c0_3] : memref<3x8x64xf32, #tpu.memory_space<vmem>>, vector<1x8x64xf32>
    %4 = vector.shape_cast %3 : vector<1x8x64xf32> to vector<8x64xf32>
    %5 = arith.truncf %4 : vector<8x64xf32> to vector<8x64xbf16>
    %c2 = arith.constant 2 : index
    %c0_4 = arith.constant 0 : index
    %c0_5 = arith.constant 0 : index
    %6 = vector.load %arg3[%c2, %c0_4, %c0_5] : memref<3x8x64xf32, #tpu.memory_space<vmem>>, vector<1x8x64xf32>
    %7 = vector.shape_cast %6 : vector<1x8x64xf32> to vector<8x64xf32>
    %8 = arith.truncf %7 : vector<8x64xf32> to vector<8x64xbf16>
    %c0_6 = arith.constant 0 : index
    %9 = memref.load %arg1[%c0_6] : memref<48xf32, #tpu.memory_space<smem>>
    %10 = vector.broadcast %9 : f32 to vector<1x64xf32>
    %11 = arith.truncf %10 : vector<1x64xf32> to vector<1x64xbf16>
    %c1_7 = arith.constant 1 : index
    %12 = memref.load %arg1[%c1_7] : memref<48xf32, #tpu.memory_space<smem>>
    %13 = vector.broadcast %12 : f32 to vector<1x64xf32>
    %14 = arith.truncf %13 : vector<1x64xf32> to vector<1x64xbf16>
    %c2_8 = arith.constant 2 : index
    %15 = memref.load %arg1[%c2_8] : memref<48xf32, #tpu.memory_space<smem>>
    %16 = vector.broadcast %15 : f32 to vector<1x64xf32>
    %17 = arith.truncf %16 : vector<1x64xf32> to vector<1x64xbf16>
    %c0_9 = arith.constant 0 : index
    %18 = memref.load %arg2[%c0_9] : memref<16xf32, #tpu.memory_space<smem>>
    %19 = vector.broadcast %18 : f32 to vector<1x64xf32>
    %20 = arith.truncf %19 : vector<1x64xf32> to vector<1x64xbf16>
    %21 = vector.broadcast %11 : vector<1x64xbf16> to vector<8x64xbf16>
    %22 = arith.mulf %21, %2 : vector<8x64xbf16>
    %23 = vector.broadcast %14 : vector<1x64xbf16> to vector<8x64xbf16>
    %24 = arith.mulf %23, %5 : vector<8x64xbf16>
    %25 = arith.addf %22, %24 : vector<8x64xbf16>
    %26 = vector.broadcast %17 : vector<1x64xbf16> to vector<8x64xbf16>
    %27 = arith.mulf %26, %8 : vector<8x64xbf16>
    %28 = arith.addf %25, %27 : vector<8x64xbf16>
    %29 = vector.broadcast %20 : vector<1x64xbf16> to vector<8x64xbf16>
    %30 = arith.addf %28, %29 : vector<8x64xbf16>
    %cst = arith.constant 1.000980e-02 : bf16
    %31 = vector.broadcast %cst : bf16 to vector<8x64xbf16>
    %32 = arith.mulf %31, %30 : vector<8x64xbf16>
    %33 = arith.maximumf %30, %32 : vector<8x64xbf16>
    %c0_10 = arith.constant 0 : index
    %c0_11 = arith.constant 0 : index
    %34 = vector.load %arg15[%c0_10, %c0_11] : memref<8x1088xbf16, #tpu.memory_space<vmem>>, vector<8x64xbf16>
    tpu.vector_store %arg15[%c0_10, %c0_11], %33 {strides = array<i32>} : memref<8x1088xbf16, #tpu.memory_space<vmem>>, vector<8x64xbf16>,
    %c3 = arith.constant 3 : index
    %35 = memref.load %arg1[%c3] : memref<48xf32, #tpu.memory_space<smem>>
    %36 = vector.broadcast %35 : f32 to vector<1x64xf32>
    %37 = arith.truncf %36 : vector<1x64xf32> to vector<1x64xbf16>
    %c4 = arith.constant 4 : index
    %38 = memref.load %arg1[%c4] : memref<48xf32, #tpu.memory_space<smem>>
    %39 = vector.broadcast %38 : f32 to vector<1x64xf32>
    %40 = arith.truncf %39 : vector<1x64xf32> to vector<1x64xbf16>
    %c5 = arith.constant 5 : index
    %41 = memref.load %arg1[%c5] : memref<48xf32, #tpu.memory_space<smem>>
    %42 = vector.broadcast %41 : f32 to vector<1x64xf32>
    %43 = arith.truncf %42 : vector<1x64xf32> to vector<1x64xbf16>
    %c1_12 = arith.constant 1 : index
    %44 = memref.load %arg2[%c1_12] : memref<16xf32, #tpu.memory_space<smem>>
    %45 = vector.broadcast %44 : f32 to vector<1x64xf32>
    %46 = arith.truncf %45 : vector<1x64xf32> to vector<1x64xbf16>
    %47 = vector.broadcast %37 : vector<1x64xbf16> to vector<8x64xbf16>
    %48 = arith.mulf %47, %2 : vector<8x64xbf16>
    %49 = vector.broadcast %40 : vector<1x64xbf16> to vector<8x64xbf16>
    %50 = arith.mulf %49, %5 : vector<8x64xbf16>
    %51 = arith.addf %48, %50 : vector<8x64xbf16>
    %52 = vector.broadcast %43 : vector<1x64xbf16> to vector<8x64xbf16>
    %53 = arith.mulf %52, %8 : vector<8x64xbf16>
    %54 = arith.addf %51, %53 : vector<8x64xbf16>
    %55 = vector.broadcast %46 : vector<1x64xbf16> to vector<8x64xbf16>
    %56 = arith.addf %54, %55 : vector<8x64xbf16>
    %cst_13 = arith.constant 1.000980e-02 : bf16
    %57 = vector.broadcast %cst_13 : bf16 to vector<8x64xbf16>
    %58 = arith.mulf %57, %56 : vector<8x64xbf16>
    %59 = arith.maximumf %56, %58 : vector<8x64xbf16>
    %c0_14 = arith.constant 0 : index
    %c64 = arith.constant 64 : index
    %60 = vector.load %arg15[%c0_14, %c64] : memref<8x1088xbf16, #tpu.memory_space<vmem>>, vector<8x64xbf16>
    tpu.vector_store %arg15[%c0_14, %c64], %59 {strides = array<i32>} : memref<8x1088xbf16, #tpu.memory_space<vmem>>, vector<8x64xbf16>,
    %c6 = arith.constant 6 : index
    %61 = memref.load %arg1[%c6] : memref<48xf32, #tpu.memory_space<smem>>
    %62 = vector.broadcast %61 : f32 to vector<1x64xf32>
    %63 = arith.truncf %62 : vector<1x64xf32> to vector<1x64xbf16>
    %c7 = arith.constant 7 : index
    %64 = memref.load %arg1[%c7] : memref<48xf32, #tpu.memory_space<smem>>
    %65 = vector.broadcast %64 : f32 to vector<1x64xf32>
    %66 = arith.truncf %65 : vector<1x64xf32> to vector<1x64xbf16>
    %c8 = arith.constant 8 : index
    %67 = memref.load %arg1[%c8] : memref<48xf32, #tpu.memory_space<smem>>
    %68 = vector.broadcast %67 : f32 to vector<1x64xf32>
    %69 = arith.truncf %68 : vector<1x64xf32> to vector<1x64xbf16>
    %c2_15 = arith.constant 2 : index
    %70 = memref.load %arg2[%c2_15] : memref<16xf32, #tpu.memory_space<smem>>
    %71 = vector.broadcast %70 : f32 to vector<1x64xf32>
    %72 = arith.truncf %71 : vector<1x64xf32> to vector<1x64xbf16>
    %73 = vector.broadcast %63 : vector<1x64xbf16> to vector<8x64xbf16>
    %74 = arith.mulf %73, %2 : vector<8x64xbf16>
    %75 = vector.broadcast %66 : vector<1x64xbf16> to vector<8x64xbf16>
    %76 = arith.mulf %75, %5 : vector<8x64xbf16>
    %77 = arith.addf %74, %76 : vector<8x64xbf16>
    %78 = vector.broadcast %69 : vector<1x64xbf16> to vector<8x64xbf16>
    %79 = arith.mulf %78, %8 : vector<8x64xbf16>
    %80 = arith.addf %77, %79 : vector<8x64xbf16>
    %81 = vector.broadcast %72 : vector<1x64xbf16> to vector<8x64xbf16>
    %82 = arith.addf %80, %81 : vector<8x64xbf16>
    %cst_16 = arith.constant 1.000980e-02 : bf16
    %83 = vector.broadcast %cst_16 : bf16 to vector<8x64xbf16>
    %84 = arith.mulf %83, %82 : vector<8x64xbf16>
    %85 = arith.maximumf %82, %84 : vector<8x64xbf16>
    %c0_17 = arith.constant 0 : index
    %c128 = arith.constant 128 : index
    %86 = vector.load %arg15[%c0_17, %c128] : memref<8x1088xbf16, #tpu.memory_space<vmem>>, vector<8x64xbf16>
    tpu.vector_store %arg15[%c0_17, %c128], %85 {strides = array<i32>} : memref<8x1088xbf16, #tpu.memory_space<vmem>>, vector<8x64xbf16>,
    %c9 = arith.constant 9 : index
    %87 = memref.load %arg1[%c9] : memref<48xf32, #tpu.memory_space<smem>>
    %88 = vector.broadcast %87 : f32 to vector<1x64xf32>
    %89 = arith.truncf %88 : vector<1x64xf32> to vector<1x64xbf16>
    %c10 = arith.constant 10 : index
    %90 = memref.load %arg1[%c10] : memref<48xf32, #tpu.memory_space<smem>>
    %91 = vector.broadcast %90 : f32 to vector<1x64xf32>
    %92 = arith.truncf %91 : vector<1x64xf32> to vector<1x64xbf16>
    %c11 = arith.constant 11 : index
    %93 = memref.load %arg1[%c11] : memref<48xf32, #tpu.memory_space<smem>>
    %94 = vector.broadcast %93 : f32 to vector<1x64xf32>
    %95 = arith.truncf %94 : vector<1x64xf32> to vector<1x64xbf16>
    %c3_18 = arith.constant 3 : index
    %96 = memref.load %arg2[%c3_18] : memref<16xf32, #tpu.memory_space<smem>>
    %97 = vector.broadcast %96 : f32 to vector<1x64xf32>
    %98 = arith.truncf %97 : vector<1x64xf32> to vector<1x64xbf16>
    %99 = vector.broadcast %89 : vector<1x64xbf16> to vector<8x64xbf16>
    %100 = arith.mulf %99, %2 : vector<8x64xbf16>
    %101 = vector.broadcast %92 : vector<1x64xbf16> to vector<8x64xbf16>
    %102 = arith.mulf %101, %5 : vector<8x64xbf16>
    %103 = arith.addf %100, %102 : vector<8x64xbf16>
    %104 = vector.broadcast %95 : vector<1x64xbf16> to vector<8x64xbf16>
    %105 = arith.mulf %104, %8 : vector<8x64xbf16>
    %106 = arith.addf %103, %105 : vector<8x64xbf16>
    %107 = vector.broadcast %98 : vector<1x64xbf16> to vector<8x64xbf16>
    %108 = arith.addf %106, %107 : vector<8x64xbf16>
    %cst_19 = arith.constant 1.000980e-02 : bf16
    %109 = vector.broadcast %cst_19 : bf16 to vector<8x64xbf16>
    %110 = arith.mulf %109, %108 : vector<8x64xbf16>
    %111 = arith.maximumf %108, %110 : vector<8x64xbf16>
    %c0_20 = arith.constant 0 : index
    %c192 = arith.constant 192 : index
    %112 = vector.load %arg15[%c0_20, %c192] : memref<8x1088xbf16, #tpu.memory_space<vmem>>, vector<8x64xbf16>
    tpu.vector_store %arg15[%c0_20, %c192], %111 {strides = array<i32>} : memref<8x1088xbf16, #tpu.memory_space<vmem>>, vector<8x64xbf16>,
    %c12 = arith.constant 12 : index
    %113 = memref.load %arg1[%c12] : memref<48xf32, #tpu.memory_space<smem>>
    %114 = vector.broadcast %113 : f32 to vector<1x64xf32>
    %115 = arith.truncf %114 : vector<1x64xf32> to vector<1x64xbf16>
    %c13 = arith.constant 13 : index
    %116 = memref.load %arg1[%c13] : memref<48xf32, #tpu.memory_space<smem>>
    %117 = vector.broadcast %116 : f32 to vector<1x64xf32>
    %118 = arith.truncf %117 : vector<1x64xf32> to vector<1x64xbf16>
    %c14 = arith.constant 14 : index
    %119 = memref.load %arg1[%c14] : memref<48xf32, #tpu.memory_space<smem>>
    %120 = vector.broadcast %119 : f32 to vector<1x64xf32>
    %121 = arith.truncf %120 : vector<1x64xf32> to vector<1x64xbf16>
    %c4_21 = arith.constant 4 : index
    %122 = memref.load %arg2[%c4_21] : memref<16xf32, #tpu.memory_space<smem>>
    %123 = vector.broadcast %122 : f32 to vector<1x64xf32>
    %124 = arith.truncf %123 : vector<1x64xf32> to vector<1x64xbf16>
    %125 = vector.broadcast %115 : vector<1x64xbf16> to vector<8x64xbf16>
    %126 = arith.mulf %125, %2 : vector<8x64xbf16>
    %127 = vector.broadcast %118 : vector<1x64xbf16> to vector<8x64xbf16>
    %128 = arith.mulf %127, %5 : vector<8x64xbf16>
    %129 = arith.addf %126, %128 : vector<8x64xbf16>
    %130 = vector.broadcast %121 : vector<1x64xbf16> to vector<8x64xbf16>
    %131 = arith.mulf %130, %8 : vector<8x64xbf16>
    %132 = arith.addf %129, %131 : vector<8x64xbf16>
    %133 = vector.broadcast %124 : vector<1x64xbf16> to vector<8x64xbf16>
    %134 = arith.addf %132, %133 : vector<8x64xbf16>
    %cst_22 = arith.constant 1.000980e-02 : bf16
    %135 = vector.broadcast %cst_22 : bf16 to vector<8x64xbf16>
    %136 = arith.mulf %135, %134 : vector<8x64xbf16>
    %137 = arith.maximumf %134, %136 : vector<8x64xbf16>
    %c0_23 = arith.constant 0 : index
    %c256 = arith.constant 256 : index
    %138 = vector.load %arg15[%c0_23, %c256] : memref<8x1088xbf16, #tpu.memory_space<vmem>>, vector<8x64xbf16>
    tpu.vector_store %arg15[%c0_23, %c256], %137 {strides = array<i32>} : memref<8x1088xbf16, #tpu.memory_space<vmem>>, vector<8x64xbf16>,
    %c15 = arith.constant 15 : index
    %139 = memref.load %arg1[%c15] : memref<48xf32, #tpu.memory_space<smem>>
    %140 = vector.broadcast %139 : f32 to vector<1x64xf32>
    %141 = arith.truncf %140 : vector<1x64xf32> to vector<1x64xbf16>
    %c16 = arith.constant 16 : index
    %142 = memref.load %arg1[%c16] : memref<48xf32, #tpu.memory_space<smem>>
    %143 = vector.broadcast %142 : f32 to vector<1x64xf32>
    %144 = arith.truncf %143 : vector<1x64xf32> to vector<1x64xbf16>
    %c17 = arith.constant 17 : index
    %145 = memref.load %arg1[%c17] : memref<48xf32, #tpu.memory_space<smem>>
    %146 = vector.broadcast %145 : f32 to vector<1x64xf32>
    %147 = arith.truncf %146 : vector<1x64xf32> to vector<1x64xbf16>
    %c5_24 = arith.constant 5 : index
    %148 = memref.load %arg2[%c5_24] : memref<16xf32, #tpu.memory_space<smem>>
    %149 = vector.broadcast %148 : f32 to vector<1x64xf32>
    %150 = arith.truncf %149 : vector<1x64xf32> to vector<1x64xbf16>
    %151 = vector.broadcast %141 : vector<1x64xbf16> to vector<8x64xbf16>
    %152 = arith.mulf %151, %2 : vector<8x64xbf16>
    %153 = vector.broadcast %144 : vector<1x64xbf16> to vector<8x64xbf16>
    %154 = arith.mulf %153, %5 : vector<8x64xbf16>
    %155 = arith.addf %152, %154 : vector<8x64xbf16>
    %156 = vector.broadcast %147 : vector<1x64xbf16> to vector<8x64xbf16>
    %157 = arith.mulf %156, %8 : vector<8x64xbf16>
    %158 = arith.addf %155, %157 : vector<8x64xbf16>
    %159 = vector.broadcast %150 : vector<1x64xbf16> to vector<8x64xbf16>
    %160 = arith.addf %158, %159 : vector<8x64xbf16>
    %cst_25 = arith.constant 1.000980e-02 : bf16
    %161 = vector.broadcast %cst_25 : bf16 to vector<8x64xbf16>
    %162 = arith.mulf %161, %160 : vector<8x64xbf16>
    %163 = arith.maximumf %160, %162 : vector<8x64xbf16>
    %c0_26 = arith.constant 0 : index
    %c320 = arith.constant 320 : index
    %164 = vector.load %arg15[%c0_26, %c320] : memref<8x1088xbf16, #tpu.memory_space<vmem>>, vector<8x64xbf16>
    tpu.vector_store %arg15[%c0_26, %c320], %163 {strides = array<i32>} : memref<8x1088xbf16, #tpu.memory_space<vmem>>, vector<8x64xbf16>,
    %c18 = arith.constant 18 : index
    %165 = memref.load %arg1[%c18] : memref<48xf32, #tpu.memory_space<smem>>
    %166 = vector.broadcast %165 : f32 to vector<1x64xf32>
    %167 = arith.truncf %166 : vector<1x64xf32> to vector<1x64xbf16>
    %c19 = arith.constant 19 : index
    %168 = memref.load %arg1[%c19] : memref<48xf32, #tpu.memory_space<smem>>
    %169 = vector.broadcast %168 : f32 to vector<1x64xf32>
    %170 = arith.truncf %169 : vector<1x64xf32> to vector<1x64xbf16>
    %c20 = arith.constant 20 : index
    %171 = memref.load %arg1[%c20] : memref<48xf32, #tpu.memory_space<smem>>
    %172 = vector.broadcast %171 : f32 to vector<1x64xf32>
    %173 = arith.truncf %172 : vector<1x64xf32> to vector<1x64xbf16>
    %c6_27 = arith.constant 6 : index
    %174 = memref.load %arg2[%c6_27] : memref<16xf32, #tpu.memory_space<smem>>
    %175 = vector.broadcast %174 : f32 to vector<1x64xf32>
    %176 = arith.truncf %175 : vector<1x64xf32> to vector<1x64xbf16>
    %177 = vector.broadcast %167 : vector<1x64xbf16> to vector<8x64xbf16>
    %178 = arith.mulf %177, %2 : vector<8x64xbf16>
    %179 = vector.broadcast %170 : vector<1x64xbf16> to vector<8x64xbf16>
    %180 = arith.mulf %179, %5 : vector<8x64xbf16>
    %181 = arith.addf %178, %180 : vector<8x64xbf16>
    %182 = vector.broadcast %173 : vector<1x64xbf16> to vector<8x64xbf16>
    %183 = arith.mulf %182, %8 : vector<8x64xbf16>
    %184 = arith.addf %181, %183 : vector<8x64xbf16>
    %185 = vector.broadcast %176 : vector<1x64xbf16> to vector<8x64xbf16>
    %186 = arith.addf %184, %185 : vector<8x64xbf16>
    %cst_28 = arith.constant 1.000980e-02 : bf16
    %187 = vector.broadcast %cst_28 : bf16 to vector<8x64xbf16>
    %188 = arith.mulf %187, %186 : vector<8x64xbf16>
    %189 = arith.maximumf %186, %188 : vector<8x64xbf16>
    %c0_29 = arith.constant 0 : index
    %c384 = arith.constant 384 : index
    %190 = vector.load %arg15[%c0_29, %c384] : memref<8x1088xbf16, #tpu.memory_space<vmem>>, vector<8x64xbf16>
    tpu.vector_store %arg15[%c0_29, %c384], %189 {strides = array<i32>} : memref<8x1088xbf16, #tpu.memory_space<vmem>>, vector<8x64xbf16>,
    %c21 = arith.constant 21 : index
    %191 = memref.load %arg1[%c21] : memref<48xf32, #tpu.memory_space<smem>>
    %192 = vector.broadcast %191 : f32 to vector<1x64xf32>
    %193 = arith.truncf %192 : vector<1x64xf32> to vector<1x64xbf16>
    %c22 = arith.constant 22 : index
    %194 = memref.load %arg1[%c22] : memref<48xf32, #tpu.memory_space<smem>>
    %195 = vector.broadcast %194 : f32 to vector<1x64xf32>
    %196 = arith.truncf %195 : vector<1x64xf32> to vector<1x64xbf16>
    %c23 = arith.constant 23 : index
    %197 = memref.load %arg1[%c23] : memref<48xf32, #tpu.memory_space<smem>>
    %198 = vector.broadcast %197 : f32 to vector<1x64xf32>
    %199 = arith.truncf %198 : vector<1x64xf32> to vector<1x64xbf16>
    %c7_30 = arith.constant 7 : index
    %200 = memref.load %arg2[%c7_30] : memref<16xf32, #tpu.memory_space<smem>>
    %201 = vector.broadcast %200 : f32 to vector<1x64xf32>
    %202 = arith.truncf %201 : vector<1x64xf32> to vector<1x64xbf16>
    %203 = vector.broadcast %193 : vector<1x64xbf16> to vector<8x64xbf16>
    %204 = arith.mulf %203, %2 : vector<8x64xbf16>
    %205 = vector.broadcast %196 : vector<1x64xbf16> to vector<8x64xbf16>
    %206 = arith.mulf %205, %5 : vector<8x64xbf16>
    %207 = arith.addf %204, %206 : vector<8x64xbf16>
    %208 = vector.broadcast %199 : vector<1x64xbf16> to vector<8x64xbf16>
    %209 = arith.mulf %208, %8 : vector<8x64xbf16>
    %210 = arith.addf %207, %209 : vector<8x64xbf16>
    %211 = vector.broadcast %202 : vector<1x64xbf16> to vector<8x64xbf16>
    %212 = arith.addf %210, %211 : vector<8x64xbf16>
    %cst_31 = arith.constant 1.000980e-02 : bf16
    %213 = vector.broadcast %cst_31 : bf16 to vector<8x64xbf16>
    %214 = arith.mulf %213, %212 : vector<8x64xbf16>
    %215 = arith.maximumf %212, %214 : vector<8x64xbf16>
    %c0_32 = arith.constant 0 : index
    %c448 = arith.constant 448 : index
    %216 = vector.load %arg15[%c0_32, %c448] : memref<8x1088xbf16, #tpu.memory_space<vmem>>, vector<8x64xbf16>
    tpu.vector_store %arg15[%c0_32, %c448], %215 {strides = array<i32>} : memref<8x1088xbf16, #tpu.memory_space<vmem>>, vector<8x64xbf16>,
    %c24 = arith.constant 24 : index
    %217 = memref.load %arg1[%c24] : memref<48xf32, #tpu.memory_space<smem>>
    %218 = vector.broadcast %217 : f32 to vector<1x64xf32>
    %219 = arith.truncf %218 : vector<1x64xf32> to vector<1x64xbf16>
    %c25 = arith.constant 25 : index
    %220 = memref.load %arg1[%c25] : memref<48xf32, #tpu.memory_space<smem>>
    %221 = vector.broadcast %220 : f32 to vector<1x64xf32>
    %222 = arith.truncf %221 : vector<1x64xf32> to vector<1x64xbf16>
    %c26 = arith.constant 26 : index
    %223 = memref.load %arg1[%c26] : memref<48xf32, #tpu.memory_space<smem>>
    %224 = vector.broadcast %223 : f32 to vector<1x64xf32>
    %225 = arith.truncf %224 : vector<1x64xf32> to vector<1x64xbf16>
    %c8_33 = arith.constant 8 : index
    %226 = memref.load %arg2[%c8_33] : memref<16xf32, #tpu.memory_space<smem>>
    %227 = vector.broadcast %226 : f32 to vector<1x64xf32>
    %228 = arith.truncf %227 : vector<1x64xf32> to vector<1x64xbf16>
    %229 = vector.broadcast %219 : vector<1x64xbf16> to vector<8x64xbf16>
    %230 = arith.mulf %229, %2 : vector<8x64xbf16>
    %231 = vector.broadcast %222 : vector<1x64xbf16> to vector<8x64xbf16>
    %232 = arith.mulf %231, %5 : vector<8x64xbf16>
    %233 = arith.addf %230, %232 : vector<8x64xbf16>
    %234 = vector.broadcast %225 : vector<1x64xbf16> to vector<8x64xbf16>
    %235 = arith.mulf %234, %8 : vector<8x64xbf16>
    %236 = arith.addf %233, %235 : vector<8x64xbf16>
    %237 = vector.broadcast %228 : vector<1x64xbf16> to vector<8x64xbf16>
    %238 = arith.addf %236, %237 : vector<8x64xbf16>
    %cst_34 = arith.constant 1.000980e-02 : bf16
    %239 = vector.broadcast %cst_34 : bf16 to vector<8x64xbf16>
    %240 = arith.mulf %239, %238 : vector<8x64xbf16>
    %241 = arith.maximumf %238, %240 : vector<8x64xbf16>
    %c0_35 = arith.constant 0 : index
    %c512 = arith.constant 512 : index
    %242 = vector.load %arg15[%c0_35, %c512] : memref<8x1088xbf16, #tpu.memory_space<vmem>>, vector<8x64xbf16>
    tpu.vector_store %arg15[%c0_35, %c512], %241 {strides = array<i32>} : memref<8x1088xbf16, #tpu.memory_space<vmem>>, vector<8x64xbf16>,
    %c27 = arith.constant 27 : index
    %243 = memref.load %arg1[%c27] : memref<48xf32, #tpu.memory_space<smem>>
    %244 = vector.broadcast %243 : f32 to vector<1x64xf32>
    %245 = arith.truncf %244 : vector<1x64xf32> to vector<1x64xbf16>
    %c28 = arith.constant 28 : index
    %246 = memref.load %arg1[%c28] : memref<48xf32, #tpu.memory_space<smem>>
    %247 = vector.broadcast %246 : f32 to vector<1x64xf32>
    %248 = arith.truncf %247 : vector<1x64xf32> to vector<1x64xbf16>
    %c29 = arith.constant 29 : index
    %249 = memref.load %arg1[%c29] : memref<48xf32, #tpu.memory_space<smem>>
    %250 = vector.broadcast %249 : f32 to vector<1x64xf32>
    %251 = arith.truncf %250 : vector<1x64xf32> to vector<1x64xbf16>
    %c9_36 = arith.constant 9 : index
    %252 = memref.load %arg2[%c9_36] : memref<16xf32, #tpu.memory_space<smem>>
    %253 = vector.broadcast %252 : f32 to vector<1x64xf32>
    %254 = arith.truncf %253 : vector<1x64xf32> to vector<1x64xbf16>
    %255 = vector.broadcast %245 : vector<1x64xbf16> to vector<8x64xbf16>
    %256 = arith.mulf %255, %2 : vector<8x64xbf16>
    %257 = vector.broadcast %248 : vector<1x64xbf16> to vector<8x64xbf16>
    %258 = arith.mulf %257, %5 : vector<8x64xbf16>
    %259 = arith.addf %256, %258 : vector<8x64xbf16>
    %260 = vector.broadcast %251 : vector<1x64xbf16> to vector<8x64xbf16>
    %261 = arith.mulf %260, %8 : vector<8x64xbf16>
    %262 = arith.addf %259, %261 : vector<8x64xbf16>
    %263 = vector.broadcast %254 : vector<1x64xbf16> to vector<8x64xbf16>
    %264 = arith.addf %262, %263 : vector<8x64xbf16>
    %cst_37 = arith.constant 1.000980e-02 : bf16
    %265 = vector.broadcast %cst_37 : bf16 to vector<8x64xbf16>
    %266 = arith.mulf %265, %264 : vector<8x64xbf16>
    %267 = arith.maximumf %264, %266 : vector<8x64xbf16>
    %c0_38 = arith.constant 0 : index
    %c576 = arith.constant 576 : index
    %268 = vector.load %arg15[%c0_38, %c576] : memref<8x1088xbf16, #tpu.memory_space<vmem>>, vector<8x64xbf16>
    tpu.vector_store %arg15[%c0_38, %c576], %267 {strides = array<i32>} : memref<8x1088xbf16, #tpu.memory_space<vmem>>, vector<8x64xbf16>,
    %c30 = arith.constant 30 : index
    %269 = memref.load %arg1[%c30] : memref<48xf32, #tpu.memory_space<smem>>
    %270 = vector.broadcast %269 : f32 to vector<1x64xf32>
    %271 = arith.truncf %270 : vector<1x64xf32> to vector<1x64xbf16>
    %c31 = arith.constant 31 : index
    %272 = memref.load %arg1[%c31] : memref<48xf32, #tpu.memory_space<smem>>
    %273 = vector.broadcast %272 : f32 to vector<1x64xf32>
    %274 = arith.truncf %273 : vector<1x64xf32> to vector<1x64xbf16>
    %c32 = arith.constant 32 : index
    %275 = memref.load %arg1[%c32] : memref<48xf32, #tpu.memory_space<smem>>
    %276 = vector.broadcast %275 : f32 to vector<1x64xf32>
    %277 = arith.truncf %276 : vector<1x64xf32> to vector<1x64xbf16>
    %c10_39 = arith.constant 10 : index
    %278 = memref.load %arg2[%c10_39] : memref<16xf32, #tpu.memory_space<smem>>
    %279 = vector.broadcast %278 : f32 to vector<1x64xf32>
    %280 = arith.truncf %279 : vector<1x64xf32> to vector<1x64xbf16>
    %281 = vector.broadcast %271 : vector<1x64xbf16> to vector<8x64xbf16>
    %282 = arith.mulf %281, %2 : vector<8x64xbf16>
    %283 = vector.broadcast %274 : vector<1x64xbf16> to vector<8x64xbf16>
    %284 = arith.mulf %283, %5 : vector<8x64xbf16>
    %285 = arith.addf %282, %284 : vector<8x64xbf16>
    %286 = vector.broadcast %277 : vector<1x64xbf16> to vector<8x64xbf16>
    %287 = arith.mulf %286, %8 : vector<8x64xbf16>
    %288 = arith.addf %285, %287 : vector<8x64xbf16>
    %289 = vector.broadcast %280 : vector<1x64xbf16> to vector<8x64xbf16>
    %290 = arith.addf %288, %289 : vector<8x64xbf16>
    %cst_40 = arith.constant 1.000980e-02 : bf16
    %291 = vector.broadcast %cst_40 : bf16 to vector<8x64xbf16>
    %292 = arith.mulf %291, %290 : vector<8x64xbf16>
    %293 = arith.maximumf %290, %292 : vector<8x64xbf16>
    %c0_41 = arith.constant 0 : index
    %c640 = arith.constant 640 : index
    %294 = vector.load %arg15[%c0_41, %c640] : memref<8x1088xbf16, #tpu.memory_space<vmem>>, vector<8x64xbf16>
    tpu.vector_store %arg15[%c0_41, %c640], %293 {strides = array<i32>} : memref<8x1088xbf16, #tpu.memory_space<vmem>>, vector<8x64xbf16>,
    %c33 = arith.constant 33 : index
    %295 = memref.load %arg1[%c33] : memref<48xf32, #tpu.memory_space<smem>>
    %296 = vector.broadcast %295 : f32 to vector<1x64xf32>
    %297 = arith.truncf %296 : vector<1x64xf32> to vector<1x64xbf16>
    %c34 = arith.constant 34 : index
    %298 = memref.load %arg1[%c34] : memref<48xf32, #tpu.memory_space<smem>>
    %299 = vector.broadcast %298 : f32 to vector<1x64xf32>
    %300 = arith.truncf %299 : vector<1x64xf32> to vector<1x64xbf16>
    %c35 = arith.constant 35 : index
    %301 = memref.load %arg1[%c35] : memref<48xf32, #tpu.memory_space<smem>>
    %302 = vector.broadcast %301 : f32 to vector<1x64xf32>
    %303 = arith.truncf %302 : vector<1x64xf32> to vector<1x64xbf16>
    %c11_42 = arith.constant 11 : index
    %304 = memref.load %arg2[%c11_42] : memref<16xf32, #tpu.memory_space<smem>>
    %305 = vector.broadcast %304 : f32 to vector<1x64xf32>
    %306 = arith.truncf %305 : vector<1x64xf32> to vector<1x64xbf16>
    %307 = vector.broadcast %297 : vector<1x64xbf16> to vector<8x64xbf16>
    %308 = arith.mulf %307, %2 : vector<8x64xbf16>
    %309 = vector.broadcast %300 : vector<1x64xbf16> to vector<8x64xbf16>
    %310 = arith.mulf %309, %5 : vector<8x64xbf16>
    %311 = arith.addf %308, %310 : vector<8x64xbf16>
    %312 = vector.broadcast %303 : vector<1x64xbf16> to vector<8x64xbf16>
    %313 = arith.mulf %312, %8 : vector<8x64xbf16>
    %314 = arith.addf %311, %313 : vector<8x64xbf16>
    %315 = vector.broadcast %306 : vector<1x64xbf16> to vector<8x64xbf16>
    %316 = arith.addf %314, %315 : vector<8x64xbf16>
    %cst_43 = arith.constant 1.000980e-02 : bf16
    %317 = vector.broadcast %cst_43 : bf16 to vector<8x64xbf16>
    %318 = arith.mulf %317, %316 : vector<8x64xbf16>
    %319 = arith.maximumf %316, %318 : vector<8x64xbf16>
    %c0_44 = arith.constant 0 : index
    %c704 = arith.constant 704 : index
    %320 = vector.load %arg15[%c0_44, %c704] : memref<8x1088xbf16, #tpu.memory_space<vmem>>, vector<8x64xbf16>
    tpu.vector_store %arg15[%c0_44, %c704], %319 {strides = array<i32>} : memref<8x1088xbf16, #tpu.memory_space<vmem>>, vector<8x64xbf16>,
    %c36 = arith.constant 36 : index
    %321 = memref.load %arg1[%c36] : memref<48xf32, #tpu.memory_space<smem>>
    %322 = vector.broadcast %321 : f32 to vector<1x64xf32>
    %323 = arith.truncf %322 : vector<1x64xf32> to vector<1x64xbf16>
    %c37 = arith.constant 37 : index
    %324 = memref.load %arg1[%c37] : memref<48xf32, #tpu.memory_space<smem>>
    %325 = vector.broadcast %324 : f32 to vector<1x64xf32>
    %326 = arith.truncf %325 : vector<1x64xf32> to vector<1x64xbf16>
    %c38 = arith.constant 38 : index
    %327 = memref.load %arg1[%c38] : memref<48xf32, #tpu.memory_space<smem>>
    %328 = vector.broadcast %327 : f32 to vector<1x64xf32>
    %329 = arith.truncf %328 : vector<1x64xf32> to vector<1x64xbf16>
    %c12_45 = arith.constant 12 : index
    %330 = memref.load %arg2[%c12_45] : memref<16xf32, #tpu.memory_space<smem>>
    %331 = vector.broadcast %330 : f32 to vector<1x64xf32>
    %332 = arith.truncf %331 : vector<1x64xf32> to vector<1x64xbf16>
    %333 = vector.broadcast %323 : vector<1x64xbf16> to vector<8x64xbf16>
    %334 = arith.mulf %333, %2 : vector<8x64xbf16>
    %335 = vector.broadcast %326 : vector<1x64xbf16> to vector<8x64xbf16>
    %336 = arith.mulf %335, %5 : vector<8x64xbf16>
    %337 = arith.addf %334, %336 : vector<8x64xbf16>
    %338 = vector.broadcast %329 : vector<1x64xbf16> to vector<8x64xbf16>
    %339 = arith.mulf %338, %8 : vector<8x64xbf16>
    %340 = arith.addf %337, %339 : vector<8x64xbf16>
    %341 = vector.broadcast %332 : vector<1x64xbf16> to vector<8x64xbf16>
    %342 = arith.addf %340, %341 : vector<8x64xbf16>
    %cst_46 = arith.constant 1.000980e-02 : bf16
    %343 = vector.broadcast %cst_46 : bf16 to vector<8x64xbf16>
    %344 = arith.mulf %343, %342 : vector<8x64xbf16>
    %345 = arith.maximumf %342, %344 : vector<8x64xbf16>
    %c0_47 = arith.constant 0 : index
    %c768 = arith.constant 768 : index
    %346 = vector.load %arg15[%c0_47, %c768] : memref<8x1088xbf16, #tpu.memory_space<vmem>>, vector<8x64xbf16>
    tpu.vector_store %arg15[%c0_47, %c768], %345 {strides = array<i32>} : memref<8x1088xbf16, #tpu.memory_space<vmem>>, vector<8x64xbf16>,
    %c39 = arith.constant 39 : index
    %347 = memref.load %arg1[%c39] : memref<48xf32, #tpu.memory_space<smem>>
    %348 = vector.broadcast %347 : f32 to vector<1x64xf32>
    %349 = arith.truncf %348 : vector<1x64xf32> to vector<1x64xbf16>
    %c40 = arith.constant 40 : index
    %350 = memref.load %arg1[%c40] : memref<48xf32, #tpu.memory_space<smem>>
    %351 = vector.broadcast %350 : f32 to vector<1x64xf32>
    %352 = arith.truncf %351 : vector<1x64xf32> to vector<1x64xbf16>
    %c41 = arith.constant 41 : index
    %353 = memref.load %arg1[%c41] : memref<48xf32, #tpu.memory_space<smem>>
    %354 = vector.broadcast %353 : f32 to vector<1x64xf32>
    %355 = arith.truncf %354 : vector<1x64xf32> to vector<1x64xbf16>
    %c13_48 = arith.constant 13 : index
    %356 = memref.load %arg2[%c13_48] : memref<16xf32, #tpu.memory_space<smem>>
    %357 = vector.broadcast %356 : f32 to vector<1x64xf32>
    %358 = arith.truncf %357 : vector<1x64xf32> to vector<1x64xbf16>
    %359 = vector.broadcast %349 : vector<1x64xbf16> to vector<8x64xbf16>
    %360 = arith.mulf %359, %2 : vector<8x64xbf16>
    %361 = vector.broadcast %352 : vector<1x64xbf16> to vector<8x64xbf16>
    %362 = arith.mulf %361, %5 : vector<8x64xbf16>
    %363 = arith.addf %360, %362 : vector<8x64xbf16>
    %364 = vector.broadcast %355 : vector<1x64xbf16> to vector<8x64xbf16>
    %365 = arith.mulf %364, %8 : vector<8x64xbf16>
    %366 = arith.addf %363, %365 : vector<8x64xbf16>
    %367 = vector.broadcast %358 : vector<1x64xbf16> to vector<8x64xbf16>
    %368 = arith.addf %366, %367 : vector<8x64xbf16>
    %cst_49 = arith.constant 1.000980e-02 : bf16
    %369 = vector.broadcast %cst_49 : bf16 to vector<8x64xbf16>
    %370 = arith.mulf %369, %368 : vector<8x64xbf16>
    %371 = arith.maximumf %368, %370 : vector<8x64xbf16>
    %c0_50 = arith.constant 0 : index
    %c832 = arith.constant 832 : index
    %372 = vector.load %arg15[%c0_50, %c832] : memref<8x1088xbf16, #tpu.memory_space<vmem>>, vector<8x64xbf16>
    tpu.vector_store %arg15[%c0_50, %c832], %371 {strides = array<i32>} : memref<8x1088xbf16, #tpu.memory_space<vmem>>, vector<8x64xbf16>,
    %c42 = arith.constant 42 : index
    %373 = memref.load %arg1[%c42] : memref<48xf32, #tpu.memory_space<smem>>
    %374 = vector.broadcast %373 : f32 to vector<1x64xf32>
    %375 = arith.truncf %374 : vector<1x64xf32> to vector<1x64xbf16>
    %c43 = arith.constant 43 : index
    %376 = memref.load %arg1[%c43] : memref<48xf32, #tpu.memory_space<smem>>
    %377 = vector.broadcast %376 : f32 to vector<1x64xf32>
    %378 = arith.truncf %377 : vector<1x64xf32> to vector<1x64xbf16>
    %c44 = arith.constant 44 : index
    %379 = memref.load %arg1[%c44] : memref<48xf32, #tpu.memory_space<smem>>
    %380 = vector.broadcast %379 : f32 to vector<1x64xf32>
    %381 = arith.truncf %380 : vector<1x64xf32> to vector<1x64xbf16>
    %c14_51 = arith.constant 14 : index
    %382 = memref.load %arg2[%c14_51] : memref<16xf32, #tpu.memory_space<smem>>
    %383 = vector.broadcast %382 : f32 to vector<1x64xf32>
    %384 = arith.truncf %383 : vector<1x64xf32> to vector<1x64xbf16>
    %385 = vector.broadcast %375 : vector<1x64xbf16> to vector<8x64xbf16>
    %386 = arith.mulf %385, %2 : vector<8x64xbf16>
    %387 = vector.broadcast %378 : vector<1x64xbf16> to vector<8x64xbf16>
    %388 = arith.mulf %387, %5 : vector<8x64xbf16>
    %389 = arith.addf %386, %388 : vector<8x64xbf16>
    %390 = vector.broadcast %381 : vector<1x64xbf16> to vector<8x64xbf16>
    %391 = arith.mulf %390, %8 : vector<8x64xbf16>
    %392 = arith.addf %389, %391 : vector<8x64xbf16>
    %393 = vector.broadcast %384 : vector<1x64xbf16> to vector<8x64xbf16>
    %394 = arith.addf %392, %393 : vector<8x64xbf16>
    %cst_52 = arith.constant 1.000980e-02 : bf16
    %395 = vector.broadcast %cst_52 : bf16 to vector<8x64xbf16>
    %396 = arith.mulf %395, %394 : vector<8x64xbf16>
    %397 = arith.maximumf %394, %396 : vector<8x64xbf16>
    %c0_53 = arith.constant 0 : index
    %c896 = arith.constant 896 : index
    %398 = vector.load %arg15[%c0_53, %c896] : memref<8x1088xbf16, #tpu.memory_space<vmem>>, vector<8x64xbf16>
    tpu.vector_store %arg15[%c0_53, %c896], %397 {strides = array<i32>} : memref<8x1088xbf16, #tpu.memory_space<vmem>>, vector<8x64xbf16>,
    %c45 = arith.constant 45 : index
    %399 = memref.load %arg1[%c45] : memref<48xf32, #tpu.memory_space<smem>>
    %400 = vector.broadcast %399 : f32 to vector<1x64xf32>
    %401 = arith.truncf %400 : vector<1x64xf32> to vector<1x64xbf16>
    %c46 = arith.constant 46 : index
    %402 = memref.load %arg1[%c46] : memref<48xf32, #tpu.memory_space<smem>>
    %403 = vector.broadcast %402 : f32 to vector<1x64xf32>
    %404 = arith.truncf %403 : vector<1x64xf32> to vector<1x64xbf16>
    %c47 = arith.constant 47 : index
    %405 = memref.load %arg1[%c47] : memref<48xf32, #tpu.memory_space<smem>>
    %406 = vector.broadcast %405 : f32 to vector<1x64xf32>
    %407 = arith.truncf %406 : vector<1x64xf32> to vector<1x64xbf16>
    %c15_54 = arith.constant 15 : index
    %408 = memref.load %arg2[%c15_54] : memref<16xf32, #tpu.memory_space<smem>>
    %409 = vector.broadcast %408 : f32 to vector<1x64xf32>
    %410 = arith.truncf %409 : vector<1x64xf32> to vector<1x64xbf16>
    %411 = vector.broadcast %401 : vector<1x64xbf16> to vector<8x64xbf16>
    %412 = arith.mulf %411, %2 : vector<8x64xbf16>
    %413 = vector.broadcast %404 : vector<1x64xbf16> to vector<8x64xbf16>
    %414 = arith.mulf %413, %5 : vector<8x64xbf16>
    %415 = arith.addf %412, %414 : vector<8x64xbf16>
    %416 = vector.broadcast %407 : vector<1x64xbf16> to vector<8x64xbf16>
    %417 = arith.mulf %416, %8 : vector<8x64xbf16>
    %418 = arith.addf %415, %417 : vector<8x64xbf16>
    %419 = vector.broadcast %410 : vector<1x64xbf16> to vector<8x64xbf16>
    %420 = arith.addf %418, %419 : vector<8x64xbf16>
    %cst_55 = arith.constant 1.000980e-02 : bf16
    %421 = vector.broadcast %cst_55 : bf16 to vector<8x64xbf16>
    %422 = arith.mulf %421, %420 : vector<8x64xbf16>
    %423 = arith.maximumf %420, %422 : vector<8x64xbf16>
    %c0_56 = arith.constant 0 : index
    %c960 = arith.constant 960 : index
    %424 = vector.load %arg15[%c0_56, %c960] : memref<8x1088xbf16, #tpu.memory_space<vmem>>, vector<8x64xbf16>
    tpu.vector_store %arg15[%c0_56, %c960], %423 {strides = array<i32>} : memref<8x1088xbf16, #tpu.memory_space<vmem>>, vector<8x64xbf16>,
    %c0_57 = arith.constant 0 : index
    %c1024 = arith.constant 1024 : index
    %425 = vector.load %arg15[%c0_57, %c1024] : memref<8x1088xbf16, #tpu.memory_space<vmem>>, vector<8x64xbf16>
    tpu.vector_store %arg15[%c0_57, %c1024], %5 {strides = array<i32>} : memref<8x1088xbf16, #tpu.memory_space<vmem>>, vector<8x64xbf16>,
    %c0_58 = arith.constant 0 : index
    %c0_59 = arith.constant 0 : index
    %426 = vector.load %arg15[%c0_58, %c0_59] : memref<8x1088xbf16, #tpu.memory_space<vmem>>, vector<8x1088xbf16>
    %c0_60 = arith.constant 0 : index
    %c0_61 = arith.constant 0 : index
    %427 = vector.load %arg4[%c0_60, %c0_61] : memref<1088x1024xbf16, #tpu.memory_space<vmem>>, vector<1088x1024xbf16>
    %cst_62 = arith.constant dense<0.000000e+00> : vector<8x1024xf32>
    %428 = tpu.matmul %426, %427, %cst_62 {dimension_numbers = #tpu.dot_dimension_numbers<[1], [0], [0], [1], [0, 0, 1, 1], [], []>} : vector<8x1088xbf16>, vector<1088x1024xbf16>, vector<8x1024xf32> -> vector<8x1024xf32>
    %c0_63 = arith.constant 0 : index
    %c0_64 = arith.constant 0 : index
    %429 = vector.load %arg5[%c0_63, %c0_64] : memref<1x1024xf32, #tpu.memory_space<vmem>>, vector<1x1024xf32>
    %430 = vector.broadcast %429 : vector<1x1024xf32> to vector<8x1024xf32>
    %431 = arith.addf %428, %430 : vector<8x1024xf32>
    %cst_65 = arith.constant 0.00999999977 : f32
    %432 = vector.broadcast %cst_65 : f32 to vector<8x1024xf32>
    %433 = arith.mulf %432, %431 : vector<8x1024xf32>
    %434 = arith.maximumf %431, %433 : vector<8x1024xf32>
    %435 = arith.truncf %434 : vector<8x1024xf32> to vector<8x1024xbf16>
    %c0_66 = arith.constant 0 : index
    %c0_67 = arith.constant 0 : index
    %436 = vector.load %arg6[%c0_66, %c0_67] : memref<1024x512xbf16, #tpu.memory_space<vmem>>, vector<1024x512xbf16>
    %cst_68 = arith.constant dense<0.000000e+00> : vector<8x512xf32>
    %437 = tpu.matmul %435, %436, %cst_68 {dimension_numbers = #tpu.dot_dimension_numbers<[1], [0], [0], [1], [0, 0, 1, 1], [], []>} : vector<8x1024xbf16>, vector<1024x512xbf16>, vector<8x512xf32> -> vector<8x512xf32>
    %c0_69 = arith.constant 0 : index
    %c0_70 = arith.constant 0 : index
    %438 = vector.load %arg7[%c0_69, %c0_70] : memref<1x512xf32, #tpu.memory_space<vmem>>, vector<1x512xf32>
    %439 = vector.broadcast %438 : vector<1x512xf32> to vector<8x512xf32>
    %440 = arith.addf %437, %439 : vector<8x512xf32>
    %cst_71 = arith.constant 0.00999999977 : f32
    %441 = vector.broadcast %cst_71 : f32 to vector<8x512xf32>
    %442 = arith.mulf %441, %440 : vector<8x512xf32>
    %443 = arith.maximumf %440, %442 : vector<8x512xf32>
    %444 = arith.truncf %443 : vector<8x512xf32> to vector<8x512xbf16>
    %c0_72 = arith.constant 0 : index
    %c0_73 = arith.constant 0 : index
    %445 = vector.load %arg8[%c0_72, %c0_73] : memref<512x256xbf16, #tpu.memory_space<vmem>>, vector<512x256xbf16>
    %cst_74 = arith.constant dense<0.000000e+00> : vector<8x256xf32>
    %446 = tpu.matmul %444, %445, %cst_74 {dimension_numbers = #tpu.dot_dimension_numbers<[1], [0], [0], [1], [0, 0, 1, 1], [], []>} : vector<8x512xbf16>, vector<512x256xbf16>, vector<8x256xf32> -> vector<8x256xf32>
    %c0_75 = arith.constant 0 : index
    %c0_76 = arith.constant 0 : index
    %447 = vector.load %arg9[%c0_75, %c0_76] : memref<1x256xf32, #tpu.memory_space<vmem>>, vector<1x256xf32>
    %448 = vector.broadcast %447 : vector<1x256xf32> to vector<8x256xf32>
    %449 = arith.addf %446, %448 : vector<8x256xf32>
    %cst_77 = arith.constant 0.00999999977 : f32
    %450 = vector.broadcast %cst_77 : f32 to vector<8x256xf32>
    %451 = arith.mulf %450, %449 : vector<8x256xf32>
    %452 = arith.maximumf %449, %451 : vector<8x256xf32>
    %453 = arith.truncf %452 : vector<8x256xf32> to vector<8x256xbf16>
    %c0_78 = arith.constant 0 : index
    %c0_79 = arith.constant 0 : index
    %454 = vector.load %arg10[%c0_78, %c0_79] : memref<256x128xbf16, #tpu.memory_space<vmem>>, vector<256x128xbf16>
    %cst_80 = arith.constant dense<0.000000e+00> : vector<8x128xf32>
    %455 = tpu.matmul %453, %454, %cst_80 {dimension_numbers = #tpu.dot_dimension_numbers<[1], [0], [0], [1], [0, 0, 1, 1], [], []>} : vector<8x256xbf16>, vector<256x128xbf16>, vector<8x128xf32> -> vector<8x128xf32>
    %c0_81 = arith.constant 0 : index
    %c0_82 = arith.constant 0 : index
    %456 = vector.load %arg11[%c0_81, %c0_82] : memref<1x128xf32, #tpu.memory_space<vmem>>, vector<1x128xf32>
    %457 = vector.broadcast %456 : vector<1x128xf32> to vector<8x128xf32>
    %458 = arith.addf %455, %457 : vector<8x128xf32>
    %cst_83 = arith.constant 0.00999999977 : f32
    %459 = vector.broadcast %cst_83 : f32 to vector<8x128xf32>
    %460 = arith.mulf %459, %458 : vector<8x128xf32>
    %461 = arith.maximumf %458, %460 : vector<8x128xf32>
    %c0_84 = arith.constant 0 : index
    %c0_85 = arith.constant 0 : index
    %462 = vector.load %arg12[%c0_84, %c0_85] : memref<1x128xf32, #tpu.memory_space<vmem>>, vector<1x128xf32>
    %463 = vector.broadcast %462 : vector<1x128xf32> to vector<8x128xf32>
    %464 = arith.mulf %461, %463 : vector<8x128xf32>
    %cst_86 = arith.constant dense<0.000000e+00> : vector<8xf32>
    %465 = vector.multi_reduction <add>, %464, %cst_86 [1] : vector<8x128xf32> to vector<8xf32>
    %466 = vector.shape_cast %465 : vector<8xf32> to vector<8x1xf32>
    %c0_87 = arith.constant 0 : index
    %c0_88 = arith.constant 0 : index
    %467 = vector.load %arg13[%c0_87, %c0_88] : memref<1x1xf32, #tpu.memory_space<vmem>>, vector<1x1xf32>
    %468 = vector.broadcast %467 : vector<1x1xf32> to vector<8x1xf32>
    %469 = arith.addf %466, %468 : vector<8x1xf32>
    %470 = arith.negf %469 : vector<8x1xf32>
    %471 = math.exp %470 : vector<8x1xf32>
    %cst_89 = arith.constant 1.000000e+00 : f32
    %472 = vector.broadcast %cst_89 : f32 to vector<8x1xf32>
    %473 = arith.addf %472, %471 : vector<8x1xf32>
    %474 = arith.divf %472, %473 : vector<8x1xf32>
    %475 = tpu.transpose %474, [1, 0] : vector<8x1xf32> -> vector<1x8xf32>
    %c0_90 = arith.constant 0 : index
    %c0_91 = arith.constant 0 : index
    %476 = vector.load %arg14[%c0_90, %c0_91] : memref<1x8xf32, #tpu.memory_space<vmem>>, vector<1x8xf32>
    tpu.vector_store %arg14[%c0_90, %c0_91], %475 {strides = array<i32>} : memref<1x8xf32, #tpu.memory_space<vmem>>, vector<1x8xf32>,
    return
  }
  func.func @transform_0(%arg0: i32) -> i32 {
    %c0_i32 = arith.constant 0 : i32
    %c0_i32_0 = arith.constant 0 : i32
    return %c0_i32 : i32
  }
  func.func @transform_1(%arg0: i32) -> i32 {
    %c0_i32 = arith.constant 0 : i32
    %c0_i32_0 = arith.constant 0 : i32
    return %c0_i32 : i32
  }
  func.func @transform_2(%arg0: i32) -> (i32, i32, i32) {
    %c0_i32 = arith.constant 0 : i32
    %c0_i32_0 = arith.constant 0 : i32
    %c0_i32_1 = arith.constant 0 : i32
    return %c0_i32, %arg0, %c0_i32_0 : i32, i32, i32
  }
  func.func @transform_3(%arg0: i32) -> (i32, i32) {
    %c0_i32 = arith.constant 0 : i32
    %c0_i32_0 = arith.constant 0 : i32
    %c0_i32_1 = arith.constant 0 : i32
    return %c0_i32, %c0_i32_0 : i32, i32
  }
  func.func @transform_4(%arg0: i32) -> (i32, i32) {
    %c0_i32 = arith.constant 0 : i32
    %c0_i32_0 = arith.constant 0 : i32
    %c0_i32_1 = arith.constant 0 : i32
    return %c0_i32, %c0_i32_0 : i32, i32
  }
  func.func @transform_5(%arg0: i32) -> (i32, i32) {
    %c0_i32 = arith.constant 0 : i32
    %c0_i32_0 = arith.constant 0 : i32
    %c0_i32_1 = arith.constant 0 : i32
    return %c0_i32, %c0_i32_0 : i32, i32
  }
  func.func @transform_6(%arg0: i32) -> (i32, i32) {
    %c0_i32 = arith.constant 0 : i32
    %c0_i32_0 = arith.constant 0 : i32
    %c0_i32_1 = arith.constant 0 : i32
    return %c0_i32, %c0_i32_0 : i32, i32
  }
  func.func @transform_7(%arg0: i32) -> (i32, i32) {
    %c0_i32 = arith.constant 0 : i32
    %c0_i32_0 = arith.constant 0 : i32
    %c0_i32_1 = arith.constant 0 : i32
    return %c0_i32, %c0_i32_0 : i32, i32
  }
  func.func @transform_8(%arg0: i32) -> (i32, i32) {
    %c0_i32 = arith.constant 0 : i32
    %c0_i32_0 = arith.constant 0 : i32
    %c0_i32_1 = arith.constant 0 : i32
    return %c0_i32, %c0_i32_0 : i32, i32
  }
  func.func @transform_9(%arg0: i32) -> (i32, i32) {
    %c0_i32 = arith.constant 0 : i32
    %c0_i32_0 = arith.constant 0 : i32
    %c0_i32_1 = arith.constant 0 : i32
    return %c0_i32, %c0_i32_0 : i32, i32
  }
  func.func @transform_10(%arg0: i32) -> (i32, i32) {
    %c0_i32 = arith.constant 0 : i32
    %c0_i32_0 = arith.constant 0 : i32
    %c0_i32_1 = arith.constant 0 : i32
    return %c0_i32, %c0_i32_0 : i32, i32
  }
  func.func @transform_11(%arg0: i32) -> (i32, i32) {
    %c0_i32 = arith.constant 0 : i32
    %c0_i32_0 = arith.constant 0 : i32
    %c0_i32_1 = arith.constant 0 : i32
    return %c0_i32, %c0_i32_0 : i32, i32
  }
  func.func @transform_12(%arg0: i32) -> (i32, i32) {
    %c0_i32 = arith.constant 0 : i32
    %c0_i32_0 = arith.constant 0 : i32
    %c0_i32_1 = arith.constant 0 : i32
    return %c0_i32, %c0_i32_0 : i32, i32
  }
  func.func @transform_13(%arg0: i32) -> (i32, i32) {
    %c0_i32 = arith.constant 0 : i32
    %c0_i32_0 = arith.constant 0 : i32
    return %arg0, %c0_i32 : i32, i32
  }
}

</mosaic_0001>

<bundles_post_ra>
// kernel: net2_forward.1
= control target key start
LH: loop header
LB: loop body
LE: loop exit
PB: predicated region body
PF: predicated region fallthrough
CT: control target
= control target key end

     0   :  { %s13448_s0 = inlined_call_operand.hbm [shape: f32[48], index: 0, kind: input, shape index: {}]   ;;  %s13449_s1 = inlined_call_operand.hbm [shape: f32[16], index: 1, kind: input, shape index: {}]   ;;  %s13450_s2 = inlined_call_operand.vmem [shape: f32[3,8,64], index: 2, kind: input, shape index: {}]   ;;  %s13451_s3 = inlined_call_operand.hbm [shape: bf16[1088,1024], index: 3, kind: input, shape index: {}]   ;;  %s13452_s4 = inlined_call_operand.hbm [shape: f32[1,1024], index: 4, kind: input, shape index: {}]   ;;  %s13453_s5 = inlined_call_operand.hbm [shape: bf16[1024,512], index: 5, kind: input, shape index: {}]   ;;  %s13454_s6 = inlined_call_operand.hbm [shape: f32[1,512], index: 6, kind: input, shape index: {}]   ;;  %s13455_s7 = inlined_call_operand.hbm [shape: bf16[512,256], index: 7, kind: input, shape index: {}]   ;;  %s13456_s8 = inlined_call_operand.hbm [shape: f32[1,256], index: 8, kind: input, shape index: {}]   ;;  %s13457_s9 = inlined_call_operand.hbm [shape: bf16[256,128], index: 9, kind: input, shape index: {}]   ;;  %s13458_s10 = inlined_call_operand.hbm [shape: f32[1,128], index: 10, kind: input, shape index: {}]   ;;  %s13459_s11 = inlined_call_operand.hbm [shape: f32[1,128], index: 11, kind: input, shape index: {}]   ;;  %s13460_s12 = inlined_call_operand.<no memory space> [shape: f32[1,1], index: 12, kind: input, shape index: {}]   ;;  %s13461_s13 = inlined_call_operand.hbm [shape: f32[1,8], index: 13, kind: output, shape index: {}]  }
   0x1   :  { %v18_v0 = vstv %s13460_s12 }
   0x2   :  { %19 = vst [vmem:[#allocation3] sm:$0x1] %v18_v0 }
   0x3   :  { %20 = vsyncpa [#allocation7], 0 }
   0x4   :  { %21 = vsyncpa [#allocation9], 0 }
   0x5   :  { %22 = vsyncpa [#allocation5], 0 }
   0x6   :  { %23 = vsyncpa [#allocation12], 0 }
   0x7   :  { %24 = vsyncpa [#allocation15], 0 }
   0x8   :  { %25 = vsyncpa [#allocation18], 0 }
   0x9   :  { %26 = vsyncpa [#allocation21], 0  ;;  %s66_s29 = sshll.u32 %s13452_s4, 4  ;;  %s67_s29 = int_to_ptr.hbm [resolvable:$true] %s66_s29 }
   0xa   :  { %27 = vsyncpa [#allocation6], 0  ;;  %s12678_s30 = smov [#allocation11]   ;;  %s90_s12 = sshll.u32 %s13454_s6, 4  ;;  %s91_s12 = int_to_ptr.hbm [resolvable:$true] %s90_s12 }
   0xb   :  { %s68_s14 = sshll.u32 %s12678_s30, 4  ;;  %s12679_s17 = smov [#allocation14]   ;;  %s69_s14 = int_to_ptr.vmem [resolvable:$true] %s68_s14 }
   0xc   :  { %71 = dma.hbm_to_vmem [thread:$0]  %s67_s29, 128, %s69_s14, [#allocation12]  }
   0xd   :  { %s92_s18 = sshll.u32 %s12679_s17, 4  ;;  %s114_s21 = sshll.u32 %s13456_s8, 4  ;;  %s93_s18 = int_to_ptr.vmem [resolvable:$true] %s92_s18  ;;  %s115_s21 = int_to_ptr.hbm [resolvable:$true] %s114_s21 }
   0xe   :  { %95 = dma.hbm_to_vmem [thread:$0]  %s91_s12, 64, %s93_s18, [#allocation15]  }
   0xf   :  { %s138_s23 = sshll.u32 %s13458_s10, 4  ;;  %s12680_s24 = smov [#allocation17]   ;;  %s139_s23 = int_to_ptr.hbm [resolvable:$true] %s138_s23 }
  0x10   :  { %s116_s25 = sshll.u32 %s12680_s24, 4  ;;  %s12681_s6 = smov [#allocation20]   ;;  %s117_s25 = int_to_ptr.vmem [resolvable:$true] %s116_s25 }
  0x11   :  { %119 = dma.hbm_to_vmem [thread:$0]  %s115_s21, 32, %s117_s25, [#allocation18]  }
  0x12   :  { %s140_s26 = sshll.u32 %s12681_s6, 4  ;;  %s33_s29 = sshll.u32 %s13448_s0, 4  ;;  %s141_s26 = int_to_ptr.vmem [resolvable:$true] %s140_s26  ;;  %s34_s29 = int_to_ptr.hbm [resolvable:$true] %s33_s29 }
  0x13   :  { %143 = dma.hbm_to_vmem [thread:$0]  %s139_s23, 16, %s141_s26, [#allocation21]  }
  0x14   :  { %s42_s14 = sshll.u32 %s13449_s1, 4  ;;  %s12682_s15 = smov [#allocation4]   ;;  %s43_s14 = int_to_ptr.hbm [resolvable:$true] %s42_s14 }
  0x15   :  { %36 = dma.hbm_to_smem %s34_s29, 16, %s12682_s15, [#allocation7]  }
  0x16   :  { %s12683_s10 = smov [#allocation8]   ;;  %s52_s17 = sshll.u32 %s13451_s3, 4  ;;  %s53_s17 = int_to_ptr.hbm [resolvable:$true] %s52_s17 }
  0x17   :  { %45 = dma.hbm_to_smem %s43_s14, 16, %s12683_s10, [#allocation9]  }
  0x18   :  { %s12684_s18 = smov [#allocation10]   ;;  %s76_s21 = sshll.u32 %s13453_s5, 4  ;;  %s77_s21 = int_to_ptr.hbm [resolvable:$true] %s76_s21 }
  0x19   :  { %s54_s19 = sshll.u32 %s12684_s18, 4  ;;  %s12685_s4 = smov 512   ;;  %s55_s19 = int_to_ptr.vmem [resolvable:$true] %s54_s19 }
  0x1a   :  { %s12686_s22 = smov 32   ;;  %s12687_s1 = smov [#allocation13]  }
  0x1b   :  { %60 = dma.hbm_to_vmem [thread:$0]  %s53_s17, 69632, %s55_s19, [#allocation5], %s12685_s4, %s12685_s4, %s12686_s22  }
  0x1c   :  { %s78_s23 = sshll.u32 %s12687_s1, 4  ;;  %s12688_s24 = smov 256   ;;  %s79_s23 = int_to_ptr.vmem [resolvable:$true] %s78_s23 }
  0x1d   :  { %s12689_s25 = smov 16   ;;  %s100_s26 = sshll.u32 %s13455_s7, 4  ;;  %s101_s26 = int_to_ptr.hbm [resolvable:$true] %s100_s26 }
  0x1e   :  { %84 = dma.hbm_to_vmem [thread:$0]  %s77_s21, 32768, %s79_s23, [#allocation12], %s12688_s24, %s12688_s24, %s12689_s25  }
  0x1f   :  { %s12690_s27 = smov [#allocation16]   ;;  %s124_s8 = sshll.u32 %s13457_s9, 4  ;;  %s125_s8 = int_to_ptr.hbm [resolvable:$true] %s124_s8 }
  0x20   :  { %s102_s28 = sshll.u32 %s12690_s27, 4  ;;  %s12691_s30 = smov 128   ;;  %s103_s28 = int_to_ptr.vmem [resolvable:$true] %s102_s28 }
  0x21   :  { %s12692_s14 = smov 8   ;;  %s12693_s15 = smov [#allocation19]  }
  0x22   :  { %108 = dma.hbm_to_vmem [thread:$0]  %s101_s26, 8192, %s103_s28, [#allocation15], %s12691_s30, %s12691_s30, %s12692_s14  }
  0x23   :  { %s126_s10 = sshll.u32 %s12693_s15, 4  ;;  %s12694_s16 = smov 64   ;;  %s127_s10 = int_to_ptr.vmem [resolvable:$true] %s126_s10 }
  0x24   :  { %s12695_s12 = smov 4   ;;  %s149_s18 = sshll.u32 %s13459_s11, 4  ;;  %s150_s18 = int_to_ptr.hbm [resolvable:$true] %s149_s18 }
  0x25   :  { %132 = dma.hbm_to_vmem [thread:$0]  %s125_s8, 2048, %s127_s10, [#allocation18], %s12694_s16, %s12694_s16, %s12695_s12  }
  0x26   :  { %s12696_s19 = smov [#allocation22]  }
  0x27   :  { %s151_s0 = sshll.u32 %s12696_s19, 4  ;;  %s152_s0 = int_to_ptr.vmem [resolvable:$true] %s151_s0 }
  0x28   :  { %154 = dma.hbm_to_vmem [thread:$0]  %s150_s18, 16, %s152_s0, [#allocation21]  }
  0x29   :  { %12662 = dma.done.wait [#allocation7], 16  }
  0x2a   :  { %12663 = vsyncadd [#allocation7], 4294967280 }
  0x2b   :  { %12664 = dma.done.wait [#allocation9], 16  }
  0x2c   :  { %12665 = vsyncadd [#allocation9], 4294967280 }
  0x2d   :  { %12666 = dma.done.wait [#allocation5], 69632  }
  0x2e   :  { %12667 = vsyncadd [#allocation5], 4294897664 }
  0x2f   :  { %12668 = dma.done.wait [#allocation12], 32896  }
  0x30   :  { %12669 = vsyncadd [#allocation12], 4294934400 }
  0x31   :  { %12670 = dma.done.wait [#allocation15], 8256  }
  0x32   :  { %12671 = vsyncadd [#allocation15], 4294959040 }
  0x33   :  { %12672 = dma.done.wait [#allocation18], 2080  }
  0x34   :  { %12673 = vsyncadd [#allocation18], 4294965216 }
  0x35   :  { %12674 = dma.done.wait [#allocation21], 32  }
  0x36   :  { %12675 = vsyncadd [#allocation21], 4294967264 }
  0x37   :  { %201 = sfence }
  0x38   :  { %v203_v1 = vld [vmem:[%s13450_s2] sm:$0xff]  ;;  %v7893_v2 = vld [vmem:[%s13450_s2 + $0x8] sm:$0xff]  ;;  %s7945_s4 = sld [smem:[#allocation4 + $0x27]]  ;;  %v7894_v3 = vld [vmem:[%s13450_s2 + $0x10] sm:$0xff]  ;;  %vm253_vm0 = vcmask 519168   ;;  %vm298_vm1 = vcmask 1043968  }
  0x39   :  { %s7946_s22 = sld [smem:[#allocation4 + $0x28]]  ;;  %v204_v4 = vpack.c.bf16 %v203_v1, %v203_v1  ;;  %v12815_v5 = vpack.c.bf16 %v7893_v2, %v7893_v2  ;;  %v210_v6 = vpack.c.bf16 %v7894_v3, %v7894_v3  ;;  %vm4207_vm2 = vcmask 523264  }
  0x3a   :  { %s7947_s24 = sld [smem:[#allocation4 + $0x29]]  ;;  %vm7868_vm7 = vcmask 57344  }
  0x3b   :  { %s7948_s25 = sld [smem:[#allocation8 + $0xd]]  ;;  %v12817_v8 = vunpack.c.l.bf16 %v204_v4  ;;  %v12822_v11 = vunpack.c.l.bf16 %v12815_v5  ;;  %v12826_v14 = vunpack.c.l.bf16 %v210_v6  ;;  %888 = vst.msk [vmem:[#allocation2 + $0x20] sm:$0xf] %vm253_vm0, %v12815_v5  ;;  %v11866_v5 = vld [vmem:[#allocation10 + $0xbdc] sm:$0xf0] }
  0x3c   :  { %s7913_s6 = sld [smem:[#allocation4 + $0xf]] }
  0x3d   :  { %s7914_s3 = sld [smem:[#allocation4 + $0x10]] }
  0x3e   :  { %v761_v7 = vstv %s7945_s4  ;;  %s7915_s26 = sld [smem:[#allocation4 + $0x11]] }
  0x3f   :  { %v762_v9 = vpack.c.bf16 %v761_v7, %v761_v7  ;;  %v764_v10 = vstv %s7946_s22  ;;  %s12819_s27 = sld [smem:[#allocation8 + $0x5]] }
  0x40   :  { %v765_v12 = vpack.c.bf16 %v764_v10, %v764_v10  ;;  %v767_v13 = vstv %s7947_s24  ;;  %s12824_s2 = sld [smem:[#allocation4 + $0x3]] }
  0x41   :  { %v768_v15 = vpack.c.bf16 %v767_v13, %v767_v13  ;;  %v770_v16 = vstv %s7948_s25  ;;  %v772_v17 = vunpack.c.l.bf16 %v762_v9  ;;  %s12828_s28 = sld [smem:[#allocation4 + $0x4]] }
  0x42   :  { %v775_v18 = vunpack.c.l.bf16 %v765_v12  ;;  %v425_v19 = vstv %s7913_s6  ;;  %s12831_s29 = sld [smem:[#allocation4 + $0x5]]  ;;  %v12833_v24 = vpack.c.bf16 %v770_v16, %v770_v16 }
  0x43   :  { %v773_v20 = vmul.f32 %v772_v17, %v12817_v8  ;;  %v782_v21 = vunpack.c.l.bf16 %v768_v15  ;;  %v426_v22 = vpack.c.bf16 %v425_v19, %v425_v19  ;;  %v428_v23 = vstv %s7914_s3  ;;  %s12837_s5 = sld [smem:[#allocation8 + $0x1]] }
  0x44   :  { %v776_v25 = vmul.f32 %v775_v18, %v12822_v11  ;;  %v429_v26 = vpack.c.bf16 %v428_v23, %v428_v23  ;;  %v431_v27 = vstv %s7915_s26  ;;  %s12840_s8 = sld [smem:[#allocation4 + $0x2d]]  ;;  %v790_v40 = vunpack.c.l.bf16 %v12833_v24 }
  0x45   :  { %v774_v28 = vpack.c.bf16 %v773_v20, %v773_v20  ;;  %v783_v29 = vmul.f32 %v782_v21, %v12826_v14  ;;  %v432_v30 = vpack.c.bf16 %v431_v27, %v431_v27  ;;  %v434_v32 = vstv %s12819_s27  ;;  %s12846_s30 = sld [smem:[#allocation4 + $0x2e]] }
  0x46   :  { %v777_v31 = vpack.c.bf16 %v776_v25, %v776_v25  ;;  %v436_v33 = vunpack.c.l.bf16 %v426_v22  ;;  %v439_v34 = vunpack.c.l.bf16 %v429_v26  ;;  %v256_v38 = vstv %s12824_s2  ;;  %s12852_s14 = sld [smem:[#allocation4 + $0x2f]] }
  0x47   :  { %v778_v35 = vunpack.c.l.bf16 %v774_v28  ;;  %v784_v36 = vpack.c.bf16 %v783_v29, %v783_v29  ;;  %v446_v37 = vunpack.c.l.bf16 %v432_v30  ;;  %v12848_v43 = vpack.c.bf16 %v434_v32, %v434_v32  ;;  %s12855_s15 = sld [smem:[#allocation8 + $0xf]] }
  0x48   :  { %v779_v39 = vunpack.c.l.bf16 %v777_v31  ;;  %v437_v41 = vmul.f32 %v436_v33, %v12817_v8  ;;  %v440_v42 = vmul.f32 %v439_v34, %v12822_v11  ;;  %v257_v45 = vpack.c.bf16 %v256_v38, %v256_v38  ;;  %s12861_s10 = sld [smem:[#allocation4 + $0x15]] }
  0x49   :  { %v447_v44 = vmul.f32 %v446_v37, %v12826_v14  ;;  %v259_v46 = vstv %s12828_s28  ;;  %v786_v51 = vunpack.c.l.bf16 %v784_v36  ;;  %v262_v53 = vstv %s12831_s29  ;;  %s12866_s12 = sld [smem:[#allocation4 + $0x16]] }
  0x4a   :  { %v780_v47 = vadd.f32 %v779_v39, %v778_v35  ;;  %v438_v48 = vpack.c.bf16 %v437_v41, %v437_v41  ;;  %v441_v49 = vpack.c.bf16 %v440_v42, %v440_v42  ;;  %v260_v50 = vpack.c.bf16 %v259_v46, %v259_v46  ;;  %s12869_s7 = sld [smem:[#allocation4 + $0x17]] }
  0x4b   :  { %v448_v52 = vpack.c.bf16 %v447_v44, %v447_v44  ;;  %v267_v54 = vunpack.c.l.bf16 %v257_v45  ;;  %v263_v58 = vpack.c.bf16 %v262_v53, %v262_v53  ;;  %v454_v59 = vunpack.c.l.bf16 %v12848_v43  ;;  %s12878_s17 = sld [smem:[#allocation8 + $0x7]] }
  0x4c   :  { %v781_v55 = vpack.c.bf16 %v780_v47, %v780_v47  ;;  %v442_v56 = vunpack.c.l.bf16 %v438_v48  ;;  %v443_v57 = vunpack.c.l.bf16 %v441_v49  ;;  %v265_v60 = vstv %s12837_s5  ;;  %s12881_s18 = sld [smem:[#allocation4 + $0x9]] }
  0x4d   :  { %v268_v61 = vmul.f32 %v267_v54, %v12817_v8  ;;  %v270_v62 = vunpack.c.l.bf16 %v260_v50  ;;  %v277_v1 = vunpack.c.l.bf16 %v263_v58  ;;  %v845_v2 = vstv %s12840_s8  ;;  %s12884_s19 = sld [smem:[#allocation4 + $0xa]] }
  0x4e   :  { %v785_v63 = vunpack.c.l.bf16 %v781_v55  ;;  %v444_v0 = vadd.f32 %v443_v57, %v442_v56  ;;  %v450_v3 = vunpack.c.l.bf16 %v448_v52  ;;  %v846_v7 = vpack.c.bf16 %v845_v2, %v845_v2  ;;  %s12887_s0 = sld [smem:[#allocation4 + $0xb]] }
  0x4f   :  { %v269_v4 = vpack.c.bf16 %v268_v61, %v268_v61  ;;  %v271_v6 = vmul.f32 %v270_v62, %v12822_v11  ;;  %v278_v12 = vmul.f32 %v277_v1, %v12826_v14  ;;  %v848_v13 = vstv %s12846_s30  ;;  %s12890_s9 = sld [smem:[#allocation4 + $0x21]] }
  0x50   :  { %v787_v9 = vadd.f32 %v786_v51, %v785_v63  ;;  %v445_v10 = vpack.c.bf16 %v444_v0, %v444_v0  ;;  %v849_v17 = vpack.c.bf16 %v848_v13, %v848_v13  ;;  %v851_v18 = vstv %s12852_s14  ;;  %s12895_s11 = sld [smem:[#allocation8 + $0x3]] }
  0x51   :  { %v272_v15 = vpack.c.bf16 %v271_v6, %v271_v6  ;;  %v273_v16 = vunpack.c.l.bf16 %v269_v4  ;;  %v279_v21 = vpack.c.bf16 %v278_v12, %v278_v12  ;;  %v852_v22 = vpack.c.bf16 %v851_v18, %v851_v18  ;;  %s12899_s20 = sld [smem:[#allocation4 + $0x22]] }
  0x52   :  { %v788_v19 = vpack.c.bf16 %v787_v9, %v787_v9  ;;  %v449_v20 = vunpack.c.l.bf16 %v445_v10  ;;  %v854_v24 = vstv %s12855_s15  ;;  %v856_v25 = vunpack.c.l.bf16 %v846_v7  ;;  %s12903_s21 = sld [smem:[#allocation4 + $0x23]] }
  0x53   :  { %v274_v23 = vunpack.c.l.bf16 %v272_v15  ;;  %v859_v26 = vunpack.c.l.bf16 %v849_v17  ;;  %v266_v29 = vpack.c.bf16 %v265_v60, %v265_v60  ;;  %v281_v30 = vunpack.c.l.bf16 %v279_v21  ;;  %s12910_s4 = sld [smem:[#allocation4 + $0x1b]] }
  0x54   :  { %v789_v27 = vunpack.c.l.bf16 %v788_v19  ;;  %v451_v28 = vadd.f32 %v450_v3, %v449_v20  ;;  %v857_v32 = vmul.f32 %v856_v25, %v12817_v8  ;;  %v866_v34 = vunpack.c.l.bf16 %v852_v22  ;;  %s12914_s22 = sld [smem:[#allocation4 + $0x1c]] }
  0x55   :  { %v275_v31 = vadd.f32 %v274_v23, %v273_v16  ;;  %v860_v33 = vmul.f32 %v859_v26, %v12822_v11  ;;  %v12874_v37 = vpack.c.bf16 %v854_v24, %v854_v24  ;;  %v509_v38 = vstv %s12861_s10  ;;  %s12917_s1 = sld [smem:[#allocation4 + $0x1d]] }
  0x56   :  { %v791_v35 = vadd.f32 %v790_v40, %v789_v27  ;;  %v452_v36 = vpack.c.bf16 %v451_v28, %v451_v28  ;;  %v858_v41 = vpack.c.bf16 %v857_v32, %v857_v32  ;;  %v867_v43 = vmul.f32 %v866_v34, %v12826_v14  ;;  %s12920_s23 = sld [smem:[#allocation8 + $0xb]] }
  0x57   :  { %v276_v39 = vpack.c.bf16 %v275_v31, %v275_v31  ;;  %v861_v42 = vpack.c.bf16 %v860_v33, %v860_v33  ;;  %v510_v46 = vpack.c.bf16 %v509_v38, %v509_v38  ;;  %v512_v47 = vstv %s12866_s12  ;;  %s12929_s24 = sld [smem:[#allocation8 + $0x9]] }
  0x58   :  { %v792_v44 = vpack.c.bf16 %v791_v35, %v791_v35  ;;  %v453_v45 = vunpack.c.l.bf16 %v452_v36  ;;  %v862_v49 = vunpack.c.l.bf16 %v858_v41  ;;  %v868_v40 = vpack.c.bf16 %v867_v43, %v867_v43  ;;  %s12938_s25 = sld [smem:[#allocation4 + $0x1]] }
  0x59   :  { %v280_v48 = vunpack.c.l.bf16 %v276_v39  ;;  %v863_v50 = vunpack.c.l.bf16 %v861_v42  ;;  %v513_v53 = vpack.c.bf16 %v512_v47, %v512_v47  ;;  %v515_v54 = vstv %s12869_s7  ;;  %s7896_s6 = sld [smem:[#allocation4 + $0x2]] }
  0x5a   :  { %v793_v51 = vunpack.c.l.bf16 %v792_v44  ;;  %v455_v52 = vadd.f32 %v454_v59, %v453_v45  ;;  %v285_v56 = vunpack.c.l.bf16 %v266_v29  ;;  %v516_v58 = vpack.c.bf16 %v515_v54, %v515_v54  ;;  %s211_s3 = sld [smem:[#allocation4]] }
  0x5b   :  { %v282_v55 = vadd.f32 %v281_v30, %v280_v48  ;;  %v864_v57 = vadd.f32 %v863_v50, %v862_v49  ;;  %v874_v62 = vunpack.c.l.bf16 %v12874_v37  ;;  %v520_v63 = vunpack.c.l.bf16 %v510_v46  ;;  %s7902_s26 = sld [smem:[#allocation4 + $0x7]] }
  0x5c   :  { %v794_v60 = vmul.f32 0.010009766, %v793_v51  ;;  %v456_v61 = vpack.c.bf16 %v455_v52, %v455_v52  ;;  %v870_v2 = vunpack.c.l.bf16 %v868_v40  ;;  %v523_v59 = vunpack.c.l.bf16 %v513_v53  ;;  %s7903_s27 = sld [smem:[#allocation4 + $0x8]] }
  0x5d   :  { %v283_v0 = vpack.c.bf16 %v282_v55, %v282_v55  ;;  %v865_v1 = vpack.c.bf16 %v864_v57, %v864_v57  ;;  %v521_v6 = vmul.f32 %v520_v63, %v12817_v8  ;;  %v530_v7 = vunpack.c.l.bf16 %v516_v58  ;;  %s12946_s2 = sld [smem:[#allocation8]] }
  0x5e   :  { %v797_v3 = vmax.f32 %v793_v51, %v794_v60  ;;  %v457_v4 = vunpack.c.l.bf16 %v456_v61  ;;  %v518_v12 = vstv %s12878_s17  ;;  %v524_v13 = vmul.f32 %v523_v59, %v12822_v11  ;;  %s12949_s28 = sld [smem:[#allocation8 + $0x2]] }
  0x5f   :  { %v284_v9 = vunpack.c.l.bf16 %v283_v0  ;;  %v869_v10 = vunpack.c.l.bf16 %v865_v1  ;;  %v522_v17 = vpack.c.bf16 %v521_v6, %v521_v6  ;;  %v531_v18 = vmul.f32 %v530_v7, %v12826_v14  ;;  %s12952_s29 = sld [smem:[#allocation4 + $0xc]] }
  0x60   :  { %v798_v15 = vpack.c.bf16 %v797_v3, %v797_v3  ;;  %v458_v16 = vmul.f32 0.010009766, %v457_v4  ;;  %v525_v21 = vpack.c.bf16 %v524_v13, %v524_v13  ;;  %v341_v22 = vstv %s12881_s18  ;;  %s7910_s5 = sld [smem:[#allocation4 + $0xd]] }
  0x61   :  { %v286_v19 = vadd.f32 %v285_v56, %v284_v9  ;;  %v871_v20 = vadd.f32 %v870_v2, %v869_v10  ;;  %v526_v24 = vunpack.c.l.bf16 %v522_v17  ;;  %v532_v25 = vpack.c.bf16 %v531_v18, %v531_v18  ;;  %s7911_s8 = sld [smem:[#allocation4 + $0xe]] }
  0x62   :  { %800 = vrot.lane.b32.xlu1 %v798_v15, %s12694_s16  ;;  %v461_v23 = vmax.f32 %v457_v4, %v458_v16  ;;  %v342_v26 = vpack.c.bf16 %v341_v22, %v341_v22  ;;  %v527_v29 = vunpack.c.l.bf16 %v525_v21  ;;  %v344_v30 = vstv %s12884_s19  ;;  %s12960_s30 = sld [smem:[#allocation4 + $0x24]] }
  0x63   :  { %v287_v27 = vpack.c.bf16 %v286_v19, %v286_v19  ;;  %v872_v28 = vpack.c.bf16 %v871_v20, %v871_v20  ;;  %v345_v32 = vpack.c.bf16 %v344_v30, %v344_v30  ;;  %v347_v33 = vstv %s12887_s0  ;;  %s12962_s14 = sld [smem:[#allocation4 + $0x25]] }
  0x64   :  { %v462_v31 = vpack.c.bf16 %v461_v23, %v461_v23  ;;  %v528_v36 = vadd.f32 %v527_v29, %v526_v24  ;;  %v348_v37 = vpack.c.bf16 %v347_v33, %v347_v33  ;;  %v519_v38 = vpack.c.bf16 %v518_v12, %v518_v12  ;;  %s12964_s15 = sld [smem:[#allocation4 + $0x26]] }
  0x65   :  { %v288_v34 = vunpack.c.l.bf16 %v287_v27  ;;  %v873_v35 = vunpack.c.l.bf16 %v872_v28  ;;  %v352_v39 = vunpack.c.l.bf16 %v342_v26  ;;  %v355_v41 = vunpack.c.l.bf16 %v345_v32  ;;  %s12966_s10 = sld [smem:[#allocation8 + $0xc]] }
  0x66   :  { %464 = vrot.lane.b32.xlu0 %v462_v31, %s12694_s16  ;;  %v677_v42 = vstv %s12890_s9  ;;  %v529_v45 = vpack.c.bf16 %v528_v36, %v528_v36  ;;  %v534_v46 = vunpack.c.l.bf16 %v532_v25  ;;  %v350_v47 = vstv %s12895_s11  ;;  %s12970_s12 = sld [smem:[#allocation8 + $0x4]] }
  0x67   :  { %v289_v43 = vmul.f32 0.010009766, %v288_v34  ;;  %v875_v44 = vadd.f32 %v874_v62, %v873_v35  ;;  %v353_v48 = vmul.f32 %v352_v39, %v12817_v8  ;;  %v356_v49 = vmul.f32 %v355_v41, %v12822_v11  ;;  %s12972_s7 = sld [smem:[#allocation4 + $0x12]] }
  0x68   :  { %v362_v50 = vunpack.c.l.bf16 %v348_v37  ;;  %v533_v52 = vunpack.c.l.bf16 %v529_v45  ;;  %v678_v53 = vpack.c.bf16 %v677_v42, %v677_v42  ;;  %v680_v57 = vstv %s12899_s20  ;;  %v8183_v45 = vld [vmem:[#allocation10 + $0x1c0] sm:$0xf]  ;;  %s12974_s17 = sld [smem:[#allocation4 + $0x2a]] }
  0x69   :  { %v292_v40 = vmax.f32 %v288_v34, %v289_v43  ;;  %v876_v51 = vpack.c.bf16 %v875_v44, %v875_v44  ;;  %v354_v54 = vpack.c.bf16 %v353_v48, %v353_v48  ;;  %v357_v55 = vpack.c.bf16 %v356_v49, %v356_v49  ;;  %s12976_s18 = sld [smem:[#allocation4 + $0x2b]] }
  0x6a   :  { %v363_v56 = vmul.f32 %v362_v50, %v12826_v14  ;;  %v535_v61 = vadd.f32 %v534_v46, %v533_v52  ;;  %v681_v62 = vpack.c.bf16 %v680_v57, %v680_v57  ;;  %v683_v2 = vstv %s12903_s21  ;;  %v11546_v46 = vld [vmem:[#allocation10 + $0x1dc] sm:$0xf0]  ;;  %s12978_s19 = sld [smem:[#allocation4 + $0x2c]] }
  0x6b   :  { %v293_v58 = vpack.c.bf16 %v292_v40, %v292_v40  ;;  %v877_v60 = vunpack.c.l.bf16 %v876_v51  ;;  %v358_v63 = vunpack.c.l.bf16 %v354_v54  ;;  %v359_v0 = vunpack.c.l.bf16 %v357_v55  ;;  %v11610_v51 = vld [vmem:[#allocation10 + $0x3dc] sm:$0xf0]  ;;  %s12980_s0 = sld [smem:[#allocation4 + $0x13]] }
  0x6c   :  { %v364_v1 = vpack.c.bf16 %v363_v56, %v363_v56  ;;  %v536_v3 = vpack.c.bf16 %v535_v61, %v535_v61  ;;  %v538_v4 = vunpack.c.l.bf16 %v519_v38  ;;  %v684_v6 = vpack.c.bf16 %v683_v2, %v683_v2  ;;  %v8151_v52 = vld [vmem:[#allocation10 + $0x180] sm:$0xf]  ;;  %s12997_s9 = sld [smem:[#allocation4 + $0x14]] }
  0x6d   :  { %295 = vrot.lane.b32.xlu2 %v293_v58, %s12694_s16  ;;  %v878_v59 = vmul.f32 0.010009766, %v877_v60  ;;  %v351_v7 = vpack.c.bf16 %v350_v47, %v350_v47  ;;  %v360_v9 = vadd.f32 %v359_v0, %v358_v63  ;;  %v688_v10 = vunpack.c.l.bf16 %v678_v53  ;;  %v8439_v47 = vld [vmem:[#allocation10 + $0x3c0] sm:$0xf]  ;;  %s13003_s11 = sld [smem:[#allocation8 + $0xe]] }
  0x6e   :  { %v537_v13 = vunpack.c.l.bf16 %v536_v3  ;;  %v691_v15 = vunpack.c.l.bf16 %v681_v62  ;;  %v698_v16 = vunpack.c.l.bf16 %v684_v6  ;;  %v366_v18 = vunpack.c.l.bf16 %v364_v1  ;;  %v11538_v57 = vld [vmem:[#allocation10 + $0x19c] sm:$0xf0]  ;;  %s13010_s20 = sld [smem:[#allocation8 + $0x6]] }
  0x6f   :  { %v881_v12 = vmax.f32 %v877_v60, %v878_v59  ;;  %v361_v17 = vpack.c.bf16 %v360_v9, %v360_v9  ;;  %v689_v19 = vmul.f32 %v688_v10, %v12817_v8  ;;  %v593_v20 = vstv %s12910_s4  ;;  %v8407_v58 = vld [vmem:[#allocation10 + $0x380] sm:$0xf]  ;;  %s13017_s21 = sld [smem:[#allocation4 + $0x1e]] }
  0x70   :  { %v539_v22 = vadd.f32 %v538_v4, %v537_v13  ;;  %v692_v23 = vmul.f32 %v691_v15, %v12822_v11  ;;  %v699_v24 = vmul.f32 %v698_v16, %v12826_v14  ;;  %v594_v27 = vpack.c.bf16 %v593_v20, %v593_v20  ;;  %v11602_v60 = vld [vmem:[#allocation10 + $0x39c] sm:$0xf0]  ;;  %s13019_s4 = sld [smem:[#allocation4 + $0x1f]] }
  0x71   :  { %v882_v21 = vpack.c.bf16 %v881_v12, %v881_v12  ;;  %v365_v25 = vunpack.c.l.bf16 %v361_v17  ;;  %v690_v26 = vpack.c.bf16 %v689_v19, %v689_v19  ;;  %v596_v28 = vstv %s12914_s22  ;;  %v8119_v4 = vld [vmem:[#allocation10 + $0x140] sm:$0xf]  ;;  %s13023_s22 = sld [smem:[#allocation4 + $0x20]] }
  0x72   :  { %v540_v29 = vpack.c.bf16 %v539_v22, %v539_v22  ;;  %v693_v30 = vpack.c.bf16 %v692_v23, %v692_v23  ;;  %v597_v31 = vpack.c.bf16 %v596_v28, %v596_v28  ;;  %v700_v34 = vpack.c.bf16 %v699_v24, %v699_v24  ;;  %v11530_v6 = vld [vmem:[#allocation10 + $0x15c] sm:$0xf0] }
  0x73   :  { %884 = vrot.lane.b32.xlu1 %v882_v21, %s12694_s16  ;;  %v367_v32 = vadd.f32 %v366_v18, %v365_v25  ;;  %v694_v33 = vunpack.c.l.bf16 %v690_v26  ;;  %v599_v35 = vstv %s12917_s1  ;;  %v370_v37 = vunpack.c.l.bf16 %v351_v7  ;;  %v8375_v18 = vld [vmem:[#allocation10 + $0x340] sm:$0xf]  ;;  %s13028_s1 = sld [smem:[#allocation4 + $0x18]] }
  0x74   :  { %v541_v36 = vunpack.c.l.bf16 %v540_v29  ;;  %v695_v38 = vunpack.c.l.bf16 %v693_v30  ;;  %v600_v39 = vpack.c.bf16 %v599_v35, %v599_v35  ;;  %v686_v42 = vstv %s12920_s23  ;;  %v11594_v19 = vld [vmem:[#allocation10 + $0x35c] sm:$0xf0]  ;;  %s13031_s23 = sld [smem:[#allocation4 + $0x19]] }
  0x75   :  { %v368_v41 = vpack.c.bf16 %v367_v32, %v367_v32  ;;  %v604_v43 = vunpack.c.l.bf16 %v594_v27  ;;  %v607_v44 = vunpack.c.l.bf16 %v597_v31  ;;  %v8184_v40 = vor.u32 %v11546_v46, %v8183_v45  ;;  %v8087_v22 = vld [vmem:[#allocation10 + $0x100] sm:$0xf] }
  0x76   :  { %v542_v48 = vmul.f32 0.010009766, %v541_v36  ;;  %v696_v49 = vadd.f32 %v695_v38, %v694_v33  ;;  %v614_v50 = vunpack.c.l.bf16 %v600_v39  ;;  %v702_v54 = vunpack.c.l.bf16 %v700_v34  ;;  %v11522_v26 = vld [vmem:[#allocation10 + $0x11c] sm:$0xf0] }
  0x77   :  { %v369_v53 = vunpack.c.l.bf16 %v368_v41  ;;  %v605_v55 = vmul.f32 %v604_v43, %v12817_v8  ;;  %v608_v56 = vmul.f32 %v607_v44, %v12822_v11  ;;  %4211 = vmatpush.bf16.msra.mxu0 %v8184_v40  ;;  %v8440_v0 = vor.u32 %v11610_v51, %v8439_v47  ;;  %v8951_v27 = vld [vmem:[#allocation10 + $0x7c0] sm:$0xf] }
  0x78   :  { %v545_v61 = vmax.f32 %v541_v36, %v542_v48  ;;  %v697_v62 = vpack.c.bf16 %v696_v49, %v696_v49  ;;  %v615_v63 = vmul.f32 %v614_v50, %v12826_v14  ;;  %v8152_v3 = vor.u32 %v11538_v57, %v8151_v52  ;;  %v11738_v28 = vld [vmem:[#allocation10 + $0x7dc] sm:$0xf0] }
  0x79   :  { %v371_v1 = vadd.f32 %v370_v37, %v369_v53  ;;  %v606_v2 = vpack.c.bf16 %v605_v55, %v605_v55  ;;  %v609_v59 = vpack.c.bf16 %v608_v56, %v608_v56  ;;  %v687_v9 = vpack.c.bf16 %v686_v42, %v686_v42  ;;  %4224 = vmatpush.bf16.msra.mxu1 %v8440_v0  ;;  %v8343_v32 = vld [vmem:[#allocation10 + $0x300] sm:$0xf] }
  0x7a   :  { %v546_v7 = vpack.c.bf16 %v545_v61, %v545_v61  ;;  %v701_v10 = vunpack.c.l.bf16 %v697_v62  ;;  %v8408_v12 = vor.u32 %v11602_v60, %v8407_v58  ;;  %v616_v17 = vpack.c.bf16 %v615_v63, %v615_v63  ;;  %v11586_v36 = vld [vmem:[#allocation10 + $0x31c] sm:$0xf0] }
  0x7b   :  { %v372_v13 = vpack.c.bf16 %v371_v1, %v371_v1  ;;  %v610_v15 = vunpack.c.l.bf16 %v606_v2  ;;  %v611_v16 = vunpack.c.l.bf16 %v609_v59  ;;  %4212 = vmatpush.bf16.msra.mxu0 %v8152_v3  ;;  %v8120_v21 = vor.u32 %v11530_v6, %v8119_v4  ;;  %v8695_v38 = vld [vmem:[#allocation10 + $0x5c0] sm:$0xf] }
  0x7c   :  { %548 = vrot.lane.b32.xlu0 %v546_v7, %s12694_s16  ;;  %v703_v20 = vadd.f32 %v702_v54, %v701_v10  ;;  %v602_v24 = vstv %s12929_s24  ;;  %v706_v30 = vunpack.c.l.bf16 %v687_v9  ;;  %v8376_v31 = vor.u32 %v11594_v19, %v8375_v18  ;;  %v11674_v43 = vld [vmem:[#allocation10 + $0x5dc] sm:$0xf0]  ;;  %s13035_s24 = sld [smem:[#allocation4 + $0x1a]] }
  0x7d   :  { %v373_v23 = vunpack.c.l.bf16 %v372_v13  ;;  %v612_v25 = vadd.f32 %v611_v16, %v610_v15  ;;  %4225 = vmatpush.bf16.msra.mxu1 %v8408_v12  ;;  %v618_v35 = vunpack.c.l.bf16 %v616_v17  ;;  %v8952_v37 = vor.u32 %v11738_v28, %v8951_v27  ;;  %v8919_v44 = vld [vmem:[#allocation10 + $0x780] sm:$0xf] }
  0x7e   :  { %v704_v29 = vpack.c.bf16 %v703_v20, %v703_v20  ;;  %v603_v41 = vpack.c.bf16 %v602_v24, %v602_v24  ;;  %v8088_v42 = vor.u32 %v11522_v26, %v8087_v22  ;;  %v11730_v45 = vld [vmem:[#allocation10 + $0x79c] sm:$0xf0]  ;;  %v8696_v50 = vor.u32 %v11674_v43, %v8695_v38 }
  0x7f   :  { %v374_v33 = vmul.f32 0.010009766, %v373_v23  ;;  %v613_v34 = vpack.c.bf16 %v612_v25, %v612_v25  ;;  %4213 = vmatpush.bf16.msra.mxu0 %v8120_v21  ;;  %v8055_v48 = vld [vmem:[#allocation10 + $0xc0] sm:$0xf]  ;;  %4250 = vmatpush.bf16.msra.mxu3 %v8952_v37  ;;  %v8920_v40 = vor.u32 %v11730_v45, %v8919_v44  ;;  %v8344_v52 = vor.u32 %v11586_v36, %v8343_v32 }
  0x80   :  { %v705_v39 = vunpack.c.l.bf16 %v704_v29  ;;  %v11514_v49 = vld [vmem:[#allocation10 + $0xdc] sm:$0xf0]  ;;  %4237 = vmatpush.bf16.msra.mxu2 %v8696_v50  ;;  %v622_v59 = vunpack.c.l.bf16 %v603_v41 }
  0x81   :  { %v377_v46 = vmax.f32 %v373_v23, %v374_v33  ;;  %v617_v47 = vunpack.c.l.bf16 %v613_v34  ;;  %4226 = vmatpush.bf16.msra.mxu1 %v8376_v31  ;;  %v8311_v53 = vld [vmem:[#allocation10 + $0x2c0] sm:$0xf]  ;;  %v8056_v0 = vor.u32 %v11514_v49, %v8055_v48 }
  0x82   :  { %v707_v51 = vadd.f32 %v706_v30, %v705_v39  ;;  %v8663_v54 = vld [vmem:[#allocation10 + $0x580] sm:$0xf] }
  0x83   :  { %v11666_v55 = vld [vmem:[#allocation10 + $0x59c] sm:$0xf0]  ;;  %v378_v56 = vpack.c.bf16 %v377_v46, %v377_v46  ;;  %v619_v57 = vadd.f32 %v618_v35, %v617_v47  ;;  %4214 = vmatpush.bf16.msra.mxu0 %v8088_v42  ;;  %4251 = vmatpush.bf16.msra.mxu3 %v8920_v40 }
  0x84   :  { %v11578_v58 = vld [vmem:[#allocation10 + $0x2dc] sm:$0xf0]  ;;  %v8664_v60 = vor.u32 %v11666_v55, %v8663_v54  ;;  %v708_v63 = vpack.c.bf16 %v707_v51, %v707_v51 }
  0x85   :  { %v8887_v61 = vld [vmem:[#allocation10 + $0x740] sm:$0xf]  ;;  %380 = vrot.lane.b32.xlu2 %v378_v56, %s12694_s16  ;;  %v620_v2 = vpack.c.bf16 %v619_v57, %v619_v57  ;;  %4227 = vmatpush.bf16.msra.mxu1 %v8344_v52  ;;  %v8312_v10 = vor.u32 %v11578_v58, %v8311_v53  ;;  %v215_v58 = vstv %s12938_s25  ;;  %s13053_s25 = sld [smem:[#allocation8 + $0xa]] }
  0x86   :  { %v11722_v62 = vld [vmem:[#allocation10 + $0x75c] sm:$0xf0]  ;;  %v709_v9 = vunpack.c.l.bf16 %v708_v63  ;;  %4238 = vmatpush.bf16.msra.mxu2 %v8664_v60 }
  0x87   :  { %v8023_v1 = vld [vmem:[#allocation10 + $0x80] sm:$0xf]  ;;  %v8888_v4 = vor.u32 %v11722_v62, %v8887_v61  ;;  %v621_v15 = vunpack.c.l.bf16 %v620_v2  ;;  %4215 = vmatpush.bf16.msra.mxu0 %v8056_v0  ;;  %v216_v0 = vpack.c.bf16 %v215_v58, %v215_v58 }
  0x88   :  { %v11506_v3 = vld [vmem:[#allocation10 + $0x9c] sm:$0xf0]  ;;  %v710_v19 = vmul.f32 0.010009766, %v709_v9 }
  0x89   :  { %v8631_v6 = vld [vmem:[#allocation10 + $0x540] sm:$0xf]  ;;  %v8024_v20 = vor.u32 %v11506_v3, %v8023_v1  ;;  %v623_v23 = vadd.f32 %v622_v59, %v621_v15  ;;  %4252 = vmatpush.bf16.msra.mxu3 %v8888_v4  ;;  %4228 = vmatpush.bf16.msra.mxu1 %v8312_v10  ;;  %v218_v3 = vstv %s7896_s6  ;;  %s13073_s6 = sld [smem:[#allocation8 + $0x8]] }
  0x8a   :  { %v11658_v7 = vld [vmem:[#allocation10 + $0x55c] sm:$0xf0]  ;;  %v713_v27 = vmax.f32 %v709_v9, %v710_v19  ;;  %v219_v9 = vpack.c.bf16 %v218_v3, %v218_v3 }
  0x8b   :  { %v8855_v12 = vld [vmem:[#allocation10 + $0x700] sm:$0xf]  ;;  %v8632_v18 = vor.u32 %v11658_v7, %v8631_v6  ;;  %v624_v31 = vpack.c.bf16 %v623_v23, %v623_v23  ;;  %4216 = vmatpush.bf16.msra.mxu0 %v8024_v20  ;;  %v212_v6 = vstv %s211_s3  ;;  %v227_v7 = vunpack.c.l.bf16 %v216_v0  ;;  %s12697_s3 = smov [#allocation23]  }
  0x8c   :  { %v11714_v13 = vld [vmem:[#allocation10 + $0x71c] sm:$0xf0]  ;;  %v714_v35 = vpack.c.bf16 %v713_v27, %v713_v27  ;;  %v213_v10 = vpack.c.bf16 %v212_v6, %v212_v6 }
  0x8d   :  { %v8279_v16 = vld [vmem:[#allocation10 + $0x280] sm:$0xf]  ;;  %v8856_v26 = vor.u32 %v11714_v13, %v8855_v12  ;;  %4239 = vmatpush.bf16.msra.mxu2 %v8632_v18  ;;  %v625_v37 = vunpack.c.l.bf16 %v624_v31  ;;  %v229_v12 = vmul.f32 %v12822_v11, %v227_v7  ;;  %v235_v13 = vunpack.c.l.bf16 %v219_v9 }
  0x8e   :  { %v11570_v17 = vld [vmem:[#allocation10 + $0x29c] sm:$0xf0]  ;;  %716 = vrot.lane.b32.xlu1 %v714_v35, %s12694_s16  ;;  %v223_v15 = vunpack.c.l.bf16 %v213_v10  ;;  %v310_v10 = vstv %s12949_s28 }
  0x8f   :  { %v8599_v21 = vld [vmem:[#allocation10 + $0x500] sm:$0xf]  ;;  %v8280_v28 = vor.u32 %v11570_v17, %v8279_v16  ;;  %4253 = vmatpush.bf16.msra.mxu3 %v8856_v26  ;;  %v626_v45 = vmul.f32 0.010009766, %v625_v37  ;;  %v230_v16 = vpack.c.bf16 %v229_v12, %v229_v12  ;;  %v237_v17 = vmul.f32 %v12826_v14, %v235_v13 }
  0x90   :  { %v11650_v22 = vld [vmem:[#allocation10 + $0x51c] sm:$0xf0]  ;;  %v225_v18 = vmul.f32 %v12817_v8, %v223_v15 }
  0x91   :  { %v7991_v24 = vld [vmem:[#allocation10 + $0x40] sm:$0xf]  ;;  %v8600_v34 = vor.u32 %v11650_v22, %v8599_v21  ;;  %4229 = vmatpush.bf16.msra.mxu1 %v8280_v28  ;;  %v629_v50 = vmax.f32 %v625_v37, %v626_v45  ;;  %v232_v19 = vunpack.c.l.bf16 %v230_v16  ;;  %v385_v16 = vstv %s12952_s29 }
  0x92   :  { %v11498_v25 = vld [vmem:[#allocation10 + $0x5c] sm:$0xf0]  ;;  %v226_v26 = vpack.c.bf16 %v225_v18, %v225_v18  ;;  %v386_v18 = vpack.c.bf16 %v385_v16, %v385_v16 }
  0x93   :  { %v8823_v29 = vld [vmem:[#allocation10 + $0x6c0] sm:$0xf]  ;;  %v7992_v36 = vor.u32 %v11498_v25, %v7991_v24  ;;  %4240 = vmatpush.bf16.msra.mxu2 %v8600_v34  ;;  %v630_v54 = vpack.c.bf16 %v629_v50, %v629_v50  ;;  %v304_v24 = vstv %s7902_s26  ;;  %v307_v25 = vstv %s7903_s27 }
  0x94   :  { %v11706_v30 = vld [vmem:[#allocation10 + $0x6dc] sm:$0xf0] }
  0x95   :  { %v8247_v32 = vld [vmem:[#allocation10 + $0x240] sm:$0xf]  ;;  %v8824_v41 = vor.u32 %v11706_v30, %v8823_v29  ;;  %4217 = vmatpush.bf16.msra.mxu0 %v7992_v36  ;;  %632 = vrot.lane.b32.xlu0 %v630_v54, %s12694_s16  ;;  %s7901_s16 = sld [smem:[#allocation4 + $0x6]] }
  0x96   :  { %v11562_v33 = vld [vmem:[#allocation10 + $0x25c] sm:$0xf0] }
  0x97   :  { %v7959_v38 = vld [vmem:[#allocation10] sm:$0xf]  ;;  %v8248_v42 = vor.u32 %v11562_v33, %v8247_v32  ;;  %4254 = vmatpush.bf16.msra.mxu3 %v8824_v41  ;;  %v305_v32 = vpack.c.bf16 %v304_v24, %v304_v24  ;;  %v238_v33 = vpack.c.bf16 %v237_v17, %v237_v17  ;;  %v231_v41 = vunpack.c.l.bf16 %v226_v26 }
  0x98   :  { %v11490_v39 = vld [vmem:[#allocation10 + $0x1c] sm:$0xf0]  ;;  %v388_v17 = vstv %s7910_s5 }
  0x99   :  { %v9207_v43 = vld [vmem:[#allocation10 + $0x9c0] sm:$0xf]  ;;  %v7960_v48 = vor.u32 %v11490_v39, %v7959_v38  ;;  %4230 = vmatpush.bf16.msra.mxu1 %v8248_v42  ;;  %v308_v39 = vpack.c.bf16 %v307_v25, %v307_v25 }
  0x9a   :  { %v11802_v44 = vld [vmem:[#allocation10 + $0x9dc] sm:$0xf0] }
  0x9b   :  { %v8215_v46 = vld [vmem:[#allocation10 + $0x200] sm:$0xf]  ;;  %v9208_v40 = vor.u32 %v11802_v44, %v9207_v43  ;;  %4218 = vmatpush.bf16.msra.mxu0 %v7960_v48  ;;  %v301_v23 = vstv %s7901_s16  ;;  %v221_v48 = vstv %s12946_s2  ;;  %s7875_s16 = sshll.u32 %s12697_s3, 4  ;;  %s7877_s2 = sshll.u32 %s13461_s13, 4  ;;  %s7876_s16 = int_to_ptr.vmem [resolvable:$true] %s7875_s16  ;;  %s7878_s2 = int_to_ptr.hbm [resolvable:$true] %s7877_s2 }
  0x9c   :  { %v11554_v47 = vld [vmem:[#allocation10 + $0x21c] sm:$0xf0]  ;;  %v302_v31 = vpack.c.bf16 %v301_v23, %v301_v23  ;;  %v396_v23 = vunpack.c.l.bf16 %v386_v18 }
  0x9d   :  { %v9463_v49 = vld [vmem:[#allocation10 + $0xbc0] sm:$0xf]  ;;  %v8216_v51 = vor.u32 %v11554_v47, %v8215_v46  ;;  %v315_v47 = vunpack.c.l.bf16 %v305_v32  ;;  %v391_v32 = vstv %s7911_s8 }
  0x9e   :  { %v9175_v52 = vld [vmem:[#allocation10 + $0x980] sm:$0xf]  ;;  %v9464_v55 = vor.u32 %v11866_v5, %v9463_v49  ;;  %v312_v46 = vunpack.c.l.bf16 %v302_v31 }
  0x9f   :  { %v11794_v53 = vld [vmem:[#allocation10 + $0x99c] sm:$0xf0]  ;;  %4263 = vmatpush.bf16.msrb.mxu0 %v9208_v40  ;;  %4231 = vmatpush.bf16.msra.mxu1 %v8216_v51 }
  0xa0   :  { %v9431_v56 = vld [vmem:[#allocation10 + $0xb80] sm:$0xf]  ;;  %v9176_v60 = vor.u32 %v11794_v53, %v9175_v52  ;;  %v322_v52 = vunpack.c.l.bf16 %v308_v39  ;;  %v233_v53 = vadd.f32 %v232_v19, %v231_v41  ;;  %v389_v19 = vpack.c.bf16 %v388_v17, %v388_v17 }
  0xa1   :  { %v11858_v57 = vld [vmem:[#allocation10 + $0xb9c] sm:$0xf0] }
  0xa2   :  { %v9143_v61 = vld [vmem:[#allocation10 + $0x940] sm:$0xf]  ;;  %v9432_v63 = vor.u32 %v11858_v57, %v9431_v56  ;;  %v313_v56 = vmul.f32 %v312_v46, %v12817_v8  ;;  %v316_v57 = vmul.f32 %v315_v47, %v12822_v11  ;;  %v399_v24 = vunpack.c.l.bf16 %v389_v19 }
  0xa3   :  { %v11786_v62 = vld [vmem:[#allocation10 + $0x95c] sm:$0xf0]  ;;  %4276 = vmatpush.bf16.msrb.mxu1 %v9464_v55  ;;  %4264 = vmatpush.bf16.msrb.mxu0 %v9176_v60  ;;  %v323_v60 = vmul.f32 %v322_v52, %v12826_v14 }
  0xa4   :  { %v9399_v1 = vld [vmem:[#allocation10 + $0xb40] sm:$0xf]  ;;  %v9144_v59 = vor.u32 %v11786_v62, %v9143_v61  ;;  %v240_v61 = vunpack.c.l.bf16 %v238_v33  ;;  %v234_v62 = vpack.c.bf16 %v233_v53, %v233_v53  ;;  %v317_v0 = vpack.c.bf16 %v316_v57, %v316_v57 }
  0xa5   :  { %v11850_v2 = vld [vmem:[#allocation10 + $0xb5c] sm:$0xf0]  ;;  %v392_v33 = vpack.c.bf16 %v391_v32, %v391_v32 }
  0xa6   :  { %v9400_v4 = vor.u32 %v11850_v2, %v9399_v1  ;;  %v8567_v20 = vld [vmem:[#allocation10 + $0x4c0] sm:$0xf]  ;;  %v222_v1 = vpack.c.bf16 %v221_v48, %v221_v48  ;;  %v324_v2 = vpack.c.bf16 %v323_v60, %v323_v60 }
  0xa7   :  { %4277 = vmatpush.bf16.msrb.mxu1 %v9432_v63  ;;  %4265 = vmatpush.bf16.msrb.mxu0 %v9144_v59  ;;  %v11642_v21 = vld [vmem:[#allocation10 + $0x4dc] sm:$0xf0]  ;;  %v314_v63 = vpack.c.bf16 %v313_v56, %v313_v56  ;;  %v239_v59 = vunpack.c.l.bf16 %v234_v62 }
  0xa8   :  { %v8791_v22 = vld [vmem:[#allocation10 + $0x680] sm:$0xf]  ;;  %v8568_v27 = vor.u32 %v11642_v21, %v8567_v20  ;;  %v244_v9 = vunpack.c.l.bf16 %v222_v1  ;;  %v326_v12 = vunpack.c.l.bf16 %v324_v2  ;;  %v311_v21 = vpack.c.bf16 %v310_v10, %v310_v10 }
  0xa9   :  { %v11698_v28 = vld [vmem:[#allocation10 + $0x69c] sm:$0xf0]  ;;  %v318_v3 = vunpack.c.l.bf16 %v314_v63  ;;  %v241_v6 = vadd.f32 %v240_v61, %v239_v59 }
  0xaa   :  { %v9111_v29 = vld [vmem:[#allocation10 + $0x900] sm:$0xf]  ;;  %v8792_v34 = vor.u32 %v11698_v28, %v8791_v22  ;;  %4241 = vmatpush.bf16.msra.mxu2 %v8568_v27  ;;  %v400_v27 = vmul.f32 %v399_v24, %v12822_v11  ;;  %v397_v28 = vmul.f32 %v396_v23, %v12817_v8  ;;  %v330_v31 = vunpack.c.l.bf16 %v311_v21 }
  0xab   :  { %4278 = vmatpush.bf16.msrb.mxu1 %v9400_v4  ;;  %v11778_v30 = vld [vmem:[#allocation10 + $0x91c] sm:$0xf0]  ;;  %v319_v4 = vunpack.c.l.bf16 %v317_v0  ;;  %v242_v13 = vpack.c.bf16 %v241_v6, %v241_v6  ;;  %v469_v6 = vstv %s12972_s7 }
  0xac   :  { %v9112_v35 = vor.u32 %v11778_v30, %v9111_v29  ;;  %v9367_v36 = vld [vmem:[#allocation10 + $0xb00] sm:$0xf]  ;;  %4255 = vmatpush.bf16.msra.mxu3 %v8792_v34  ;;  %v401_v34 = vpack.c.bf16 %v400_v27, %v400_v27 }
  0xad   :  { %v11842_v37 = vld [vmem:[#allocation10 + $0xb1c] sm:$0xf0]  ;;  %v320_v7 = vadd.f32 %v319_v4, %v318_v3  ;;  %v243_v20 = vunpack.c.l.bf16 %v242_v13 }
  0xae   :  { %v8535_v38 = vld [vmem:[#allocation10 + $0x480] sm:$0xf]  ;;  %v9368_v42 = vor.u32 %v11842_v37, %v9367_v36  ;;  %4266 = vmatpush.bf16.msrb.mxu0 %v9112_v35  ;;  %v398_v35 = vpack.c.bf16 %v397_v28, %v397_v28  ;;  %v403_v41 = vunpack.c.l.bf16 %v401_v34 }
  0xaf   :  { %v11634_v43 = vld [vmem:[#allocation10 + $0x49c] sm:$0xf0]  ;;  %v321_v15 = vpack.c.bf16 %v320_v7, %v320_v7  ;;  %v245_v25 = vadd.f32 %v244_v9, %v243_v20 }
  0xb0   :  { %v8759_v44 = vld [vmem:[#allocation10 + $0x640] sm:$0xf]  ;;  %v8536_v49 = vor.u32 %v11634_v43, %v8535_v38  ;;  %4279 = vmatpush.bf16.msrb.mxu1 %v9368_v42  ;;  %v406_v42 = vunpack.c.l.bf16 %v392_v33  ;;  %v402_v43 = vunpack.c.l.bf16 %v398_v35  ;;  %v472_v35 = vstv %s12980_s0 }
  0xb1   :  { %v11690_v45 = vld [vmem:[#allocation10 + $0x65c] sm:$0xf0]  ;;  %v325_v22 = vunpack.c.l.bf16 %v321_v15  ;;  %v246_v29 = vpack.c.bf16 %v245_v25, %v245_v25 }
  0xb2   :  { %v8760_v5 = vor.u32 %v11690_v45, %v8759_v44  ;;  %v9079_v50 = vld [vmem:[#allocation10 + $0x8c0] sm:$0xf]  ;;  %4242 = vmatpush.bf16.msra.mxu2 %v8536_v49  ;;  %v721_v49 = vstv %s12960_s30  ;;  %v407_v20 = vmul.f32 %v406_v42, %v12826_v14  ;;  %v404_v21 = vadd.f32 %v403_v41, %v402_v43 }
  0xb3   :  { %v11770_v40 = vld [vmem:[#allocation10 + $0x8dc] sm:$0xf0]  ;;  %v327_v26 = vadd.f32 %v326_v12, %v325_v22  ;;  %v247_v36 = vunpack.c.l.bf16 %v246_v29  ;;  %v722_v53 = vpack.c.bf16 %v721_v49, %v721_v49  ;;  %v12993_v43 = vpack.c.bf16 %v469_v6, %v469_v6 }
  0xb4   :  { %v9335_v51 = vld [vmem:[#allocation10 + $0xac0] sm:$0xf]  ;;  %v9080_v54 = vor.u32 %v11770_v40, %v9079_v50  ;;  %4256 = vmatpush.bf16.msra.mxu3 %v8760_v5  ;;  %v724_v5 = vstv %s12962_s14 }
  0xb5   :  { %v11834_v55 = vld [vmem:[#allocation10 + $0xadc] sm:$0xf0]  ;;  %v328_v30 = vpack.c.bf16 %v327_v26, %v327_v26  ;;  %v248_v38 = vmul.f32 0.010009766, %v247_v36  ;;  %v732_v4 = vunpack.c.l.bf16 %v722_v53  ;;  %v408_v53 = vpack.c.bf16 %v407_v20, %v407_v20 }
  0xb6   :  { %v9336_v58 = vor.u32 %v11834_v55, %v9335_v51  ;;  %4267 = vmatpush.bf16.msrb.mxu0 %v9080_v54  ;;  %v8503_v46 = vld [vmem:[#allocation10 + $0x440] sm:$0xf]  ;;  %v725_v54 = vpack.c.bf16 %v724_v5, %v724_v5  ;;  %v727_v55 = vstv %s12964_s15  ;;  %v394_v5 = vstv %s12970_s12 }
  0xb7   :  { %v329_v37 = vunpack.c.l.bf16 %v328_v30  ;;  %v251_v44 = vmax.f32 %v247_v36, %v248_v38  ;;  %v11626_v47 = vld [vmem:[#allocation10 + $0x45c] sm:$0xf0]  ;;  %v728_v3 = vpack.c.bf16 %v727_v55, %v727_v55  ;;  %v733_v19 = vmul.f32 %v732_v4, %v12817_v8 }
  0xb8   :  { %4280 = vmatpush.bf16.msrb.mxu1 %v9336_v58  ;;  %v8727_v48 = vld [vmem:[#allocation10 + $0x600] sm:$0xf]  ;;  %v8504_v50 = vor.u32 %v11626_v47, %v8503_v46  ;;  %v735_v13 = vunpack.c.l.bf16 %v725_v54  ;;  %v730_v55 = vstv %s12966_s10 }
  0xb9   :  { %v331_v39 = vadd.f32 %v330_v31, %v329_v37  ;;  %v11682_v40 = vld [vmem:[#allocation10 + $0x61c] sm:$0xf0]  ;;  %v252_v56 = vpack.c.bf16 %v251_v44, %v251_v44  ;;  %v742_v18 = vunpack.c.l.bf16 %v728_v3  ;;  %v734_v34 = vpack.c.bf16 %v733_v19, %v733_v19 }
  0xba   :  { %v9047_v51 = vld [vmem:[#allocation10 + $0x880] sm:$0xf]  ;;  %v8728_v58 = vor.u32 %v11682_v40, %v8727_v48  ;;  %4243 = vmatpush.bf16.msra.mxu2 %v8504_v50  ;;  %v736_v29 = vmul.f32 %v735_v13, %v12822_v11 }
  0xbb   :  { %v332_v45 = vpack.c.bf16 %v331_v39, %v331_v39  ;;  %v11762_v52 = vld [vmem:[#allocation10 + $0x89c] sm:$0xf0]  ;;  %254 = vst.msk [vmem:[#allocation2] sm:$0xf] %vm253_vm0, %v252_v56  ;;  %v743_v33 = vmul.f32 %v742_v18, %v12826_v14  ;;  %v738_v49 = vunpack.c.l.bf16 %v734_v34  ;;  %v405_v56 = vpack.c.bf16 %v404_v21, %v404_v21 }
  0xbc   :  { %v9048_v60 = vor.u32 %v11762_v52, %v9047_v51  ;;  %v9303_v61 = vld [vmem:[#allocation10 + $0xa80] sm:$0xf]  ;;  %4257 = vmatpush.bf16.msra.mxu3 %v8728_v58  ;;  %v737_v42 = vpack.c.bf16 %v736_v29, %v736_v29  ;;  %v731_v18 = vpack.c.bf16 %v730_v55, %v730_v55 }
  0xbd   :  { %v333_v57 = vunpack.c.l.bf16 %v332_v45  ;;  %v11826_v62 = vld [vmem:[#allocation10 + $0xa9c] sm:$0xf0]  ;;  %v744_v52 = vpack.c.bf16 %v743_v33, %v743_v33  ;;  %v480_v33 = vunpack.c.l.bf16 %v12993_v43 }
  0xbe   :  { %v9975_v63 = vld [vmem:[#allocation10 + $0xfc0] sm:$0xf]  ;;  %v9304_v0 = vor.u32 %v11826_v62, %v9303_v61  ;;  %4268 = vmatpush.bf16.msrb.mxu0 %v9048_v60  ;;  %v739_v51 = vunpack.c.l.bf16 %v737_v42  ;;  %v410_v60 = vunpack.c.l.bf16 %v408_v53  ;;  %v808_v62 = vstv %s12976_s18 }
  0xbf   :  { %v11994_v1 = vld [vmem:[#allocation10 + $0xfdc] sm:$0xf0]  ;;  %v334_v7 = vmul.f32 0.010009766, %v333_v57  ;;  %v746_v3 = vunpack.c.l.bf16 %v744_v52 }
  0xc0   :  { %v8471_v2 = vld [vmem:[#allocation10 + $0x400] sm:$0xf]  ;;  %v9976_v9 = vor.u32 %v11994_v1, %v9975_v63  ;;  %4281 = vmatpush.bf16.msrb.mxu1 %v9304_v0  ;;  %v740_v58 = vadd.f32 %v739_v51, %v738_v49  ;;  %v395_v63 = vpack.c.bf16 %v394_v5, %v394_v5  ;;  %v409_v0 = vunpack.c.l.bf16 %v405_v56 }
  0xc1   :  { %v11618_v59 = vld [vmem:[#allocation10 + $0x41c] sm:$0xf0]  ;;  %v337_v23 = vmax.f32 %v333_v57, %v334_v7  ;;  %v805_v57 = vstv %s12974_s17  ;;  %v481_v5 = vmul.f32 %v480_v33, %v12817_v8 }
  0xc2   :  { %v8472_v10 = vor.u32 %v11618_v59, %v8471_v2  ;;  %v9015_v12 = vld [vmem:[#allocation10 + $0x840] sm:$0xf]  ;;  %4302 = vmatpush.bf16.msrb.mxu3 %v9976_v9  ;;  %v806_v61 = vpack.c.bf16 %v805_v57, %v805_v57  ;;  %v809_v2 = vpack.c.bf16 %v808_v62, %v808_v62  ;;  %v811_v59 = vstv %s12978_s19 }
  0xc3   :  { %v11754_v15 = vld [vmem:[#allocation10 + $0x85c] sm:$0xf0]  ;;  %v338_v36 = vpack.c.bf16 %v337_v23, %v337_v23  ;;  %v741_v4 = vpack.c.bf16 %v740_v58, %v740_v58  ;;  %v411_v13 = vadd.f32 %v410_v60, %v409_v0  ;;  %v482_v55 = vpack.c.bf16 %v481_v5, %v481_v5 }
  0xc4   :  { %v9271_v16 = vld [vmem:[#allocation10 + $0xa40] sm:$0xf]  ;;  %v9016_v24 = vor.u32 %v11754_v15, %v9015_v12  ;;  %4244 = vmatpush.bf16.msra.mxu2 %v8472_v10  ;;  %v812_v10 = vpack.c.bf16 %v811_v59, %v811_v59  ;;  %v816_v12 = vunpack.c.l.bf16 %v806_v61  ;;  %v478_v0 = vstv %s13010_s20 }
  0xc5   :  { %v11818_v17 = vld [vmem:[#allocation10 + $0xa5c] sm:$0xf0]  ;;  %339 = vst.msk [vmem:[#allocation2 + $0x4] sm:$0xf] %vm253_vm0, %v338_v36  ;;  %v745_v19 = vunpack.c.l.bf16 %v741_v4  ;;  %v412_v23 = vpack.c.bf16 %v411_v13, %v411_v13 }
  0xc6   :  { %v9272_v25 = vor.u32 %v11818_v17, %v9271_v16  ;;  %v9719_v26 = vld [vmem:[#allocation10 + $0xdc0] sm:$0xf]  ;;  %4269 = vmatpush.bf16.msrb.mxu0 %v9016_v24  ;;  %v819_v17 = vunpack.c.l.bf16 %v809_v2  ;;  %v817_v20 = vmul.f32 %v816_v12, %v12817_v8  ;;  %v826_v21 = vunpack.c.l.bf16 %v812_v10 }
  0xc7   :  { %v296_v22 = vpop.permute.xlu2 %295  ;;  %v11930_v27 = vld [vmem:[#allocation10 + $0xddc] sm:$0xf0]  ;;  %v413_v34 = vunpack.c.l.bf16 %v412_v23 }
  0xc8   :  { %v9943_v28 = vld [vmem:[#allocation10 + $0xf80] sm:$0xf]  ;;  %299 = vst.msk [vmem:[#allocation2] sm:$0xf] %vm298_vm1, %v296_v22  ;;  %v9720_v30 = vor.u32 %v11930_v27, %v9719_v26  ;;  %4282 = vmatpush.bf16.msrb.mxu1 %v9272_v25  ;;  %v414_v22 = vunpack.c.l.bf16 %v395_v63  ;;  %v820_v25 = vmul.f32 %v819_v17, %v12822_v11  ;;  %v473_v26 = vpack.c.bf16 %v472_v35, %v472_v35 }
  0xc9   :  { %v11986_v31 = vld [vmem:[#allocation10 + $0xf9c] sm:$0xf0]  ;;  %v747_v27 = vadd.f32 %v746_v3, %v745_v19  ;;  %v827_v35 = vmul.f32 %v826_v21, %v12826_v14  ;;  %v13033_v19 = vpack.c.bf16 %v478_v0, %v478_v0  ;;  %v559_v0 = vstv %s13035_s24 }
  0xca   :  { %v8983_v32 = vld [vmem:[#allocation10 + $0x800] sm:$0xf]  ;;  %v9944_v37 = vor.u32 %v11986_v31, %v9943_v28  ;;  %4289 = vmatpush.bf16.msrb.mxu2 %v9720_v30  ;;  %v818_v31 = vpack.c.bf16 %v817_v20, %v817_v20 }
  0xcb   :  { %v11746_v38 = vld [vmem:[#allocation10 + $0x81c] sm:$0xf0]  ;;  %v828_v49 = vpack.c.bf16 %v827_v35, %v827_v35 }
  0xcc   :  { %v9239_v39 = vld [vmem:[#allocation10 + $0xa00] sm:$0xf]  ;;  %v8984_v44 = vor.u32 %v11746_v38, %v8983_v32  ;;  %4303 = vmatpush.bf16.msrb.mxu3 %v9944_v37  ;;  %v475_v32 = vstv %s12997_s9  ;;  %v821_v38 = vpack.c.bf16 %v820_v25, %v820_v25  ;;  %v822_v42 = vunpack.c.l.bf16 %v818_v31  ;;  %v13039_v31 = vld [vmem:[#allocation10 + $0x1e0] sm:$0xf0] }
  0xcd   :  { %v11810_v41 = vld [vmem:[#allocation10 + $0xa1c] sm:$0xf0] }
  0xce   :  { %v9240_v45 = vor.u32 %v11810_v41, %v9239_v39  ;;  %v9687_v46 = vld [vmem:[#allocation10 + $0xd80] sm:$0xf]  ;;  %4270 = vmatpush.bf16.msrb.mxu0 %v8984_v44  ;;  %v750_v39 = vunpack.c.l.bf16 %v731_v18  ;;  %v748_v41 = vpack.c.bf16 %v747_v27, %v747_v27  ;;  %v415_v44 = vadd.f32 %v414_v22, %v413_v34 }
  0xcf   :  { %v11922_v47 = vld [vmem:[#allocation10 + $0xd9c] sm:$0xf0]  ;;  %v637_v34 = vstv %s13017_s21 }
  0xd0   :  { %v9911_v48 = vld [vmem:[#allocation10 + $0xf40] sm:$0xf]  ;;  %v9688_v50 = vor.u32 %v11922_v47, %v9687_v46  ;;  %4283 = vmatpush.bf16.msrb.mxu1 %v9240_v45  ;;  %v814_v45 = vstv %s13003_s11  ;;  %v823_v46 = vunpack.c.l.bf16 %v821_v38  ;;  %v476_v47 = vpack.c.bf16 %v475_v32, %v475_v32 }
  0xd1   :  { %v11978_v40 = vld [vmem:[#allocation10 + $0xf5c] sm:$0xf0]  ;;  %v416_v43 = vpack.c.bf16 %v415_v44, %v415_v44  ;;  %v13021_v53 = vpack.c.bf16 %v814_v45, %v814_v45  ;;  %v640_v38 = vstv %s13019_s4 }
  0xd2   :  { %v9912_v54 = vor.u32 %v11978_v40, %v9911_v48  ;;  %4290 = vmatpush.bf16.msrb.mxu2 %v9688_v50  ;;  %v9655_v1 = vld [vmem:[#allocation10 + $0xd40] sm:$0xf]  ;;  %v749_v48 = vunpack.c.l.bf16 %v748_v41  ;;  %v824_v50 = vadd.f32 %v823_v46, %v822_v42  ;;  %v483_v40 = vunpack.c.l.bf16 %v473_v26  ;;  %v13046_v41 = vld [vmem:[#allocation10 + $0x7c4] sm:$0xf] }
  0xd3   :  { %v11914_v6 = vld [vmem:[#allocation10 + $0xd5c] sm:$0xf0]  ;;  %v490_v51 = vunpack.c.l.bf16 %v476_v47  ;;  %v417_v56 = vunpack.c.l.bf16 %v416_v43  ;;  %v834_v10 = vunpack.c.l.bf16 %v13021_v53  ;;  %v13048_v42 = vld [vmem:[#allocation10 + $0x7e0] sm:$0xf0]  ;;  %v641_v45 = vpack.c.bf16 %v640_v38, %v640_v38 }
  0xd4   :  { %4304 = vmatpush.bf16.msrb.mxu3 %v9912_v54  ;;  %v9879_v7 = vld [vmem:[#allocation10 + $0xf00] sm:$0xf]  ;;  %v9656_v15 = vor.u32 %v11914_v6, %v9655_v1  ;;  %v751_v52 = vadd.f32 %v750_v39, %v749_v48  ;;  %v830_v54 = vunpack.c.l.bf16 %v828_v49  ;;  %v825_v57 = vpack.c.bf16 %v824_v50, %v824_v50 }
  0xd5   :  { %v11970_v9 = vld [vmem:[#allocation10 + $0xf1c] sm:$0xf0]  ;;  %v484_v58 = vmul.f32 %v483_v40, %v12822_v11  ;;  %v491_v60 = vmul.f32 %v490_v51, %v12826_v14  ;;  %v486_v1 = vunpack.c.l.bf16 %v482_v55  ;;  %v418_v3 = vmul.f32 0.010009766, %v417_v56  ;;  %v801_v51 = vpop.permute.xlu1 %800 }
  0xd6   :  { %v9880_v16 = vor.u32 %v11970_v9, %v9879_v7  ;;  %4291 = vmatpush.bf16.msrb.mxu2 %v9656_v15  ;;  %v9623_v24 = vld [vmem:[#allocation10 + $0xd00] sm:$0xf]  ;;  %v752_v63 = vpack.c.bf16 %v751_v52, %v751_v52  ;;  %v829_v4 = vunpack.c.l.bf16 %v825_v57  ;;  %v643_v39 = vstv %s13023_s22 }
  0xd7   :  { %v11906_v28 = vld [vmem:[#allocation10 + $0xd1c] sm:$0xf0]  ;;  %v485_v6 = vpack.c.bf16 %v484_v58, %v484_v58  ;;  %v492_v7 = vpack.c.bf16 %v491_v60, %v491_v60  ;;  %v421_v17 = vmax.f32 %v417_v56, %v418_v3  ;;  %v644_v46 = vpack.c.bf16 %v643_v39, %v643_v39 }
  0xd8   :  { %4305 = vmatpush.bf16.msrb.mxu3 %v9880_v16  ;;  %v9847_v29 = vld [vmem:[#allocation10 + $0xec0] sm:$0xf]  ;;  %v9624_v36 = vor.u32 %v11906_v28, %v9623_v24  ;;  %v753_v9 = vunpack.c.l.bf16 %v752_v63  ;;  %v831_v18 = vadd.f32 %v830_v54, %v829_v4  ;;  %v465_v28 = vpop.permute.xlu0 %464  ;;  %v651_v50 = vunpack.c.l.bf16 %v641_v45  ;;  %v8889_v45 = vld [vmem:[#allocation10 + $0x760] sm:$0xf0] }
  0xd9   :  { %v11962_v30 = vld [vmem:[#allocation10 + $0xedc] sm:$0xf0]  ;;  %v487_v20 = vunpack.c.l.bf16 %v485_v6  ;;  %v494_v24 = vunpack.c.l.bf16 %v492_v7  ;;  %v553_v40 = vstv %s13028_s1  ;;  %v8956_v52 = vor.u32 %v13046_v41, %v13048_v42 }
  0xda   :  { %v9848_v37 = vor.u32 %v11962_v30, %v9847_v29  ;;  %4292 = vmatpush.bf16.msrb.mxu2 %v9624_v36  ;;  %v9591_v61 = vld [vmem:[#allocation10 + $0xcc0] sm:$0xf]  ;;  %v754_v23 = vmul.f32 0.010009766, %v753_v9  ;;  %v422_v29 = vpack.c.bf16 %v421_v17, %v421_v17  ;;  %v13037_v30 = vld [vmem:[#allocation10 + $0x1c4] sm:$0xf]  ;;  %v832_v32 = vpack.c.bf16 %v831_v18, %v831_v18 }
  0xdb   :  { %v11898_v62 = vld [vmem:[#allocation10 + $0xcdc] sm:$0xf0]  ;;  %v488_v33 = vadd.f32 %v487_v20, %v486_v1  ;;  %v8188_v48 = vor.u32 %v13037_v30, %v13039_v31  ;;  %v658_v53 = vunpack.c.l.bf16 %v644_v46  ;;  %v556_v55 = vstv %s13031_s23 }
  0xdc   :  { %4306 = vmatpush.bf16.msrb.mxu3 %v9848_v37  ;;  %v9815_v2 = vld [vmem:[#allocation10 + $0xe80] sm:$0xf]  ;;  %v9592_v12 = vor.u32 %v11898_v62, %v9591_v61  ;;  %v757_v36 = vmax.f32 %v753_v9, %v754_v23  ;;  %v638_v37 = vpack.c.bf16 %v637_v34, %v637_v34  ;;  %423 = vst.msk [vmem:[#allocation2 + $0x8] sm:$0xf] %vm253_vm0, %v422_v29  ;;  %v833_v35 = vunpack.c.l.bf16 %v832_v32  ;;  %v11534_v9 = vld [vmem:[#allocation10 + $0x184] sm:$0xf] }
  0xdd   :  { %v11954_v59 = vld [vmem:[#allocation10 + $0xe9c] sm:$0xf0]  ;;  %v489_v44 = vpack.c.bf16 %v488_v33, %v488_v33  ;;  %467 = vst.msk [vmem:[#allocation2 + $0x8] sm:$0xf] %vm298_vm1, %v465_v28  ;;  %v498_v58 = vunpack.c.l.bf16 %v13033_v19  ;;  %v652_v60 = vmul.f32 %v651_v50, %v12822_v11  ;;  %v659_v61 = vmul.f32 %v658_v53, %v12826_v14 }
  0xde   :  { %v9816_v13 = vor.u32 %v11954_v59, %v9815_v2  ;;  %v9559_v15 = vld [vmem:[#allocation10 + $0xc80] sm:$0xf]  ;;  %4293 = vmatpush.bf16.msrb.mxu2 %v9592_v12  ;;  %v758_v47 = vpack.c.bf16 %v757_v36, %v757_v36  ;;  %v648_v49 = vunpack.c.l.bf16 %v638_v37  ;;  %v835_v5 = vadd.f32 %v834_v10, %v833_v35  ;;  %v8153_v10 = vld [vmem:[#allocation10 + $0x1a0] sm:$0xf0] }
  0xdf   :  { %v11890_v16 = vld [vmem:[#allocation10 + $0xc9c] sm:$0xf0]  ;;  %v381_v27 = vpop.permute.xlu2 %380  ;;  %v493_v43 = vunpack.c.l.bf16 %v489_v44  ;;  %v554_v63 = vpack.c.bf16 %v553_v40, %v553_v40  ;;  %v653_v3 = vpack.c.bf16 %v652_v60, %v652_v60  ;;  %v557_v4 = vpack.c.bf16 %v556_v55, %v556_v55  ;;  %v11526_v37 = vld [vmem:[#allocation10 + $0x144] sm:$0xf] }
  0xe0   :  { %v9783_v21 = vld [vmem:[#allocation10 + $0xe40] sm:$0xf]  ;;  %4307 = vmatpush.bf16.msrb.mxu3 %v9816_v13  ;;  %v9560_v25 = vor.u32 %v11890_v16, %v9559_v15  ;;  %383 = vst.msk [vmem:[#allocation2 + $0x4] sm:$0xf] %vm298_vm1, %v381_v27  ;;  %v649_v54 = vmul.f32 %v648_v49, %v12817_v8  ;;  %v836_v56 = vpack.c.bf16 %v835_v5, %v835_v5  ;;  %v11726_v15 = vld [vmem:[#allocation10 + $0x784] sm:$0xf]  ;;  %v646_v23 = vstv %s13053_s25 }
  0xe1   :  { %v11946_v22 = vld [vmem:[#allocation10 + $0xe5c] sm:$0xf0]  ;;  %759 = vst.msk [vmem:[#allocation2 + $0x18] sm:$0xf] %vm253_vm0, %v758_v47  ;;  %v495_v57 = vadd.f32 %v494_v24, %v493_v43  ;;  %v560_v13 = vpack.c.bf16 %v559_v0, %v559_v0  ;;  %v8921_v16 = vld [vmem:[#allocation10 + $0x7a0] sm:$0xf0]  ;;  %v655_v19 = vunpack.c.l.bf16 %v653_v3  ;;  %v660_v20 = vpack.c.bf16 %v659_v61, %v659_v61 }
  0xe2   :  { %v9784_v26 = vor.u32 %v11946_v22, %v9783_v21  ;;  %4294 = vmatpush.bf16.msrb.mxu2 %v9560_v25  ;;  %803 = vst.msk [vmem:[#allocation2 + $0x18] sm:$0xf] %vm298_vm1, %v801_v51  ;;  %v650_v62 = vpack.c.bf16 %v649_v54, %v649_v54  ;;  %v837_v2 = vunpack.c.l.bf16 %v836_v56  ;;  %v564_v27 = vunpack.c.l.bf16 %v554_v63  ;;  %v9527_v32 = vld [vmem:[#allocation10 + $0xc40] sm:$0xf]  ;;  %v8121_v35 = vld [vmem:[#allocation10 + $0x160] sm:$0xf0] }
  0xe3   :  { %v496_v59 = vpack.c.bf16 %v495_v57, %v495_v57  ;;  %v8156_v28 = vor.u32 %v11534_v9, %v8153_v10  ;;  %v8924_v29 = vor.u32 %v11726_v15, %v8921_v16  ;;  %v567_v30 = vunpack.c.l.bf16 %v557_v4  ;;  %v11882_v33 = vld [vmem:[#allocation10 + $0xc5c] sm:$0xf0]  ;;  %v11718_v44 = vld [vmem:[#allocation10 + $0x744] sm:$0xf] }
  0xe4   :  { %4308 = vmatpush.bf16.msrb.mxu3 %v9784_v26  ;;  %v654_v12 = vunpack.c.l.bf16 %v650_v62  ;;  %v838_v17 = vmul.f32 0.010009766, %v837_v2  ;;  %v574_v31 = vunpack.c.l.bf16 %v560_v13  ;;  %v662_v38 = vunpack.c.l.bf16 %v660_v20  ;;  %v9751_v41 = vld [vmem:[#allocation10 + $0xe00] sm:$0xf]  ;;  %v11518_v57 = vld [vmem:[#allocation10 + $0x104] sm:$0xf] }
  0xe5   :  { %v497_v18 = vunpack.c.l.bf16 %v496_v59  ;;  %v11938_v42 = vld [vmem:[#allocation10 + $0xe1c] sm:$0xf0]  ;;  %v647_v46 = vpack.c.bf16 %v646_v23, %v646_v23  ;;  %v565_v47 = vmul.f32 %v564_v27, %v12817_v8  ;;  %v568_v49 = vmul.f32 %v567_v30, %v12822_v11  ;;  %v11710_v60 = vld [vmem:[#allocation10 + $0x704] sm:$0xf] }
  0xe6   :  { %v841_v24 = vmax.f32 %v837_v2, %v838_v17  ;;  %v656_v26 = vadd.f32 %v655_v19, %v654_v12  ;;  %v575_v5 = vmul.f32 %v574_v31, %v12826_v14  ;;  %v9528_v40 = vor.u32 %v11882_v33, %v9527_v32  ;;  %v9495_v54 = vld [vmem:[#allocation10 + $0xc00] sm:$0xf]  ;;  %v8089_v14 = vld [vmem:[#allocation10 + $0x120] sm:$0xf0] }
  0xe7   :  { %v889_v1 = vld [vmem:[#allocation2] sm:$0xff]  ;;  %v499_v25 = vadd.f32 %v498_v58, %v497_v18  ;;  %v9752_v51 = vor.u32 %v11938_v42, %v9751_v41  ;;  %v569_v53 = vpack.c.bf16 %v568_v49, %v568_v49  ;;  %v8124_v56 = vor.u32 %v11526_v37, %v8121_v35  ;;  %v8857_v61 = vld [vmem:[#allocation10 + $0x720] sm:$0xf0] }
  0xe8   :  { %v1461_v6 = vunpack.c.l.b16 %v889_v1  ;;  %v1462_v7 = vunpack.c.h.b16 %v889_v1  ;;  %v842_v34 = vpack.c.bf16 %v841_v24, %v841_v24  ;;  %v657_v39 = vpack.c.bf16 %v656_v26, %v656_v26  ;;  %v11874_v55 = vld [vmem:[#allocation10 + $0xc1c] sm:$0xf0]  ;;  %4295 = vmatpush.bf16.msrb.mxu2 %v9528_v40  ;;  %v11510_v15 = vld [vmem:[#allocation10 + $0xc4] sm:$0xf] }
  0xe9   :  { %v500_v36 = vpack.c.bf16 %v499_v25, %v499_v25  ;;  %v8892_v11 = vor.u32 %v11718_v44, %v8889_v45  ;;  %v571_v63 = vunpack.c.l.bf16 %v569_v53  ;;  %v576_v0 = vpack.c.bf16 %v575_v5, %v575_v5  ;;  %4309 = vmatpush.bf16.msrb.mxu3 %v9752_v51  ;;  %v8057_v18 = vld [vmem:[#allocation10 + $0xe0] sm:$0xf0]  ;;  %v10103_v44 = vld [vmem:[#allocation10 + $0x10c0] sm:$0xf] }
  0xea   :  { %v13066_v21 = vpack.c.b16 %v1461_v6, %v1461_v6  ;;  %v13068_v22 = vpack.c.b16 %v1462_v7, %v1462_v7  ;;  %843 = vst.msk [vmem:[#allocation2 + $0x1c] sm:$0xf] %vm253_vm0, %v842_v34  ;;  %v661_v50 = vunpack.c.l.bf16 %v657_v39  ;;  %v9496_v1 = vor.u32 %v11874_v55, %v9495_v54  ;;  %v11702_v19 = vld [vmem:[#allocation10 + $0x6c4] sm:$0xf] }
  0xeb   :  { %v501_v43 = vunpack.c.l.bf16 %v500_v36  ;;  %v666_v59 = vunpack.c.l.bf16 %v647_v46  ;;  %v8092_v4 = vor.u32 %v11518_v57, %v8089_v14  ;;  %v8860_v10 = vor.u32 %v11710_v60, %v8857_v61  ;;  %v8825_v20 = vld [vmem:[#allocation10 + $0x6e0] sm:$0xf0]  ;;  %v12026_v46 = vld [vmem:[#allocation10 + $0x10dc] sm:$0xf0] }
  0xec   :  { %4219 = vmatmul.bf16.vlgmr.msra.gmra.mxu0 %v13066_v21  ;;  %4232 = vmatmul.bf16.vlgmr.msra.gmra.mxu1 %v13068_v22  ;;  %v663_v58 = vadd.f32 %v662_v38, %v661_v50  ;;  %v562_v13 = vstv %s13073_s6  ;;  %v578_v17 = vunpack.c.l.bf16 %v576_v0  ;;  %v8060_v27 = vor.u32 %v11510_v15, %v8057_v18  ;;  %v8025_v31 = vld [vmem:[#allocation10 + $0xa0] sm:$0xf0]  ;;  %v10071_v14 = vld [vmem:[#allocation10 + $0x1080] sm:$0xf] }
  0xed   :  { %4328 = vmatpush.bf16.msra.mxu1 %v8188_v48  ;;  %4367 = vmatpush.bf16.msra.mxu0 %v8956_v52  ;;  %v885_v48 = vpop.permute.xlu1 %884  ;;  %v566_v52 = vpack.c.bf16 %v565_v47, %v565_v47  ;;  %v502_v8 = vmul.f32 0.010009766, %v501_v43  ;;  %v563_v24 = vpack.c.bf16 %v562_v13, %v562_v13  ;;  %v11694_v32 = vld [vmem:[#allocation10 + $0x684] sm:$0xf]  ;;  %v10039_v15 = vld [vmem:[#allocation10 + $0x1040] sm:$0xf] }
  0xee   :  { %887 = vst.msk [vmem:[#allocation2 + $0x1c] sm:$0xf] %vm298_vm1, %v885_v48  ;;  %v664_v3 = vpack.c.bf16 %v663_v58, %v663_v58  ;;  %v549_v9 = vpop.permute.xlu0 %548  ;;  %4296 = vmatpush.bf16.msrb.mxu2 %v9496_v1  ;;  %v8793_v33 = vld [vmem:[#allocation10 + $0x6a0] sm:$0xf0] }
  0xef   :  { %v570_v62 = vunpack.c.l.bf16 %v566_v52  ;;  %v505_v2 = vmax.f32 %v501_v43, %v502_v8  ;;  %v582_v37 = vunpack.c.l.bf16 %v563_v24  ;;  %v11670_v38 = vld [vmem:[#allocation10 + $0x5c4] sm:$0xf]  ;;  %v8796_v42 = vor.u32 %v11694_v32, %v8793_v33 }
  0xf0   :  { %v665_v12 = vunpack.c.l.bf16 %v664_v3  ;;  %v8697_v35 = vld [vmem:[#allocation10 + $0x5e0] sm:$0xf0]  ;;  %v10104_v8 = vor.u32 %v12026_v46, %v10103_v44 }
  0xf1   :  { %4329 = vmatpush.bf16.msra.mxu1 %v8156_v28  ;;  %4368 = vmatpush.bf16.msra.mxu0 %v8924_v29  ;;  %v572_v6 = vadd.f32 %v571_v63, %v570_v62  ;;  %v506_v7 = vpack.c.bf16 %v505_v2, %v505_v2  ;;  %v8828_v28 = vor.u32 %v11702_v19, %v8825_v20  ;;  %v11502_v29 = vld [vmem:[#allocation10 + $0x84] sm:$0xf]  ;;  %v12018_v63 = vld [vmem:[#allocation10 + $0x109c] sm:$0xf0] }
  0xf2   :  { %v667_v23 = vadd.f32 %v666_v59, %v665_v12  ;;  %v8028_v41 = vor.u32 %v11502_v29, %v8025_v31  ;;  %v11494_v47 = vld [vmem:[#allocation10 + $0x44] sm:$0xf]  ;;  %v8700_v53 = vor.u32 %v11670_v38, %v8697_v35 }
  0xf3   :  { %v573_v16 = vpack.c.bf16 %v572_v6, %v572_v6  ;;  %507 = vst.msk [vmem:[#allocation2 + $0xc] sm:$0xf] %vm253_vm0, %v506_v7  ;;  %v7993_v49 = vld [vmem:[#allocation10 + $0x60] sm:$0xf0]  ;;  %v10072_v6 = vor.u32 %v12018_v63, %v10071_v14 }
  0xf4   :  { %551 = vst.msk [vmem:[#allocation2 + $0xc] sm:$0xf] %vm298_vm1, %v549_v9  ;;  %v668_v26 = vpack.c.bf16 %v667_v23, %v667_v23  ;;  %v11686_v43 = vld [vmem:[#allocation10 + $0x644] sm:$0xf] }
  0xf5   :  { %4330 = vmatpush.bf16.msra.mxu1 %v8124_v56  ;;  %4369 = vmatpush.bf16.msra.mxu0 %v8892_v11  ;;  %v577_v25 = vunpack.c.l.bf16 %v573_v16  ;;  %v8761_v50 = vld [vmem:[#allocation10 + $0x660] sm:$0xf0]  ;;  %v7996_v56 = vor.u32 %v11494_v47, %v7993_v49  ;;  %v12010_v16 = vld [vmem:[#allocation10 + $0x105c] sm:$0xf0] }
  0xf6   :  { %v669_v34 = vunpack.c.l.bf16 %v668_v26  ;;  %v11662_v11 = vld [vmem:[#allocation10 + $0x584] sm:$0xf]  ;;  %v8764_v62 = vor.u32 %v11686_v43, %v8761_v50  ;;  %v10040_v19 = vor.u32 %v12010_v16, %v10039_v15  ;;  %v10007_v26 = vld [vmem:[#allocation10 + $0x1000] sm:$0xf] }
  0xf7   :  { %v579_v30 = vadd.f32 %v578_v17, %v577_v25  ;;  %v8665_v57 = vld [vmem:[#allocation10 + $0x5a0] sm:$0xf0] }
  0xf8   :  { %v670_v39 = vmul.f32 0.010009766, %v669_v34  ;;  %v11486_v0 = vld [vmem:[#allocation10 + $0x4] sm:$0xf] }
  0xf9   :  { %4331 = vmatpush.bf16.msra.mxu1 %v8092_v4  ;;  %4370 = vmatpush.bf16.msra.mxu0 %v8860_v10  ;;  %v580_v36 = vpack.c.bf16 %v579_v30, %v579_v30  ;;  %v7961_v1 = vld [vmem:[#allocation10 + $0x20] sm:$0xf0]  ;;  %v8668_v4 = vor.u32 %v11662_v11, %v8665_v57 }
  0xfa   :  { %v673_v5 = vmax.f32 %v669_v34, %v670_v39  ;;  %v11678_v2 = vld [vmem:[#allocation10 + $0x604] sm:$0xf]  ;;  %v7964_v12 = vor.u32 %v11486_v0, %v7961_v1  ;;  %v893_v1 = vld [vmem:[#allocation2 + $0x20] sm:$0xf] }
  0xfb   :  { %v581_v45 = vunpack.c.l.bf16 %v580_v36  ;;  %v890_v48 = vld [vmem:[#allocation2 + $0x8] sm:$0xff] }
  0xfc   :  { %v1463_v51 = vunpack.c.l.b16 %v890_v48  ;;  %v1464_v52 = vunpack.c.h.b16 %v890_v48  ;;  %v674_v55 = vpack.c.bf16 %v673_v5, %v673_v5  ;;  %v8729_v59 = vld [vmem:[#allocation10 + $0x620] sm:$0xf0] }
  0xfd   :  { %4332 = vmatpush.bf16.msra.mxu1 %v8060_v27  ;;  %4371 = vmatpush.bf16.msra.mxu0 %v8828_v28  ;;  %v583_v40 = vadd.f32 %v582_v37, %v581_v45  ;;  %v11654_v7 = vld [vmem:[#allocation10 + $0x544] sm:$0xf]  ;;  %v8732_v13 = vor.u32 %v11678_v2, %v8729_v59  ;;  %v12002_v27 = vld [vmem:[#allocation10 + $0x101c] sm:$0xf0]  ;;  %v892_v28 = vld [vmem:[#allocation2 + $0x18] sm:$0xff] }
  0xfe   :  { %v13083_v60 = vpack.c.b16 %v1463_v51, %v1463_v51  ;;  %v13085_v61 = vpack.c.b16 %v1464_v52, %v1464_v52  ;;  %675 = vst.msk [vmem:[#allocation2 + $0x14] sm:$0xf] %vm253_vm0, %v674_v55  ;;  %v8633_v9 = vld [vmem:[#allocation10 + $0x560] sm:$0xf0]  ;;  %v10008_v30 = vor.u32 %v12002_v27, %v10007_v26  ;;  %v1467_v32 = vunpack.c.l.b16 %v892_v28 }
  0xff   :  { %v584_v58 = vpack.c.bf16 %v583_v40, %v583_v40  ;;  %v8636_v18 = vor.u32 %v11654_v7, %v8633_v9  ;;  %v11646_v20 = vld [vmem:[#allocation10 + $0x504] sm:$0xf]  ;;  %v1468_v33 = vunpack.c.h.b16 %v892_v28 }
 0x100   :  { %v717_v54 = vpop.permute.xlu1 %716  ;;  %4245 = vmatmul.bf16.vlgmr.msra.gmra.mxu2 %v13083_v60  ;;  %4258 = vmatmul.bf16.vlgmr.msra.gmra.mxu3 %v13085_v61  ;;  %v8601_v25 = vld [vmem:[#allocation10 + $0x520] sm:$0xf0]  ;;  %v13093_v44 = vpack.c.b16 %v1467_v32, %v1467_v32 }
 0x101   :  { %4333 = vmatpush.bf16.msra.mxu1 %v8028_v41  ;;  %4372 = vmatpush.bf16.msra.mxu0 %v8796_v42  ;;  %719 = vst.msk [vmem:[#allocation2 + $0x14] sm:$0xf] %vm298_vm1, %v717_v54  ;;  %v585_v3 = vunpack.c.l.bf16 %v584_v58  ;;  %v8604_v29 = vor.u32 %v11646_v20, %v8601_v25  ;;  %v11606_v31 = vld [vmem:[#allocation10 + $0x3c4] sm:$0xf]  ;;  %v13095_v45 = vpack.c.b16 %v1468_v33, %v1468_v33 }
 0x102   :  { %4354 = vmatpush.bf16.msra.mxu3 %v8700_v53  ;;  %4319 = vmatpush.bf16.msra.mxu2 %v10104_v8  ;;  %v8441_v34 = vld [vmem:[#allocation10 + $0x3e0] sm:$0xf0] }
 0x103   :  { %v586_v10 = vmul.f32 0.010009766, %v585_v3  ;;  %v11638_v36 = vld [vmem:[#allocation10 + $0x4c4] sm:$0xf]  ;;  %v8444_v38 = vor.u32 %v11606_v31, %v8441_v34 }
 0x104   :  { %v8569_v37 = vld [vmem:[#allocation10 + $0x4e0] sm:$0xf0] }
 0x105   :  { %4334 = vmatpush.bf16.msra.mxu1 %v7996_v56  ;;  %4373 = vmatpush.bf16.msra.mxu0 %v8764_v62  ;;  %v589_v17 = vmax.f32 %v585_v3, %v586_v10  ;;  %v8572_v39 = vor.u32 %v11638_v36, %v8569_v37  ;;  %v11798_v41 = vld [vmem:[#allocation10 + $0x9c4] sm:$0xf] }
 0x106   :  { %4355 = vmatpush.bf16.msra.mxu3 %v8668_v4  ;;  %4320 = vmatpush.bf16.msra.mxu2 %v10072_v6  ;;  %v9209_v42 = vld [vmem:[#allocation10 + $0x9e0] sm:$0xf0] }
 0x107   :  { %v590_v23 = vpack.c.bf16 %v589_v17, %v589_v17  ;;  %v633_v24 = vpop.permute.xlu0 %632  ;;  %v11990_v35 = vld [vmem:[#allocation10 + $0xfc4] sm:$0xf]  ;;  %v9212_v51 = vor.u32 %v11798_v41, %v9209_v42  ;;  %v1469_v17 = vunpack.c.l.b16 %v893_v1 }
 0x108   :  { %v9977_v46 = vld [vmem:[#allocation10 + $0xfe0] sm:$0xf0] }
 0x109   :  { %4335 = vmatpush.bf16.msra.mxu1 %v7964_v12  ;;  %4374 = vmatpush.bf16.msra.mxu0 %v8732_v13  ;;  %591 = vst.msk [vmem:[#allocation2 + $0x10] sm:$0xf] %vm253_vm0, %v590_v23  ;;  %v11598_v47 = vld [vmem:[#allocation10 + $0x384] sm:$0xf]  ;;  %v9980_v52 = vor.u32 %v11990_v35, %v9977_v46  ;;  %v13105_v31 = vpack.c.b16 %v1469_v17, %v1469_v17 }
 0x10a   :  { %635 = vst.msk [vmem:[#allocation2 + $0x10] sm:$0xf] %vm298_vm1, %v633_v24  ;;  %4356 = vmatpush.bf16.msra.mxu3 %v8636_v18  ;;  %4321 = vmatpush.bf16.msra.mxu2 %v10040_v19  ;;  %v8409_v49 = vld [vmem:[#allocation10 + $0x3a0] sm:$0xf0] }
 0x10b   :  { %v11630_v48 = vld [vmem:[#allocation10 + $0x484] sm:$0xf]  ;;  %v8412_v57 = vor.u32 %v11598_v47, %v8409_v49 }
 0x10c   :  { %v8537_v43 = vld [vmem:[#allocation10 + $0x4a0] sm:$0xf0] }
 0x10d   :  { %v11790_v53 = vld [vmem:[#allocation10 + $0x984] sm:$0xf]  ;;  %v8540_v14 = vor.u32 %v11630_v48, %v8537_v43 }
 0x10e   :  { %4357 = vmatpush.bf16.msra.mxu3 %v8604_v29  ;;  %4322 = vmatpush.bf16.msra.mxu2 %v10008_v30  ;;  %v9177_v54 = vld [vmem:[#allocation10 + $0x9a0] sm:$0xf0] }
 0x10f   :  { %v11982_v56 = vld [vmem:[#allocation10 + $0xf84] sm:$0xf]  ;;  %v9180_v2 = vor.u32 %v11790_v53, %v9177_v54 }
 0x110   :  { %4297 = vmatmul.bf16.vlgmr.msrb.gmra.mxu2 %v13093_v44  ;;  %4310 = vmatmul.bf16.vlgmr.msrb.gmra.mxu3 %v13095_v45  ;;  %v9945_v11 = vld [vmem:[#allocation10 + $0xfa0] sm:$0xf0] }
 0x111   :  { %v891_v5 = vld [vmem:[#allocation2 + $0x10] sm:$0xff]  ;;  %v11590_v58 = vld [vmem:[#allocation10 + $0x344] sm:$0xf]  ;;  %v9948_v59 = vor.u32 %v11982_v56, %v9945_v11 }
 0x112   :  { %v1465_v50 = vunpack.c.l.b16 %v891_v5  ;;  %v1466_v40 = vunpack.c.h.b16 %v891_v5  ;;  %4341 = vmatpush.bf16.msrb.mxu2 %v8444_v38  ;;  %4358 = vmatpush.bf16.msra.mxu3 %v8572_v39  ;;  %v8377_v62 = vld [vmem:[#allocation10 + $0x360] sm:$0xf0] }
 0x113   :  { %v11622_v63 = vld [vmem:[#allocation10 + $0x444] sm:$0xf]  ;;  %v8380_v9 = vor.u32 %v11590_v58, %v8377_v62 }
 0x114   :  { %v13099_v55 = vpack.c.b16 %v1465_v50, %v1465_v50  ;;  %v13101_v8 = vpack.c.b16 %v1466_v40, %v1466_v40  ;;  %v8505_v0 = vld [vmem:[#allocation10 + $0x460] sm:$0xf0] }
 0x115   :  { %v11782_v3 = vld [vmem:[#allocation10 + $0x944] sm:$0xf]  ;;  %v8508_v10 = vor.u32 %v11622_v63, %v8505_v0 }
 0x116   :  { %4271 = vmatmul.bf16.vlgmr.msrb.gmra.mxu0 %v13099_v55  ;;  %4284 = vmatmul.bf16.vlgmr.msrb.gmra.mxu1 %v13101_v8  ;;  %v9145_v4 = vld [vmem:[#allocation10 + $0x960] sm:$0xf0] }
 0x117   :  { %4380 = vmatpush.bf16.msrb.mxu1 %v9212_v51  ;;  %4419 = vmatpush.bf16.msrb.mxu0 %v9980_v52  ;;  %v11974_v6 = vld [vmem:[#allocation10 + $0xf44] sm:$0xf]  ;;  %v9148_v20 = vor.u32 %v11782_v3, %v9145_v4 }
 0x118   :  { %v9913_v7 = vld [vmem:[#allocation10 + $0xf60] sm:$0xf0]  ;;  %4342 = vmatpush.bf16.msrb.mxu2 %v8412_v57  ;;  %4359 = vmatpush.bf16.msra.mxu3 %v8540_v14 }
 0x119   :  { %v11582_v12 = vld [vmem:[#allocation10 + $0x304] sm:$0xf]  ;;  %v9916_v23 = vor.u32 %v11974_v6, %v9913_v7 }
 0x11a   :  { %v8345_v13 = vld [vmem:[#allocation10 + $0x320] sm:$0xf0] }
 0x11b   :  { %v11614_v15 = vld [vmem:[#allocation10 + $0x404] sm:$0xf]  ;;  %4381 = vmatpush.bf16.msrb.mxu1 %v9180_v2  ;;  %4420 = vmatpush.bf16.msrb.mxu0 %v9948_v59  ;;  %v8348_v28 = vor.u32 %v11582_v12, %v8345_v13 }
 0x11c   :  { %v8473_v16 = vld [vmem:[#allocation10 + $0x420] sm:$0xf0]  ;;  %4343 = vmatpush.bf16.msrb.mxu2 %v8380_v9  ;;  %4360 = vmatpush.bf16.msra.mxu3 %v8508_v10 }
 0x11d   :  { %v11926_v18 = vld [vmem:[#allocation10 + $0xdc4] sm:$0xf]  ;;  %v8476_v29 = vor.u32 %v11614_v15, %v8473_v16 }
 0x11e   :  { %v9721_v19 = vld [vmem:[#allocation10 + $0xde0] sm:$0xf0] }
 0x11f   :  { %v11774_v24 = vld [vmem:[#allocation10 + $0x904] sm:$0xf]  ;;  %v9724_v30 = vor.u32 %v11926_v18, %v9721_v19  ;;  %4382 = vmatpush.bf16.msrb.mxu1 %v9148_v20  ;;  %4421 = vmatpush.bf16.msrb.mxu0 %v9916_v23 }
 0x120   :  { %v9113_v25 = vld [vmem:[#allocation10 + $0x920] sm:$0xf0]  ;;  %4344 = vmatpush.bf16.msrb.mxu2 %v8348_v28  ;;  %4361 = vmatpush.bf16.msra.mxu3 %v8476_v29  ;;  %v11739_v28 = vld [vmem:[#allocation10 + $0x7e4] sm:$0xf0] }
 0x121   :  { %v11966_v26 = vld [vmem:[#allocation10 + $0xf04] sm:$0xf]  ;;  %v9116_v37 = vor.u32 %v11774_v24, %v9113_v25  ;;  %10133 = vmatmul.msk.bf16.vlgmr.msra.gmra.mxu2 %vm4207_vm2, %v13105_v31  ;;  %v8703_v24 = vld [vmem:[#allocation10 + $0x5c8] sm:$0xf] }
 0x122   :  { %v9881_v27 = vld [vmem:[#allocation10 + $0xf20] sm:$0xf0] }
 0x123   :  { %v11574_v32 = vld [vmem:[#allocation10 + $0x2c4] sm:$0xf]  ;;  %v9884_v38 = vor.u32 %v11966_v26, %v9881_v27  ;;  %4383 = vmatpush.bf16.msrb.mxu1 %v9116_v37  ;;  %4362 = vmatmul.bf16.vlgmr.msra.gmra.mxu3 %v13083_v60  ;;  %v11675_v26 = vld [vmem:[#allocation10 + $0x5e4] sm:$0xf0] }
 0x124   :  { %v8313_v33 = vld [vmem:[#allocation10 + $0x2e0] sm:$0xf0]  ;;  %4406 = vmatpush.bf16.msrb.mxu3 %v9724_v30  ;;  %v8959_v27 = vld [vmem:[#allocation10 + $0x7c8] sm:$0xf] }
 0x125   :  { %v11918_v34 = vld [vmem:[#allocation10 + $0xd84] sm:$0xf]  ;;  %v8316_v46 = vor.u32 %v11574_v32, %v8313_v33  ;;  %4422 = vmatpush.bf16.msrb.mxu0 %v9884_v38 }
 0x126   :  { %v9689_v36 = vld [vmem:[#allocation10 + $0xda0] sm:$0xf0]  ;;  %4336 = vmatmul.bf16.vlgmr.msra.gmra.mxu1 %v13066_v21  ;;  %4375 = vmatmul.bf16.vlgmr.msra.gmra.mxu0 %v13085_v61 }
 0x127   :  { %v11766_v39 = vld [vmem:[#allocation10 + $0x8c4] sm:$0xf]  ;;  %v9692_v47 = vor.u32 %v11918_v34, %v9689_v36  ;;  %4345 = vmatpush.bf16.msrb.mxu2 %v8316_v46  ;;  %v8927_v46 = vld [vmem:[#allocation10 + $0x788] sm:$0xf] }
 0x128   :  { %v9081_v41 = vld [vmem:[#allocation10 + $0x8e0] sm:$0xf0] }
 0x129   :  { %v11958_v42 = vld [vmem:[#allocation10 + $0xec4] sm:$0xf]  ;;  %v9084_v50 = vor.u32 %v11766_v39, %v9081_v41  ;;  %4407 = vmatpush.bf16.msrb.mxu3 %v9692_v47  ;;  %v8704_v39 = vor.u32 %v11675_v26, %v8703_v24  ;;  %v8960_v41 = vor.u32 %v11739_v28, %v8959_v27  ;;  %v11731_v47 = vld [vmem:[#allocation10 + $0x7a4] sm:$0xf0] }
 0x12a   :  { %v9849_v35 = vld [vmem:[#allocation10 + $0xee0] sm:$0xf0]  ;;  %v11643_v24 = vld [vmem:[#allocation10 + $0x4e4] sm:$0xf0] }
 0x12b   :  { %v11566_v49 = vld [vmem:[#allocation10 + $0x284] sm:$0xf]  ;;  %v9852_v40 = vor.u32 %v11958_v42, %v9849_v35  ;;  %4384 = vmatpush.bf16.msrb.mxu1 %v9084_v50  ;;  %v8671_v42 = vld [vmem:[#allocation10 + $0x588] sm:$0xf] }
 0x12c   :  { %v8281_v5 = vld [vmem:[#allocation10 + $0x2a0] sm:$0xf0]  ;;  %v11667_v35 = vld [vmem:[#allocation10 + $0x5a4] sm:$0xf0] }
 0x12d   :  { %v11910_v48 = vld [vmem:[#allocation10 + $0xd44] sm:$0xf]  ;;  %v8284_v56 = vor.u32 %v11566_v49, %v8281_v5  ;;  %4423 = vmatpush.bf16.msrb.mxu0 %v9852_v40  ;;  %v11707_v26 = vld [vmem:[#allocation10 + $0x6e4] sm:$0xf0] }
 0x12e   :  { %v9657_v43 = vld [vmem:[#allocation10 + $0xd60] sm:$0xf0] }
 0x12f   :  { %v11758_v51 = vld [vmem:[#allocation10 + $0x884] sm:$0xf]  ;;  %v9660_v11 = vor.u32 %v11910_v48, %v9657_v43  ;;  %4346 = vmatpush.bf16.msrb.mxu2 %v8284_v56  ;;  %v8895_v56 = vld [vmem:[#allocation10 + $0x748] sm:$0xf] }
 0x130   :  { %v9049_v52 = vld [vmem:[#allocation10 + $0x8a0] sm:$0xf0] }
 0x131   :  { %v11950_v53 = vld [vmem:[#allocation10 + $0xe84] sm:$0xf]  ;;  %v9052_v63 = vor.u32 %v11758_v51, %v9049_v52  ;;  %4408 = vmatpush.bf16.msrb.mxu3 %v9660_v11  ;;  %v8672_v51 = vor.u32 %v11667_v35, %v8671_v42  ;;  %v8928_v52 = vor.u32 %v11731_v47, %v8927_v46  ;;  %v11723_v11 = vld [vmem:[#allocation10 + $0x764] sm:$0xf0] }
 0x132   :  { %v9817_v54 = vld [vmem:[#allocation10 + $0xea0] sm:$0xf0] }
 0x133   :  { %v11558_v57 = vld [vmem:[#allocation10 + $0x244] sm:$0xf]  ;;  %v9820_v0 = vor.u32 %v11950_v53, %v9817_v54  ;;  %4385 = vmatpush.bf16.msrb.mxu1 %v9052_v63  ;;  %v8639_v53 = vld [vmem:[#allocation10 + $0x548] sm:$0xf] }
 0x134   :  { %v8249_v14 = vld [vmem:[#allocation10 + $0x260] sm:$0xf0]  ;;  %v11659_v54 = vld [vmem:[#allocation10 + $0x564] sm:$0xf0] }
 0x135   :  { %v11902_v58 = vld [vmem:[#allocation10 + $0xd04] sm:$0xf]  ;;  %v8252_v4 = vor.u32 %v11558_v57, %v8249_v14  ;;  %4424 = vmatpush.bf16.msrb.mxu0 %v9820_v0 }
 0x136   :  { %v9625_v62 = vld [vmem:[#allocation10 + $0xd20] sm:$0xf0] }
 0x137   :  { %v11750_v1 = vld [vmem:[#allocation10 + $0x844] sm:$0xf]  ;;  %v9628_v6 = vor.u32 %v11902_v58, %v9625_v62  ;;  %4347 = vmatpush.bf16.msrb.mxu2 %v8252_v4  ;;  %v8607_v4 = vld [vmem:[#allocation10 + $0x508] sm:$0xf] }
 0x138   :  { %v9017_v2 = vld [vmem:[#allocation10 + $0x860] sm:$0xf0] }
 0x139   :  { %v11942_v59 = vld [vmem:[#allocation10 + $0xe44] sm:$0xf]  ;;  %v9020_v16 = vor.u32 %v11750_v1, %v9017_v2  ;;  %4409 = vmatpush.bf16.msrb.mxu3 %v9628_v6  ;;  %v11651_v6 = vld [vmem:[#allocation10 + $0x524] sm:$0xf0] }
 0x13a   :  { %v9785_v3 = vld [vmem:[#allocation10 + $0xe60] sm:$0xf0] }
 0x13b   :  { %v11550_v7 = vld [vmem:[#allocation10 + $0x204] sm:$0xf]  ;;  %v9788_v17 = vor.u32 %v11942_v59, %v9785_v3  ;;  %4386 = vmatpush.bf16.msrb.mxu1 %v9020_v16  ;;  %v8640_v59 = vor.u32 %v11659_v54, %v8639_v53  ;;  %v8896_v3 = vor.u32 %v11723_v11, %v8895_v56  ;;  %v8767_v53 = vld [vmem:[#allocation10 + $0x648] sm:$0xf] }
 0x13c   :  { %v8217_v9 = vld [vmem:[#allocation10 + $0x220] sm:$0xf0]  ;;  %v11691_v54 = vld [vmem:[#allocation10 + $0x664] sm:$0xf0] }
 0x13d   :  { %v11862_v10 = vld [vmem:[#allocation10 + $0xbc4] sm:$0xf]  ;;  %v8220_v25 = vor.u32 %v11550_v7, %v8217_v9  ;;  %4425 = vmatpush.bf16.msrb.mxu0 %v9788_v17  ;;  %v8863_v7 = vld [vmem:[#allocation10 + $0x708] sm:$0xf] }
 0x13e   :  { %v9465_v12 = vld [vmem:[#allocation10 + $0xbe0] sm:$0xf0]  ;;  %v11715_v9 = vld [vmem:[#allocation10 + $0x724] sm:$0xf0] }
 0x13f   :  { %v11894_v13 = vld [vmem:[#allocation10 + $0xcc4] sm:$0xf]  ;;  %v9468_v29 = vor.u32 %v11862_v10, %v9465_v12  ;;  %4348 = vmatpush.bf16.msrb.mxu2 %v8220_v25  ;;  %v8831_v25 = vld [vmem:[#allocation10 + $0x6c8] sm:$0xf] }
 0x140   :  { %v9593_v15 = vld [vmem:[#allocation10 + $0xce0] sm:$0xf0] }
 0x141   :  { %v11742_v18 = vld [vmem:[#allocation10 + $0x804] sm:$0xf]  ;;  %v9596_v30 = vor.u32 %v11894_v13, %v9593_v15 }
 0x142   :  { %v8985_v19 = vld [vmem:[#allocation10 + $0x820] sm:$0xf0]  ;;  %4349 = vmatmul.bf16.vlgmr.msrb.gmra.mxu2 %v13068_v22 }
 0x143   :  { %v11934_v20 = vld [vmem:[#allocation10 + $0xe04] sm:$0xf]  ;;  %v8988_v34 = vor.u32 %v11742_v18, %v8985_v19  ;;  %4393 = vmatpush.bf16.msra.mxu2 %v9468_v29  ;;  %4410 = vmatpush.bf16.msrb.mxu3 %v9596_v30  ;;  %v8608_v19 = vor.u32 %v11651_v6, %v8607_v4  ;;  %v11603_v4 = vld [vmem:[#allocation10 + $0x3a4] sm:$0xf0] }
 0x144   :  { %v9753_v23 = vld [vmem:[#allocation10 + $0xe20] sm:$0xf0]  ;;  %v8735_v6 = vld [vmem:[#allocation10 + $0x608] sm:$0xf] }
 0x145   :  { %v11886_v32 = vld [vmem:[#allocation10 + $0xc84] sm:$0xf]  ;;  %v9756_v36 = vor.u32 %v11934_v20, %v9753_v23  ;;  %4387 = vmatpush.bf16.msrb.mxu1 %v8988_v34  ;;  %v8864_v20 = vor.u32 %v11715_v9, %v8863_v7  ;;  %v8575_v23 = vld [vmem:[#allocation10 + $0x4c8] sm:$0xf] }
 0x146   :  { %v9561_v33 = vld [vmem:[#allocation10 + $0xca0] sm:$0xf0]  ;;  %v8576_v34 = vor.u32 %v11643_v24, %v8575_v23  ;;  %v11683_v7 = vld [vmem:[#allocation10 + $0x624] sm:$0xf0] }
 0x147   :  { %v11854_v37 = vld [vmem:[#allocation10 + $0xb84] sm:$0xf]  ;;  %v9564_v49 = vor.u32 %v11886_v32, %v9561_v33  ;;  %4426 = vmatpush.bf16.msrb.mxu0 %v9756_v36  ;;  %v8832_v36 = vor.u32 %v11707_v26, %v8831_v25  ;;  %v9727_v9 = vld [vmem:[#allocation10 + $0xdc8] sm:$0xf] }
 0x148   :  { %v9433_v38 = vld [vmem:[#allocation10 + $0xba0] sm:$0xf0]  ;;  %4388 = vmatmul.bf16.vlgmr.msrb.gmra.mxu1 %v13099_v55  ;;  %v8159_v23 = vld [vmem:[#allocation10 + $0x188] sm:$0xf] }
 0x149   :  { %v9436_v5 = vor.u32 %v11854_v37, %v9433_v38  ;;  %v11878_v48 = vld [vmem:[#allocation10 + $0xc44] sm:$0xf]  ;;  %4484 = vmatpush.bf16.msra.mxu1 %v8960_v41  ;;  %4411 = vmatpush.bf16.msrb.mxu3 %v9564_v49  ;;  %v8543_v37 = vld [vmem:[#allocation10 + $0x488] sm:$0xf] }
 0x14a   :  { %v9529_v43 = vld [vmem:[#allocation10 + $0xc60] sm:$0xf0]  ;;  %4427 = vmatmul.bf16.vlgmr.msrb.gmra.mxu0 %v13095_v45  ;;  %v11635_v38 = vld [vmem:[#allocation10 + $0x4a4] sm:$0xf0] }
 0x14b   :  { %v11846_v50 = vld [vmem:[#allocation10 + $0xb44] sm:$0xf]  ;;  %4471 = vmatpush.bf16.msra.mxu0 %v8704_v39  ;;  %v9532_v57 = vor.u32 %v11878_v48, %v9529_v43  ;;  %4394 = vmatpush.bf16.msra.mxu2 %v9436_v5  ;;  %v8799_v39 = vld [vmem:[#allocation10 + $0x688] sm:$0xf]  ;;  %v8544_v48 = vor.u32 %v11635_v38, %v8543_v37 }
 0x14c   :  { %v9401_v40 = vld [vmem:[#allocation10 + $0xb60] sm:$0xf0]  ;;  %v11699_v41 = vld [vmem:[#allocation10 + $0x6a4] sm:$0xf0] }
 0x14d   :  { %v9404_v14 = vor.u32 %v11846_v50, %v9401_v40  ;;  %v11838_v58 = vld [vmem:[#allocation10 + $0xb04] sm:$0xf]  ;;  %4485 = vmatpush.bf16.msra.mxu1 %v8928_v52  ;;  %4412 = vmatpush.bf16.msrb.mxu3 %v9532_v57  ;;  %v8800_v43 = vor.u32 %v11699_v41, %v8799_v39  ;;  %v8511_v50 = vld [vmem:[#allocation10 + $0x448] sm:$0xf] }
 0x14e   :  { %v11870_v62 = vld [vmem:[#allocation10 + $0xc04] sm:$0xf]  ;;  %v8447_v40 = vld [vmem:[#allocation10 + $0x3c8] sm:$0xf] }
 0x14f   :  { %v9497_v63 = vld [vmem:[#allocation10 + $0xc20] sm:$0xf0]  ;;  %4472 = vmatpush.bf16.msra.mxu0 %v8672_v51  ;;  %4395 = vmatpush.bf16.msra.mxu2 %v9404_v14  ;;  %v11611_v51 = vld [vmem:[#allocation10 + $0x3e4] sm:$0xf0] }
 0x150   :  { %v9369_v0 = vld [vmem:[#allocation10 + $0xb20] sm:$0xf0]  ;;  %v9500_v10 = vor.u32 %v11870_v62, %v9497_v63  ;;  %v11627_v52 = vld [vmem:[#allocation10 + $0x464] sm:$0xf0] }
 0x151   :  { %v12022_v1 = vld [vmem:[#allocation10 + $0x10c4] sm:$0xf]  ;;  %v9372_v12 = vor.u32 %v11838_v58, %v9369_v0  ;;  %4486 = vmatpush.bf16.msra.mxu1 %v8896_v3  ;;  %v8479_v57 = vld [vmem:[#allocation10 + $0x408] sm:$0xf]  ;;  %v8448_v58 = vor.u32 %v11611_v51, %v8447_v40 }
 0x152   :  { %v10105_v2 = vld [vmem:[#allocation10 + $0x10e0] sm:$0xf0]  ;;  %4413 = vmatpush.bf16.msrb.mxu3 %v9500_v10  ;;  %v11619_v14 = vld [vmem:[#allocation10 + $0x424] sm:$0xf0] }
 0x153   :  { %v10108_v13 = vor.u32 %v12022_v1, %v10105_v2  ;;  %v11830_v15 = vld [vmem:[#allocation10 + $0xac4] sm:$0xf]  ;;  %4473 = vmatpush.bf16.msra.mxu0 %v8640_v59  ;;  %4396 = vmatpush.bf16.msra.mxu2 %v9372_v12  ;;  %v8191_v0 = vld [vmem:[#allocation10 + $0x1c8] sm:$0xf]  ;;  %v8512_v1 = vor.u32 %v11627_v52, %v8511_v50  ;;  %v8768_v2 = vor.u32 %v11691_v54, %v8767_v53 }
 0x154   :  { %v9337_v16 = vld [vmem:[#allocation10 + $0xae0] sm:$0xf0]  ;;  %v11547_v59 = vld [vmem:[#allocation10 + $0x1e4] sm:$0xf0] }
 0x155   :  { %v12014_v17 = vld [vmem:[#allocation10 + $0x1084] sm:$0xf]  ;;  %v9340_v27 = vor.u32 %v11830_v15, %v9337_v16  ;;  %4487 = vmatpush.bf16.msra.mxu1 %v8864_v20  ;;  %4414 = vmatmul.bf16.vlgmr.msrb.gmra.mxu3 %v13093_v44  ;;  %v8415_v3 = vld [vmem:[#allocation10 + $0x388] sm:$0xf]  ;;  %v8192_v16 = vor.u32 %v11547_v59, %v8191_v0 }
 0x156   :  { %v10073_v18 = vld [vmem:[#allocation10 + $0x10a0] sm:$0xf0]  ;;  %4436 = vmatpush.bf16.msra.mxu3 %v10108_v13  ;;  %v11931_v10 = vld [vmem:[#allocation10 + $0xde4] sm:$0xf0] }
 0x157   :  { %v10076_v28 = vor.u32 %v12014_v17, %v10073_v18  ;;  %v11822_v29 = vld [vmem:[#allocation10 + $0xa84] sm:$0xf]  ;;  %4474 = vmatpush.bf16.msra.mxu0 %v8608_v19  ;;  %4397 = vmatpush.bf16.msra.mxu2 %v9340_v27  ;;  %v9983_v12 = vld [vmem:[#allocation10 + $0xfc8] sm:$0xf]  ;;  %v8416_v17 = vor.u32 %v11603_v4, %v8415_v3  ;;  %v8480_v18 = vor.u32 %v11619_v14, %v8479_v57 }
 0x158   :  { %v9305_v30 = vld [vmem:[#allocation10 + $0xaa0] sm:$0xf0]  ;;  %v11995_v13 = vld [vmem:[#allocation10 + $0xfe4] sm:$0xf0]  ;;  %v8736_v19 = vor.u32 %v11683_v7, %v8735_v6  ;;  %v9728_v24 = vor.u32 %v11931_v10, %v9727_v9 }
 0x159   :  { %v12006_v32 = vld [vmem:[#allocation10 + $0x1044] sm:$0xf]  ;;  %v9308_v42 = vor.u32 %v11822_v29, %v9305_v30  ;;  %4488 = vmatpush.bf16.msra.mxu1 %v8832_v36  ;;  %v9695_v20 = vld [vmem:[#allocation10 + $0xd88] sm:$0xf]  ;;  %v9984_v25 = vor.u32 %v11995_v13, %v9983_v12 }
 0x15a   :  { %v10041_v33 = vld [vmem:[#allocation10 + $0x1060] sm:$0xf0]  ;;  %4437 = vmatpush.bf16.msra.mxu3 %v10076_v28  ;;  %v11539_v26 = vld [vmem:[#allocation10 + $0x1a4] sm:$0xf0] }
 0x15b   :  { %v10044_v35 = vor.u32 %v12006_v32, %v10041_v33  ;;  %v11814_v46 = vld [vmem:[#allocation10 + $0xa44] sm:$0xf]  ;;  %4475 = vmatpush.bf16.msra.mxu0 %v8576_v34  ;;  %4398 = vmatpush.bf16.msra.mxu2 %v9308_v42  ;;  %v8383_v27 = vld [vmem:[#allocation10 + $0x348] sm:$0xf]  ;;  %v8160_v34 = vor.u32 %v11539_v26, %v8159_v23 }
 0x15c   :  { %v9273_v47 = vld [vmem:[#allocation10 + $0xa60] sm:$0xf0]  ;;  %v11595_v28 = vld [vmem:[#allocation10 + $0x364] sm:$0xf0] }
 0x15d   :  { %v11998_v49 = vld [vmem:[#allocation10 + $0x1004] sm:$0xf]  ;;  %v9276_v56 = vor.u32 %v11814_v46, %v9273_v47  ;;  %4489 = vmatpush.bf16.msra.mxu1 %v8800_v43  ;;  %v11923_v29 = vld [vmem:[#allocation10 + $0xda4] sm:$0xf0]  ;;  %v8384_v36 = vor.u32 %v11595_v28, %v8383_v27 }
 0x15e   :  { %v10009_v5 = vld [vmem:[#allocation10 + $0x1020] sm:$0xf0]  ;;  %4438 = vmatpush.bf16.msra.mxu3 %v10044_v35  ;;  %v9951_v30 = vld [vmem:[#allocation10 + $0xf88] sm:$0xf]  ;;  %v9696_v38 = vor.u32 %v11923_v29, %v9695_v20 }
 0x15f   :  { %v10012_v11 = vor.u32 %v11998_v49, %v10009_v5  ;;  %v11806_v62 = vld [vmem:[#allocation10 + $0xa04] sm:$0xf]  ;;  %4476 = vmatpush.bf16.msra.mxu0 %v8544_v48  ;;  %4399 = vmatpush.bf16.msra.mxu2 %v9276_v56  ;;  %v11987_v32 = vld [vmem:[#allocation10 + $0xfa4] sm:$0xf0] }
 0x160   :  { %v9241_v63 = vld [vmem:[#allocation10 + $0xa20] sm:$0xf0]  ;;  %v9663_v33 = vld [vmem:[#allocation10 + $0xd48] sm:$0xf]  ;;  %v9952_v39 = vor.u32 %v11987_v32, %v9951_v30 }
 0x161   :  { %v9244_v15 = vor.u32 %v11806_v62, %v9241_v63  ;;  %4490 = vmatpush.bf16.msra.mxu1 %v8768_v2  ;;  %v8127_v37 = vld [vmem:[#allocation10 + $0x148] sm:$0xf] }
 0x162   :  { %4439 = vmatpush.bf16.msra.mxu3 %v10012_v11  ;;  %v11531_v41 = vld [vmem:[#allocation10 + $0x164] sm:$0xf0] }
 0x163   :  { %4477 = vmatpush.bf16.msra.mxu0 %v8512_v1  ;;  %4400 = vmatpush.bf16.msra.mxu2 %v9244_v15  ;;  %v8351_v42 = vld [vmem:[#allocation10 + $0x308] sm:$0xf]  ;;  %v8128_v48 = vor.u32 %v11531_v41, %v8127_v37 }
 0x164   :  { %v11587_v35 = vld [vmem:[#allocation10 + $0x324] sm:$0xf0] }
 0x165   :  { %4491 = vmatpush.bf16.msra.mxu1 %v8736_v19  ;;  %v11915_v46 = vld [vmem:[#allocation10 + $0xd64] sm:$0xf0]  ;;  %10134 = vmatmul.msk.bf16.vlgmr.msra.gmra.mxu3 %vm4207_vm2, %v13105_v31  ;;  %v8352_v43 = vor.u32 %v11587_v35, %v8351_v42 }
 0x166   :  { %4458 = vmatpush.bf16.msrb.mxu3 %v8448_v58  ;;  %v9919_v47 = vld [vmem:[#allocation10 + $0xf48] sm:$0xf]  ;;  %4401 = vmatmul.bf16.vlgmr.msra.gmra.mxu2 %v13101_v8  ;;  %v9664_v40 = vor.u32 %v11915_v46, %v9663_v33 }
 0x167   :  { %4445 = vmatpush.bf16.msrb.mxu2 %v8192_v16  ;;  %4478 = vmatpush.bf16.msra.mxu0 %v8480_v18  ;;  %v11979_v49 = vld [vmem:[#allocation10 + $0xf64] sm:$0xf0] }
 0x168   :  { %4492 = vmatmul.bf16.vlgmr.msra.gmra.mxu1 %v13085_v61  ;;  %v9631_v5 = vld [vmem:[#allocation10 + $0xd08] sm:$0xf]  ;;  %v9920_v51 = vor.u32 %v11979_v49, %v9919_v47 }
 0x169   :  { %4536 = vmatpush.bf16.msrb.mxu1 %v9984_v25  ;;  %v8095_v50 = vld [vmem:[#allocation10 + $0x108] sm:$0xf] }
 0x16a   :  { %4459 = vmatpush.bf16.msrb.mxu3 %v8416_v17  ;;  %4479 = vmatmul.bf16.vlgmr.msra.gmra.mxu0 %v13083_v60  ;;  %v11523_v52 = vld [vmem:[#allocation10 + $0x124] sm:$0xf0] }
 0x16b   :  { %4523 = vmatpush.bf16.msrb.mxu0 %v9728_v24  ;;  %4446 = vmatpush.bf16.msrb.mxu2 %v8160_v34  ;;  %v8319_v53 = vld [vmem:[#allocation10 + $0x2c8] sm:$0xf]  ;;  %v8096_v58 = vor.u32 %v11523_v52, %v8095_v50 }
 0x16c   :  { %v11579_v54 = vld [vmem:[#allocation10 + $0x2e4] sm:$0xf0] }
 0x16d   :  { %4537 = vmatpush.bf16.msrb.mxu1 %v9952_v39  ;;  %v11907_v56 = vld [vmem:[#allocation10 + $0xd24] sm:$0xf0]  ;;  %v8320_v62 = vor.u32 %v11579_v54, %v8319_v53  ;;  %v13121_v39 = vld [vmem:[#allocation11] sm:$0xff]  ;;  %v11607_v53 = vld [vmem:[#allocation10 + $0x3cc] sm:$0xf] }
 0x16e   :  { %4460 = vmatpush.bf16.msrb.mxu3 %v8384_v36  ;;  %v9887_v11 = vld [vmem:[#allocation10 + $0xf08] sm:$0xf]  ;;  %v9632_v0 = vor.u32 %v11907_v56, %v9631_v5  ;;  %v1440_v35 = vperm.slane %v13121_v39, 0  ;;  %v8449_v54 = vld [vmem:[#allocation10 + $0x3e8] sm:$0xf0] }
 0x16f   :  { %4524 = vmatpush.bf16.msrb.mxu0 %v9696_v38  ;;  %v11971_v57 = vld [vmem:[#allocation10 + $0xf24] sm:$0xf0]  ;;  %4447 = vmatpush.bf16.msrb.mxu2 %v8128_v48 }
 0x170   :  { %v9599_v14 = vld [vmem:[#allocation10 + $0xcc8] sm:$0xf]  ;;  %v9888_v1 = vor.u32 %v11971_v57, %v9887_v11  ;;  %v4220_v11 = vpop.f32.mrf.mxu0  ;;  %v4233_v57 = vpop.f32.mrf.mxu1 }
 0x171   :  { %v8063_v63 = vld [vmem:[#allocation10 + $0xc8] sm:$0xf]  ;;  %4538 = vmatpush.bf16.msrb.mxu1 %v9920_v51 }
 0x172   :  { %4461 = vmatpush.bf16.msrb.mxu3 %v8352_v43  ;;  %v11515_v2 = vld [vmem:[#allocation10 + $0xe4] sm:$0xf0] }
 0x173   :  { %4525 = vmatpush.bf16.msrb.mxu0 %v9664_v40  ;;  %v8287_v59 = vld [vmem:[#allocation10 + $0x288] sm:$0xf]  ;;  %4448 = vmatpush.bf16.msrb.mxu2 %v8096_v58  ;;  %v8064_v10 = vor.u32 %v11515_v2, %v8063_v63  ;;  %v8705_v58 = vld [vmem:[#allocation10 + $0x5e8] sm:$0xf0]  ;;  %v4221_v63 = vadd.f32 %v4220_v11, %v1440_v35 }
 0x174   :  { %v11571_v3 = vld [vmem:[#allocation10 + $0x2a4] sm:$0xf0]  ;;  %v8321_v11 = vld [vmem:[#allocation10 + $0x2e8] sm:$0xf0] }
 0x175   :  { %v11899_v4 = vld [vmem:[#allocation10 + $0xce4] sm:$0xf0]  ;;  %v8288_v12 = vor.u32 %v11571_v3, %v8287_v59  ;;  %4539 = vmatpush.bf16.msrb.mxu1 %v9888_v1 }
 0x176   :  { %v9855_v6 = vld [vmem:[#allocation10 + $0xec8] sm:$0xf]  ;;  %4462 = vmatpush.bf16.msrb.mxu3 %v8320_v62  ;;  %v9600_v15 = vor.u32 %v11899_v4, %v9599_v14  ;;  %v11671_v14 = vld [vmem:[#allocation10 + $0x5cc] sm:$0xf] }
 0x177   :  { %v11963_v7 = vld [vmem:[#allocation10 + $0xee4] sm:$0xf0]  ;;  %4526 = vmatpush.bf16.msrb.mxu0 %v9632_v0  ;;  %4449 = vmatpush.bf16.msrb.mxu2 %v8064_v10  ;;  %v11599_v10 = vld [vmem:[#allocation10 + $0x38c] sm:$0xf] }
 0x178   :  { %v9567_v9 = vld [vmem:[#allocation10 + $0xc88] sm:$0xf]  ;;  %v9856_v16 = vor.u32 %v11963_v7, %v9855_v6  ;;  %v13124_v6 = vadd.f32 %v4233_v57, %v4221_v63  ;;  %v8452_v7 = vor.u32 %v11607_v53, %v8449_v54  ;;  %v11639_v57 = vld [vmem:[#allocation10 + $0x4cc] sm:$0xf] }
 0x179   :  { %v8031_v13 = vld [vmem:[#allocation10 + $0x88] sm:$0xf] }
 0x17a   :  { %v11507_v17 = vld [vmem:[#allocation10 + $0xa4] sm:$0xf0]  ;;  %4463 = vmatpush.bf16.msrb.mxu3 %v8288_v12  ;;  %4540 = vmatpush.bf16.msrb.mxu1 %v9856_v16  ;;  %v8417_v12 = vld [vmem:[#allocation10 + $0x3a8] sm:$0xf0] }
 0x17b   :  { %v8255_v18 = vld [vmem:[#allocation10 + $0x248] sm:$0xf]  ;;  %v8032_v27 = vor.u32 %v11507_v17, %v8031_v13  ;;  %4527 = vmatpush.bf16.msrb.mxu0 %v9600_v15  ;;  %v11663_v13 = vld [vmem:[#allocation10 + $0x58c] sm:$0xf] }
 0x17c   :  { %v11563_v19 = vld [vmem:[#allocation10 + $0x264] sm:$0xf0]  ;;  %v8673_v15 = vld [vmem:[#allocation10 + $0x5a8] sm:$0xf0] }
 0x17d   :  { %v11891_v20 = vld [vmem:[#allocation10 + $0xca4] sm:$0xf0]  ;;  %v8256_v28 = vor.u32 %v11563_v19, %v8255_v18  ;;  %4450 = vmatpush.bf16.msrb.mxu2 %v8032_v27  ;;  %v8385_v27 = vld [vmem:[#allocation10 + $0x368] sm:$0xf0] }
 0x17e   :  { %v9823_v23 = vld [vmem:[#allocation10 + $0xe88] sm:$0xf]  ;;  %v9568_v30 = vor.u32 %v11891_v20, %v9567_v9  ;;  %v8708_v9 = vor.u32 %v11671_v14, %v8705_v58  ;;  %v8577_v14 = vld [vmem:[#allocation10 + $0x4e8] sm:$0xf0] }
 0x17f   :  { %v11955_v24 = vld [vmem:[#allocation10 + $0xea4] sm:$0xf0]  ;;  %4464 = vmatpush.bf16.msrb.mxu3 %v8256_v28  ;;  %v4222_v28 = vpop.f32.mrf.mxu0 }
 0x180   :  { %v9535_v25 = vld [vmem:[#allocation10 + $0xc48] sm:$0xf]  ;;  %v9824_v32 = vor.u32 %v11955_v24, %v9823_v23  ;;  %4528 = vmatpush.bf16.msrb.mxu0 %v9568_v30  ;;  %v8420_v24 = vor.u32 %v11599_v10, %v8417_v12  ;;  %v11655_v30 = vld [vmem:[#allocation10 + $0x54c] sm:$0xf] }
 0x181   :  { %v11883_v26 = vld [vmem:[#allocation10 + $0xc64] sm:$0xf0]  ;;  %v8545_v10 = vld [vmem:[#allocation10 + $0x4a8] sm:$0xf0] }
 0x182   :  { %v7999_v29 = vld [vmem:[#allocation10 + $0x48] sm:$0xf]  ;;  %4541 = vmatpush.bf16.msrb.mxu1 %v9824_v32  ;;  %v9536_v48 = vor.u32 %v11883_v26, %v9535_v25  ;;  %v8676_v25 = vor.u32 %v11663_v13, %v8673_v15  ;;  %v11591_v26 = vld [vmem:[#allocation10 + $0x34c] sm:$0xf] }
 0x183   :  { %v11499_v33 = vld [vmem:[#allocation10 + $0x64] sm:$0xf0]  ;;  %v8641_v32 = vld [vmem:[#allocation10 + $0x568] sm:$0xf0] }
 0x184   :  { %v8223_v34 = vld [vmem:[#allocation10 + $0x208] sm:$0xf]  ;;  %v8000_v49 = vor.u32 %v11499_v33, %v7999_v29  ;;  %4529 = vmatpush.bf16.msrb.mxu0 %v9536_v48  ;;  %v4235_v29 = vpop.f32.mrf.mxu1  ;;  %v8644_v35 = vor.u32 %v11655_v30, %v8641_v32 }
 0x185   :  { %v11555_v36 = vld [vmem:[#allocation10 + $0x224] sm:$0xf0] }
 0x186   :  { %v9791_v37 = vld [vmem:[#allocation10 + $0xe48] sm:$0xf]  ;;  %v8224_v5 = vor.u32 %v11555_v36, %v8223_v34  ;;  %4451 = vmatpush.bf16.msrb.mxu2 %v8000_v49  ;;  %v11647_v49 = vld [vmem:[#allocation10 + $0x50c] sm:$0xf] }
 0x187   :  { %v11947_v38 = vld [vmem:[#allocation10 + $0xe64] sm:$0xf0] }
 0x188   :  { %v9471_v41 = vld [vmem:[#allocation10 + $0xbc8] sm:$0xf]  ;;  %v9792_v43 = vor.u32 %v11947_v38, %v9791_v37  ;;  %4465 = vmatpush.bf16.msrb.mxu3 %v8224_v5  ;;  %v8609_v5 = vld [vmem:[#allocation10 + $0x528] sm:$0xf0] }
 0x189   :  { %v11867_v42 = vld [vmem:[#allocation10 + $0xbe4] sm:$0xf0]  ;;  %v8612_v54 = vor.u32 %v11647_v49, %v8609_v5 }
 0x18a   :  { %v9503_v46 = vld [vmem:[#allocation10 + $0xc08] sm:$0xf]  ;;  %v9472_v56 = vor.u32 %v11867_v42, %v9471_v41  ;;  %4542 = vmatpush.bf16.msrb.mxu1 %v9792_v43  ;;  %v8388_v42 = vor.u32 %v11591_v26, %v8385_v27  ;;  %v8513_v26 = vld [vmem:[#allocation10 + $0x468] sm:$0xf0] }
 0x18b   :  { %v11875_v47 = vld [vmem:[#allocation10 + $0xc24] sm:$0xf0]  ;;  %4466 = vmatmul.bf16.vlgmr.msrb.gmra.mxu3 %v13068_v22 }
 0x18c   :  { %v9759_v50 = vld [vmem:[#allocation10 + $0xe08] sm:$0xf]  ;;  %v9504_v3 = vor.u32 %v11875_v47, %v9503_v46  ;;  %4510 = vmatpush.bf16.msra.mxu3 %v9472_v56  ;;  %v11583_v46 = vld [vmem:[#allocation10 + $0x30c] sm:$0xf] }
 0x18d   :  { %v7967_v40 = vld [vmem:[#allocation10 + $0x8] sm:$0xf]  ;;  %v8353_v47 = vld [vmem:[#allocation10 + $0x328] sm:$0xf0] }
 0x18e   :  { %v11491_v51 = vld [vmem:[#allocation10 + $0x24] sm:$0xf0]  ;;  %4530 = vmatpush.bf16.msrb.mxu0 %v9504_v3  ;;  %v8356_v53 = vor.u32 %v11583_v46, %v8353_v47  ;;  %v11575_v56 = vld [vmem:[#allocation10 + $0x2cc] sm:$0xf]  ;;  %v8580_v3 = vor.u32 %v11639_v57, %v8577_v14 }
 0x18f   :  { %v11939_v52 = vld [vmem:[#allocation10 + $0xe24] sm:$0xf0]  ;;  %v7968_v0 = vor.u32 %v11491_v51, %v7967_v40  ;;  %v8481_v46 = vld [vmem:[#allocation10 + $0x428] sm:$0xf0] }
 0x190   :  { %v9215_v62 = vld [vmem:[#allocation10 + $0x9c8] sm:$0xf]  ;;  %v9760_v4 = vor.u32 %v11939_v52, %v9759_v50  ;;  %v11863_v47 = vld [vmem:[#allocation10 + $0xbcc] sm:$0xf] }
 0x191   :  { %v11803_v1 = vld [vmem:[#allocation10 + $0x9e4] sm:$0xf0]  ;;  %4452 = vmatpush.bf16.msrb.mxu2 %v7968_v0  ;;  %4531 = vmatmul.bf16.vlgmr.msrb.gmra.mxu0 %v13093_v44  ;;  %v11855_v14 = vld [vmem:[#allocation10 + $0xb8c] sm:$0xf] }
 0x192   :  { %v9439_v2 = vld [vmem:[#allocation10 + $0xb88] sm:$0xf]  ;;  %v9216_v16 = vor.u32 %v11803_v1, %v9215_v62  ;;  %4543 = vmatpush.bf16.msrb.mxu1 %v9760_v4  ;;  %4575 = vmatpush.bf16.msra.mxu0 %v8452_v7  ;;  %v11567_v4 = vld [vmem:[#allocation10 + $0x28c] sm:$0xf] }
 0x193   :  { %v11859_v59 = vld [vmem:[#allocation10 + $0xba4] sm:$0xf0]  ;;  %v8289_v7 = vld [vmem:[#allocation10 + $0x2a8] sm:$0xf0] }
 0x194   :  { %v9440_v17 = vor.u32 %v11859_v59, %v9439_v2  ;;  %v9183_v18 = vld [vmem:[#allocation10 + $0x988] sm:$0xf]  ;;  %4453 = vmatmul.bf16.vlgmr.msrb.gmra.mxu2 %v13066_v21  ;;  %v8324_v59 = vor.u32 %v11575_v56, %v8321_v11 }
 0x195   :  { %v11795_v19 = vld [vmem:[#allocation10 + $0x9a4] sm:$0xf0]  ;;  %4497 = vmatpush.bf16.msra.mxu2 %v9216_v16  ;;  %4544 = vmatmul.bf16.vlgmr.msrb.gmra.mxu1 %v13095_v45 }
 0x196   :  { %v9407_v20 = vld [vmem:[#allocation10 + $0xb48] sm:$0xf]  ;;  %4588 = vmatpush.bf16.msra.mxu1 %v8708_v9  ;;  %4511 = vmatpush.bf16.msra.mxu3 %v9440_v17  ;;  %v9184_v33 = vor.u32 %v11795_v19, %v9183_v18  ;;  %v11631_v9 = vld [vmem:[#allocation10 + $0x48c] sm:$0xf]  ;;  %v8292_v19 = vor.u32 %v11567_v4, %v8289_v7 }
 0x197   :  { %v11851_v23 = vld [vmem:[#allocation10 + $0xb64] sm:$0xf0]  ;;  %4576 = vmatpush.bf16.msra.mxu0 %v8420_v24  ;;  %v8257_v24 = vld [vmem:[#allocation10 + $0x268] sm:$0xf0] }
 0x198   :  { %v9408_v34 = vor.u32 %v11851_v23, %v9407_v20  ;;  %v9151_v36 = vld [vmem:[#allocation10 + $0x948] sm:$0xf]  ;;  %v8548_v20 = vor.u32 %v11631_v9, %v8545_v10  ;;  %v11559_v23 = vld [vmem:[#allocation10 + $0x24c] sm:$0xf] }
 0x199   :  { %v11787_v37 = vld [vmem:[#allocation10 + $0x964] sm:$0xf0]  ;;  %4498 = vmatpush.bf16.msra.mxu2 %v9184_v33  ;;  %v11919_v4 = vld [vmem:[#allocation10 + $0xd8c] sm:$0xf] }
 0x19a   :  { %v9375_v38 = vld [vmem:[#allocation10 + $0xb08] sm:$0xf]  ;;  %4589 = vmatpush.bf16.msra.mxu1 %v8676_v25  ;;  %4512 = vmatpush.bf16.msra.mxu3 %v9408_v34  ;;  %v9152_v48 = vor.u32 %v11787_v37, %v9151_v36  ;;  %v11623_v25 = vld [vmem:[#allocation10 + $0x44c] sm:$0xf]  ;;  %v8260_v37 = vor.u32 %v11559_v23, %v8257_v24 }
 0x19b   :  { %v11843_v41 = vld [vmem:[#allocation10 + $0xb24] sm:$0xf0]  ;;  %4577 = vmatpush.bf16.msra.mxu0 %v8388_v42  ;;  %v11543_v34 = vld [vmem:[#allocation10 + $0x1cc] sm:$0xf] }
 0x19c   :  { %v9376_v43 = vor.u32 %v11843_v41, %v9375_v38  ;;  %v9119_v50 = vld [vmem:[#allocation10 + $0x908] sm:$0xf]  ;;  %v8193_v36 = vld [vmem:[#allocation10 + $0x1e8] sm:$0xf0]  ;;  %v8516_v38 = vor.u32 %v11623_v25, %v8513_v26 }
 0x19d   :  { %v11779_v40 = vld [vmem:[#allocation10 + $0x924] sm:$0xf0]  ;;  %4499 = vmatpush.bf16.msra.mxu2 %v9152_v48  ;;  %v11551_v41 = vld [vmem:[#allocation10 + $0x20c] sm:$0xf] }
 0x19e   :  { %v9343_v51 = vld [vmem:[#allocation10 + $0xac8] sm:$0xf]  ;;  %4590 = vmatpush.bf16.msra.mxu1 %v8644_v35  ;;  %4513 = vmatpush.bf16.msra.mxu3 %v9376_v43  ;;  %v9120_v58 = vor.u32 %v11779_v40, %v9119_v50  ;;  %v8225_v42 = vld [vmem:[#allocation10 + $0x228] sm:$0xf0]  ;;  %v8196_v40 = vor.u32 %v11543_v34, %v8193_v36 }
 0x19f   :  { %v11835_v52 = vld [vmem:[#allocation10 + $0xae4] sm:$0xf0]  ;;  %4578 = vmatpush.bf16.msra.mxu0 %v8356_v53  ;;  %v11615_v35 = vld [vmem:[#allocation10 + $0x40c] sm:$0xf]  ;;  %v8228_v11 = vor.u32 %v11551_v41, %v8225_v42 }
 0x1a0   :  { %v9344_v62 = vor.u32 %v11835_v52, %v9343_v51  ;;  %v9087_v63 = vld [vmem:[#allocation10 + $0x8c8] sm:$0xf]  ;;  %v9473_v48 = vld [vmem:[#allocation10 + $0xbe8] sm:$0xf0]  ;;  %v4246_v51 = vpop.f32.mrf.mxu2  ;;  %v4259_v52 = vpop.f32.mrf.mxu3  ;;  %v8484_v57 = vor.u32 %v11615_v35, %v8481_v46 }
 0x1a1   :  { %v11771_v0 = vld [vmem:[#allocation10 + $0x8e4] sm:$0xf0]  ;;  %4500 = vmatpush.bf16.msra.mxu2 %v9120_v58  ;;  %v11927_v43 = vld [vmem:[#allocation10 + $0xdcc] sm:$0xf]  ;;  %v4247_v53 = vadd.f32 %v4246_v51, %v13124_v6 }
 0x1a2   :  { %v9311_v1 = vld [vmem:[#allocation10 + $0xa88] sm:$0xf]  ;;  %4591 = vmatpush.bf16.msra.mxu1 %v8612_v54  ;;  %4514 = vmatpush.bf16.msra.mxu3 %v9344_v62  ;;  %v9088_v12 = vor.u32 %v11771_v0, %v9087_v63  ;;  %v9729_v50 = vld [vmem:[#allocation10 + $0xde8] sm:$0xf0]  ;;  %v9476_v62 = vor.u32 %v11863_v47, %v9473_v48  ;;  %v4285_v48 = vpop.f32.mrf.mxu1 }
 0x1a3   :  { %v11827_v2 = vld [vmem:[#allocation10 + $0xaa4] sm:$0xf0]  ;;  %4579 = vmatpush.bf16.msra.mxu0 %v8324_v59  ;;  %v9732_v63 = vor.u32 %v11927_v43, %v9729_v50  ;;  %v13131_v0 = vadd.f32 %v4259_v52, %v4247_v53  ;;  %v8161_v59 = vld [vmem:[#allocation10 + $0x1a8] sm:$0xf0] }
 0x1a4   :  { %v9312_v13 = vor.u32 %v11827_v2, %v9311_v1  ;;  %v9055_v15 = vld [vmem:[#allocation10 + $0x888] sm:$0xf]  ;;  %v11535_v2 = vld [vmem:[#allocation10 + $0x18c] sm:$0xf] }
 0x1a5   :  { %v11763_v16 = vld [vmem:[#allocation10 + $0x8a4] sm:$0xf0]  ;;  %4501 = vmatpush.bf16.msra.mxu2 %v9088_v12  ;;  %v9697_v6 = vld [vmem:[#allocation10 + $0xda8] sm:$0xf0]  ;;  %v8164_v12 = vor.u32 %v11535_v2, %v8161_v59 }
 0x1a6   :  { %v9279_v17 = vld [vmem:[#allocation10 + $0xa48] sm:$0xf]  ;;  %4592 = vmatpush.bf16.msra.mxu1 %v8580_v3  ;;  %4515 = vmatpush.bf16.msra.mxu3 %v9312_v13  ;;  %v9056_v27 = vor.u32 %v11763_v16, %v9055_v15  ;;  %v9441_v3 = vld [vmem:[#allocation10 + $0xba8] sm:$0xf0]  ;;  %v9700_v16 = vor.u32 %v11919_v4, %v9697_v6 }
 0x1a7   :  { %v11819_v18 = vld [vmem:[#allocation10 + $0xa64] sm:$0xf0]  ;;  %4580 = vmatpush.bf16.msra.mxu0 %v8292_v19  ;;  %v11847_v10 = vld [vmem:[#allocation10 + $0xb4c] sm:$0xf]  ;;  %v9444_v15 = vor.u32 %v11855_v14, %v9441_v3 }
 0x1a8   :  { %v9280_v28 = vor.u32 %v11819_v18, %v9279_v17  ;;  %v9023_v29 = vld [vmem:[#allocation10 + $0x848] sm:$0xf]  ;;  %v11527_v18 = vld [vmem:[#allocation10 + $0x14c] sm:$0xf]  ;;  %v4248_v25 = vpop.f32.mrf.mxu2  ;;  %v4261_v26 = vpop.f32.mrf.mxu3 }
 0x1a9   :  { %v11755_v30 = vld [vmem:[#allocation10 + $0x864] sm:$0xf0]  ;;  %4502 = vmatpush.bf16.msra.mxu2 %v9056_v27  ;;  %v8129_v19 = vld [vmem:[#allocation10 + $0x168] sm:$0xf0] }
 0x1aa   :  { %v9247_v32 = vld [vmem:[#allocation10 + $0xa08] sm:$0xf]  ;;  %4593 = vmatpush.bf16.msra.mxu1 %v8548_v20  ;;  %4516 = vmatpush.bf16.msra.mxu3 %v9280_v28  ;;  %v9024_v49 = vor.u32 %v11755_v30, %v9023_v29  ;;  %v9409_v20 = vld [vmem:[#allocation10 + $0xb68] sm:$0xf0]  ;;  %v8132_v29 = vor.u32 %v11527_v18, %v8129_v19 }
 0x1ab   :  { %v11811_v33 = vld [vmem:[#allocation10 + $0xa24] sm:$0xf0]  ;;  %4581 = vmatpush.bf16.msra.mxu0 %v8260_v37  ;;  %v11911_v23 = vld [vmem:[#allocation10 + $0xd4c] sm:$0xf] }
 0x1ac   :  { %v9248_v5 = vor.u32 %v11811_v33, %v9247_v32  ;;  %v8991_v54 = vld [vmem:[#allocation10 + $0x808] sm:$0xf]  ;;  %v9665_v24 = vld [vmem:[#allocation10 + $0xd68] sm:$0xf0]  ;;  %v9412_v32 = vor.u32 %v11847_v10, %v9409_v20  ;;  %v4287_v20 = vpop.f32.mrf.mxu1 }
 0x1ad   :  { %v11747_v56 = vld [vmem:[#allocation10 + $0x824] sm:$0xf0]  ;;  %4503 = vmatpush.bf16.msra.mxu2 %v9024_v49  ;;  %v11839_v28 = vld [vmem:[#allocation10 + $0xb0c] sm:$0xf]  ;;  %v9668_v33 = vor.u32 %v11911_v23, %v9665_v24 }
 0x1ae   :  { %4594 = vmatpush.bf16.msra.mxu1 %v8516_v38  ;;  %v10111_v58 = vld [vmem:[#allocation10 + $0x10c8] sm:$0xf]  ;;  %4517 = vmatpush.bf16.msra.mxu3 %v9248_v5  ;;  %v8992_v7 = vor.u32 %v11747_v56, %v8991_v54  ;;  %v11519_v36 = vld [vmem:[#allocation10 + $0x10c] sm:$0xf]  ;;  %v4272_v5 = vpop.f32.mrf.mxu0 }
 0x1af   :  { %v12027_v1 = vld [vmem:[#allocation10 + $0x10e4] sm:$0xf0]  ;;  %4582 = vmatpush.bf16.msra.mxu0 %v8228_v11  ;;  %v8097_v37 = vld [vmem:[#allocation10 + $0x128] sm:$0xf0]  ;;  %v4273_v53 = vadd.f32 %v4272_v5, %v13131_v0 }
 0x1b0   :  { %v10112_v9 = vor.u32 %v12027_v1, %v10111_v58  ;;  %v10079_v13 = vld [vmem:[#allocation10 + $0x1088] sm:$0xf]  ;;  %v9377_v38 = vld [vmem:[#allocation10 + $0xb28] sm:$0xf0]  ;;  %v8100_v47 = vor.u32 %v11519_v36, %v8097_v37  ;;  %v4311_v14 = vpop.f32.mrf.mxu3 }
 0x1b1   :  { %v12019_v17 = vld [vmem:[#allocation10 + $0x10a4] sm:$0xf0]  ;;  %4504 = vmatpush.bf16.msra.mxu2 %v8992_v7  ;;  %4518 = vmatmul.bf16.vlgmr.msra.gmra.mxu3 %v13101_v8  ;;  %v11903_v41 = vld [vmem:[#allocation10 + $0xd0c] sm:$0xf]  ;;  %v9380_v43 = vor.u32 %v11839_v28, %v9377_v38 }
 0x1b2   :  { %4562 = vmatpush.bf16.msrb.mxu3 %v8196_v40  ;;  %4595 = vmatpush.bf16.msra.mxu1 %v8484_v57  ;;  %v10080_v27 = vor.u32 %v12019_v17, %v10079_v13  ;;  %v10047_v30 = vld [vmem:[#allocation10 + $0x1048] sm:$0xf]  ;;  %v9633_v42 = vld [vmem:[#allocation10 + $0xd28] sm:$0xf0]  ;;  %v4298_v57 = vpop.f32.mrf.mxu2 }
 0x1b3   :  { %4627 = vmatpush.bf16.msrb.mxu0 %v9476_v62  ;;  %v12011_v34 = vld [vmem:[#allocation10 + $0x1064] sm:$0xf0]  ;;  %v11831_v46 = vld [vmem:[#allocation10 + $0xacc] sm:$0xf]  ;;  %v9636_v50 = vor.u32 %v11903_v41, %v9633_v42 }
 0x1b4   :  { %4583 = vmatmul.bf16.vlgmr.msra.gmra.mxu0 %v13068_v22  ;;  %4505 = vmatmul.bf16.vlgmr.msra.gmra.mxu2 %v13099_v55  ;;  %v10048_v35 = vor.u32 %v12011_v34, %v10047_v30  ;;  %v10015_v49 = vld [vmem:[#allocation10 + $0x1008] sm:$0xf]  ;;  %v11511_v51 = vld [vmem:[#allocation10 + $0xcc] sm:$0xf] }
 0x1b5   :  { %4596 = vmatmul.bf16.vlgmr.msra.gmra.mxu1 %v13083_v60  ;;  %4553 = vmatpush.bf16.msrb.mxu2 %v10112_v9  ;;  %v12003_v40 = vld [vmem:[#allocation10 + $0x1024] sm:$0xf0]  ;;  %v8065_v52 = vld [vmem:[#allocation10 + $0xe8] sm:$0xf0] }
 0x1b6   :  { %4640 = vmatpush.bf16.msrb.mxu1 %v9732_v63  ;;  %4563 = vmatpush.bf16.msrb.mxu3 %v8164_v12  ;;  %v9345_v54 = vld [vmem:[#allocation10 + $0xae8] sm:$0xf0]  ;;  %v4286_v63 = vadd.f32 %v4285_v48, %v4273_v53  ;;  %v10016_v1 = vor.u32 %v12003_v40, %v10015_v49  ;;  %v8068_v2 = vor.u32 %v11511_v51, %v8065_v52  ;;  %v4274_v19 = vpop.f32.mrf.mxu0  ;;  %v11548_v40 = vld [vmem:[#allocation10 + $0x1ec] sm:$0xf0] }
 0x1b7   :  { %4628 = vmatpush.bf16.msrb.mxu0 %v9444_v15  ;;  %v11895_v56 = vld [vmem:[#allocation10 + $0xccc] sm:$0xf]  ;;  %v9348_v59 = vor.u32 %v11831_v46, %v9345_v54  ;;  %v8455_v51 = vld [vmem:[#allocation10 + $0x3d0] sm:$0xf] }
 0x1b8   :  { %v9601_v11 = vld [vmem:[#allocation10 + $0xce8] sm:$0xf0]  ;;  %v4299_v13 = vadd.f32 %v4298_v57, %v4286_v63  ;;  %v4313_v34 = vpop.f32.mrf.mxu3  ;;  %v11612_v52 = vld [vmem:[#allocation10 + $0x3ec] sm:$0xf0] }
 0x1b9   :  { %4554 = vmatpush.bf16.msrb.mxu2 %v10080_v27  ;;  %v11735_v58 = vld [vmem:[#allocation10 + $0x7cc] sm:$0xf]  ;;  %v9604_v3 = vor.u32 %v11895_v56, %v9601_v11 }
 0x1ba   :  { %4641 = vmatpush.bf16.msrb.mxu1 %v9700_v16  ;;  %4564 = vmatpush.bf16.msrb.mxu3 %v8132_v29  ;;  %v8961_v62 = vld [vmem:[#allocation10 + $0x7e8] sm:$0xf0]  ;;  %v4312_v17 = vadd.f32 %v4311_v14, %v4299_v13  ;;  %v13140_v14 = vpop.f32.mrf.mxu1 }
 0x1bb   :  { %4629 = vmatpush.bf16.msrb.mxu0 %v9412_v32  ;;  %v11823_v4 = vld [vmem:[#allocation10 + $0xa8c] sm:$0xf]  ;;  %v8964_v12 = vor.u32 %v11735_v58, %v8961_v62 }
 0x1bc   :  { %v11503_v6 = vld [vmem:[#allocation10 + $0x8c] sm:$0xf] }
 0x1bd   :  { %4555 = vmatpush.bf16.msrb.mxu2 %v10048_v35  ;;  %v8033_v7 = vld [vmem:[#allocation10 + $0xa8] sm:$0xf0] }
 0x1be   :  { %4642 = vmatpush.bf16.msrb.mxu1 %v9668_v33  ;;  %4565 = vmatpush.bf16.msrb.mxu3 %v8100_v47  ;;  %v9313_v0 = vld [vmem:[#allocation10 + $0xaa8] sm:$0xf0]  ;;  %v8036_v18 = vor.u32 %v11503_v6, %v8033_v7  ;;  %v4300_v33 = vpop.f32.mrf.mxu2  ;;  %v13142_v58 = vpop.f32.mrf.mxu0  ;;  %v8423_v7 = vld [vmem:[#allocation10 + $0x390] sm:$0xf] }
 0x1bf   :  { %4630 = vmatpush.bf16.msrb.mxu0 %v9380_v43  ;;  %v11887_v9 = vld [vmem:[#allocation10 + $0xc8c] sm:$0xf]  ;;  %v9316_v23 = vor.u32 %v11823_v4, %v9313_v0  ;;  %v11604_v0 = vld [vmem:[#allocation10 + $0x3ac] sm:$0xf0] }
 0x1c0   :  { %v9569_v10 = vld [vmem:[#allocation10 + $0xca8] sm:$0xf0]  ;;  %v8424_v20 = vor.u32 %v11604_v0, %v8423_v7 }
 0x1c1   :  { %v11727_v15 = vld [vmem:[#allocation10 + $0x78c] sm:$0xf]  ;;  %4556 = vmatpush.bf16.msrb.mxu2 %v10016_v1  ;;  %v9572_v24 = vor.u32 %v11887_v9, %v9569_v10 }
 0x1c2   :  { %4643 = vmatpush.bf16.msrb.mxu1 %v9636_v50  ;;  %v8929_v16 = vld [vmem:[#allocation10 + $0x7a8] sm:$0xf0]  ;;  %4566 = vmatpush.bf16.msrb.mxu3 %v8068_v2  ;;  %v8199_v50 = vld [vmem:[#allocation10 + $0x1d0] sm:$0xf]  ;;  %v8456_v2 = vor.u32 %v11612_v52, %v8455_v51  ;;  %v4339_v33 = vpop.f32.mrf.mxu1 }
 0x1c3   :  { %4631 = vmatpush.bf16.msrb.mxu0 %v9348_v59  ;;  %v11815_v25 = vld [vmem:[#allocation10 + $0xa4c] sm:$0xf]  ;;  %v8932_v32 = vor.u32 %v11727_v15, %v8929_v16  ;;  %v8200_v1 = vor.u32 %v11548_v40, %v8199_v50  ;;  %v8167_v59 = vld [vmem:[#allocation10 + $0x190] sm:$0xf] }
 0x1c4   :  { %v11495_v26 = vld [vmem:[#allocation10 + $0x4c] sm:$0xf]  ;;  %10135 = vmatmul.msk.bf16.vlgmr.msrb.gmra.mxu2 %vm4207_vm2, %v13105_v31  ;;  %v11500_v33 = vld [vmem:[#allocation10 + $0x6c] sm:$0xf0] }
 0x1c5   :  { %v8001_v27 = vld [vmem:[#allocation10 + $0x68] sm:$0xf0]  ;;  %4601 = vmatpush.bf16.msra.mxu2 %v8964_v12 }
 0x1c6   :  { %4644 = vmatpush.bf16.msrb.mxu1 %v9604_v3  ;;  %v9281_v28 = vld [vmem:[#allocation10 + $0xa68] sm:$0xf0]  ;;  %4567 = vmatpush.bf16.msrb.mxu3 %v8036_v18  ;;  %v8004_v42 = vor.u32 %v11495_v26, %v8001_v27  ;;  %v11540_v3 = vld [vmem:[#allocation10 + $0x1ac] sm:$0xf0]  ;;  %v4324_v4 = vpop.f32.mrf.mxu2  ;;  %v13146_v18 = vpop.f32.mrf.mxu3 }
 0x1c7   :  { %v11879_v29 = vld [vmem:[#allocation10 + $0xc4c] sm:$0xf]  ;;  %4632 = vmatpush.bf16.msrb.mxu0 %v9316_v23  ;;  %v9284_v35 = vor.u32 %v11815_v25, %v9281_v28  ;;  %v13144_v12 = vadd.f32 %v4324_v4, %v4312_v17  ;;  %v8168_v19 = vor.u32 %v11540_v3, %v8167_v59  ;;  %v8135_v23 = vld [vmem:[#allocation10 + $0x150] sm:$0xf]  ;;  %v4378_v34 = vpop.f32.mrf.mxu0  ;;  %v1441_v3 = vperm.slane %v13121_v39, 1 }
 0x1c8   :  { %v9537_v30 = vld [vmem:[#allocation10 + $0xc68] sm:$0xf0]  ;;  %v8391_v26 = vld [vmem:[#allocation10 + $0x350] sm:$0xf] }
 0x1c9   :  { %v11719_v36 = vld [vmem:[#allocation10 + $0x74c] sm:$0xf]  ;;  %v9540_v46 = vor.u32 %v11879_v29, %v9537_v30  ;;  %4602 = vmatpush.bf16.msra.mxu2 %v8932_v32  ;;  %v11596_v17 = vld [vmem:[#allocation10 + $0x36c] sm:$0xf0] }
 0x1ca   :  { %v8897_v37 = vld [vmem:[#allocation10 + $0x768] sm:$0xf0]  ;;  %4645 = vmatpush.bf16.msrb.mxu1 %v9572_v24  ;;  %4568 = vmatpush.bf16.msrb.mxu3 %v8004_v42  ;;  %v11532_v24 = vld [vmem:[#allocation10 + $0x16c] sm:$0xf0] }
 0x1cb   :  { %v11807_v38 = vld [vmem:[#allocation10 + $0xa0c] sm:$0xf]  ;;  %v8900_v43 = vor.u32 %v11719_v36, %v8897_v37  ;;  %4633 = vmatpush.bf16.msrb.mxu0 %v9284_v35  ;;  %v8136_v36 = vor.u32 %v11532_v24, %v8135_v23  ;;  %v8392_v37 = vor.u32 %v11596_v17, %v8391_v26  ;;  %v4338_v26 = vadd.f32 %v13140_v14, %v1441_v3  ;;  %v8263_v34 = vld [vmem:[#allocation10 + $0x250] sm:$0xf] }
 0x1cc   :  { %v9249_v41 = vld [vmem:[#allocation10 + $0xa28] sm:$0xf0] }
 0x1cd   :  { %v11871_v47 = vld [vmem:[#allocation10 + $0xc0c] sm:$0xf]  ;;  %v9252_v62 = vor.u32 %v11807_v38, %v9249_v41  ;;  %4603 = vmatpush.bf16.msra.mxu2 %v8900_v43  ;;  %v8103_v38 = vld [vmem:[#allocation10 + $0x110] sm:$0xf] }
 0x1ce   :  { %v11487_v49 = vld [vmem:[#allocation10 + $0xc] sm:$0xf]  ;;  %4646 = vmatpush.bf16.msrb.mxu1 %v9540_v46  ;;  %v11524_v41 = vld [vmem:[#allocation10 + $0x12c] sm:$0xf0]  ;;  %v4326_v42 = vpop.f32.mrf.mxu2  ;;  %v4365_v40 = vpop.f32.mrf.mxu3 }
 0x1cf   :  { %v7969_v5 = vld [vmem:[#allocation10 + $0x28] sm:$0xf0]  ;;  %4634 = vmatpush.bf16.msrb.mxu0 %v9252_v62  ;;  %v8359_v46 = vld [vmem:[#allocation10 + $0x310] sm:$0xf]  ;;  %v8104_v51 = vor.u32 %v11524_v41, %v8103_v38  ;;  %v13152_v4 = vpop.f32.mrf.mxu0 }
 0x1d0   :  { %v9505_v48 = vld [vmem:[#allocation10 + $0xc28] sm:$0xf0]  ;;  %v7972_v54 = vor.u32 %v11487_v49, %v7969_v5  ;;  %v8231_v40 = vld [vmem:[#allocation10 + $0x210] sm:$0xf] }
 0x1d1   :  { %v11711_v53 = vld [vmem:[#allocation10 + $0x70c] sm:$0xf]  ;;  %v9508_v63 = vor.u32 %v11871_v47, %v9505_v48  ;;  %v11588_v47 = vld [vmem:[#allocation10 + $0x32c] sm:$0xf0] }
 0x1d2   :  { %v8865_v56 = vld [vmem:[#allocation10 + $0x728] sm:$0xf0]  ;;  %4569 = vmatpush.bf16.msrb.mxu3 %v7972_v54  ;;  %4635 = vmatmul.bf16.vlgmr.msrb.gmra.mxu0 %v13101_v8  ;;  %v8360_v52 = vor.u32 %v11588_v47, %v8359_v46  ;;  %v11516_v54 = vld [vmem:[#allocation10 + $0xec] sm:$0xf0] }
 0x1d3   :  { %v11799_v11 = vld [vmem:[#allocation10 + $0x9cc] sm:$0xf]  ;;  %v8868_v6 = vor.u32 %v11711_v53, %v8865_v56  ;;  %4647 = vmatpush.bf16.msrb.mxu1 %v9508_v63  ;;  %4679 = vmatpush.bf16.msra.mxu0 %v8200_v1  ;;  %v8071_v53 = vld [vmem:[#allocation10 + $0xd0] sm:$0xf] }
 0x1d4   :  { %v9217_v57 = vld [vmem:[#allocation10 + $0x9e8] sm:$0xf0]  ;;  %v8072_v0 = vor.u32 %v11516_v54, %v8071_v53  ;;  %v9223_v54 = vld [vmem:[#allocation10 + $0x9d0] sm:$0xf] }
 0x1d5   :  { %v9220_v9 = vor.u32 %v11799_v11, %v9217_v57  ;;  %v11703_v10 = vld [vmem:[#allocation10 + $0x6cc] sm:$0xf]  ;;  %4604 = vmatpush.bf16.msra.mxu2 %v8868_v6  ;;  %4570 = vmatmul.bf16.vlgmr.msrb.gmra.mxu3 %v13066_v21  ;;  %v8327_v11 = vld [vmem:[#allocation10 + $0x2d0] sm:$0xf] }
 0x1d6   :  { %v8833_v13 = vld [vmem:[#allocation10 + $0x6e8] sm:$0xf0]  ;;  %4648 = vmatmul.bf16.vlgmr.msrb.gmra.mxu1 %v13093_v44  ;;  %v11580_v57 = vld [vmem:[#allocation10 + $0x2ec] sm:$0xf0] }
 0x1d7   :  { %v11791_v15 = vld [vmem:[#allocation10 + $0x98c] sm:$0xf]  ;;  %4692 = vmatpush.bf16.msra.mxu1 %v8456_v2  ;;  %4614 = vmatpush.bf16.msra.mxu3 %v9220_v9  ;;  %v8836_v25 = vor.u32 %v11703_v10, %v8833_v13  ;;  %v8328_v9 = vor.u32 %v11580_v57, %v8327_v11  ;;  %v8039_v10 = vld [vmem:[#allocation10 + $0x90] sm:$0xf]  ;;  %v4389_v13 = vpop.f32.mrf.mxu1  ;;  %v4430_v14 = vpop.f32.mrf.mxu0 }
 0x1d8   :  { %v9185_v16 = vld [vmem:[#allocation10 + $0x9a8] sm:$0xf0]  ;;  %4680 = vmatpush.bf16.msra.mxu0 %v8168_v19  ;;  %v8295_v19 = vld [vmem:[#allocation10 + $0x290] sm:$0xf] }
 0x1d9   :  { %v9188_v27 = vor.u32 %v11791_v15, %v9185_v16  ;;  %v11695_v28 = vld [vmem:[#allocation10 + $0x68c] sm:$0xf]  ;;  %4605 = vmatpush.bf16.msra.mxu2 %v8836_v25  ;;  %v11508_v16 = vld [vmem:[#allocation10 + $0xac] sm:$0xf0] }
 0x1da   :  { %v8801_v29 = vld [vmem:[#allocation10 + $0x6a8] sm:$0xf0]  ;;  %v9479_v57 = vld [vmem:[#allocation10 + $0xbd0] sm:$0xf] }
 0x1db   :  { %v11783_v30 = vld [vmem:[#allocation10 + $0x94c] sm:$0xf]  ;;  %4693 = vmatpush.bf16.msra.mxu1 %v8424_v20  ;;  %4615 = vmatpush.bf16.msra.mxu3 %v9188_v27  ;;  %v8804_v35 = vor.u32 %v11695_v28, %v8801_v29  ;;  %v11572_v20 = vld [vmem:[#allocation10 + $0x2ac] sm:$0xf0]  ;;  %v8040_v28 = vor.u32 %v11508_v16, %v8039_v10 }
 0x1dc   :  { %v9153_v32 = vld [vmem:[#allocation10 + $0x968] sm:$0xf0]  ;;  %4681 = vmatpush.bf16.msra.mxu0 %v8136_v36  ;;  %v8296_v29 = vor.u32 %v11572_v20, %v8295_v19  ;;  %v11564_v36 = vld [vmem:[#allocation10 + $0x26c] sm:$0xf0] }
 0x1dd   :  { %v9156_v49 = vor.u32 %v11783_v30, %v9153_v32  ;;  %v11687_v5 = vld [vmem:[#allocation10 + $0x64c] sm:$0xf]  ;;  %4606 = vmatpush.bf16.msra.mxu2 %v8804_v35  ;;  %v8007_v30 = vld [vmem:[#allocation10 + $0x50] sm:$0xf]  ;;  %v4350_v32 = vpop.f32.mrf.mxu2 }
 0x1de   :  { %v8769_v48 = vld [vmem:[#allocation10 + $0x668] sm:$0xf0]  ;;  %v4351_v38 = vadd.f32 %v4350_v32, %v4338_v26 }
 0x1df   :  { %v11775_v43 = vld [vmem:[#allocation10 + $0x90c] sm:$0xf]  ;;  %4694 = vmatpush.bf16.msra.mxu1 %v8392_v37  ;;  %4616 = vmatpush.bf16.msra.mxu3 %v9156_v49  ;;  %v8772_v56 = vor.u32 %v11687_v5, %v8769_v48  ;;  %v8008_v5 = vor.u32 %v11500_v33, %v8007_v30  ;;  %v8264_v48 = vor.u32 %v11564_v36, %v8263_v34  ;;  %v11788_v34 = vld [vmem:[#allocation10 + $0x96c] sm:$0xf0] }
 0x1e0   :  { %v9121_v50 = vld [vmem:[#allocation10 + $0x928] sm:$0xf0]  ;;  %4682 = vmatpush.bf16.msra.mxu0 %v8104_v51  ;;  %v4364_v46 = vadd.f32 %v13146_v18, %v4351_v38  ;;  %v4391_v51 = vpop.f32.mrf.mxu1  ;;  %v9415_v36 = vld [vmem:[#allocation10 + $0xb50] sm:$0xf] }
 0x1e1   :  { %v9124_v62 = vor.u32 %v11775_v43, %v9121_v50  ;;  %v11679_v63 = vld [vmem:[#allocation10 + $0x60c] sm:$0xf]  ;;  %4607 = vmatpush.bf16.msra.mxu2 %v8772_v56  ;;  %v7975_v43 = vld [vmem:[#allocation10 + $0x10] sm:$0xf] }
 0x1e2   :  { %v8737_v1 = vld [vmem:[#allocation10 + $0x628] sm:$0xf0]  ;;  %v11492_v50 = vld [vmem:[#allocation10 + $0x2c] sm:$0xf0]  ;;  %v4377_v11 = vadd.f32 %v13142_v58, %v4364_v46 }
 0x1e3   :  { %v11767_v2 = vld [vmem:[#allocation10 + $0x8cc] sm:$0xf]  ;;  %4695 = vmatpush.bf16.msra.mxu1 %v8360_v52  ;;  %4617 = vmatpush.bf16.msra.mxu3 %v9124_v62  ;;  %v8740_v15 = vor.u32 %v11679_v63, %v8737_v1  ;;  %v11556_v52 = vld [vmem:[#allocation10 + $0x22c] sm:$0xf0] }
 0x1e4   :  { %v9089_v59 = vld [vmem:[#allocation10 + $0x8e8] sm:$0xf0]  ;;  %4683 = vmatpush.bf16.msra.mxu0 %v8072_v0  ;;  %v11804_v56 = vld [vmem:[#allocation10 + $0x9ec] sm:$0xf0]  ;;  %v13158_v3 = vadd.f32 %v4389_v13, %v4377_v11 }
 0x1e5   :  { %v11991_v6 = vld [vmem:[#allocation10 + $0xfcc] sm:$0xf]  ;;  %v9092_v23 = vor.u32 %v11767_v2, %v9089_v59  ;;  %4608 = vmatpush.bf16.msra.mxu2 %v8740_v15  ;;  %v11868_v62 = vld [vmem:[#allocation10 + $0xbec] sm:$0xf0]  ;;  %v4352_v0 = vpop.f32.mrf.mxu2 }
 0x1e6   :  { %v9985_v7 = vld [vmem:[#allocation10 + $0xfe8] sm:$0xf0]  ;;  %v9480_v10 = vor.u32 %v11868_v62, %v9479_v57  ;;  %v9191_v15 = vld [vmem:[#allocation10 + $0x990] sm:$0xf] }
 0x1e7   :  { %v9988_v24 = vor.u32 %v11991_v6, %v9985_v7  ;;  %v11759_v25 = vld [vmem:[#allocation10 + $0x88c] sm:$0xf]  ;;  %4696 = vmatpush.bf16.msra.mxu1 %v8328_v9  ;;  %4618 = vmatpush.bf16.msra.mxu3 %v9092_v23  ;;  %v7976_v6 = vor.u32 %v11492_v50, %v7975_v43  ;;  %v8232_v7 = vor.u32 %v11556_v52, %v8231_v40  ;;  %v11796_v23 = vld [vmem:[#allocation10 + $0x9ac] sm:$0xf0] }
 0x1e8   :  { %v9057_v39 = vld [vmem:[#allocation10 + $0x8a8] sm:$0xf0]  ;;  %4684 = vmatpush.bf16.msra.mxu0 %v8040_v28  ;;  %4609 = vmatmul.bf16.vlgmr.msra.gmra.mxu2 %v13085_v61  ;;  %v9224_v9 = vor.u32 %v11804_v56, %v9223_v54  ;;  %v9127_v46 = vld [vmem:[#allocation10 + $0x910] sm:$0xf] }
 0x1e9   :  { %v11983_v17 = vld [vmem:[#allocation10 + $0xf8c] sm:$0xf]  ;;  %v9060_v37 = vor.u32 %v11759_v25, %v9057_v39  ;;  %4653 = vmatpush.bf16.msrb.mxu2 %v9988_v24  ;;  %v9447_v24 = vld [vmem:[#allocation10 + $0xb90] sm:$0xf] }
 0x1ea   :  { %v9953_v27 = vld [vmem:[#allocation10 + $0xfa8] sm:$0xf0]  ;;  %v11860_v25 = vld [vmem:[#allocation10 + $0xbac] sm:$0xf0] }
 0x1eb   :  { %v9956_v41 = vor.u32 %v11983_v17, %v9953_v27  ;;  %v11751_v42 = vld [vmem:[#allocation10 + $0x84c] sm:$0xf]  ;;  %4697 = vmatpush.bf16.msra.mxu1 %v8296_v29  ;;  %4619 = vmatpush.bf16.msra.mxu3 %v9060_v37  ;;  %v13160_v17 = vpop.f32.mrf.mxu3  ;;  %v9192_v27 = vor.u32 %v11796_v23, %v9191_v15  ;;  %v9448_v28 = vor.u32 %v11860_v25, %v9447_v24  ;;  %v9159_v29 = vld [vmem:[#allocation10 + $0x950] sm:$0xf] }
 0x1ec   :  { %v9025_v35 = vld [vmem:[#allocation10 + $0x868] sm:$0xf0]  ;;  %4685 = vmatpush.bf16.msra.mxu0 %v8008_v5  ;;  %v11852_v37 = vld [vmem:[#allocation10 + $0xb6c] sm:$0xf0] }
 0x1ed   :  { %v11975_v47 = vld [vmem:[#allocation10 + $0xf4c] sm:$0xf]  ;;  %v9028_v53 = vor.u32 %v11751_v42, %v9025_v35  ;;  %4654 = vmatpush.bf16.msrb.mxu2 %v9956_v41  ;;  %v9160_v35 = vor.u32 %v11788_v34, %v9159_v29  ;;  %v9416_v14 = vor.u32 %v11852_v37, %v9415_v36  ;;  %v9383_v43 = vld [vmem:[#allocation10 + $0xb10] sm:$0xf]  ;;  %v4402_v37 = vpop.f32.mrf.mxu2 }
 0x1ee   :  { %v9921_v49 = vld [vmem:[#allocation10 + $0xf68] sm:$0xf0]  ;;  %v11844_v50 = vld [vmem:[#allocation10 + $0xb2c] sm:$0xf0] }
 0x1ef   :  { %v9924_v18 = vor.u32 %v11975_v47, %v9921_v49  ;;  %v11743_v63 = vld [vmem:[#allocation10 + $0x80c] sm:$0xf]  ;;  %4698 = vmatpush.bf16.msra.mxu1 %v8264_v48  ;;  %4620 = vmatpush.bf16.msra.mxu3 %v9028_v53  ;;  %v11780_v48 = vld [vmem:[#allocation10 + $0x92c] sm:$0xf0]  ;;  %v9384_v11 = vor.u32 %v11844_v50, %v9383_v43 }
 0x1f0   :  { %v8993_v1 = vld [vmem:[#allocation10 + $0x828] sm:$0xf0]  ;;  %4686 = vmatpush.bf16.msra.mxu0 %v7976_v6  ;;  %v9095_v53 = vld [vmem:[#allocation10 + $0x8d0] sm:$0xf]  ;;  %v9128_v56 = vor.u32 %v11780_v48, %v9127_v46  ;;  %v4403_v46 = vadd.f32 %v4402_v37, %v13158_v3 }
 0x1f1   :  { %v11967_v2 = vld [vmem:[#allocation10 + $0xf0c] sm:$0xf]  ;;  %4655 = vmatpush.bf16.msrb.mxu2 %v9924_v18  ;;  %v8996_v19 = vor.u32 %v11743_v63, %v8993_v1  ;;  %v11772_v18 = vld [vmem:[#allocation10 + $0x8ec] sm:$0xf0] }
 0x1f2   :  { %v9889_v59 = vld [vmem:[#allocation10 + $0xf28] sm:$0xf0]  ;;  %v9351_v1 = vld [vmem:[#allocation10 + $0xad0] sm:$0xf]  ;;  %v4416_v50 = vadd.f32 %v13160_v17, %v4403_v46 }
 0x1f3   :  { %v12023_v58 = vld [vmem:[#allocation10 + $0x10cc] sm:$0xf]  ;;  %v9892_v20 = vor.u32 %v11967_v2, %v9889_v59  ;;  %4699 = vmatpush.bf16.msra.mxu1 %v8232_v7  ;;  %4621 = vmatpush.bf16.msra.mxu3 %v8996_v19  ;;  %v4417_v54 = vpop.f32.mrf.mxu3  ;;  %v11836_v2 = vld [vmem:[#allocation10 + $0xaec] sm:$0xf0]  ;;  %v9096_v19 = vor.u32 %v11772_v18, %v9095_v53 }
 0x1f4   :  { %v10113_v16 = vld [vmem:[#allocation10 + $0x10e8] sm:$0xf0]  ;;  %4731 = vmatpush.bf16.msrb.mxu0 %v9224_v9  ;;  %v8967_v59 = vld [vmem:[#allocation10 + $0x7d0] sm:$0xf]  ;;  %v13165_v9 = vpop.f32.mrf.mxu0 }
 0x1f5   :  { %v11959_v39 = vld [vmem:[#allocation10 + $0xecc] sm:$0xf]  ;;  %v10116_v26 = vor.u32 %v12023_v58, %v10113_v16  ;;  %4656 = vmatpush.bf16.msrb.mxu2 %v9892_v20  ;;  %4687 = vmatmul.bf16.vlgmr.msra.gmra.mxu0 %v13066_v21  ;;  %v11740_v6 = vld [vmem:[#allocation10 + $0x7ec] sm:$0xf0]  ;;  %v9352_v20 = vor.u32 %v11836_v2, %v9351_v1  ;;  %v11544_v1 = vld [vmem:[#allocation10 + $0x1d4] sm:$0xf] }
 0x1f6   :  { %v9857_v13 = vld [vmem:[#allocation10 + $0xee8] sm:$0xf0]  ;;  %4700 = vmatmul.bf16.vlgmr.msra.gmra.mxu1 %v13068_v22  ;;  %4622 = vmatmul.bf16.vlgmr.msra.gmra.mxu3 %v13099_v55  ;;  %v8711_v58 = vld [vmem:[#allocation10 + $0x5d0] sm:$0xf]  ;;  %v8968_v24 = vor.u32 %v11740_v6, %v8967_v59  ;;  %v8201_v2 = vld [vmem:[#allocation10 + $0x1f0] sm:$0xf0] }
 0x1f7   :  { %4744 = vmatpush.bf16.msrb.mxu1 %v9480_v10  ;;  %v12015_v30 = vld [vmem:[#allocation10 + $0x108c] sm:$0xf]  ;;  %v9860_v33 = vor.u32 %v11959_v39, %v9857_v13  ;;  %4670 = vmatpush.bf16.msrb.mxu3 %v10116_v26  ;;  %v13167_v10 = vpop.f32.mrf.mxu1  ;;  %v11676_v16 = vld [vmem:[#allocation10 + $0x5ec] sm:$0xf0] }
 0x1f8   :  { %v10081_v32 = vld [vmem:[#allocation10 + $0x10a8] sm:$0xf0]  ;;  %4732 = vmatpush.bf16.msrb.mxu0 %v9192_v27  ;;  %v9063_v23 = vld [vmem:[#allocation10 + $0x890] sm:$0xf]  ;;  %v8712_v27 = vor.u32 %v11676_v16, %v8711_v58 }
 0x1f9   :  { %v11951_v38 = vld [vmem:[#allocation10 + $0xe8c] sm:$0xf]  ;;  %v10084_v42 = vor.u32 %v12015_v30, %v10081_v32  ;;  %4657 = vmatpush.bf16.msrb.mxu2 %v9860_v33  ;;  %v11764_v39 = vld [vmem:[#allocation10 + $0x8ac] sm:$0xf0] }
 0x1fa   :  { %v9825_v41 = vld [vmem:[#allocation10 + $0xea8] sm:$0xf0]  ;;  %v9319_v13 = vld [vmem:[#allocation10 + $0xa90] sm:$0xf]  ;;  %v9064_v33 = vor.u32 %v11764_v39, %v9063_v23  ;;  %v8204_v23 = vor.u32 %v11544_v1, %v8201_v2 }
 0x1fb   :  { %4745 = vmatpush.bf16.msrb.mxu1 %v9448_v28  ;;  %v12007_v47 = vld [vmem:[#allocation10 + $0x104c] sm:$0xf]  ;;  %v9828_v5 = vor.u32 %v11951_v38, %v9825_v41  ;;  %4671 = vmatpush.bf16.msrb.mxu3 %v10084_v42  ;;  %v11828_v26 = vld [vmem:[#allocation10 + $0xaac] sm:$0xf0]  ;;  %v4441_v38 = vpop.f32.mrf.mxu3 }
 0x1fc   :  { %v10049_v49 = vld [vmem:[#allocation10 + $0x1068] sm:$0xf0]  ;;  %4733 = vmatpush.bf16.msrb.mxu0 %v9160_v35  ;;  %v8935_v28 = vld [vmem:[#allocation10 + $0x790] sm:$0xf]  ;;  %v9320_v34 = vor.u32 %v11828_v26, %v9319_v13  ;;  %v4482_v48 = vpop.f32.mrf.mxu0  ;;  %v11536_v26 = vld [vmem:[#allocation10 + $0x194] sm:$0xf] }
 0x1fd   :  { %v11943_v40 = vld [vmem:[#allocation10 + $0xe4c] sm:$0xf]  ;;  %v10052_v52 = vor.u32 %v12007_v47, %v10049_v49  ;;  %4658 = vmatpush.bf16.msrb.mxu2 %v9828_v5  ;;  %v11732_v29 = vld [vmem:[#allocation10 + $0x7ac] sm:$0xf0] }
 0x1fe   :  { %v9793_v51 = vld [vmem:[#allocation10 + $0xe68] sm:$0xf0]  ;;  %v8679_v30 = vld [vmem:[#allocation10 + $0x590] sm:$0xf]  ;;  %v8936_v41 = vor.u32 %v11732_v29, %v8935_v28 }
 0x1ff   :  { %4746 = vmatpush.bf16.msrb.mxu1 %v9416_v14  ;;  %v11999_v57 = vld [vmem:[#allocation10 + $0x100c] sm:$0xf]  ;;  %v9796_v63 = vor.u32 %v11943_v40, %v9793_v51  ;;  %4672 = vmatpush.bf16.msrb.mxu3 %v10052_v52  ;;  %v11668_v32 = vld [vmem:[#allocation10 + $0x5ac] sm:$0xf0]  ;;  %v4495_v43 = vpop.f32.mrf.mxu1 }
 0x200   :  { %v10017_v62 = vld [vmem:[#allocation10 + $0x1028] sm:$0xf0]  ;;  %4734 = vmatpush.bf16.msrb.mxu0 %v9128_v56  ;;  %v9031_v36 = vld [vmem:[#allocation10 + $0x850] sm:$0xf]  ;;  %v8680_v47 = vor.u32 %v11668_v32, %v8679_v30 }
 0x201   :  { %v11935_v7 = vld [vmem:[#allocation10 + $0xe0c] sm:$0xf]  ;;  %v10020_v15 = vor.u32 %v11999_v57, %v10017_v62  ;;  %4659 = vmatpush.bf16.msrb.mxu2 %v9796_v63  ;;  %v11756_v42 = vld [vmem:[#allocation10 + $0x86c] sm:$0xf0]  ;;  %v4429_v63 = vadd.f32 %v13152_v4, %v4416_v50 }
 0x202   :  { %v9761_v0 = vld [vmem:[#allocation10 + $0xe28] sm:$0xf0]  ;;  %v9287_v35 = vld [vmem:[#allocation10 + $0xa50] sm:$0xf]  ;;  %v9032_v52 = vor.u32 %v11756_v42, %v9031_v36  ;;  %v11528_v42 = vld [vmem:[#allocation10 + $0x154] sm:$0xf] }
 0x203   :  { %4747 = vmatpush.bf16.msrb.mxu1 %v9384_v11  ;;  %v9764_v25 = vor.u32 %v11935_v7, %v9761_v0  ;;  %4673 = vmatpush.bf16.msrb.mxu3 %v10020_v15  ;;  %v11820_v14 = vld [vmem:[#allocation10 + $0xa6c] sm:$0xf0]  ;;  %v13175_v7 = vadd.f32 %v4441_v38, %v4429_v63 }
 0x204   :  { %4735 = vmatpush.bf16.msrb.mxu0 %v9096_v19  ;;  %v8903_v49 = vld [vmem:[#allocation10 + $0x750] sm:$0xf]  ;;  %v9288_v53 = vor.u32 %v11820_v14, %v9287_v35  ;;  %v4404_v19 = vpop.f32.mrf.mxu2  ;;  %v8137_v35 = vld [vmem:[#allocation10 + $0x170] sm:$0xf0] }
 0x205   :  { %4660 = vmatpush.bf16.msrb.mxu2 %v9764_v25  ;;  %v11724_v5 = vld [vmem:[#allocation10 + $0x76c] sm:$0xf0]  ;;  %v8140_v48 = vor.u32 %v11528_v42, %v8137_v35  ;;  %v13183_v35 = vld [vmem:[#allocation11] sm:$0xff] }
 0x206   :  { %v8647_v40 = vld [vmem:[#allocation10 + $0x550] sm:$0xf]  ;;  %v8904_v3 = vor.u32 %v11724_v5, %v8903_v49  ;;  %10136 = vmatmul.msk.bf16.vlgmr.msrb.gmra.mxu3 %vm4207_vm2, %v13105_v31 }
 0x207   :  { %4748 = vmatpush.bf16.msrb.mxu1 %v9352_v20  ;;  %4718 = vmatpush.bf16.msra.mxu3 %v8968_v24  ;;  %v11660_v51 = vld [vmem:[#allocation10 + $0x56c] sm:$0xf0]  ;;  %v4443_v20 = vpop.f32.mrf.mxu3 }
 0x208   :  { %4736 = vmatpush.bf16.msrb.mxu0 %v9064_v33  ;;  %v8999_v54 = vld [vmem:[#allocation10 + $0x810] sm:$0xf]  ;;  %4661 = vmatmul.bf16.vlgmr.msrb.gmra.mxu2 %v13095_v45  ;;  %v8648_v17 = vor.u32 %v11660_v51, %v8647_v40 }
 0x209   :  { %4705 = vmatpush.bf16.msra.mxu2 %v8712_v27  ;;  %v11748_v56 = vld [vmem:[#allocation10 + $0x82c] sm:$0xf0]  ;;  %v8169_v27 = vld [vmem:[#allocation10 + $0x1b0] sm:$0xf0] }
 0x20a   :  { %v9255_v11 = vld [vmem:[#allocation10 + $0xa10] sm:$0xf]  ;;  %v9000_v58 = vor.u32 %v11748_v56, %v8999_v54 }
 0x20b   :  { %4749 = vmatpush.bf16.msrb.mxu1 %v9320_v34  ;;  %4719 = vmatpush.bf16.msra.mxu3 %v8936_v41  ;;  %v11812_v18 = vld [vmem:[#allocation10 + $0xa2c] sm:$0xf0]  ;;  %v8172_v34 = vor.u32 %v11536_v26, %v8169_v27 }
 0x20c   :  { %v10119_v57 = vld [vmem:[#allocation10 + $0x10d0] sm:$0xf]  ;;  %4737 = vmatpush.bf16.msrb.mxu0 %v9032_v52  ;;  %v9256_v16 = vor.u32 %v11812_v18, %v9255_v11  ;;  %v11520_v52 = vld [vmem:[#allocation10 + $0x114] sm:$0xf] }
 0x20d   :  { %v12028_v62 = vld [vmem:[#allocation10 + $0x10ec] sm:$0xf0]  ;;  %4706 = vmatpush.bf16.msra.mxu2 %v8680_v47  ;;  %v11736_v11 = vld [vmem:[#allocation10 + $0x7d4] sm:$0xf] }
 0x20e   :  { %v8871_v59 = vld [vmem:[#allocation10 + $0x710] sm:$0xf]  ;;  %v10120_v4 = vor.u32 %v12028_v62, %v10119_v57  ;;  %v13179_v20 = vpop.f32.mrf.mxu0 }
 0x20f   :  { %v11716_v6 = vld [vmem:[#allocation10 + $0x72c] sm:$0xf0]  ;;  %4750 = vmatpush.bf16.msrb.mxu1 %v9288_v53  ;;  %4720 = vmatpush.bf16.msra.mxu3 %v8904_v3  ;;  %v8105_v53 = vld [vmem:[#allocation10 + $0x130] sm:$0xf0]  ;;  %v4467_v27 = vpop.f32.mrf.mxu3 }
 0x210   :  { %v8615_v0 = vld [vmem:[#allocation10 + $0x510] sm:$0xf]  ;;  %v8872_v39 = vor.u32 %v11716_v6, %v8871_v59  ;;  %4738 = vmatpush.bf16.msrb.mxu0 %v9000_v58  ;;  %v8969_v3 = vld [vmem:[#allocation10 + $0x7f0] sm:$0xf0]  ;;  %v8108_v63 = vor.u32 %v11520_v52, %v8105_v53 }
 0x211   :  { %v11652_v15 = vld [vmem:[#allocation10 + $0x52c] sm:$0xf0]  ;;  %4707 = vmatpush.bf16.msra.mxu2 %v8648_v17  ;;  %v11512_v17 = vld [vmem:[#allocation10 + $0xd4] sm:$0xf]  ;;  %v8972_v2 = vor.u32 %v11736_v11, %v8969_v3 }
 0x212   :  { %v10087_v24 = vld [vmem:[#allocation10 + $0x1090] sm:$0xf]  ;;  %v8616_v13 = vor.u32 %v11652_v15, %v8615_v0  ;;  %v8073_v59 = vld [vmem:[#allocation10 + $0xf0] sm:$0xf0] }
 0x213   :  { %v12020_v25 = vld [vmem:[#allocation10 + $0x10ac] sm:$0xf0]  ;;  %4751 = vmatpush.bf16.msrb.mxu1 %v9256_v16  ;;  %4721 = vmatpush.bf16.msra.mxu3 %v8872_v39  ;;  %v11728_v58 = vld [vmem:[#allocation10 + $0x794] sm:$0xf]  ;;  %v8076_v39 = vor.u32 %v11512_v17, %v8073_v59 }
 0x214   :  { %v8839_v28 = vld [vmem:[#allocation10 + $0x6d0] sm:$0xf]  ;;  %4787 = vmatpush.bf16.msra.mxu0 %v10120_v4  ;;  %v10088_v33 = vor.u32 %v12020_v25, %v10087_v24  ;;  %v8937_v16 = vld [vmem:[#allocation10 + $0x7b0] sm:$0xf0]  ;;  %v13181_v4 = vpop.f32.mrf.mxu1 }
 0x215   :  { %v11708_v29 = vld [vmem:[#allocation10 + $0x6ec] sm:$0xf0]  ;;  %4708 = vmatpush.bf16.msra.mxu2 %v8616_v13  ;;  %4739 = vmatmul.bf16.vlgmr.msrb.gmra.mxu0 %v13099_v55  ;;  %v8873_v52 = vld [vmem:[#allocation10 + $0x730] sm:$0xf0] }
 0x216   :  { %v8583_v30 = vld [vmem:[#allocation10 + $0x4d0] sm:$0xf]  ;;  %v8840_v38 = vor.u32 %v11708_v29, %v8839_v28  ;;  %4752 = vmatmul.bf16.vlgmr.msrb.gmra.mxu1 %v13101_v8  ;;  %v8940_v29 = vor.u32 %v11728_v58, %v8937_v16  ;;  %v4534_v53 = vpop.f32.mrf.mxu0  ;;  %v11488_v59 = vld [vmem:[#allocation10 + $0x14] sm:$0xf] }
 0x217   :  { %v11644_v32 = vld [vmem:[#allocation10 + $0x4ec] sm:$0xf0]  ;;  %4796 = vmatpush.bf16.msra.mxu1 %v8204_v23  ;;  %v4469_v17 = vpop.f32.mrf.mxu3  ;;  %v8841_v58 = vld [vmem:[#allocation10 + $0x6f0] sm:$0xf0] }
 0x218   :  { %v10055_v36 = vld [vmem:[#allocation10 + $0x1050] sm:$0xf]  ;;  %v8584_v41 = vor.u32 %v11644_v32, %v8583_v30  ;;  %4788 = vmatpush.bf16.msra.mxu0 %v10088_v33  ;;  %4722 = vmatpush.bf16.msra.mxu3 %v8840_v38  ;;  %v11504_v30 = vld [vmem:[#allocation10 + $0x94] sm:$0xf] }
 0x219   :  { %v12012_v37 = vld [vmem:[#allocation10 + $0x106c] sm:$0xf0]  ;;  %v8041_v32 = vld [vmem:[#allocation10 + $0xb0] sm:$0xf0] }
 0x21a   :  { %v8807_v14 = vld [vmem:[#allocation10 + $0x690] sm:$0xf]  ;;  %v10056_v5 = vor.u32 %v12012_v37, %v10055_v36  ;;  %4709 = vmatpush.bf16.msra.mxu2 %v8584_v41  ;;  %v11720_v36 = vld [vmem:[#allocation10 + $0x754] sm:$0xf] }
 0x21b   :  { %v11700_v46 = vld [vmem:[#allocation10 + $0x6ac] sm:$0xf0]  ;;  %4797 = vmatpush.bf16.msra.mxu1 %v8172_v34  ;;  %v8905_v37 = vld [vmem:[#allocation10 + $0x770] sm:$0xf0] }
 0x21c   :  { %v8551_v47 = vld [vmem:[#allocation10 + $0x490] sm:$0xf]  ;;  %v8808_v40 = vor.u32 %v11700_v46, %v8807_v14  ;;  %4789 = vmatpush.bf16.msra.mxu0 %v10056_v5  ;;  %v1442_v14 = vperm.slane %v13183_v35, 2  ;;  %v8044_v46 = vor.u32 %v11504_v30, %v8041_v32  ;;  %v8908_v5 = vor.u32 %v11720_v36, %v8905_v37  ;;  %v11800_v16 = vld [vmem:[#allocation10 + $0x9d4] sm:$0xf] }
 0x21d   :  { %v11636_v49 = vld [vmem:[#allocation10 + $0x4ac] sm:$0xf0]  ;;  %v11696_v30 = vld [vmem:[#allocation10 + $0x694] sm:$0xf] }
 0x21e   :  { %v10023_v43 = vld [vmem:[#allocation10 + $0x1010] sm:$0xf]  ;;  %v8552_v51 = vor.u32 %v11636_v49, %v8551_v47  ;;  %4723 = vmatpush.bf16.msra.mxu3 %v8808_v40  ;;  %v4454_v40 = vpop.f32.mrf.mxu2  ;;  %v8809_v36 = vld [vmem:[#allocation10 + $0x6b0] sm:$0xf0] }
 0x21f   :  { %v12004_v50 = vld [vmem:[#allocation10 + $0x102c] sm:$0xf0]  ;;  %4798 = vmatpush.bf16.msra.mxu1 %v8140_v48  ;;  %v11496_v48 = vld [vmem:[#allocation10 + $0x54] sm:$0xf] }
 0x220   :  { %v8775_v54 = vld [vmem:[#allocation10 + $0x650] sm:$0xf]  ;;  %v10024_v62 = vor.u32 %v12004_v50, %v10023_v43  ;;  %4710 = vmatpush.bf16.msra.mxu2 %v8552_v51  ;;  %v8009_v43 = vld [vmem:[#allocation10 + $0x70] sm:$0xf0] }
 0x221   :  { %v11692_v56 = vld [vmem:[#allocation10 + $0x66c] sm:$0xf0]  ;;  %v11712_v51 = vld [vmem:[#allocation10 + $0x714] sm:$0xf] }
 0x222   :  { %v8519_v18 = vld [vmem:[#allocation10 + $0x450] sm:$0xf]  ;;  %v8776_v1 = vor.u32 %v11692_v56, %v8775_v54  ;;  %4790 = vmatpush.bf16.msra.mxu0 %v10024_v62  ;;  %v4547_v54 = vpop.f32.mrf.mxu1  ;;  %v4455_v56 = vadd.f32 %v4454_v40, %v1442_v14  ;;  %v11792_v37 = vld [vmem:[#allocation10 + $0x994] sm:$0xf] }
 0x223   :  { %v11628_v57 = vld [vmem:[#allocation10 + $0x46c] sm:$0xf0]  ;;  %4799 = vmatpush.bf16.msra.mxu1 %v8108_v63 }
 0x224   :  { %v8743_v6 = vld [vmem:[#allocation10 + $0x610] sm:$0xf]  ;;  %v8520_v15 = vor.u32 %v11628_v57, %v8519_v18  ;;  %4724 = vmatpush.bf16.msra.mxu3 %v8776_v1  ;;  %v8012_v57 = vor.u32 %v11496_v48, %v8009_v43  ;;  %v4468_v1 = vadd.f32 %v4467_v27, %v4455_v56  ;;  %v8777_v48 = vld [vmem:[#allocation10 + $0x670] sm:$0xf0] }
 0x225   :  { %v11684_v0 = vld [vmem:[#allocation10 + $0x62c] sm:$0xf0]  ;;  %10137 = vmatmul.msk.bf16.vlgmr.msra.gmra.mxu0 %vm4207_vm2, %v13105_v31  ;;  %v11784_v43 = vld [vmem:[#allocation10 + $0x954] sm:$0xf] }
 0x226   :  { %v9991_v19 = vld [vmem:[#allocation10 + $0xfd0] sm:$0xf]  ;;  %4835 = vmatpush.bf16.msrb.mxu0 %v8972_v2  ;;  %v8744_v28 = vor.u32 %v11684_v0, %v8743_v6  ;;  %4711 = vmatpush.bf16.msra.mxu2 %v8520_v15  ;;  %v8876_v2 = vor.u32 %v11712_v51, %v8873_v52  ;;  %v7977_v6 = vld [vmem:[#allocation10 + $0x30] sm:$0xf0] }
 0x227   :  { %v11996_v23 = vld [vmem:[#allocation10 + $0xfec] sm:$0xf0]  ;;  %4800 = vmatpush.bf16.msra.mxu1 %v8076_v39  ;;  %v11704_v0 = vld [vmem:[#allocation10 + $0x6d4] sm:$0xf]  ;;  %v4481_v39 = vadd.f32 %v13165_v9, %v4468_v1 }
 0x228   :  { %v8487_v24 = vld [vmem:[#allocation10 + $0x410] sm:$0xf]  ;;  %v9992_v33 = vor.u32 %v11996_v23, %v9991_v19  ;;  %4725 = vmatpush.bf16.msra.mxu3 %v8744_v28  ;;  %v9225_v19 = vld [vmem:[#allocation10 + $0x9f0] sm:$0xf0]  ;;  %v8844_v27 = vor.u32 %v11704_v0, %v8841_v58 }
 0x229   :  { %v11620_v25 = vld [vmem:[#allocation10 + $0x42c] sm:$0xf0]  ;;  %v13192_v32 = vadd.f32 %v13167_v10, %v4481_v39 }
 0x22a   :  { %v9735_v13 = vld [vmem:[#allocation10 + $0xdd0] sm:$0xf]  ;;  %v8488_v34 = vor.u32 %v11620_v25, %v8487_v24  ;;  %4836 = vmatpush.bf16.msrb.mxu0 %v8940_v29  ;;  %v9228_v29 = vor.u32 %v11800_v16, %v9225_v19  ;;  %v11768_v19 = vld [vmem:[#allocation10 + $0x8d4] sm:$0xf] }
 0x22b   :  { %v11932_v26 = vld [vmem:[#allocation10 + $0xdec] sm:$0xf0]  ;;  %4726 = vmatmul.bf16.vlgmr.msra.gmra.mxu3 %v13085_v61  ;;  %4801 = vmatpush.bf16.msra.mxu1 %v8044_v46 }
 0x22c   :  { %v9736_v38 = vor.u32 %v11932_v26, %v9735_v13  ;;  %v9959_v41 = vld [vmem:[#allocation10 + $0xf90] sm:$0xf]  ;;  %4770 = vmatpush.bf16.msrb.mxu3 %v9992_v33  ;;  %4712 = vmatpush.bf16.msra.mxu2 %v8488_v34  ;;  %v7980_v13 = vor.u32 %v11488_v59, %v7977_v6  ;;  %v4456_v34 = vpop.f32.mrf.mxu2  ;;  %v11992_v59 = vld [vmem:[#allocation10 + $0xfd4] sm:$0xf] }
 0x22d   :  { %v11988_v42 = vld [vmem:[#allocation10 + $0xfac] sm:$0xf0]  ;;  %v9993_v6 = vld [vmem:[#allocation10 + $0xff0] sm:$0xf0] }
 0x22e   :  { %v9703_v47 = vld [vmem:[#allocation10 + $0xd90] sm:$0xf]  ;;  %v9960_v50 = vor.u32 %v11988_v42, %v9959_v41  ;;  %4837 = vmatpush.bf16.msrb.mxu0 %v8908_v5  ;;  %v11688_v5 = vld [vmem:[#allocation10 + $0x654] sm:$0xf] }
 0x22f   :  { %v11924_v49 = vld [vmem:[#allocation10 + $0xdac] sm:$0xf0]  ;;  %4713 = vmatmul.bf16.vlgmr.msra.gmra.mxu2 %v13083_v60  ;;  %4802 = vmatpush.bf16.msra.mxu1 %v8012_v57  ;;  %v8780_v56 = vor.u32 %v11688_v5, %v8777_v48  ;;  %v8713_v34 = vld [vmem:[#allocation10 + $0x5f0] sm:$0xf0] }
 0x230   :  { %4757 = vmatpush.bf16.msrb.mxu2 %v9736_v38  ;;  %v9704_v11 = vor.u32 %v11924_v49, %v9703_v47  ;;  %v9927_v3 = vld [vmem:[#allocation10 + $0xf50] sm:$0xf]  ;;  %4771 = vmatpush.bf16.msrb.mxu3 %v9960_v50  ;;  %v9193_v38 = vld [vmem:[#allocation10 + $0x9b0] sm:$0xf0]  ;;  %v8812_v47 = vor.u32 %v11696_v30, %v8809_v36 }
 0x231   :  { %v11980_v18 = vld [vmem:[#allocation10 + $0xf6c] sm:$0xf0]  ;;  %v9196_v49 = vor.u32 %v11792_v37, %v9193_v38  ;;  %v9161_v50 = vld [vmem:[#allocation10 + $0x970] sm:$0xf0]  ;;  %v13195_v30 = vpop.f32.mrf.mxu0 }
 0x232   :  { %v9671_v62 = vld [vmem:[#allocation10 + $0xd50] sm:$0xf]  ;;  %v9928_v15 = vor.u32 %v11980_v18, %v9927_v3  ;;  %4838 = vmatpush.bf16.msrb.mxu0 %v8876_v2  ;;  %v11680_v3 = vld [vmem:[#allocation10 + $0x614] sm:$0xf] }
 0x233   :  { %v11916_v63 = vld [vmem:[#allocation10 + $0xd6c] sm:$0xf0]  ;;  %4803 = vmatpush.bf16.msra.mxu1 %v7980_v13  ;;  %v8745_v18 = vld [vmem:[#allocation10 + $0x630] sm:$0xf0] }
 0x234   :  { %4758 = vmatpush.bf16.msrb.mxu2 %v9704_v11  ;;  %v9672_v23 = vor.u32 %v11916_v63, %v9671_v62  ;;  %v9895_v24 = vld [vmem:[#allocation10 + $0xf10] sm:$0xf]  ;;  %4772 = vmatpush.bf16.msrb.mxu3 %v9928_v15  ;;  %v9164_v11 = vor.u32 %v11784_v43, %v9161_v50  ;;  %v11776_v62 = vld [vmem:[#allocation10 + $0x914] sm:$0xf]  ;;  %v8748_v58 = vor.u32 %v11680_v3, %v8745_v18 }
 0x235   :  { %v11972_v25 = vld [vmem:[#allocation10 + $0xf2c] sm:$0xf0]  ;;  %v9129_v63 = vld [vmem:[#allocation10 + $0x930] sm:$0xf0] }
 0x236   :  { %v9639_v26 = vld [vmem:[#allocation10 + $0xd10] sm:$0xf]  ;;  %v9896_v33 = vor.u32 %v11972_v25, %v9895_v24  ;;  %4839 = vmatpush.bf16.msrb.mxu0 %v8844_v27  ;;  %4804 = vmatmul.bf16.vlgmr.msra.gmra.mxu1 %v13066_v21  ;;  %v9132_v16 = vor.u32 %v11776_v62, %v9129_v63  ;;  %v9996_v24 = vor.u32 %v11992_v59, %v9993_v6  ;;  %v9097_v25 = vld [vmem:[#allocation10 + $0x8f0] sm:$0xf0] }
 0x237   :  { %v11908_v28 = vld [vmem:[#allocation10 + $0xd2c] sm:$0xf0]  ;;  %4848 = vmatpush.bf16.msrb.mxu1 %v9228_v29  ;;  %v9961_v27 = vld [vmem:[#allocation10 + $0xfb0] sm:$0xf0]  ;;  %v9100_v38 = vor.u32 %v11768_v19, %v9097_v25 }
 0x238   :  { %4759 = vmatpush.bf16.msrb.mxu2 %v9672_v23  ;;  %v9640_v41 = vor.u32 %v11908_v28, %v9639_v26  ;;  %v9863_v9 = vld [vmem:[#allocation10 + $0xed0] sm:$0xf]  ;;  %4773 = vmatpush.bf16.msrb.mxu3 %v9896_v33  ;;  %v11984_v28 = vld [vmem:[#allocation10 + $0xf94] sm:$0xf]  ;;  %v13197_v33 = vpop.f32.mrf.mxu1 }
 0x239   :  { %v11964_v42 = vld [vmem:[#allocation10 + $0xeec] sm:$0xf0]  ;;  %v11672_v29 = vld [vmem:[#allocation10 + $0x5d4] sm:$0xf]  ;;  %v4586_v63 = vpop.f32.mrf.mxu0 }
 0x23a   :  { %v9607_v14 = vld [vmem:[#allocation10 + $0xcd0] sm:$0xf]  ;;  %v9864_v10 = vor.u32 %v11964_v42, %v9863_v9  ;;  %4840 = vmatpush.bf16.msrb.mxu0 %v8812_v47  ;;  %v8457_v9 = vld [vmem:[#allocation10 + $0x3f0] sm:$0xf0] }
 0x23b   :  { %v11900_v46 = vld [vmem:[#allocation10 + $0xcec] sm:$0xf0]  ;;  %4849 = vmatpush.bf16.msrb.mxu1 %v9196_v49  ;;  %v9065_v47 = vld [vmem:[#allocation10 + $0x8b0] sm:$0xf0]  ;;  %v8716_v49 = vor.u32 %v11672_v29, %v8713_v34 }
 0x23c   :  { %4760 = vmatpush.bf16.msrb.mxu2 %v9640_v41  ;;  %v9608_v40 = vor.u32 %v11900_v46, %v9607_v14  ;;  %v9831_v51 = vld [vmem:[#allocation10 + $0xe90] sm:$0xf]  ;;  %4774 = vmatpush.bf16.msrb.mxu3 %v9864_v10  ;;  %v11608_v41 = vld [vmem:[#allocation10 + $0x3d4] sm:$0xf]  ;;  %v9964_v14 = vor.u32 %v11984_v28, %v9961_v27 }
 0x23d   :  { %v11956_v52 = vld [vmem:[#allocation10 + $0xeac] sm:$0xf0]  ;;  %v11760_v46 = vld [vmem:[#allocation10 + $0x894] sm:$0xf]  ;;  %v8460_v43 = vor.u32 %v11608_v41, %v8457_v9 }
 0x23e   :  { %v9575_v53 = vld [vmem:[#allocation10 + $0xc90] sm:$0xf]  ;;  %v9832_v57 = vor.u32 %v11956_v52, %v9831_v51  ;;  %4841 = vmatpush.bf16.msrb.mxu0 %v8780_v56  ;;  %v11976_v10 = vld [vmem:[#allocation10 + $0xf54] sm:$0xf]  ;;  %v9068_v51 = vor.u32 %v11760_v46, %v9065_v47  ;;  %v4519_v52 = vpop.f32.mrf.mxu3 }
 0x23f   :  { %v11892_v54 = vld [vmem:[#allocation10 + $0xcac] sm:$0xf0]  ;;  %4850 = vmatpush.bf16.msrb.mxu1 %v9164_v11  ;;  %v9929_v48 = vld [vmem:[#allocation10 + $0xf70] sm:$0xf0] }
 0x240   :  { %v9799_v17 = vld [vmem:[#allocation10 + $0xe50] sm:$0xf]  ;;  %4761 = vmatpush.bf16.msrb.mxu2 %v9608_v40  ;;  %v9576_v1 = vor.u32 %v11892_v54, %v9575_v53  ;;  %4775 = vmatpush.bf16.msrb.mxu3 %v9832_v57  ;;  %v11664_v50 = vld [vmem:[#allocation10 + $0x594] sm:$0xf]  ;;  %v9932_v56 = vor.u32 %v11976_v10, %v9929_v48 }
 0x241   :  { %v11948_v2 = vld [vmem:[#allocation10 + $0xe6c] sm:$0xf0]  ;;  %v8681_v40 = vld [vmem:[#allocation10 + $0x5b0] sm:$0xf0] }
 0x242   :  { %v9543_v0 = vld [vmem:[#allocation10 + $0xc50] sm:$0xf]  ;;  %v9800_v23 = vor.u32 %v11948_v2, %v9799_v17  ;;  %4842 = vmatpush.bf16.msrb.mxu0 %v8748_v58  ;;  %v11600_v53 = vld [vmem:[#allocation10 + $0x394] sm:$0xf]  ;;  %v8684_v18 = vor.u32 %v11664_v50, %v8681_v40  ;;  %v4599_v17 = vpop.f32.mrf.mxu1 }
 0x243   :  { %v11884_v15 = vld [vmem:[#allocation10 + $0xc6c] sm:$0xf0]  ;;  %4851 = vmatpush.bf16.msrb.mxu1 %v9132_v16  ;;  %v8425_v54 = vld [vmem:[#allocation10 + $0x3b0] sm:$0xf0] }
 0x244   :  { %v9767_v39 = vld [vmem:[#allocation10 + $0xe10] sm:$0xf]  ;;  %4762 = vmatpush.bf16.msrb.mxu2 %v9576_v1  ;;  %v9544_v26 = vor.u32 %v11884_v15, %v9543_v0  ;;  %4776 = vmatpush.bf16.msrb.mxu3 %v9800_v23  ;;  %v11752_v11 = vld [vmem:[#allocation10 + $0x854] sm:$0xf]  ;;  %v8428_v1 = vor.u32 %v11600_v53, %v8425_v54  ;;  %v4506_v0 = vpop.f32.mrf.mxu2 }
 0x245   :  { %v11940_v13 = vld [vmem:[#allocation10 + $0xe2c] sm:$0xf0]  ;;  %4843 = vmatmul.bf16.vlgmr.msrb.gmra.mxu0 %v13085_v61  ;;  %v9033_v3 = vld [vmem:[#allocation10 + $0x870] sm:$0xf0]  ;;  %v4507_v16 = vadd.f32 %v4506_v0, %v13192_v32 }
 0x246   :  { %v9511_v36 = vld [vmem:[#allocation10 + $0xc10] sm:$0xf]  ;;  %4887 = vmatpush.bf16.msra.mxu0 %v9996_v24  ;;  %v9768_v42 = vor.u32 %v11940_v13, %v9767_v39  ;;  %v11968_v57 = vld [vmem:[#allocation10 + $0xf14] sm:$0xf]  ;;  %v9036_v6 = vor.u32 %v11752_v11, %v9033_v3 }
 0x247   :  { %v11876_v37 = vld [vmem:[#allocation10 + $0xc2c] sm:$0xf0]  ;;  %4852 = vmatpush.bf16.msrb.mxu1 %v9100_v38  ;;  %v9897_v62 = vld [vmem:[#allocation10 + $0xf30] sm:$0xf0]  ;;  %v4520_v27 = vadd.f32 %v4519_v52, %v4507_v16  ;;  %v4521_v38 = vpop.f32.mrf.mxu3 }
 0x248   :  { %4763 = vmatpush.bf16.msrb.mxu2 %v9544_v26  ;;  %v9512_v5 = vor.u32 %v11876_v37, %v9511_v36  ;;  %4777 = vmatpush.bf16.msrb.mxu3 %v9768_v42  ;;  %v11656_v2 = vld [vmem:[#allocation10 + $0x554] sm:$0xf]  ;;  %v9900_v19 = vor.u32 %v11968_v57, %v9897_v62 }
 0x249   :  { %v8649_v59 = vld [vmem:[#allocation10 + $0x570] sm:$0xf0]  ;;  %v4533_v46 = vadd.f32 %v13179_v20, %v4520_v27 }
 0x24a   :  { %4888 = vmatpush.bf16.msra.mxu0 %v9964_v14  ;;  %v11592_v15 = vld [vmem:[#allocation10 + $0x354] sm:$0xf]  ;;  %v8652_v39 = vor.u32 %v11656_v2, %v8649_v59 }
 0x24b   :  { %4778 = vmatmul.bf16.vlgmr.msrb.gmra.mxu3 %v13095_v45  ;;  %4853 = vmatpush.bf16.msrb.mxu1 %v9068_v51  ;;  %v8393_v58 = vld [vmem:[#allocation10 + $0x370] sm:$0xf0]  ;;  %v4546_v40 = vadd.f32 %v13181_v4, %v4533_v46  ;;  %v8687_v46 = vld [vmem:[#allocation10 + $0x598] sm:$0xf] }
 0x24c   :  { %4822 = vmatpush.bf16.msra.mxu3 %v8716_v49  ;;  %4764 = vmatpush.bf16.msrb.mxu2 %v9512_v5  ;;  %v11744_v23 = vld [vmem:[#allocation10 + $0x814] sm:$0xf]  ;;  %v8396_v29 = vor.u32 %v11592_v15, %v8393_v58  ;;  %v4508_v51 = vpop.f32.mrf.mxu2 }
 0x24d   :  { %v9001_v24 = vld [vmem:[#allocation10 + $0x830] sm:$0xf0] }
 0x24e   :  { %4889 = vmatpush.bf16.msra.mxu0 %v9932_v56  ;;  %v11960_v25 = vld [vmem:[#allocation10 + $0xed4] sm:$0xf]  ;;  %v9004_v37 = vor.u32 %v11744_v23, %v9001_v24 }
 0x24f   :  { %4765 = vmatmul.bf16.vlgmr.msrb.gmra.mxu2 %v13093_v44  ;;  %v9865_v13 = vld [vmem:[#allocation10 + $0xef0] sm:$0xf0]  ;;  %4854 = vmatpush.bf16.msrb.mxu1 %v9036_v6 }
 0x250   :  { %4809 = vmatpush.bf16.msra.mxu2 %v8460_v43  ;;  %4823 = vmatpush.bf16.msra.mxu3 %v8684_v18  ;;  %v12024_v26 = vld [vmem:[#allocation10 + $0x10d4] sm:$0xf]  ;;  %v9868_v32 = vor.u32 %v11960_v25, %v9865_v13  ;;  %v8719_v25 = vld [vmem:[#allocation10 + $0x5d8] sm:$0xf] }
 0x251   :  { %v10121_v28 = vld [vmem:[#allocation10 + $0x10f0] sm:$0xf0]  ;;  %v8975_v13 = vld [vmem:[#allocation10 + $0x7d8] sm:$0xf] }
 0x252   :  { %v11648_v34 = vld [vmem:[#allocation10 + $0x514] sm:$0xf]  ;;  %4890 = vmatpush.bf16.msra.mxu0 %v9900_v19  ;;  %v10124_v42 = vor.u32 %v12024_v26, %v10121_v28  ;;  %v11741_v26 = vld [vmem:[#allocation10 + $0x7f4] sm:$0xf0] }
 0x253   :  { %v8617_v36 = vld [vmem:[#allocation10 + $0x530] sm:$0xf0]  ;;  %4855 = vmatpush.bf16.msrb.mxu1 %v9004_v37 }
 0x254   :  { %4810 = vmatpush.bf16.msra.mxu2 %v8428_v1  ;;  %v11584_v41 = vld [vmem:[#allocation10 + $0x314] sm:$0xf]  ;;  %4824 = vmatpush.bf16.msra.mxu3 %v8652_v39  ;;  %v8620_v47 = vor.u32 %v11648_v34, %v8617_v36  ;;  %v11677_v39 = vld [vmem:[#allocation10 + $0x5f4] sm:$0xf0] }
 0x255   :  { %v8361_v9 = vld [vmem:[#allocation10 + $0x330] sm:$0xf0] }
 0x256   :  { %v11952_v14 = vld [vmem:[#allocation10 + $0xe94] sm:$0xf]  ;;  %v8364_v48 = vor.u32 %v11584_v41, %v8361_v9  ;;  %4891 = vmatpush.bf16.msra.mxu0 %v9868_v32  ;;  %4856 = vmatmul.bf16.vlgmr.msrb.gmra.mxu1 %v13099_v55  ;;  %v8720_v41 = vor.u32 %v11677_v39, %v8719_v25  ;;  %v8879_v25 = vld [vmem:[#allocation10 + $0x718] sm:$0xf] }
 0x257   :  { %v9833_v49 = vld [vmem:[#allocation10 + $0xeb0] sm:$0xf0]  ;;  %4904 = vmatpush.bf16.msra.mxu1 %v10124_v42  ;;  %v8976_v42 = vor.u32 %v11741_v26, %v8975_v13 }
 0x258   :  { %v12016_v5 = vld [vmem:[#allocation10 + $0x1094] sm:$0xf]  ;;  %4811 = vmatpush.bf16.msra.mxu2 %v8396_v29  ;;  %v9836_v54 = vor.u32 %v11952_v14, %v9833_v49  ;;  %4825 = vmatpush.bf16.msra.mxu3 %v8620_v47  ;;  %v4558_v29 = vpop.f32.mrf.mxu2  ;;  %v11669_v47 = vld [vmem:[#allocation10 + $0x5b4] sm:$0xf0] }
 0x259   :  { %v10089_v10 = vld [vmem:[#allocation10 + $0x10b0] sm:$0xf0]  ;;  %v13206_v37 = vadd.f32 %v4558_v29, %v4546_v40  ;;  %v8943_v49 = vld [vmem:[#allocation10 + $0x798] sm:$0xf] }
 0x25a   :  { %v11640_v43 = vld [vmem:[#allocation10 + $0x4d4] sm:$0xf]  ;;  %v10092_v56 = vor.u32 %v12016_v5, %v10089_v10  ;;  %4892 = vmatpush.bf16.msra.mxu0 %v9836_v54  ;;  %v13208_v5 = vpop.f32.mrf.mxu0  ;;  %v13210_v10 = vpop.f32.mrf.mxu1 }
 0x25b   :  { %v8585_v50 = vld [vmem:[#allocation10 + $0x4f0] sm:$0xf0] }
 0x25c   :  { %v11576_v52 = vld [vmem:[#allocation10 + $0x2d4] sm:$0xf]  ;;  %v8588_v11 = vor.u32 %v11640_v43, %v8585_v50  ;;  %4812 = vmatpush.bf16.msra.mxu2 %v8364_v48  ;;  %4905 = vmatpush.bf16.msra.mxu1 %v10092_v56  ;;  %v11733_v48 = vld [vmem:[#allocation10 + $0x7b4] sm:$0xf0] }
 0x25d   :  { %v8329_v53 = vld [vmem:[#allocation10 + $0x2f0] sm:$0xf0] }
 0x25e   :  { %v11944_v20 = vld [vmem:[#allocation10 + $0xe54] sm:$0xf]  ;;  %v8332_v62 = vor.u32 %v11576_v52, %v8329_v53  ;;  %4826 = vmatpush.bf16.msra.mxu3 %v8588_v11  ;;  %v8688_v53 = vor.u32 %v11669_v47, %v8687_v46  ;;  %v8944_v11 = vor.u32 %v11733_v48, %v8943_v49  ;;  %v11645_v46 = vld [vmem:[#allocation10 + $0x4f4] sm:$0xf0] }
 0x25f   :  { %v9801_v3 = vld [vmem:[#allocation10 + $0xe70] sm:$0xf0]  ;;  %v8847_v47 = vld [vmem:[#allocation10 + $0x6d8] sm:$0xf] }
 0x260   :  { %v12008_v18 = vld [vmem:[#allocation10 + $0x1054] sm:$0xf]  ;;  %v9804_v2 = vor.u32 %v11944_v20, %v9801_v3  ;;  %4813 = vmatpush.bf16.msra.mxu2 %v8332_v62  ;;  %v8655_v20 = vld [vmem:[#allocation10 + $0x558] sm:$0xf] }
 0x261   :  { %v10057_v57 = vld [vmem:[#allocation10 + $0x1070] sm:$0xf0]  ;;  %v11725_v62 = vld [vmem:[#allocation10 + $0x774] sm:$0xf0] }
 0x262   :  { %v11632_v63 = vld [vmem:[#allocation10 + $0x494] sm:$0xf]  ;;  %v10060_v59 = vor.u32 %v12008_v18, %v10057_v57  ;;  %4893 = vmatpush.bf16.msra.mxu0 %v9804_v2  ;;  %v11661_v18 = vld [vmem:[#allocation10 + $0x574] sm:$0xf0]  ;;  %v4638_v39 = vpop.f32.mrf.mxu0  ;;  %v4651_v13 = vpop.f32.mrf.mxu1 }
 0x263   :  { %v8553_v4 = vld [vmem:[#allocation10 + $0x4b0] sm:$0xf0]  ;;  %v8911_v57 = vld [vmem:[#allocation10 + $0x758] sm:$0xf] }
 0x264   :  { %v11568_v17 = vld [vmem:[#allocation10 + $0x294] sm:$0xf]  ;;  %v8556_v58 = vor.u32 %v11632_v63, %v8553_v4  ;;  %4906 = vmatpush.bf16.msra.mxu1 %v10060_v59  ;;  %v1443_v4 = vperm.slane %v13183_v35, 3  ;;  %v4560_v59 = vpop.f32.mrf.mxu2  ;;  %v11709_v49 = vld [vmem:[#allocation10 + $0x6f4] sm:$0xf0] }
 0x265   :  { %v8297_v1 = vld [vmem:[#allocation10 + $0x2b0] sm:$0xf0]  ;;  %v8527_v59 = vld [vmem:[#allocation10 + $0x458] sm:$0xf] }
 0x266   :  { %v11936_v6 = vld [vmem:[#allocation10 + $0xe14] sm:$0xf]  ;;  %v8300_v24 = vor.u32 %v11568_v17, %v8297_v1  ;;  %4827 = vmatpush.bf16.msra.mxu3 %v8556_v58  ;;  %v8912_v58 = vor.u32 %v11725_v62, %v8911_v57  ;;  %v8495_v39 = vld [vmem:[#allocation10 + $0x418] sm:$0xf] }
 0x267   :  { %v9769_v0 = vld [vmem:[#allocation10 + $0xe30] sm:$0xf0] }
 0x268   :  { %v12000_v15 = vld [vmem:[#allocation10 + $0x1014] sm:$0xf]  ;;  %v9772_v34 = vor.u32 %v11936_v6, %v9769_v0  ;;  %4814 = vmatpush.bf16.msra.mxu2 %v8300_v24  ;;  %v8656_v6 = vor.u32 %v11661_v18, %v8655_v20  ;;  %v11653_v24 = vld [vmem:[#allocation10 + $0x534] sm:$0xf0] }
 0x269   :  { %v10025_v16 = vld [vmem:[#allocation10 + $0x1030] sm:$0xf0]  ;;  %v8559_v20 = vld [vmem:[#allocation10 + $0x498] sm:$0xf] }
 0x26a   :  { %v11624_v19 = vld [vmem:[#allocation10 + $0x454] sm:$0xf]  ;;  %v10028_v36 = vor.u32 %v12000_v15, %v10025_v16  ;;  %4894 = vmatpush.bf16.msra.mxu0 %v9772_v34  ;;  %v4571_v16 = vpop.f32.mrf.mxu3  ;;  %v11701_v18 = vld [vmem:[#allocation10 + $0x6b4] sm:$0xf0] }
 0x26b   :  { %v8521_v23 = vld [vmem:[#allocation10 + $0x470] sm:$0xf0]  ;;  %v4572_v26 = vadd.f32 %v4571_v16, %v1443_v4 }
 0x26c   :  { %v11560_v28 = vld [vmem:[#allocation10 + $0x254] sm:$0xf]  ;;  %v8524_v38 = vor.u32 %v11624_v19, %v8521_v23  ;;  %4907 = vmatpush.bf16.msra.mxu1 %v10028_v36  ;;  %v8623_v23 = vld [vmem:[#allocation10 + $0x518] sm:$0xf] }
 0x26d   :  { %v8265_v27 = vld [vmem:[#allocation10 + $0x270] sm:$0xf0]  ;;  %4895 = vmatmul.bf16.vlgmr.msra.gmra.mxu0 %v13095_v45  ;;  %v4585_v36 = vadd.f32 %v13195_v30, %v4572_v26 }
 0x26e   :  { %v11616_v9 = vld [vmem:[#allocation10 + $0x414] sm:$0xf]  ;;  %v8268_v14 = vor.u32 %v11560_v28, %v8265_v27  ;;  %4828 = vmatpush.bf16.msra.mxu3 %v8524_v38  ;;  %4939 = vmatpush.bf16.msrb.mxu0 %v8720_v41  ;;  %v11717_v28 = vld [vmem:[#allocation10 + $0x734] sm:$0xf0]  ;;  %v8624_v38 = vor.u32 %v11653_v24, %v8623_v23 }
 0x26f   :  { %v8489_v32 = vld [vmem:[#allocation10 + $0x430] sm:$0xf0]  ;;  %10138 = vmatmul.msk.bf16.vlgmr.msra.gmra.mxu1 %vm4207_vm2, %v13105_v31 }
 0x270   :  { %v11928_v43 = vld [vmem:[#allocation10 + $0xdd4] sm:$0xf]  ;;  %v8492_v52 = vor.u32 %v11616_v9, %v8489_v32  ;;  %4952 = vmatpush.bf16.msrb.mxu1 %v8976_v42  ;;  %4815 = vmatpush.bf16.msra.mxu2 %v8268_v14  ;;  %v8880_v32 = vor.u32 %v11717_v28, %v8879_v25  ;;  %v8591_v14 = vld [vmem:[#allocation10 + $0x4d8] sm:$0xf] }
 0x271   :  { %v9737_v50 = vld [vmem:[#allocation10 + $0xdf0] sm:$0xf0]  ;;  %v8592_v30 = vor.u32 %v11645_v46, %v8591_v14  ;;  %v11621_v28 = vld [vmem:[#allocation10 + $0x434] sm:$0xf0] }
 0x272   :  { %v11552_v40 = vld [vmem:[#allocation10 + $0x214] sm:$0xf]  ;;  %v9740_v3 = vor.u32 %v11928_v43, %v9737_v50  ;;  %4829 = vmatpush.bf16.msra.mxu3 %v8492_v52  ;;  %4940 = vmatpush.bf16.msrb.mxu0 %v8688_v53  ;;  %v4598_v50 = vadd.f32 %v13197_v33, %v4585_v36  ;;  %v8848_v53 = vor.u32 %v11709_v49, %v8847_v47  ;;  %v11997_v14 = vld [vmem:[#allocation10 + $0xff4] sm:$0xf0]  ;;  %v1444_v47 = vperm.slane %v13183_v35, 4 }
 0x273   :  { %v8233_v51 = vld [vmem:[#allocation10 + $0x230] sm:$0xf0]  ;;  %v8496_v49 = vor.u32 %v11621_v28, %v8495_v39  ;;  %v8463_v35 = vld [vmem:[#allocation10 + $0x3d8] sm:$0xf] }
 0x274   :  { %v11864_v54 = vld [vmem:[#allocation10 + $0xbd4] sm:$0xf]  ;;  %v8236_v63 = vor.u32 %v11552_v40, %v8233_v51  ;;  %4953 = vmatpush.bf16.msrb.mxu1 %v8944_v11  ;;  %v11637_v11 = vld [vmem:[#allocation10 + $0x4b4] sm:$0xf0] }
 0x275   :  { %v9481_v56 = vld [vmem:[#allocation10 + $0xbf0] sm:$0xf0]  ;;  %4830 = vmatmul.bf16.vlgmr.msra.gmra.mxu3 %v13083_v60  ;;  %v8560_v33 = vor.u32 %v11637_v11, %v8559_v20  ;;  %v11925_v20 = vld [vmem:[#allocation10 + $0xdb4] sm:$0xf0]  ;;  %v4688_v11 = vpop.f32.mrf.mxu0 }
 0x276   :  { %v11920_v17 = vld [vmem:[#allocation10 + $0xd94] sm:$0xf]  ;;  %v9484_v2 = vor.u32 %v11864_v54, %v9481_v56  ;;  %4874 = vmatpush.bf16.msrb.mxu3 %v9740_v3  ;;  %4816 = vmatpush.bf16.msra.mxu2 %v8236_v63  ;;  %v4573_v54 = vpop.f32.mrf.mxu3  ;;  %v8815_v3 = vld [vmem:[#allocation10 + $0x698] sm:$0xf] }
 0x277   :  { %v9705_v1 = vld [vmem:[#allocation10 + $0xdb0] sm:$0xf0]  ;;  %4941 = vmatpush.bf16.msrb.mxu0 %v8656_v6  ;;  %v11629_v6 = vld [vmem:[#allocation10 + $0x474] sm:$0xf0] }
 0x278   :  { %v11856_v0 = vld [vmem:[#allocation10 + $0xb94] sm:$0xf]  ;;  %v9708_v19 = vor.u32 %v11920_v17, %v9705_v1  ;;  %4954 = vmatpush.bf16.msrb.mxu1 %v8912_v58  ;;  %v8816_v1 = vor.u32 %v11701_v18, %v8815_v3  ;;  %v8528_v23 = vor.u32 %v11629_v6, %v8527_v59  ;;  %v4701_v3 = vpop.f32.mrf.mxu1  ;;  %v9967_v18 = vld [vmem:[#allocation10 + $0xf98] sm:$0xf] }
 0x279   :  { %v9449_v15 = vld [vmem:[#allocation10 + $0xbb0] sm:$0xf0]  ;;  %4817 = vmatmul.bf16.vlgmr.msra.gmra.mxu2 %v13068_v22  ;;  %v8175_v28 = vld [vmem:[#allocation10 + $0x198] sm:$0xf] }
 0x27a   :  { %v11912_v27 = vld [vmem:[#allocation10 + $0xd54] sm:$0xf]  ;;  %4861 = vmatpush.bf16.msrb.mxu2 %v9484_v2  ;;  %v9452_v34 = vor.u32 %v11856_v0, %v9449_v15  ;;  %4875 = vmatpush.bf16.msrb.mxu3 %v9708_v19  ;;  %v8783_v0 = vld [vmem:[#allocation10 + $0x658] sm:$0xf] }
 0x27b   :  { %v9673_v29 = vld [vmem:[#allocation10 + $0xd70] sm:$0xf0]  ;;  %4942 = vmatpush.bf16.msrb.mxu0 %v8624_v38  ;;  %v11693_v15 = vld [vmem:[#allocation10 + $0x674] sm:$0xf0] }
 0x27c   :  { %v11848_v41 = vld [vmem:[#allocation10 + $0xb54] sm:$0xf]  ;;  %v9676_v42 = vor.u32 %v11912_v27, %v9673_v29  ;;  %4955 = vmatpush.bf16.msrb.mxu1 %v8880_v32  ;;  %v8784_v13 = vor.u32 %v11693_v15, %v8783_v0  ;;  %v8751_v27 = vld [vmem:[#allocation10 + $0x618] sm:$0xf] }
 0x27d   :  { %v9417_v9 = vld [vmem:[#allocation10 + $0xb70] sm:$0xf0]  ;;  %v11685_v29 = vld [vmem:[#allocation10 + $0x634] sm:$0xf0] }
 0x27e   :  { %v11904_v48 = vld [vmem:[#allocation10 + $0xd14] sm:$0xf]  ;;  %4862 = vmatpush.bf16.msrb.mxu2 %v9452_v34  ;;  %v9420_v40 = vor.u32 %v11848_v41, %v9417_v9  ;;  %4876 = vmatpush.bf16.msrb.mxu3 %v9676_v42  ;;  %v9743_v38 = vld [vmem:[#allocation10 + $0xdd8] sm:$0xf]  ;;  %v4610_v41 = vpop.f32.mrf.mxu2 }
 0x27f   :  { %v9641_v43 = vld [vmem:[#allocation10 + $0xd30] sm:$0xf0]  ;;  %4943 = vmatpush.bf16.msrb.mxu0 %v8592_v30  ;;  %v11933_v32 = vld [vmem:[#allocation10 + $0xdf4] sm:$0xf0]  ;;  %v13220_v46 = vadd.f32 %v4610_v41, %v4598_v50 }
 0x280   :  { %v11840_v51 = vld [vmem:[#allocation10 + $0xb14] sm:$0xf]  ;;  %v9644_v56 = vor.u32 %v11904_v48, %v9641_v43  ;;  %4956 = vmatpush.bf16.msrb.mxu1 %v8848_v53  ;;  %v9999_v42 = vld [vmem:[#allocation10 + $0xfd8] sm:$0xf]  ;;  %v4703_v41 = vpop.f32.mrf.mxu1 }
 0x281   :  { %v9385_v52 = vld [vmem:[#allocation10 + $0xb30] sm:$0xf0]  ;;  %v10000_v53 = vor.u32 %v11997_v14, %v9999_v42  ;;  %v9679_v15 = vld [vmem:[#allocation10 + $0xd58] sm:$0xf] }
 0x282   :  { %v11896_v57 = vld [vmem:[#allocation10 + $0xcd4] sm:$0xf]  ;;  %4863 = vmatpush.bf16.msrb.mxu2 %v9420_v40  ;;  %v9388_v63 = vor.u32 %v11840_v51, %v9385_v52  ;;  %4877 = vmatpush.bf16.msrb.mxu3 %v9644_v56  ;;  %v8752_v40 = vor.u32 %v11685_v29, %v8751_v27  ;;  %v9744_v52 = vor.u32 %v11933_v32, %v9743_v38  ;;  %v9711_v56 = vld [vmem:[#allocation10 + $0xd98] sm:$0xf]  ;;  %v4690_v38 = vpop.f32.mrf.mxu0 }
 0x283   :  { %v9609_v62 = vld [vmem:[#allocation10 + $0xcf0] sm:$0xf0]  ;;  %4944 = vmatpush.bf16.msrb.mxu0 %v8560_v33  ;;  %v9712_v6 = vor.u32 %v11925_v20, %v9711_v56  ;;  %v11541_v27 = vld [vmem:[#allocation10 + $0x1b4] sm:$0xf0] }
 0x284   :  { %v11832_v4 = vld [vmem:[#allocation10 + $0xad4] sm:$0xf]  ;;  %v9612_v2 = vor.u32 %v11896_v57, %v9609_v62  ;;  %4957 = vmatpush.bf16.msrb.mxu1 %v8816_v1  ;;  %v11989_v57 = vld [vmem:[#allocation10 + $0xfb4] sm:$0xf0]  ;;  %v4689_v62 = vadd.f32 %v4688_v11, %v1444_v47  ;;  %v4623_v47 = vpop.f32.mrf.mxu3 }
 0x285   :  { %v9353_v17 = vld [vmem:[#allocation10 + $0xaf0] sm:$0xf0]  ;;  %v8207_v1 = vld [vmem:[#allocation10 + $0x1d8] sm:$0xf]  ;;  %v9968_v0 = vor.u32 %v11989_v57, %v9967_v18 }
 0x286   :  { %v11888_v58 = vld [vmem:[#allocation10 + $0xc94] sm:$0xf]  ;;  %4864 = vmatpush.bf16.msrb.mxu2 %v9388_v63  ;;  %v9356_v19 = vor.u32 %v11832_v4, %v9353_v17  ;;  %4878 = vmatpush.bf16.msrb.mxu3 %v9612_v2  ;;  %v11613_v63 = vld [vmem:[#allocation10 + $0x3f4] sm:$0xf0]  ;;  %v13223_v59 = vadd.f32 %v4701_v3, %v4689_v62 }
 0x287   :  { %v9577_v16 = vld [vmem:[#allocation10 + $0xcb0] sm:$0xf0]  ;;  %4945 = vmatpush.bf16.msrb.mxu0 %v8528_v23  ;;  %v11549_v2 = vld [vmem:[#allocation10 + $0x1f4] sm:$0xf0] }
 0x288   :  { %v11824_v24 = vld [vmem:[#allocation10 + $0xa94] sm:$0xf]  ;;  %v9580_v26 = vor.u32 %v11888_v58, %v9577_v16  ;;  %4958 = vmatpush.bf16.msrb.mxu1 %v8784_v13  ;;  %v4612_v58 = vpop.f32.mrf.mxu2  ;;  %v8464_v16 = vor.u32 %v11613_v63, %v8463_v35  ;;  %v11917_v23 = vld [vmem:[#allocation10 + $0xd74] sm:$0xf0]  ;;  %v8208_v39 = vor.u32 %v11549_v2, %v8207_v1 }
 0x289   :  { %v9321_v25 = vld [vmem:[#allocation10 + $0xab0] sm:$0xf0]  ;;  %v8431_v13 = vld [vmem:[#allocation10 + $0x398] sm:$0xf]  ;;  %v9680_v29 = vor.u32 %v11917_v23, %v9679_v15 }
 0x28a   :  { %v11880_v34 = vld [vmem:[#allocation10 + $0xc54] sm:$0xf]  ;;  %4865 = vmatpush.bf16.msrb.mxu2 %v9356_v19  ;;  %v9324_v9 = vor.u32 %v11824_v24, %v9321_v25  ;;  %4879 = vmatpush.bf16.msrb.mxu3 %v9580_v26  ;;  %v9935_v24 = vld [vmem:[#allocation10 + $0xf58] sm:$0xf] }
 0x28b   :  { %v9545_v36 = vld [vmem:[#allocation10 + $0xc70] sm:$0xf0]  ;;  %4946 = vmatpush.bf16.msrb.mxu0 %v8496_v49  ;;  %v11981_v25 = vld [vmem:[#allocation10 + $0xf74] sm:$0xf0]  ;;  %v8176_v49 = vor.u32 %v11541_v27, %v8175_v28 }
 0x28c   :  { %v11816_v48 = vld [vmem:[#allocation10 + $0xa54] sm:$0xf]  ;;  %v9548_v30 = vor.u32 %v11880_v34, %v9545_v36  ;;  %4959 = vmatpush.bf16.msrb.mxu1 %v8752_v40  ;;  %v11605_v26 = vld [vmem:[#allocation10 + $0x3b4] sm:$0xf0]  ;;  %v9936_v34 = vor.u32 %v11981_v25, %v9935_v24  ;;  %v4624_v40 = vadd.f32 %v4623_v47, %v13220_v46 }
 0x28d   :  { %v9289_v43 = vld [vmem:[#allocation10 + $0xa70] sm:$0xf0]  ;;  %v9647_v36 = vld [vmem:[#allocation10 + $0xd18] sm:$0xf] }
 0x28e   :  { %v11872_v51 = vld [vmem:[#allocation10 + $0xc14] sm:$0xf]  ;;  %4866 = vmatpush.bf16.msrb.mxu2 %v9324_v9  ;;  %v9292_v50 = vor.u32 %v11816_v48, %v9289_v43  ;;  %4880 = vmatpush.bf16.msrb.mxu3 %v9548_v30  ;;  %v8432_v9 = vor.u32 %v11605_v26, %v8431_v13  ;;  %v11909_v32 = vld [vmem:[#allocation10 + $0xd34] sm:$0xf0]  ;;  %v4637_v56 = vadd.f32 %v13208_v5, %v4624_v40 }
 0x28f   :  { %v9513_v54 = vld [vmem:[#allocation10 + $0xc30] sm:$0xf0]  ;;  %4991 = vmatpush.bf16.msra.mxu0 %v9744_v52  ;;  %4960 = vmatmul.bf16.vlgmr.msrb.gmra.mxu1 %v13085_v61  ;;  %v9903_v42 = vld [vmem:[#allocation10 + $0xf18] sm:$0xf]  ;;  %v9648_v52 = vor.u32 %v11909_v32, %v9647_v36 }
 0x290   :  { %v11808_v33 = vld [vmem:[#allocation10 + $0xa14] sm:$0xf]  ;;  %v9516_v17 = vor.u32 %v11872_v51, %v9513_v54  ;;  %5004 = vmatpush.bf16.msra.mxu1 %v10000_v53  ;;  %4947 = vmatmul.bf16.vlgmr.msrb.gmra.mxu0 %v13083_v60  ;;  %v11973_v14 = vld [vmem:[#allocation10 + $0xf34] sm:$0xf0]  ;;  %v4650_v63 = vadd.f32 %v13210_v10, %v4637_v56  ;;  %v4662_v40 = vpop.f32.mrf.mxu2 }
 0x291   :  { %v9257_v4 = vld [vmem:[#allocation10 + $0xa30] sm:$0xf0]  ;;  %v8399_v48 = vld [vmem:[#allocation10 + $0x358] sm:$0xf]  ;;  %v9904_v53 = vor.u32 %v11973_v14, %v9903_v42 }
 0x292   :  { %4867 = vmatpush.bf16.msrb.mxu2 %v9292_v50  ;;  %v9260_v19 = vor.u32 %v11808_v33, %v9257_v4  ;;  %4881 = vmatpush.bf16.msrb.mxu3 %v9516_v17  ;;  %v11597_v43 = vld [vmem:[#allocation10 + $0x374] sm:$0xf0] }
 0x293   :  { %4992 = vmatpush.bf16.msra.mxu0 %v9712_v6  ;;  %v8143_v30 = vld [vmem:[#allocation10 + $0x158] sm:$0xf]  ;;  %v8400_v20 = vor.u32 %v11597_v43, %v8399_v48 }
 0x294   :  { %5005 = vmatpush.bf16.msra.mxu1 %v9968_v0  ;;  %v11533_v51 = vld [vmem:[#allocation10 + $0x174] sm:$0xf0]  ;;  %v4625_v0 = vpop.f32.mrf.mxu3 }
 0x295   :  { %4882 = vmatmul.bf16.vlgmr.msrb.gmra.mxu3 %v13093_v44  ;;  %v9615_v54 = vld [vmem:[#allocation10 + $0xcd8] sm:$0xf]  ;;  %v8144_v18 = vor.u32 %v11533_v51, %v8143_v30  ;;  %v11609_v51 = vld [vmem:[#allocation10 + $0x3dc] sm:$0xf] }
 0x296   :  { %4926 = vmatpush.bf16.msra.mxu3 %v8464_v16  ;;  %4868 = vmatpush.bf16.msrb.mxu2 %v9260_v19  ;;  %v11901_v11 = vld [vmem:[#allocation10 + $0xcf4] sm:$0xf0]  ;;  %v8689_v0 = vld [vmem:[#allocation10 + $0x5b8] sm:$0xf0] }
 0x297   :  { %4993 = vmatpush.bf16.msra.mxu0 %v9680_v29  ;;  %v9871_v3 = vld [vmem:[#allocation10 + $0xed8] sm:$0xf]  ;;  %v9616_v33 = vor.u32 %v11901_v11, %v9615_v54  ;;  %v4663_v54 = vadd.f32 %v4662_v40, %v4650_v63 }
 0x298   :  { %5006 = vmatpush.bf16.msra.mxu1 %v9936_v34  ;;  %v11965_v50 = vld [vmem:[#allocation10 + $0xef4] sm:$0xf0] }
 0x299   :  { %4869 = vmatmul.bf16.vlgmr.msrb.gmra.mxu2 %v13101_v8  ;;  %v8367_v57 = vld [vmem:[#allocation10 + $0x318] sm:$0xf]  ;;  %v9872_v4 = vor.u32 %v11965_v50, %v9871_v3 }
 0x29a   :  { %4913 = vmatpush.bf16.msra.mxu2 %v8208_v39  ;;  %4927 = vmatpush.bf16.msra.mxu3 %v8432_v9  ;;  %v11589_v46 = vld [vmem:[#allocation10 + $0x334] sm:$0xf0] }
 0x29b   :  { %v8111_v35 = vld [vmem:[#allocation10 + $0x118] sm:$0xf]  ;;  %4994 = vmatpush.bf16.msra.mxu0 %v9648_v52  ;;  %v8368_v17 = vor.u32 %v11589_v46, %v8367_v57  ;;  %v8465_v52 = vld [vmem:[#allocation10 + $0x3f8] sm:$0xf0] }
 0x29c   :  { %v11525_v62 = vld [vmem:[#allocation10 + $0x134] sm:$0xf0]  ;;  %5007 = vmatpush.bf16.msra.mxu1 %v9904_v53  ;;  %v11673_v53 = vld [vmem:[#allocation10 + $0x5dc] sm:$0xf]  ;;  %v4675_v56 = vpop.f32.mrf.mxu3 }
 0x29d   :  { %v9583_v5 = vld [vmem:[#allocation10 + $0xc98] sm:$0xf]  ;;  %v8112_v15 = vor.u32 %v11525_v62, %v8111_v35  ;;  %v13232_v57 = vadd.f32 %v4675_v56, %v4663_v54  ;;  %v8468_v35 = vor.u32 %v11609_v51, %v8465_v52  ;;  %v8369_v51 = vld [vmem:[#allocation10 + $0x338] sm:$0xf0] }
 0x29e   :  { %4914 = vmatpush.bf16.msra.mxu2 %v8176_v49  ;;  %4928 = vmatpush.bf16.msra.mxu3 %v8400_v20  ;;  %v11893_v1 = vld [vmem:[#allocation10 + $0xcb4] sm:$0xf0]  ;;  %v8721_v20 = vld [vmem:[#allocation10 + $0x5f8] sm:$0xf0] }
 0x29f   :  { %v9839_v2 = vld [vmem:[#allocation10 + $0xe98] sm:$0xf]  ;;  %4995 = vmatpush.bf16.msra.mxu0 %v9616_v33  ;;  %v9584_v10 = vor.u32 %v11893_v1, %v9583_v5  ;;  %v13236_v5 = vpop.f32.mrf.mxu1  ;;  %v8724_v63 = vor.u32 %v11673_v53, %v8721_v20  ;;  %v11601_v1 = vld [vmem:[#allocation10 + $0x39c] sm:$0xf] }
 0x2a0   :  { %v11957_v6 = vld [vmem:[#allocation10 + $0xeb4] sm:$0xf0]  ;;  %5008 = vmatpush.bf16.msra.mxu1 %v9872_v4  ;;  %v13234_v4 = vpop.f32.mrf.mxu0  ;;  %v11649_v52 = vld [vmem:[#allocation10 + $0x51c] sm:$0xf] }
 0x2a1   :  { %v8335_v58 = vld [vmem:[#allocation10 + $0x2d8] sm:$0xf]  ;;  %v9840_v24 = vor.u32 %v11957_v6, %v9839_v2  ;;  %v8433_v2 = vld [vmem:[#allocation10 + $0x3b8] sm:$0xf0] }
 0x2a2   :  { %4915 = vmatpush.bf16.msra.mxu2 %v8144_v18  ;;  %v11581_v16 = vld [vmem:[#allocation10 + $0x2f4] sm:$0xf0]  ;;  %4929 = vmatpush.bf16.msra.mxu3 %v8368_v17  ;;  %v11665_v6 = vld [vmem:[#allocation10 + $0x59c] sm:$0xf] }
 0x2a3   :  { %v8079_v19 = vld [vmem:[#allocation10 + $0xd8] sm:$0xf]  ;;  %v8336_v39 = vor.u32 %v11581_v16, %v8335_v58  ;;  %4996 = vmatpush.bf16.msra.mxu0 %v9584_v10  ;;  %v8436_v10 = vor.u32 %v11601_v1, %v8433_v2  ;;  %v8625_v53 = vld [vmem:[#allocation10 + $0x538] sm:$0xf0] }
 0x2a4   :  { %v11517_v23 = vld [vmem:[#allocation10 + $0xf4] sm:$0xf0]  ;;  %5009 = vmatpush.bf16.msra.mxu1 %v9840_v24 }
 0x2a5   :  { %v9551_v25 = vld [vmem:[#allocation10 + $0xc58] sm:$0xf]  ;;  %v8080_v27 = vor.u32 %v11517_v23, %v8079_v19 }
 0x2a6   :  { %v11885_v13 = vld [vmem:[#allocation10 + $0xc74] sm:$0xf0]  ;;  %4916 = vmatpush.bf16.msra.mxu2 %v8112_v15  ;;  %4930 = vmatpush.bf16.msra.mxu3 %v8336_v39  ;;  %v4664_v39 = vpop.f32.mrf.mxu2 }
 0x2a7   :  { %v9807_v26 = vld [vmem:[#allocation10 + $0xe58] sm:$0xf]  ;;  %v9552_v41 = vor.u32 %v11885_v13, %v9551_v25  ;;  %v8692_v13 = vor.u32 %v11665_v6, %v8689_v0 }
 0x2a8   :  { %v11949_v28 = vld [vmem:[#allocation10 + $0xe74] sm:$0xf0] }
 0x2a9   :  { %v8303_v29 = vld [vmem:[#allocation10 + $0x298] sm:$0xf]  ;;  %v9808_v9 = vor.u32 %v11949_v28, %v9807_v26  ;;  %4997 = vmatpush.bf16.msra.mxu0 %v9552_v41  ;;  %v11593_v28 = vld [vmem:[#allocation10 + $0x35c] sm:$0xf] }
 0x2aa   :  { %v11573_v34 = vld [vmem:[#allocation10 + $0x2b4] sm:$0xf0]  ;;  %4917 = vmatpush.bf16.msra.mxu2 %v8080_v27  ;;  %v8401_v27 = vld [vmem:[#allocation10 + $0x378] sm:$0xf0] }
 0x2ab   :  { %v8047_v36 = vld [vmem:[#allocation10 + $0x98] sm:$0xf]  ;;  %v8304_v47 = vor.u32 %v11573_v34, %v8303_v29  ;;  %5010 = vmatpush.bf16.msra.mxu1 %v9808_v9  ;;  %v11657_v29 = vld [vmem:[#allocation10 + $0x55c] sm:$0xf]  ;;  %v4677_v9 = vpop.f32.mrf.mxu3 }
 0x2ac   :  { %v11509_v38 = vld [vmem:[#allocation10 + $0xb4] sm:$0xf0]  ;;  %v11625_v9 = vld [vmem:[#allocation10 + $0x45c] sm:$0xf] }
 0x2ad   :  { %v9519_v32 = vld [vmem:[#allocation10 + $0xc18] sm:$0xf]  ;;  %v8048_v30 = vor.u32 %v11509_v38, %v8047_v36  ;;  %4931 = vmatpush.bf16.msra.mxu3 %v8304_v47  ;;  %v8657_v36 = vld [vmem:[#allocation10 + $0x578] sm:$0xf0] }
 0x2ae   :  { %v11877_v42 = vld [vmem:[#allocation10 + $0xc34] sm:$0xf0] }
 0x2af   :  { %v9775_v14 = vld [vmem:[#allocation10 + $0xe18] sm:$0xf]  ;;  %v9520_v50 = vor.u32 %v11877_v42, %v9519_v32  ;;  %4918 = vmatpush.bf16.msra.mxu2 %v8048_v30  ;;  %v8404_v42 = vor.u32 %v11593_v28, %v8401_v27  ;;  %v11585_v30 = vld [vmem:[#allocation10 + $0x31c] sm:$0xf] }
 0x2b0   :  { %v11941_v49 = vld [vmem:[#allocation10 + $0xe34] sm:$0xf0] }
 0x2b1   :  { %v8271_v48 = vld [vmem:[#allocation10 + $0x258] sm:$0xf]  ;;  %v9776_v18 = vor.u32 %v11941_v49, %v9775_v14  ;;  %4998 = vmatpush.bf16.msra.mxu0 %v9520_v50  ;;  %v4742_v49 = vpop.f32.mrf.mxu0 }
 0x2b2   :  { %v11565_v43 = vld [vmem:[#allocation10 + $0x274] sm:$0xf0] }
 0x2b3   :  { %v8015_v11 = vld [vmem:[#allocation10 + $0x58] sm:$0xf]  ;;  %v8272_v46 = vor.u32 %v11565_v43, %v8271_v48  ;;  %5011 = vmatpush.bf16.msra.mxu1 %v9776_v18  ;;  %v4755_v48 = vpop.f32.mrf.mxu1  ;;  %v8660_v43 = vor.u32 %v11657_v29, %v8657_v36  ;;  %v8628_v18 = vor.u32 %v11649_v52, %v8625_v53  ;;  %v8241_v53 = vld [vmem:[#allocation10 + $0x238] sm:$0xf0] }
 0x2b4   :  { %v11501_v3 = vld [vmem:[#allocation10 + $0x74] sm:$0xf0]  ;;  %4999 = vmatmul.bf16.vlgmr.msra.gmra.mxu0 %v13093_v44 }
 0x2b5   :  { %v8239_v62 = vld [vmem:[#allocation10 + $0x218] sm:$0xf]  ;;  %v8016_v17 = vor.u32 %v11501_v3, %v8015_v11  ;;  %4932 = vmatpush.bf16.msra.mxu3 %v8272_v46  ;;  %5043 = vmatpush.bf16.msrb.mxu0 %v8468_v35  ;;  %v8372_v11 = vor.u32 %v11585_v30, %v8369_v51  ;;  %v11577_v35 = vld [vmem:[#allocation10 + $0x2dc] sm:$0xf]  ;;  %v4727_v30 = vpop.f32.mrf.mxu3 }
 0x2b6   :  { %v11557_v33 = vld [vmem:[#allocation10 + $0x234] sm:$0xf0]  ;;  %5012 = vmatmul.bf16.vlgmr.msra.gmra.mxu1 %v13095_v45 }
 0x2b7   :  { %v9487_v15 = vld [vmem:[#allocation10 + $0xbd8] sm:$0xf]  ;;  %v8240_v23 = vor.u32 %v11557_v33, %v8239_v62  ;;  %5056 = vmatpush.bf16.msrb.mxu1 %v8724_v63  ;;  %4919 = vmatpush.bf16.msra.mxu2 %v8016_v17  ;;  %v8337_v62 = vld [vmem:[#allocation10 + $0x2f8] sm:$0xf0] }
 0x2b8   :  { %v11869_v58 = vld [vmem:[#allocation10 + $0xbf4] sm:$0xf0]  ;;  %v11641_v33 = vld [vmem:[#allocation10 + $0x4dc] sm:$0xf]  ;;  %v8340_v6 = vor.u32 %v11577_v35, %v8337_v62 }
 0x2b9   :  { %v7983_v16 = vld [vmem:[#allocation10 + $0x18] sm:$0xf]  ;;  %v9488_v26 = vor.u32 %v11869_v58, %v9487_v15  ;;  %4933 = vmatpush.bf16.msra.mxu3 %v8240_v23  ;;  %5044 = vmatpush.bf16.msrb.mxu0 %v8436_v10  ;;  %v8593_v63 = vld [vmem:[#allocation10 + $0x4f8] sm:$0xf0] }
 0x2ba   :  { %v11493_v19 = vld [vmem:[#allocation10 + $0x34] sm:$0xf0]  ;;  %v8596_v58 = vor.u32 %v11641_v33, %v8593_v63  ;;  %v8305_v23 = vld [vmem:[#allocation10 + $0x2b8] sm:$0xf0] }
 0x2bb   :  { %v9231_v24 = vld [vmem:[#allocation10 + $0x9d8] sm:$0xf]  ;;  %v7984_v34 = vor.u32 %v11493_v19, %v7983_v16  ;;  %5057 = vmatpush.bf16.msrb.mxu1 %v8692_v13  ;;  %v11569_v19 = vld [vmem:[#allocation10 + $0x29c] sm:$0xf]  ;;  %v13242_v13 = vpop.f32.mrf.mxu0 }
 0x2bc   :  { %v11805_v25 = vld [vmem:[#allocation10 + $0x9f4] sm:$0xf0]  ;;  %4934 = vmatmul.bf16.vlgmr.msra.gmra.mxu3 %v13068_v22  ;;  %v11633_v10 = vld [vmem:[#allocation10 + $0x49c] sm:$0xf]  ;;  %v8308_v28 = vor.u32 %v11569_v19, %v8305_v23 }
 0x2bd   :  { %v9455_v38 = vld [vmem:[#allocation10 + $0xb98] sm:$0xf]  ;;  %v9232_v32 = vor.u32 %v11805_v25, %v9231_v24  ;;  %4978 = vmatpush.bf16.msrb.mxu3 %v9488_v26  ;;  %4920 = vmatpush.bf16.msra.mxu2 %v7984_v34  ;;  %v8561_v24 = vld [vmem:[#allocation10 + $0x4b8] sm:$0xf0] }
 0x2be   :  { %v11861_v41 = vld [vmem:[#allocation10 + $0xbb4] sm:$0xf0]  ;;  %5045 = vmatpush.bf16.msrb.mxu0 %v8404_v42  ;;  %v8564_v34 = vor.u32 %v11633_v10, %v8561_v24  ;;  %v9489_v62 = vld [vmem:[#allocation10 + $0xbf8] sm:$0xf0] }
 0x2bf   :  { %v9199_v14 = vld [vmem:[#allocation10 + $0x998] sm:$0xf]  ;;  %v9456_v40 = vor.u32 %v11861_v41, %v9455_v38  ;;  %5058 = vmatpush.bf16.msrb.mxu1 %v8660_v43  ;;  %v11561_v38 = vld [vmem:[#allocation10 + $0x25c] sm:$0xf] }
 0x2c0   :  { %v11797_v47 = vld [vmem:[#allocation10 + $0x9b4] sm:$0xf0]  ;;  %4921 = vmatmul.bf16.vlgmr.msra.gmra.mxu2 %v13066_v21  ;;  %v8273_v41 = vld [vmem:[#allocation10 + $0x278] sm:$0xf0] }
 0x2c1   :  { %v9423_v54 = vld [vmem:[#allocation10 + $0xb58] sm:$0xf]  ;;  %4965 = vmatpush.bf16.msrb.mxu2 %v9232_v32  ;;  %v9200_v20 = vor.u32 %v11797_v47, %v9199_v14  ;;  %4979 = vmatpush.bf16.msrb.mxu3 %v9456_v40  ;;  %v8529_v32 = vld [vmem:[#allocation10 + $0x478] sm:$0xf0]  ;;  %v8276_v49 = vor.u32 %v11561_v38, %v8273_v41  ;;  %v4729_v38 = vpop.f32.mrf.mxu3 }
 0x2c2   :  { %v11853_v56 = vld [vmem:[#allocation10 + $0xb74] sm:$0xf0]  ;;  %5046 = vmatpush.bf16.msrb.mxu0 %v8372_v11  ;;  %v11553_v40 = vld [vmem:[#allocation10 + $0x21c] sm:$0xf]  ;;  %v8532_v51 = vor.u32 %v11625_v9, %v8529_v32 }
 0x2c3   :  { %v9167_v3 = vld [vmem:[#allocation10 + $0x958] sm:$0xf]  ;;  %v9424_v46 = vor.u32 %v11853_v56, %v9423_v54  ;;  %5059 = vmatpush.bf16.msrb.mxu1 %v8628_v18  ;;  %v11617_v54 = vld [vmem:[#allocation10 + $0x41c] sm:$0xf]  ;;  %v4794_v18 = vpop.f32.mrf.mxu0 }
 0x2c4   :  { %v11789_v50 = vld [vmem:[#allocation10 + $0x974] sm:$0xf0]  ;;  %v8497_v56 = vld [vmem:[#allocation10 + $0x438] sm:$0xf0] }
 0x2c5   :  { %v9391_v17 = vld [vmem:[#allocation10 + $0xb18] sm:$0xf]  ;;  %4966 = vmatpush.bf16.msrb.mxu2 %v9200_v20  ;;  %v9168_v2 = vor.u32 %v11789_v50, %v9167_v3  ;;  %4980 = vmatpush.bf16.msrb.mxu3 %v9424_v46  ;;  %v4714_v20 = vpop.f32.mrf.mxu2  ;;  %v11865_v50 = vld [vmem:[#allocation10 + $0xbdc] sm:$0xf] }
 0x2c6   :  { %v11845_v1 = vld [vmem:[#allocation10 + $0xb34] sm:$0xf0]  ;;  %5047 = vmatpush.bf16.msrb.mxu0 %v8340_v6  ;;  %v4715_v46 = vadd.f32 %v4714_v20, %v13223_v59  ;;  %v11929_v33 = vld [vmem:[#allocation10 + $0xddc] sm:$0xf]  ;;  %v9492_v19 = vor.u32 %v11865_v50, %v9489_v62 }
 0x2c7   :  { %v9135_v0 = vld [vmem:[#allocation10 + $0x918] sm:$0xf]  ;;  %v9392_v16 = vor.u32 %v11845_v1, %v9391_v17  ;;  %5060 = vmatpush.bf16.msrb.mxu1 %v8596_v58  ;;  %v9745_v63 = vld [vmem:[#allocation10 + $0xdf8] sm:$0xf0]  ;;  %v8244_v17 = vor.u32 %v11553_v40, %v8241_v53 }
 0x2c8   :  { %v11781_v15 = vld [vmem:[#allocation10 + $0x934] sm:$0xf0]  ;;  %v4728_v6 = vadd.f32 %v4727_v30, %v4715_v46  ;;  %v9748_v23 = vor.u32 %v11929_v33, %v9745_v63  ;;  %v11857_v59 = vld [vmem:[#allocation10 + $0xb9c] sm:$0xf] }
 0x2c9   :  { %v9359_v25 = vld [vmem:[#allocation10 + $0xad8] sm:$0xf]  ;;  %4967 = vmatpush.bf16.msrb.mxu2 %v9168_v2  ;;  %v9136_v26 = vor.u32 %v11781_v15, %v9135_v0  ;;  %4981 = vmatpush.bf16.msrb.mxu3 %v9392_v16  ;;  %v8500_v0 = vor.u32 %v11617_v54, %v8497_v56  ;;  %v13245_v16 = vpop.f32.mrf.mxu1  ;;  %v9457_v24 = vld [vmem:[#allocation10 + $0xbb8] sm:$0xf0] }
 0x2ca   :  { %v11837_v39 = vld [vmem:[#allocation10 + $0xaf4] sm:$0xf0]  ;;  %5048 = vmatpush.bf16.msrb.mxu0 %v8308_v28  ;;  %v11545_v28 = vld [vmem:[#allocation10 + $0x1dc] sm:$0xf] }
 0x2cb   :  { %v9103_v27 = vld [vmem:[#allocation10 + $0x8d8] sm:$0xf]  ;;  %v9360_v36 = vor.u32 %v11837_v39, %v9359_v25  ;;  %5061 = vmatpush.bf16.msrb.mxu1 %v8564_v34  ;;  %v11921_v39 = vld [vmem:[#allocation10 + $0xd9c] sm:$0xf] }
 0x2cc   :  { %v11773_v29 = vld [vmem:[#allocation10 + $0x8f4] sm:$0xf0]  ;;  %v9425_v40 = vld [vmem:[#allocation10 + $0xb78] sm:$0xf0] }
 0x2cd   :  { %v9327_v42 = vld [vmem:[#allocation10 + $0xa98] sm:$0xf]  ;;  %4968 = vmatpush.bf16.msrb.mxu2 %v9136_v26  ;;  %v9104_v47 = vor.u32 %v11773_v29, %v9103_v27  ;;  %4982 = vmatpush.bf16.msrb.mxu3 %v9360_v36  ;;  %v9713_v26 = vld [vmem:[#allocation10 + $0xdb8] sm:$0xf0]  ;;  %v4741_v27 = vadd.f32 %v13234_v4, %v4728_v6 }
 0x2ce   :  { %v11829_v14 = vld [vmem:[#allocation10 + $0xab4] sm:$0xf0]  ;;  %5049 = vmatpush.bf16.msrb.mxu0 %v8276_v49  ;;  %v8209_v29 = vld [vmem:[#allocation10 + $0x1f8] sm:$0xf0]  ;;  %v9716_v49 = vor.u32 %v11921_v39, %v9713_v26 }
 0x2cf   :  { %v9071_v48 = vld [vmem:[#allocation10 + $0x898] sm:$0xf]  ;;  %v9328_v52 = vor.u32 %v11829_v14, %v9327_v42  ;;  %5062 = vmatpush.bf16.msrb.mxu1 %v8532_v51  ;;  %v13249_v42 = vadd.f32 %v13236_v5, %v4741_v27  ;;  %v4716_v14 = vpop.f32.mrf.mxu2  ;;  %v8212_v4 = vor.u32 %v11545_v28, %v8209_v29  ;;  %v11913_v30 = vld [vmem:[#allocation10 + $0xd5c] sm:$0xf] }
 0x2d0   :  { %v11765_v43 = vld [vmem:[#allocation10 + $0x8b4] sm:$0xf0]  ;;  %v9681_v51 = vld [vmem:[#allocation10 + $0xd78] sm:$0xf0] }
 0x2d1   :  { %v9295_v11 = vld [vmem:[#allocation10 + $0xa58] sm:$0xf]  ;;  %4969 = vmatpush.bf16.msrb.mxu2 %v9104_v47  ;;  %v9072_v35 = vor.u32 %v11765_v43, %v9071_v48  ;;  %4983 = vmatpush.bf16.msrb.mxu3 %v9328_v52  ;;  %v9460_v47 = vor.u32 %v11857_v59, %v9457_v24  ;;  %v11849_v48 = vld [vmem:[#allocation10 + $0xb5c] sm:$0xf]  ;;  %v4807_v20 = vpop.f32.mrf.mxu1 }
 0x2d2   :  { %v11821_v3 = vld [vmem:[#allocation10 + $0xa74] sm:$0xf0]  ;;  %5050 = vmatpush.bf16.msrb.mxu0 %v8244_v17  ;;  %v11537_v53 = vld [vmem:[#allocation10 + $0x19c] sm:$0xf] }
 0x2d3   :  { %v9039_v1 = vld [vmem:[#allocation10 + $0x858] sm:$0xf]  ;;  %v9296_v15 = vor.u32 %v11821_v3, %v9295_v11  ;;  %5063 = vmatpush.bf16.msrb.mxu1 %v8500_v0  ;;  %v8177_v5 = vld [vmem:[#allocation10 + $0x1b8] sm:$0xf0]  ;;  %v9428_v11 = vor.u32 %v11849_v48, %v9425_v40  ;;  %v9684_v3 = vor.u32 %v11913_v30, %v9681_v51  ;;  %v13255_v0 = vpop.f32.mrf.mxu0 }
 0x2d4   :  { %v11757_v2 = vld [vmem:[#allocation10 + $0x874] sm:$0xf0]  ;;  %v8180_v50 = vor.u32 %v11537_v53, %v8177_v5  ;;  %v9393_v18 = vld [vmem:[#allocation10 + $0xb38] sm:$0xf0] }
 0x2d5   :  { %v9263_v58 = vld [vmem:[#allocation10 + $0xa18] sm:$0xf]  ;;  %4970 = vmatpush.bf16.msrb.mxu2 %v9072_v35  ;;  %v9040_v25 = vor.u32 %v11757_v2, %v9039_v1  ;;  %4984 = vmatpush.bf16.msrb.mxu3 %v9296_v15  ;;  %v11905_v46 = vld [vmem:[#allocation10 + $0xd1c] sm:$0xf] }
 0x2d6   :  { %v11813_v10 = vld [vmem:[#allocation10 + $0xa34] sm:$0xf0]  ;;  %5095 = vmatpush.bf16.msra.mxu0 %v9492_v19  ;;  %5064 = vmatmul.bf16.vlgmr.msrb.gmra.mxu1 %v13083_v60  ;;  %v9649_v35 = vld [vmem:[#allocation10 + $0xd38] sm:$0xf0] }
 0x2d7   :  { %v9007_v34 = vld [vmem:[#allocation10 + $0x818] sm:$0xf]  ;;  %v9264_v41 = vor.u32 %v11813_v10, %v9263_v58  ;;  %5108 = vmatpush.bf16.msra.mxu1 %v9748_v23  ;;  %5051 = vmatmul.bf16.vlgmr.msrb.gmra.mxu0 %v13068_v22  ;;  %v11841_v22 = vld [vmem:[#allocation10 + $0xb1c] sm:$0xf]  ;;  %v9652_v2 = vor.u32 %v11905_v46, %v9649_v35 }
 0x2d8   :  { %v11749_v36 = vld [vmem:[#allocation10 + $0x834] sm:$0xf0]  ;;  %v11529_v62 = vld [vmem:[#allocation10 + $0x15c] sm:$0xf]  ;;  %v9396_v1 = vor.u32 %v11841_v22, %v9393_v18  ;;  %v4779_v22 = vpop.f32.mrf.mxu3 }
 0x2d9   :  { %v10127_v9 = vld [vmem:[#allocation10 + $0x10d8] sm:$0xf]  ;;  %4971 = vmatpush.bf16.msrb.mxu2 %v9040_v25  ;;  %v9008_v43 = vor.u32 %v11749_v36, %v9007_v34  ;;  %4985 = vmatpush.bf16.msrb.mxu3 %v9264_v41  ;;  %v8145_v33 = vld [vmem:[#allocation10 + $0x178] sm:$0xf0] }
 0x2da   :  { %v12029_v32 = vld [vmem:[#allocation10 + $0x10f4] sm:$0xf0]  ;;  %5096 = vmatpush.bf16.msra.mxu0 %v9460_v47  ;;  %v11833_v6 = vld [vmem:[#allocation10 + $0xadc] sm:$0xf]  ;;  %v8148_v15 = vor.u32 %v11529_v62, %v8145_v33  ;;  %v4766_v62 = vpop.f32.mrf.mxu2 }
 0x2db   :  { %v10128_v52 = vor.u32 %v12029_v32, %v10127_v9  ;;  %v10095_v54 = vld [vmem:[#allocation10 + $0x1098] sm:$0xf]  ;;  %5109 = vmatpush.bf16.msra.mxu1 %v9716_v49  ;;  %v9361_v58 = vld [vmem:[#allocation10 + $0xaf8] sm:$0xf0]  ;;  %v4846_v51 = vpop.f32.mrf.mxu0 }
 0x2dc   :  { %v12021_v56 = vld [vmem:[#allocation10 + $0x10b4] sm:$0xf0]  ;;  %4986 = vmatmul.bf16.vlgmr.msrb.gmra.mxu3 %v13101_v8  ;;  %v11897_v19 = vld [vmem:[#allocation10 + $0xcdc] sm:$0xf]  ;;  %v9364_v26 = vor.u32 %v11833_v6, %v9361_v58 }
 0x2dd   :  { %5030 = vmatpush.bf16.msra.mxu3 %v8212_v4  ;;  %4972 = vmatpush.bf16.msrb.mxu2 %v9008_v43  ;;  %v10096_v60 = vor.u32 %v12021_v56, %v10095_v54  ;;  %v10063_v63 = vld [vmem:[#allocation10 + $0x1058] sm:$0xf]  ;;  %v9617_v23 = vld [vmem:[#allocation10 + $0xcf8] sm:$0xf0] }
 0x2de   :  { %v12013_v17 = vld [vmem:[#allocation10 + $0x1074] sm:$0xf0]  ;;  %5097 = vmatpush.bf16.msra.mxu0 %v9428_v11  ;;  %v11521_v59 = vld [vmem:[#allocation10 + $0x11c] sm:$0xf]  ;;  %v9620_v28 = vor.u32 %v11897_v19, %v9617_v23  ;;  %v10383_v23 = vld [vmem:[#allocation13 + $0x1e0] sm:$0xf] }
 0x2df   :  { %5110 = vmatpush.bf16.msra.mxu1 %v9684_v3  ;;  %v10064_v10 = vor.u32 %v12013_v17, %v10063_v63  ;;  %v8113_v24 = vld [vmem:[#allocation10 + $0x138] sm:$0xf0]  ;;  %v10031_v25 = vld [vmem:[#allocation10 + $0x1018] sm:$0xf] }
 0x2e0   :  { %4973 = vmatmul.bf16.vlgmr.msrb.gmra.mxu2 %v13099_v55  ;;  %v12005_v39 = vld [vmem:[#allocation10 + $0x1034] sm:$0xf0]  ;;  %v11825_v27 = vld [vmem:[#allocation10 + $0xa9c] sm:$0xf]  ;;  %v8116_v36 = vor.u32 %v11521_v59, %v8113_v24 }
 0x2e1   :  { %5021 = vmatpush.bf16.msra.mxu2 %v10128_v52  ;;  %5031 = vmatpush.bf16.msra.mxu3 %v8180_v50  ;;  %v11737_v29 = vld [vmem:[#allocation10 + $0x7dc] sm:$0xf]  ;;  %v10032_v32 = vor.u32 %v12005_v39, %v10031_v25  ;;  %v12060_v58 = vld [vmem:[#allocation13 + $0xec] sm:$0xf0] }
 0x2e2   :  { %5098 = vmatpush.bf16.msra.mxu0 %v9396_v1  ;;  %v8977_v34 = vld [vmem:[#allocation10 + $0x7f8] sm:$0xf0] }
 0x2e3   :  { %5111 = vmatpush.bf16.msra.mxu1 %v9652_v2  ;;  %v9329_v38 = vld [vmem:[#allocation10 + $0xab8] sm:$0xf0]  ;;  %v8980_v49 = vor.u32 %v11737_v29, %v8977_v34  ;;  %v4767_v2 = vadd.f32 %v4766_v62, %v13249_v42 }
 0x2e4   :  { %v11889_v41 = vld [vmem:[#allocation10 + $0xc9c] sm:$0xf]  ;;  %v9332_v48 = vor.u32 %v11825_v27, %v9329_v38 }
 0x2e5   :  { %5022 = vmatpush.bf16.msra.mxu2 %v10096_v60  ;;  %5032 = vmatpush.bf16.msra.mxu3 %v8148_v15  ;;  %v9585_v9 = vld [vmem:[#allocation10 + $0xcb8] sm:$0xf0]  ;;  %v10255_v15 = vld [vmem:[#allocation13 + $0xe0] sm:$0xf]  ;;  %v4780_v59 = vadd.f32 %v4779_v22, %v4767_v2 }
 0x2e6   :  { %v11513_v14 = vld [vmem:[#allocation10 + $0xdc] sm:$0xf]  ;;  %5099 = vmatpush.bf16.msra.mxu0 %v9364_v26  ;;  %v9588_v4 = vor.u32 %v11889_v41, %v9585_v9  ;;  %v13260_v26 = vpop.f32.mrf.mxu1  ;;  %v10239_v41 = vld [vmem:[#allocation13 + $0xc0] sm:$0xf]  ;;  %v12056_v9 = vld [vmem:[#allocation13 + $0xcc] sm:$0xf0] }
 0x2e7   :  { %v8081_v47 = vld [vmem:[#allocation10 + $0xf8] sm:$0xf0]  ;;  %5112 = vmatpush.bf16.msra.mxu1 %v9620_v28  ;;  %v10256_v28 = vor.u32 %v12060_v58, %v10255_v15 }
 0x2e8   :  { %v11817_v43 = vld [vmem:[#allocation10 + $0xa5c] sm:$0xf]  ;;  %v8084_v52 = vor.u32 %v11513_v14, %v8081_v47  ;;  %v12088_v14 = vld [vmem:[#allocation13 + $0x1cc] sm:$0xf0] }
 0x2e9   :  { %5023 = vmatpush.bf16.msra.mxu2 %v10064_v10  ;;  %v11729_v40 = vld [vmem:[#allocation10 + $0x79c] sm:$0xf]  ;;  %5033 = vmatpush.bf16.msra.mxu3 %v8116_v36  ;;  %v12092_v10 = vld [vmem:[#allocation13 + $0x1ec] sm:$0xf0]  ;;  %v13263_v36 = vadd.f32 %v13242_v13, %v4780_v59  ;;  %v10191_v59 = vld [vmem:[#allocation13 + $0x60] sm:$0xf] }
 0x2ea   :  { %v8945_v30 = vld [vmem:[#allocation10 + $0x7b8] sm:$0xf0]  ;;  %5100 = vmatpush.bf16.msra.mxu0 %v9332_v48  ;;  %v10384_v38 = vor.u32 %v12092_v10, %v10383_v23  ;;  %v4781_v48 = vpop.f32.mrf.mxu3 }
 0x2eb   :  { %v9297_v53 = vld [vmem:[#allocation10 + $0xa78] sm:$0xf0]  ;;  %v8948_v11 = vor.u32 %v11729_v40, %v8945_v30  ;;  %5113 = vmatpush.bf16.msra.mxu1 %v9588_v4  ;;  %v10240_v30 = vor.u32 %v12056_v9, %v10239_v41  ;;  %v12040_v41 = vld [vmem:[#allocation13 + $0x4c] sm:$0xf0] }
 0x2ec   :  { %v11881_v5 = vld [vmem:[#allocation10 + $0xc5c] sm:$0xf]  ;;  %v9300_v50 = vor.u32 %v11817_v43, %v9297_v53  ;;  %v4768_v43 = vpop.f32.mrf.mxu2 }
 0x2ed   :  { %v9553_v54 = vld [vmem:[#allocation10 + $0xc78] sm:$0xf0]  ;;  %5024 = vmatpush.bf16.msra.mxu2 %v10032_v32  ;;  %5034 = vmatpush.bf16.msra.mxu3 %v8084_v52  ;;  %v10367_v32 = vld [vmem:[#allocation13 + $0x1c0] sm:$0xf] }
 0x2ee   :  { %v11505_v56 = vld [vmem:[#allocation10 + $0x9c] sm:$0xf]  ;;  %v9556_v18 = vor.u32 %v11881_v5, %v9553_v54  ;;  %5101 = vmatpush.bf16.msra.mxu0 %v9300_v50  ;;  %v10368_v52 = vor.u32 %v12088_v14, %v10367_v32  ;;  %v10223_v5 = vld [vmem:[#allocation13 + $0xa0] sm:$0xf]  ;;  %v12052_v54 = vld [vmem:[#allocation13 + $0xac] sm:$0xf0]  ;;  %v4859_v50 = vpop.f32.mrf.mxu1 }
 0x2ef   :  { %v8049_v20 = vld [vmem:[#allocation10 + $0xb8] sm:$0xf0]  ;;  %v10303_v14 = vld [vmem:[#allocation13 + $0x140] sm:$0xf] }
 0x2f0   :  { %v11809_v3 = vld [vmem:[#allocation10 + $0xa1c] sm:$0xf]  ;;  %v8052_v33 = vor.u32 %v11505_v56, %v8049_v20  ;;  %5114 = vmatpush.bf16.msra.mxu1 %v9556_v18  ;;  %10139 = vmatmul.msk.bf16.vlgmr.msra.gmra.mxu2 %vm4207_vm2, %v13105_v31  ;;  %v10351_v56 = vld [vmem:[#allocation13 + $0x1a0] sm:$0xf]  ;;  %v12084_v20 = vld [vmem:[#allocation13 + $0x1ac] sm:$0xf0]  ;;  %v10224_v18 = vor.u32 %v12052_v54, %v10223_v5 }
 0x2f1   :  { %5069 = vmatpush.bf16.msrb.mxu2 %v8980_v49  ;;  %v9265_v46 = vld [vmem:[#allocation10 + $0xa38] sm:$0xf0]  ;;  %v10159_v5 = vld [vmem:[#allocation13 + $0x20] sm:$0xf]  ;;  %v12036_v54 = vld [vmem:[#allocation13 + $0x2c] sm:$0xf0] }
 0x2f2   :  { %v11721_v35 = vld [vmem:[#allocation10 + $0x75c] sm:$0xf]  ;;  %v9268_v24 = vor.u32 %v11809_v3, %v9265_v46  ;;  %5035 = vmatpush.bf16.msra.mxu3 %v8052_v33  ;;  %v10207_v33 = vld [vmem:[#allocation13 + $0x80] sm:$0xf] }
 0x2f3   :  { %v8913_v60 = vld [vmem:[#allocation10 + $0x778] sm:$0xf0] }
 0x2f4   :  { %v11873_v63 = vld [vmem:[#allocation10 + $0xc1c] sm:$0xf]  ;;  %v8916_v19 = vor.u32 %v11721_v35, %v8913_v60  ;;  %5102 = vmatpush.bf16.msra.mxu0 %v9268_v24  ;;  %v10352_v60 = vor.u32 %v12084_v20, %v10351_v56  ;;  %v12044_v24 = vld [vmem:[#allocation13 + $0x6c] sm:$0xf0] }
 0x2f5   :  { %v9521_v17 = vld [vmem:[#allocation10 + $0xc38] sm:$0xf0]  ;;  %5070 = vmatpush.bf16.msrb.mxu2 %v8948_v11 }
 0x2f6   :  { %v11497_v1 = vld [vmem:[#allocation10 + $0x5c] sm:$0xf]  ;;  %v9524_v25 = vor.u32 %v11873_v63, %v9521_v17  ;;  %v12048_v63 = vld [vmem:[#allocation13 + $0x8c] sm:$0xf0]  ;;  %v13270_v48 = vpop.f32.mrf.mxu1 }
 0x2f7   :  { %v8017_v6 = vld [vmem:[#allocation10 + $0x78] sm:$0xf0]  ;;  %5103 = vmatmul.bf16.vlgmr.msra.gmra.mxu0 %v13101_v8  ;;  %v10335_v8 = vld [vmem:[#allocation13 + $0x180] sm:$0xf]  ;;  %v12080_v17 = vld [vmem:[#allocation13 + $0x18c] sm:$0xf0] }
 0x2f8   :  { %v11489_v39 = vld [vmem:[#allocation10 + $0x1c] sm:$0xf]  ;;  %v8020_v42 = vor.u32 %v11497_v1, %v8017_v6  ;;  %5115 = vmatpush.bf16.msra.mxu1 %v9524_v25  ;;  %6717 = vmatpush.bf16.msrb.mxu0 %v10256_v28  ;;  %v10208_v6 = vor.u32 %v12048_v63, %v10207_v33  ;;  %v10336_v23 = vor.u32 %v12080_v17, %v10335_v8  ;;  %v10319_v25 = vld [vmem:[#allocation13 + $0x160] sm:$0xf]  ;;  %v4831_v33 = vpop.f32.mrf.mxu3 }
 0x2f9   :  { %v7985_v27 = vld [vmem:[#allocation10 + $0x38] sm:$0xf0]  ;;  %5071 = vmatpush.bf16.msrb.mxu2 %v8916_v19  ;;  %v13268_v19 = vpop.f32.mrf.mxu0  ;;  %v10160_v63 = vor.u32 %v12036_v54, %v10159_v5  ;;  %v10143_v17 = vld [vmem:[#allocation13] sm:$0xf] }
 0x2fa   :  { %v11713_v29 = vld [vmem:[#allocation10 + $0x71c] sm:$0xf]  ;;  %5036 = vmatpush.bf16.msra.mxu3 %v8020_v42  ;;  %v7988_v40 = vor.u32 %v11489_v39, %v7985_v27  ;;  %v12076_v39 = vld [vmem:[#allocation13 + $0x16c] sm:$0xf0] }
 0x2fb   :  { %v8881_v34 = vld [vmem:[#allocation10 + $0x738] sm:$0xf0]  ;;  %5116 = vmatmul.bf16.vlgmr.msra.gmra.mxu1 %v13093_v44  ;;  %v10320_v9 = vor.u32 %v12076_v39, %v10319_v25  ;;  %v10767_v39 = vld [vmem:[#allocation13 + $0x4e0] sm:$0xf] }
 0x2fc   :  { %v11801_v47 = vld [vmem:[#allocation10 + $0x9dc] sm:$0xf]  ;;  %v8884_v4 = vor.u32 %v11713_v29, %v8881_v34  ;;  %6730 = vmatpush.bf16.msrb.mxu1 %v10384_v38  ;;  %6718 = vmatpush.bf16.msrb.mxu0 %v10240_v30  ;;  %v10192_v29 = vor.u32 %v12044_v24, %v10191_v59  ;;  %v10175_v38 = vld [vmem:[#allocation13 + $0x40] sm:$0xf] }
 0x2fd   :  { %v9233_v49 = vld [vmem:[#allocation10 + $0x9f8] sm:$0xf0] }
 0x2fe   :  { %v11705_v51 = vld [vmem:[#allocation10 + $0x6dc] sm:$0xf]  ;;  %v9236_v53 = vor.u32 %v11801_v47, %v9233_v49  ;;  %5072 = vmatpush.bf16.msrb.mxu2 %v8884_v4  ;;  %5037 = vmatpush.bf16.msra.mxu3 %v7988_v40  ;;  %v12072_v4 = vld [vmem:[#allocation13 + $0x14c] sm:$0xf0] }
 0x2ff   :  { %v8849_v13 = vld [vmem:[#allocation10 + $0x6f8] sm:$0xf0]  ;;  %v10304_v20 = vor.u32 %v12072_v4, %v10303_v14 }
 0x300   :  { %v11793_v11 = vld [vmem:[#allocation10 + $0x99c] sm:$0xf]  ;;  %v8852_v22 = vor.u32 %v11705_v51, %v8849_v13  ;;  %6731 = vmatpush.bf16.msrb.mxu1 %v10368_v52  ;;  %6719 = vmatpush.bf16.msrb.mxu0 %v10224_v18  ;;  %v13272_v51 = vld [vmem:[#allocation11] sm:$0xff]  ;;  %v10176_v52 = vor.u32 %v12040_v41, %v10175_v38  ;;  %v12068_v18 = vld [vmem:[#allocation13 + $0x12c] sm:$0xf0] }
 0x301   :  { %v9201_v3 = vld [vmem:[#allocation10 + $0x9b8] sm:$0xf0]  ;;  %5038 = vmatmul.bf16.vlgmr.msra.gmra.mxu3 %v13066_v21  ;;  %v1445_v13 = vperm.slane %v13272_v51, 5  ;;  %v4898_v56 = vpop.f32.mrf.mxu0 }
 0x302   :  { %v11697_v46 = vld [vmem:[#allocation10 + $0x69c] sm:$0xf]  ;;  %5082 = vmatpush.bf16.msrb.mxu3 %v9236_v53  ;;  %v9204_v62 = vor.u32 %v11793_v11, %v9201_v3  ;;  %5073 = vmatpush.bf16.msrb.mxu2 %v8852_v22  ;;  %v10287_v3 = vld [vmem:[#allocation13 + $0x120] sm:$0xf] }
 0x303   :  { %v8817_v35 = vld [vmem:[#allocation10 + $0x6b8] sm:$0xf0]  ;;  %v4806_v59 = vadd.f32 %v13245_v16, %v1445_v13  ;;  %v12184_v13 = vld [vmem:[#allocation13 + $0x4cc] sm:$0xf0] }
 0x304   :  { %v11785_v44 = vld [vmem:[#allocation10 + $0x95c] sm:$0xf]  ;;  %v8820_v2 = vor.u32 %v11697_v46, %v8817_v35  ;;  %6732 = vmatpush.bf16.msrb.mxu1 %v10352_v60  ;;  %6720 = vmatpush.bf16.msrb.mxu0 %v10208_v6  ;;  %v5147_v60 = vmul.f32 0.01, %v13144_v12 }
 0x305   :  { %v9169_v1 = vld [vmem:[#allocation10 + $0x978] sm:$0xf0] }
 0x306   :  { %v11689_v15 = vld [vmem:[#allocation10 + $0x65c] sm:$0xf]  ;;  %5083 = vmatpush.bf16.msrb.mxu3 %v9204_v62  ;;  %v9172_v10 = vor.u32 %v11785_v44, %v9169_v1  ;;  %5074 = vmatpush.bf16.msrb.mxu2 %v8820_v2  ;;  %v5148_v62 = vmul.f32 0.01, %v13175_v7  ;;  %v12032_v44 = vld [vmem:[#allocation13 + $0xc] sm:$0xf0]  ;;  %v10288_v2 = vor.u32 %v12068_v18, %v10287_v3  ;;  %v5155_v41 = vmax.f32 %v13144_v12, %v5147_v60  ;;  %v4833_v12 = vpop.f32.mrf.mxu3 }
 0x307   :  { %v8785_v58 = vld [vmem:[#allocation10 + $0x678] sm:$0xf0]  ;;  %v10271_v1 = vld [vmem:[#allocation13 + $0x100] sm:$0xf]  ;;  %v12124_v12 = vld [vmem:[#allocation13 + $0x2ec] sm:$0xf0] }
 0x308   :  { %v11777_v42 = vld [vmem:[#allocation10 + $0x91c] sm:$0xf]  ;;  %v8788_v21 = vor.u32 %v11689_v15, %v8785_v58  ;;  %6733 = vmatpush.bf16.msrb.mxu1 %v10336_v23  ;;  %6721 = vmatpush.bf16.msrb.mxu0 %v10192_v29  ;;  %v12064_v15 = vld [vmem:[#allocation13 + $0x10c] sm:$0xf0]  ;;  %v5156_v14 = vmax.f32 %v13175_v7, %v5148_v62 }
 0x309   :  { %v9137_v28 = vld [vmem:[#allocation10 + $0x938] sm:$0xf0] }
 0x30a   :  { %v11681_v27 = vld [vmem:[#allocation10 + $0x61c] sm:$0xf]  ;;  %5084 = vmatpush.bf16.msrb.mxu3 %v9172_v10  ;;  %v9140_v32 = vor.u32 %v11777_v42, %v9137_v28  ;;  %5075 = vmatpush.bf16.msrb.mxu2 %v8788_v21  ;;  %v4911_v10 = vpop.f32.mrf.mxu1  ;;  %v4818_v42 = vpop.f32.mrf.mxu2  ;;  %v12188_v28 = vld [vmem:[#allocation13 + $0x4ec] sm:$0xf0]  ;;  %v10895_v21 = vld [vmem:[#allocation13 + $0x5e0] sm:$0xf] }
 0x30b   :  { %v8753_v34 = vld [vmem:[#allocation10 + $0x638] sm:$0xf0]  ;;  %v4819_v29 = vadd.f32 %v4818_v42, %v4806_v59  ;;  %v12176_v10 = vld [vmem:[#allocation13 + $0x48c] sm:$0xf0]  ;;  %v10847_v59 = vld [vmem:[#allocation13 + $0x580] sm:$0xf] }
 0x30c   :  { %v11993_v47 = vld [vmem:[#allocation10 + $0xfdc] sm:$0xf]  ;;  %v8756_v30 = vor.u32 %v11681_v27, %v8753_v34  ;;  %6734 = vmatpush.bf16.msrb.mxu1 %v10320_v9  ;;  %6722 = vmatpush.bf16.msrb.mxu0 %v10176_v52  ;;  %v12220_v27 = vld [vmem:[#allocation13 + $0x5ec] sm:$0xf0]  ;;  %v10144_v34 = vor.u32 %v12032_v44, %v10143_v17  ;;  %v10272_v9 = vor.u32 %v12064_v15, %v10271_v1  ;;  %v10879_v52 = vld [vmem:[#allocation13 + $0x5c0] sm:$0xf] }
 0x30d   :  { %v10001_v49 = vld [vmem:[#allocation10 + $0xff8] sm:$0xf0]  ;;  %v10896_v4 = vor.u32 %v12220_v27, %v10895_v21  ;;  %v13291_v27 = vpop.f32.mrf.mxu0 }
 0x30e   :  { %v11769_v43 = vld [vmem:[#allocation10 + $0x8dc] sm:$0xf]  ;;  %v10004_v53 = vor.u32 %v11993_v47, %v10001_v49  ;;  %5085 = vmatpush.bf16.msrb.mxu3 %v9140_v32  ;;  %5076 = vmatpush.bf16.msrb.mxu2 %v8756_v30  ;;  %v4832_v47 = vadd.f32 %v4831_v33, %v4819_v29  ;;  %v10768_v49 = vor.u32 %v12188_v28, %v10767_v39  ;;  %v10751_v30 = vld [vmem:[#allocation13 + $0x4c0] sm:$0xf] }
 0x30f   :  { %v9105_v40 = vld [vmem:[#allocation10 + $0x8f8] sm:$0xf0]  ;;  %v10752_v18 = vor.u32 %v12184_v13, %v10751_v30  ;;  %v10863_v33 = vld [vmem:[#allocation13 + $0x5a0] sm:$0xf] }
 0x310   :  { %v9108_v11 = vor.u32 %v11769_v43, %v9105_v40  ;;  %v11985_v22 = vld [vmem:[#allocation10 + $0xf9c] sm:$0xf]  ;;  %6735 = vmatpush.bf16.msrb.mxu1 %v10304_v20  ;;  %6723 = vmatpush.bf16.msrb.mxu0 %v10160_v63  ;;  %v13282_v20 = vadd.f32 %v13255_v0, %v4832_v47  ;;  %v12180_v0 = vld [vmem:[#allocation13 + $0x4ac] sm:$0xf0] }
 0x311   :  { %v9969_v50 = vld [vmem:[#allocation10 + $0xfb8] sm:$0xf0]  ;;  %5077 = vmatmul.bf16.vlgmr.msrb.gmra.mxu2 %v13085_v61  ;;  %v12212_v63 = vld [vmem:[#allocation13 + $0x5ac] sm:$0xf0] }
 0x312   :  { %v11761_v46 = vld [vmem:[#allocation10 + $0x89c] sm:$0xf]  ;;  %5121 = vmatpush.bf16.msra.mxu2 %v10004_v53  ;;  %v9972_v8 = vor.u32 %v11985_v22, %v9969_v50  ;;  %5086 = vmatpush.bf16.msrb.mxu3 %v9108_v11  ;;  %v12216_v53 = vld [vmem:[#allocation13 + $0x5cc] sm:$0xf0]  ;;  %v13284_v11 = vpack.c.bf16 %v5155_v41, %v5155_v41  ;;  %v13286_v50 = vpack.c.bf16 %v5156_v14, %v5156_v14  ;;  %v4820_v60 = vpop.f32.mrf.mxu2  ;;  %v13293_v41 = vpop.f32.mrf.mxu1 }
 0x313   :  { %v9073_v35 = vld [vmem:[#allocation10 + $0x8b8] sm:$0xf0]  ;;  %v10864_v15 = vor.u32 %v12212_v63, %v10863_v33  ;;  %v10671_v33 = vld [vmem:[#allocation13 + $0x420] sm:$0xf] }
 0x314   :  { %v9076_v6 = vor.u32 %v11761_v46, %v9073_v35  ;;  %v11977_v58 = vld [vmem:[#allocation10 + $0xf5c] sm:$0xf]  ;;  %6736 = vmatpush.bf16.msrb.mxu1 %v10288_v2  ;;  %6724 = vmatpush.bf16.msrb.mxu0 %v10144_v34  ;;  %v10880_v46 = vor.u32 %v12216_v53, %v10879_v52  ;;  %v10735_v35 = vld [vmem:[#allocation13 + $0x4a0] sm:$0xf] }
 0x315   :  { %v9937_v23 = vld [vmem:[#allocation10 + $0xf78] sm:$0xf0]  ;;  %v10687_v52 = vld [vmem:[#allocation13 + $0x440] sm:$0xf]  ;;  %v4950_v60 = vpop.f32.mrf.mxu0 }
 0x316   :  { %v11753_v24 = vld [vmem:[#allocation10 + $0x85c] sm:$0xf]  ;;  %5122 = vmatpush.bf16.msra.mxu2 %v9972_v8  ;;  %v9940_v38 = vor.u32 %v11977_v58, %v9937_v23  ;;  %5087 = vmatpush.bf16.msrb.mxu3 %v9076_v6  ;;  %v10736_v6 = vor.u32 %v12180_v0, %v10735_v35  ;;  %v10719_v58 = vld [vmem:[#allocation13 + $0x480] sm:$0xf]  ;;  %v12152_v35 = vld [vmem:[#allocation13 + $0x3cc] sm:$0xf0] }
 0x317   :  { %v9041_v25 = vld [vmem:[#allocation10 + $0x878] sm:$0xf0]  ;;  %6725 = vmatmul.bf16.vlgmr.msrb.gmra.mxu0 %v13284_v11  ;;  %v10720_v29 = vor.u32 %v12176_v10, %v10719_v58  ;;  %v10511_v53 = vld [vmem:[#allocation13 + $0x2e0] sm:$0xf]  ;;  %v12108_v60 = vld [vmem:[#allocation13 + $0x26c] sm:$0xf0] }
 0x318   :  { %v9044_v16 = vor.u32 %v11753_v24, %v9041_v25  ;;  %v11969_v32 = vld [vmem:[#allocation10 + $0xf1c] sm:$0xf]  ;;  %6737 = vmatpush.bf16.msrb.mxu1 %v10272_v9  ;;  %6769 = vmatpush.bf16.msra.mxu0 %v10768_v49  ;;  %v12208_v24 = vld [vmem:[#allocation13 + $0x58c] sm:$0xf0]  ;;  %v10639_v49 = vld [vmem:[#allocation13 + $0x3e0] sm:$0xf]  ;;  %v4883_v58 = vpop.f32.mrf.mxu3 }
 0x319   :  { %v9905_v61 = vld [vmem:[#allocation10 + $0xf38] sm:$0xf0]  ;;  %v10848_v34 = vor.u32 %v12208_v24, %v10847_v59  ;;  %v10495_v63 = vld [vmem:[#allocation13 + $0x2c0] sm:$0xf]  ;;  %v12148_v59 = vld [vmem:[#allocation13 + $0x3ac] sm:$0xf0] }
 0x31a   :  { %v11745_v43 = vld [vmem:[#allocation10 + $0x81c] sm:$0xf]  ;;  %5123 = vmatpush.bf16.msra.mxu2 %v9940_v38  ;;  %v9908_v5 = vor.u32 %v11969_v32, %v9905_v61  ;;  %5088 = vmatpush.bf16.msrb.mxu3 %v9044_v16  ;;  %v10703_v38 = vld [vmem:[#allocation13 + $0x460] sm:$0xf]  ;;  %v12172_v16 = vld [vmem:[#allocation13 + $0x46c] sm:$0xf0] }
 0x31b   :  { %v9009_v40 = vld [vmem:[#allocation10 + $0x838] sm:$0xf0]  ;;  %6738 = vmatmul.bf16.vlgmr.msrb.gmra.mxu1 %v13286_v50  ;;  %v10831_v32 = vld [vmem:[#allocation13 + $0x560] sm:$0xf]  ;;  %v10704_v30 = vor.u32 %v12172_v16, %v10703_v38  ;;  %v12192_v38 = vld [vmem:[#allocation13 + $0x50c] sm:$0xf0] }
 0x31c   :  { %v12025_v54 = vld [vmem:[#allocation10 + $0x10dc] sm:$0xf]  ;;  %v9012_v7 = vor.u32 %v11745_v43, %v9009_v40  ;;  %6782 = vmatpush.bf16.msra.mxu1 %v10896_v4  ;;  %6770 = vmatpush.bf16.msra.mxu0 %v10752_v18  ;;  %v12156_v4 = vld [vmem:[#allocation13 + $0x3ec] sm:$0xf0]  ;;  %v10512_v18 = vor.u32 %v12124_v12, %v10511_v53  ;;  %v10607_v10 = vld [vmem:[#allocation13 + $0x3a0] sm:$0xf]  ;;  %v4870_v16 = vpop.f32.mrf.mxu2 }
 0x31d   :  { %v10129_v56 = vld [vmem:[#allocation10 + $0x10f8] sm:$0xf0]  ;;  %v10655_v24 = vld [vmem:[#allocation13 + $0x400] sm:$0xf]  ;;  %v12054_v12 = vld [vmem:[#allocation13 + $0xc4] sm:$0xf] }
 0x31e   :  { %v11961_v3 = vld [vmem:[#allocation10 + $0xedc] sm:$0xf]  ;;  %v10132_v62 = vor.u32 %v12025_v54, %v10129_v56  ;;  %5124 = vmatpush.bf16.msra.mxu2 %v9908_v5  ;;  %5089 = vmatpush.bf16.msrb.mxu3 %v9012_v7  ;;  %v12168_v54 = vld [vmem:[#allocation13 + $0x44c] sm:$0xf0]  ;;  %v10815_v56 = vld [vmem:[#allocation13 + $0x540] sm:$0xf] }
 0x31f   :  { %v9873_v22 = vld [vmem:[#allocation10 + $0xef8] sm:$0xf0]  ;;  %v12200_v7 = vld [vmem:[#allocation13 + $0x54c] sm:$0xf0] }
 0x320   :  { %v9876_v8 = vor.u32 %v11961_v3, %v9873_v22  ;;  %v12017_v17 = vld [vmem:[#allocation10 + $0x109c] sm:$0xf]  ;;  %6783 = vmatpush.bf16.msra.mxu1 %v10880_v46  ;;  %6771 = vmatpush.bf16.msra.mxu0 %v10736_v6  ;;  %v10640_v3 = vor.u32 %v12156_v4, %v10639_v49  ;;  %v10623_v46 = vld [vmem:[#allocation13 + $0x3c0] sm:$0xf]  ;;  %v10816_v0 = vor.u32 %v12200_v7, %v10815_v56  ;;  %v5151_v6 = vmul.f32 0.01, %v13263_v36 }
 0x321   :  { %v10097_v44 = vld [vmem:[#allocation10 + $0x10b8] sm:$0xf0]  ;;  %5090 = vmatmul.bf16.vlgmr.msrb.gmra.mxu3 %v13099_v55  ;;  %v12204_v55 = vld [vmem:[#allocation13 + $0x56c] sm:$0xf0]  ;;  %v10591_v4 = vld [vmem:[#allocation13 + $0x380] sm:$0xf] }
 0x322   :  { %v11953_v1 = vld [vmem:[#allocation10 + $0xe9c] sm:$0xf]  ;;  %5138 = vmatpush.bf16.msra.mxu3 %v10132_v62  ;;  %v10100_v23 = vor.u32 %v12017_v17, %v10097_v44  ;;  %5125 = vmatpush.bf16.msra.mxu2 %v9876_v8  ;;  %v10832_v13 = vor.u32 %v12204_v55, %v10831_v32  ;;  %v10688_v62 = vor.u32 %v12168_v54, %v10687_v52  ;;  %v12120_v8 = vld [vmem:[#allocation13 + $0x2cc] sm:$0xf0]  ;;  %v4963_v17 = vpop.f32.mrf.mxu1  ;;  %v12086_v54 = vld [vmem:[#allocation13 + $0x1c4] sm:$0xf] }
 0x323   :  { %v9841_v2 = vld [vmem:[#allocation10 + $0xeb8] sm:$0xf0]  ;;  %v12164_v44 = vld [vmem:[#allocation13 + $0x42c] sm:$0xf0]  ;;  %v10608_v32 = vor.u32 %v12148_v59, %v10607_v10 }
 0x324   :  { %v9844_v25 = vor.u32 %v11953_v1, %v9841_v2  ;;  %v12009_v39 = vld [vmem:[#allocation10 + $0x105c] sm:$0xf]  ;;  %6784 = vmatpush.bf16.msra.mxu1 %v10864_v15  ;;  %6772 = vmatpush.bf16.msra.mxu0 %v10720_v29  ;;  %v10799_v1 = vld [vmem:[#allocation13 + $0x520] sm:$0xf]  ;;  %v12196_v2 = vld [vmem:[#allocation13 + $0x52c] sm:$0xf0]  ;;  %v10624_v15 = vor.u32 %v12152_v35, %v10623_v46  ;;  %v4858_v29 = vadd.f32 %v13260_v26, %v13282_v20 }
 0x325   :  { %v10065_v42 = vld [vmem:[#allocation10 + $0x1078] sm:$0xf0]  ;;  %v10447_v35 = vld [vmem:[#allocation13 + $0x260] sm:$0xf] }
 0x326   :  { %v11945_v28 = vld [vmem:[#allocation10 + $0xe5c] sm:$0xf]  ;;  %5139 = vmatpush.bf16.msra.mxu3 %v10100_v23  ;;  %v10068_v9 = vor.u32 %v12009_v39, %v10065_v42  ;;  %5126 = vmatpush.bf16.msra.mxu2 %v9844_v25  ;;  %v10496_v23 = vor.u32 %v12120_v8, %v10495_v63  ;;  %v10672_v25 = vor.u32 %v12164_v44, %v10671_v33  ;;  %v12160_v42 = vld [vmem:[#allocation13 + $0x40c] sm:$0xf0]  ;;  %v12050_v63 = vld [vmem:[#allocation13 + $0xa4] sm:$0xf] }
 0x327   :  { %v9809_v21 = vld [vmem:[#allocation10 + $0xe78] sm:$0xf0]  ;;  %v10800_v39 = vor.u32 %v12196_v2, %v10799_v1  ;;  %v10656_v26 = vor.u32 %v12160_v42, %v10655_v24  ;;  %v12082_v44 = vld [vmem:[#allocation13 + $0x1a4] sm:$0xf] }
 0x328   :  { %v9812_v61 = vor.u32 %v11945_v28, %v9809_v21  ;;  %v12001_v14 = vld [vmem:[#allocation10 + $0x101c] sm:$0xf]  ;;  %6785 = vmatpush.bf16.msra.mxu1 %v10848_v34  ;;  %6773 = vmatpush.bf16.msra.mxu0 %v10704_v30  ;;  %v10479_v28 = vld [vmem:[#allocation13 + $0x2a0] sm:$0xf]  ;;  %v12116_v21 = vld [vmem:[#allocation13 + $0x2ac] sm:$0xf0] }
 0x329   :  { %v10033_v47 = vld [vmem:[#allocation10 + $0x1038] sm:$0xf0]  ;;  %v10783_v34 = vld [vmem:[#allocation13 + $0x500] sm:$0xf]  ;;  %v10480_v49 = vor.u32 %v12116_v21, %v10479_v28  ;;  %v12112_v30 = vld [vmem:[#allocation13 + $0x28c] sm:$0xf0] }
 0x32a   :  { %v11937_v43 = vld [vmem:[#allocation10 + $0xe1c] sm:$0xf]  ;;  %5140 = vmatpush.bf16.msra.mxu3 %v10068_v9  ;;  %v10036_v5 = vor.u32 %v12001_v14, %v10033_v47  ;;  %5127 = vmatpush.bf16.msra.mxu2 %v9812_v61  ;;  %v12058_v9 = vld [vmem:[#allocation13 + $0xe4] sm:$0xf]  ;;  %v4871_v47 = vadd.f32 %v4870_v16, %v4858_v29  ;;  %v10784_v20 = vor.u32 %v12192_v38, %v10783_v34  ;;  %v10543_v38 = vld [vmem:[#allocation13 + $0x320] sm:$0xf] }
 0x32b   :  { %v9777_v40 = vld [vmem:[#allocation10 + $0xe38] sm:$0xf0]  ;;  %v12090_v61 = vld [vmem:[#allocation13 + $0x1e4] sm:$0xf]  ;;  %v10415_v16 = vld [vmem:[#allocation13 + $0x220] sm:$0xf] }
 0x32c   :  { %v9780_v22 = vor.u32 %v11937_v43, %v9777_v40  ;;  %6786 = vmatpush.bf16.msra.mxu1 %v10832_v13  ;;  %6774 = vmatpush.bf16.msra.mxu0 %v10688_v62  ;;  %v10257_v55 = vld [vmem:[#allocation13 + $0xf0] sm:$0xf0]  ;;  %v5159_v43 = vmax.f32 %v13263_v36, %v5151_v6  ;;  %v10463_v40 = vld [vmem:[#allocation13 + $0x280] sm:$0xf]  ;;  %v4884_v13 = vadd.f32 %v4883_v58, %v4871_v47  ;;  %v12136_v58 = vld [vmem:[#allocation13 + $0x34c] sm:$0xf0] }
 0x32d   :  { %v10385_v14 = vld [vmem:[#allocation13 + $0x1f0] sm:$0xf0]  ;;  %v10260_v52 = vor.u32 %v12058_v9, %v10257_v55  ;;  %v10464_v36 = vor.u32 %v12112_v30, %v10463_v40  ;;  %v10448_v6 = vor.u32 %v12108_v60, %v10447_v35  ;;  %v12078_v28 = vld [vmem:[#allocation13 + $0x184] sm:$0xf]  ;;  %v12132_v9 = vld [vmem:[#allocation13 + $0x32c] sm:$0xf0] }
 0x32e   :  { %5141 = vmatpush.bf16.msra.mxu3 %v10036_v5  ;;  %5128 = vmatpush.bf16.msra.mxu2 %v9780_v22  ;;  %v10388_v53 = vor.u32 %v12090_v61, %v10385_v14  ;;  %v10369_v56 = vld [vmem:[#allocation13 + $0x1d0] sm:$0xf0]  ;;  %v4897_v7 = vadd.f32 %v13268_v19, %v4884_v13  ;;  %v10575_v22 = vld [vmem:[#allocation13 + $0x360] sm:$0xf]  ;;  %v13303_v46 = vpack.c.bf16 %v5159_v43, %v5159_v43  ;;  %v4872_v19 = vpop.f32.mrf.mxu2  ;;  %v12042_v14 = vld [vmem:[#allocation13 + $0x64] sm:$0xf] }
 0x32f   :  { %v10372_v33 = vor.u32 %v12086_v54, %v10369_v56  ;;  %v10225_v17 = vld [vmem:[#allocation13 + $0xb0] sm:$0xf0]  ;;  %v12074_v43 = vld [vmem:[#allocation13 + $0x164] sm:$0xf]  ;;  %v10527_v30 = vld [vmem:[#allocation13 + $0x300] sm:$0xf] }
 0x330   :  { %6787 = vmatpush.bf16.msra.mxu1 %v10816_v0  ;;  %6775 = vmatpush.bf16.msra.mxu0 %v10672_v25  ;;  %v4910_v62 = vadd.f32 %v13270_v48, %v4897_v7  ;;  %v10353_v1 = vld [vmem:[#allocation13 + $0x1b0] sm:$0xf0]  ;;  %v12104_v48 = vld [vmem:[#allocation13 + $0x24c] sm:$0xf0]  ;;  %v10228_v59 = vor.u32 %v12050_v63, %v10225_v17  ;;  %v12046_v25 = vld [vmem:[#allocation13 + $0x84] sm:$0xf] }
 0x331   :  { %5129 = vmatmul.bf16.vlgmr.msra.gmra.mxu2 %v13095_v45  ;;  %10140 = vmatmul.msk.bf16.vlgmr.msra.gmra.mxu3 %vm4207_vm2, %v13105_v31  ;;  %v12144_v45 = vld [vmem:[#allocation13 + $0x38c] sm:$0xf0]  ;;  %v10241_v31 = vld [vmem:[#allocation13 + $0xd0] sm:$0xf0]  ;;  %v10356_v24 = vor.u32 %v12082_v44, %v10353_v1  ;;  %v13309_v47 = vpop.f32.mrf.mxu0  ;;  %v11023_v54 = vld [vmem:[#allocation13 + $0x6e0] sm:$0xf] }
 0x332   :  { %6756 = vmatpush.bf16.msrb.mxu3 %v10640_v3  ;;  %6743 = vmatpush.bf16.msrb.mxu2 %v10512_v18  ;;  %v10592_v5 = vor.u32 %v12144_v45, %v10591_v4  ;;  %v4885_v3 = vpop.f32.mrf.mxu3  ;;  %v12140_v18 = vld [vmem:[#allocation13 + $0x36c] sm:$0xf0]  ;;  %v10244_v0 = vor.u32 %v12054_v12, %v10241_v31  ;;  %v5152_v2 = vmul.f32 0.01, %v4910_v62  ;;  %v10209_v42 = vld [vmem:[#allocation13 + $0x90] sm:$0xf0]  ;;  %v10544_v4 = vor.u32 %v12132_v9, %v10543_v38 }
 0x333   :  { %v10576_v8 = vor.u32 %v12140_v18, %v10575_v22  ;;  %v10337_v21 = vld [vmem:[#allocation13 + $0x190] sm:$0xf0]  ;;  %v10212_v55 = vor.u32 %v12046_v25, %v10209_v42  ;;  %v12128_v13 = vld [vmem:[#allocation13 + $0x30c] sm:$0xf0]  ;;  %v12038_v3 = vld [vmem:[#allocation13 + $0x44] sm:$0xf] }
 0x334   :  { %6788 = vmatpush.bf16.msra.mxu1 %v10800_v39  ;;  %6776 = vmatpush.bf16.msra.mxu0 %v10656_v26  ;;  %v5160_v10 = vmax.f32 %v4910_v62, %v5152_v2  ;;  %v10340_v61 = vor.u32 %v12078_v28, %v10337_v21  ;;  %v10193_v45 = vld [vmem:[#allocation13 + $0x70] sm:$0xf0]  ;;  %v12096_v12 = vld [vmem:[#allocation13 + $0x20c] sm:$0xf0]  ;;  %v10528_v7 = vor.u32 %v12128_v13, %v10527_v30  ;;  %v12070_v35 = vld [vmem:[#allocation13 + $0x144] sm:$0xf] }
 0x335   :  { %v10321_v26 = vld [vmem:[#allocation13 + $0x170] sm:$0xf0]  ;;  %v12252_v56 = vld [vmem:[#allocation13 + $0x6ec] sm:$0xf0]  ;;  %v11007_v63 = vld [vmem:[#allocation13 + $0x6c0] sm:$0xf] }
 0x336   :  { %6757 = vmatpush.bf16.msrb.mxu3 %v10624_v15  ;;  %6744 = vmatpush.bf16.msrb.mxu2 %v10496_v23  ;;  %v10559_v15 = vld [vmem:[#allocation13 + $0x340] sm:$0xf]  ;;  %v13307_v29 = vpack.c.bf16 %v5160_v10, %v5160_v10  ;;  %v10324_v31 = vor.u32 %v12074_v43, %v10321_v26  ;;  %v10305_v60 = vld [vmem:[#allocation13 + $0x150] sm:$0xf0]  ;;  %v12248_v19 = vld [vmem:[#allocation13 + $0x6cc] sm:$0xf0] }
 0x337   :  { %6777 = vmatmul.bf16.vlgmr.msra.gmra.mxu0 %v13303_v46  ;;  %v10431_v23 = vld [vmem:[#allocation13 + $0x240] sm:$0xf]  ;;  %v10560_v39 = vor.u32 %v12136_v58, %v10559_v15  ;;  %v10308_v44 = vor.u32 %v12070_v35, %v10305_v60  ;;  %v12034_v1 = vld [vmem:[#allocation13 + $0x24] sm:$0xf]  ;;  %v10161_v2 = vld [vmem:[#allocation13 + $0x30] sm:$0xf0] }
 0x338   :  { %6789 = vmatpush.bf16.msra.mxu1 %v10784_v20  ;;  %6821 = vmatpush.bf16.msrb.mxu0 %v10260_v52  ;;  %v10432_v34 = vor.u32 %v12104_v48, %v10431_v23  ;;  %v5150_v20 = vmul.f32 0.01, %v13232_v57  ;;  %v5149_v52 = vmul.f32 0.01, %v13206_v37  ;;  %v10289_v15 = vld [vmem:[#allocation13 + $0x130] sm:$0xf0]  ;;  %v10164_v48 = vor.u32 %v12034_v1, %v10161_v2 }
 0x339   :  { %v1446_v10 = vperm.slane %v13272_v51, 6  ;;  %v10145_v42 = vld [vmem:[#allocation13 + $0x10] sm:$0xf0]  ;;  %v12062_v28 = vld [vmem:[#allocation13 + $0x104] sm:$0xf] }
 0x33a   :  { %6758 = vmatpush.bf16.msrb.mxu3 %v10608_v32  ;;  %6745 = vmatpush.bf16.msrb.mxu2 %v10480_v49  ;;  %v12100_v32 = vld [vmem:[#allocation13 + $0x22c] sm:$0xf0]  ;;  %v13311_v49 = vpop.f32.mrf.mxu1  ;;  %v5158_v22 = vmax.f32 %v13232_v57, %v5150_v20  ;;  %v5157_v62 = vmax.f32 %v13206_v37, %v5149_v52  ;;  %v12066_v57 = vld [vmem:[#allocation13 + $0x124] sm:$0xf]  ;;  %v11008_v37 = vor.u32 %v12248_v19, %v11007_v63  ;;  %v10273_v21 = vld [vmem:[#allocation13 + $0x110] sm:$0xf0] }
 0x33b   :  { %6790 = vmatmul.bf16.vlgmr.msra.gmra.mxu1 %v13307_v29  ;;  %v10416_v40 = vor.u32 %v12100_v32, %v10415_v16  ;;  %v10292_v25 = vor.u32 %v12066_v57, %v10289_v15  ;;  %v10769_v38 = vld [vmem:[#allocation13 + $0x4f0] sm:$0xf0]  ;;  %v12218_v32 = vld [vmem:[#allocation13 + $0x5e4] sm:$0xf]  ;;  %v10927_v1 = vld [vmem:[#allocation13 + $0x620] sm:$0xf] }
 0x33c   :  { %6834 = vmatpush.bf16.msrb.mxu1 %v10388_v53  ;;  %6822 = vmatpush.bf16.msrb.mxu0 %v10244_v0  ;;  %v10399_v53 = vld [vmem:[#allocation13 + $0x200] sm:$0xf]  ;;  %v11024_v0 = vor.u32 %v12252_v56, %v11023_v54  ;;  %v13320_v58 = vpack.c.bf16 %v5157_v62, %v5157_v62  ;;  %v10753_v30 = vld [vmem:[#allocation13 + $0x4d0] sm:$0xf0]  ;;  %v12214_v52 = vld [vmem:[#allocation13 + $0x5c4] sm:$0xf] }
 0x33d   :  { %v10400_v18 = vor.u32 %v12096_v12, %v10399_v53  ;;  %v10881_v53 = vld [vmem:[#allocation13 + $0x5d0] sm:$0xf0]  ;;  %v12210_v60 = vld [vmem:[#allocation13 + $0x5a4] sm:$0xf]  ;;  %v12228_v2 = vld [vmem:[#allocation13 + $0x62c] sm:$0xf0] }
 0x33e   :  { %6759 = vmatpush.bf16.msrb.mxu3 %v10592_v5  ;;  %6746 = vmatpush.bf16.msrb.mxu2 %v10464_v36  ;;  %v10196_v5 = vor.u32 %v12042_v14, %v10193_v45  ;;  %v10177_v36 = vld [vmem:[#allocation13 + $0x50] sm:$0xf0]  ;;  %v10975_v14 = vld [vmem:[#allocation13 + $0x680] sm:$0xf]  ;;  %v10276_v45 = vor.u32 %v12062_v28, %v10273_v21  ;;  %v12174_v19 = vld [vmem:[#allocation13 + $0x484] sm:$0xf] }
 0x33f   :  { %v4935_v23 = vpop.f32.mrf.mxu3  ;;  %v10865_v62 = vld [vmem:[#allocation13 + $0x5b0] sm:$0xf0]  ;;  %v12122_v21 = vld [vmem:[#allocation13 + $0x2e4] sm:$0xf] }
 0x340   :  { %6835 = vmatpush.bf16.msrb.mxu1 %v10372_v33  ;;  %6823 = vmatpush.bf16.msrb.mxu0 %v10228_v59  ;;  %v10180_v33 = vor.u32 %v12038_v3, %v10177_v36  ;;  %v10991_v59 = vld [vmem:[#allocation13 + $0x6a0] sm:$0xf]  ;;  %v12178_v3 = vld [vmem:[#allocation13 + $0x4a4] sm:$0xf]  ;;  %v10737_v36 = vld [vmem:[#allocation13 + $0x4b0] sm:$0xf0]  ;;  %v10868_v63 = vor.u32 %v12210_v60, %v10865_v62 }
 0x341   :  { %v10481_v60 = vld [vmem:[#allocation13 + $0x2b0] sm:$0xf0] }
 0x342   :  { %6760 = vmatpush.bf16.msrb.mxu3 %v10576_v8  ;;  %6747 = vmatpush.bf16.msrb.mxu2 %v10448_v6  ;;  %v5002_v8 = vpop.f32.mrf.mxu0  ;;  %v5015_v17 = vpop.f32.mrf.mxu1  ;;  %v13318_v6 = vpack.c.bf16 %v5158_v22, %v5158_v22 }
 0x343   :  { %v4922_v9 = vpop.f32.mrf.mxu2  ;;  %v10721_v8 = vld [vmem:[#allocation13 + $0x490] sm:$0xf0]  ;;  %v12206_v17 = vld [vmem:[#allocation13 + $0x584] sm:$0xf] }
 0x344   :  { %6836 = vmatpush.bf16.msrb.mxu1 %v10356_v24  ;;  %6824 = vmatpush.bf16.msrb.mxu0 %v10212_v55  ;;  %v12244_v24 = vld [vmem:[#allocation13 + $0x6ac] sm:$0xf0]  ;;  %v10897_v55 = vld [vmem:[#allocation13 + $0x5f0] sm:$0xf0]  ;;  %v10724_v57 = vor.u32 %v12174_v19, %v10721_v8  ;;  %v12061_v19 = vld [vmem:[#allocation13 + $0xf4] sm:$0xf0] }
 0x345   :  { %v10992_v16 = vor.u32 %v12244_v24, %v10991_v59  ;;  %v10900_v20 = vor.u32 %v12218_v32, %v10897_v55  ;;  %v10928_v59 = vor.u32 %v12228_v2, %v10927_v1  ;;  %v12202_v24 = vld [vmem:[#allocation13 + $0x564] sm:$0xf]  ;;  %v11119_v8 = vld [vmem:[#allocation13 + $0x7a0] sm:$0xf]  ;;  %v10391_v1 = vld [vmem:[#allocation13 + $0x1e8] sm:$0xf] }
 0x346   :  { %6761 = vmatpush.bf16.msrb.mxu3 %v10560_v39  ;;  %6748 = vmatpush.bf16.msrb.mxu2 %v10432_v34  ;;  %v12030_v39 = vld [vmem:[#allocation13 + $0x4] sm:$0xf]  ;;  %v12093_v2 = vld [vmem:[#allocation13 + $0x1f4] sm:$0xf0] }
 0x347   :  { %v12186_v34 = vld [vmem:[#allocation13 + $0x4e4] sm:$0xf]  ;;  %v10148_v51 = vor.u32 %v12030_v39, %v10145_v42  ;;  %v4937_v12 = vpop.f32.mrf.mxu3  ;;  %v10911_v39 = vld [vmem:[#allocation13 + $0x600] sm:$0xf]  ;;  %v12224_v42 = vld [vmem:[#allocation13 + $0x60c] sm:$0xf0] }
 0x348   :  { %6837 = vmatpush.bf16.msrb.mxu1 %v10340_v61  ;;  %6825 = vmatpush.bf16.msrb.mxu0 %v10196_v5  ;;  %v4923_v61 = vadd.f32 %v4922_v9, %v1446_v10  ;;  %v10772_v43 = vor.u32 %v12186_v34, %v10769_v38  ;;  %v10959_v5 = vld [vmem:[#allocation13 + $0x660] sm:$0xf]  ;;  %v10513_v34 = vld [vmem:[#allocation13 + $0x2f0] sm:$0xf0]  ;;  %v12166_v9 = vld [vmem:[#allocation13 + $0x444] sm:$0xf]  ;;  %v10912_v32 = vor.u32 %v12224_v42, %v10911_v39 }
 0x349   :  { %v12198_v55 = vld [vmem:[#allocation13 + $0x544] sm:$0xf]  ;;  %v10247_v39 = vld [vmem:[#allocation13 + $0xc8] sm:$0xf]  ;;  %v12057_v42 = vld [vmem:[#allocation13 + $0xd4] sm:$0xf0] }
 0x34a   :  { %6762 = vmatpush.bf16.msrb.mxu3 %v10544_v4  ;;  %6749 = vmatpush.bf16.msrb.mxu2 %v10416_v40  ;;  %v12240_v4 = vld [vmem:[#allocation13 + $0x68c] sm:$0xf0]  ;;  %v4936_v26 = vadd.f32 %v4935_v23, %v4923_v61  ;;  %v12182_v40 = vld [vmem:[#allocation13 + $0x4c4] sm:$0xf]  ;;  %v10817_v61 = vld [vmem:[#allocation13 + $0x550] sm:$0xf0] }
 0x34b   :  { %v10976_v13 = vor.u32 %v12240_v4, %v10975_v14  ;;  %v10756_v56 = vor.u32 %v12182_v40, %v10753_v30  ;;  %v12170_v23 = vld [vmem:[#allocation13 + $0x464] sm:$0xf]  ;;  %v11151_v14 = vld [vmem:[#allocation13 + $0x7e0] sm:$0xf]  ;;  %v12284_v4 = vld [vmem:[#allocation13 + $0x7ec] sm:$0xf0]  ;;  %v10820_v30 = vor.u32 %v12198_v55, %v10817_v61 }
 0x34c   :  { %6838 = vmatpush.bf16.msrb.mxu1 %v10324_v31  ;;  %6826 = vmatpush.bf16.msrb.mxu0 %v10180_v33  ;;  %v12236_v31 = vld [vmem:[#allocation13 + $0x66c] sm:$0xf0]  ;;  %v4949_v54 = vadd.f32 %v13291_v27, %v4936_v26  ;;  %v10943_v27 = vld [vmem:[#allocation13 + $0x640] sm:$0xf]  ;;  %v10740_v33 = vor.u32 %v12178_v3, %v10737_v36  ;;  %v10497_v26 = vld [vmem:[#allocation13 + $0x2d0] sm:$0xf0] }
 0x34d   :  { %v10960_v35 = vor.u32 %v12236_v31, %v10959_v5  ;;  %v12194_v12 = vld [vmem:[#allocation13 + $0x524] sm:$0xf]  ;;  %v10801_v5 = vld [vmem:[#allocation13 + $0x530] sm:$0xf0] }
 0x34e   :  { %6763 = vmatpush.bf16.msrb.mxu3 %v10528_v7  ;;  %6750 = vmatpush.bf16.msrb.mxu2 %v10400_v18  ;;  %v10884_v7 = vor.u32 %v12214_v52, %v10881_v53  ;;  %v13327_v22 = vadd.f32 %v13293_v41, %v4949_v54  ;;  %v4924_v18 = vpop.f32.mrf.mxu2  ;;  %v10673_v52 = vld [vmem:[#allocation13 + $0x430] sm:$0xf0]  ;;  %v12158_v54 = vld [vmem:[#allocation13 + $0x404] sm:$0xf] }
 0x34f   :  { %v10657_v18 = vld [vmem:[#allocation13 + $0x410] sm:$0xf0]  ;;  %v12106_v55 = vld [vmem:[#allocation13 + $0x264] sm:$0xf] }
 0x350   :  { %6839 = vmatpush.bf16.msrb.mxu1 %v10308_v44  ;;  %6827 = vmatpush.bf16.msrb.mxu0 %v10164_v48  ;;  %v10849_v44 = vld [vmem:[#allocation13 + $0x590] sm:$0xf0] }
 0x351   :  { %6764 = vmatmul.bf16.vlgmr.msrb.gmra.mxu3 %v13318_v6  ;;  %6751 = vmatmul.bf16.vlgmr.msrb.gmra.mxu2 %v13320_v58  ;;  %v10705_v48 = vld [vmem:[#allocation13 + $0x470] sm:$0xf0] }
 0x352   :  { %6795 = vmatpush.bf16.msra.mxu2 %v11024_v0  ;;  %v12232_v0 = vld [vmem:[#allocation13 + $0x64c] sm:$0xf0]  ;;  %v10708_v28 = vor.u32 %v12170_v23, %v10705_v48  ;;  %v12110_v23 = vld [vmem:[#allocation13 + $0x284] sm:$0xf]  ;;  %v10465_v48 = vld [vmem:[#allocation13 + $0x290] sm:$0xf0] }
 0x353   :  { %v10944_v41 = vor.u32 %v12232_v0, %v10943_v27  ;;  %v13333_v10 = vpop.f32.mrf.mxu1  ;;  %v10804_v27 = vor.u32 %v12194_v12, %v10801_v5  ;;  %v12190_v0 = vld [vmem:[#allocation13 + $0x504] sm:$0xf]  ;;  %v10449_v61 = vld [vmem:[#allocation13 + $0x270] sm:$0xf0] }
 0x354   :  { %6840 = vmatpush.bf16.msrb.mxu1 %v10292_v25  ;;  %6828 = vmatpush.bf16.msrb.mxu0 %v10148_v51  ;;  %v13331_v15 = vpop.f32.mrf.mxu0  ;;  %v10833_v25 = vld [vmem:[#allocation13 + $0x570] sm:$0xf0]  ;;  %v10516_v51 = vor.u32 %v12122_v21, %v10513_v34  ;;  %v10468_v34 = vor.u32 %v12110_v23, %v10465_v48  ;;  %v12260_v23 = vld [vmem:[#allocation13 + $0x72c] sm:$0xf0] }
 0x355   :  { %v10836_v38 = vor.u32 %v12202_v24, %v10833_v25  ;;  %v10392_v25 = vor.u32 %v12093_v2, %v10391_v1  ;;  %v10433_v12 = vld [vmem:[#allocation13 + $0x250] sm:$0xf0] }
 0x356   :  { %6796 = vmatpush.bf16.msra.mxu2 %v11008_v37  ;;  %v10852_v37 = vor.u32 %v12206_v17, %v10849_v44 }
 0x357   :  { %6829 = vmatmul.bf16.vlgmr.msrb.gmra.mxu0 %v13284_v11 }
 0x358   :  { %6841 = vmatpush.bf16.msrb.mxu1 %v10276_v45  ;;  %6873 = vmatpush.bf16.msra.mxu0 %v10772_v43  ;;  %v12118_v43 = vld [vmem:[#allocation13 + $0x2c4] sm:$0xf] }
 0x359   :  { %v10500_v31 = vor.u32 %v12118_v43, %v10497_v26  ;;  %v12053_v43 = vld [vmem:[#allocation13 + $0xb4] sm:$0xf0]  ;;  %v10359_v26 = vld [vmem:[#allocation13 + $0x1a8] sm:$0xf] }
 0x35a   :  { %6797 = vmatpush.bf16.msra.mxu2 %v10992_v16  ;;  %v10689_v16 = vld [vmem:[#allocation13 + $0x450] sm:$0xf0] }
 0x35b   :  { %6842 = vmatmul.bf16.vlgmr.msrb.gmra.mxu1 %v13286_v50  ;;  %v10692_v45 = vor.u32 %v12166_v9, %v10689_v16  ;;  %v5067_v53 = vpop.f32.mrf.mxu1  ;;  %v11103_v9 = vld [vmem:[#allocation13 + $0x780] sm:$0xf]  ;;  %v12272_v16 = vld [vmem:[#allocation13 + $0x78c] sm:$0xf0] }
 0x35c   :  { %6886 = vmatpush.bf16.msra.mxu1 %v10900_v20  ;;  %6874 = vmatpush.bf16.msra.mxu0 %v10756_v56  ;;  %v11152_v20 = vor.u32 %v12284_v4, %v11151_v14  ;;  %v5054_v40 = vpop.f32.mrf.mxu0  ;;  %v11135_v56 = vld [vmem:[#allocation13 + $0x7c0] sm:$0xf]  ;;  %v10248_v14 = vor.u32 %v12057_v42, %v10247_v39  ;;  %v12102_v53 = vld [vmem:[#allocation13 + $0x244] sm:$0xf] }
 0x35d   :  { %v10452_v40 = vor.u32 %v12106_v55, %v10449_v61  ;;  %v11039_v61 = vld [vmem:[#allocation13 + $0x700] sm:$0xf] }
 0x35e   :  { %6798 = vmatpush.bf16.msra.mxu2 %v10976_v13  ;;  %v12162_v13 = vld [vmem:[#allocation13 + $0x424] sm:$0xf]  ;;  %6808 = vmatpush.bf16.msra.mxu3 %v11152_v20 }
 0x35f   :  { %v4987_v3 = vpop.f32.mrf.mxu3  ;;  %v10676_v36 = vor.u32 %v12162_v13, %v10673_v52  ;;  %v11087_v13 = vld [vmem:[#allocation13 + $0x760] sm:$0xf]  ;;  %v12268_v52 = vld [vmem:[#allocation13 + $0x76c] sm:$0xf0] }
 0x360   :  { %6887 = vmatpush.bf16.msra.mxu1 %v10884_v7  ;;  %6875 = vmatpush.bf16.msra.mxu0 %v10740_v33  ;;  %v12280_v7 = vld [vmem:[#allocation13 + $0x7cc] sm:$0xf0]  ;;  %v10785_v33 = vld [vmem:[#allocation13 + $0x510] sm:$0xf0]  ;;  %v11088_v5 = vor.u32 %v12268_v52, %v11087_v13  ;;  %v10167_v52 = vld [vmem:[#allocation13 + $0x28] sm:$0xf] }
 0x361   :  { %v11136_v62 = vor.u32 %v12280_v7, %v11135_v56  ;;  %v10215_v56 = vld [vmem:[#allocation13 + $0x88] sm:$0xf]  ;;  %v12049_v7 = vld [vmem:[#allocation13 + $0x94] sm:$0xf0] }
 0x362   :  { %6799 = vmatpush.bf16.msra.mxu2 %v10960_v35  ;;  %v12114_v35 = vld [vmem:[#allocation13 + $0x2a4] sm:$0xf] }
 0x363   :  { %6809 = vmatpush.bf16.msra.mxu3 %v11136_v62  ;;  %v4974_v17 = vpop.f32.mrf.mxu2  ;;  %v10484_v44 = vor.u32 %v12114_v35, %v10481_v60  ;;  %v12081_v35 = vld [vmem:[#allocation13 + $0x194] sm:$0xf0]  ;;  %v11071_v60 = vld [vmem:[#allocation13 + $0x740] sm:$0xf]  ;;  %v12264_v62 = vld [vmem:[#allocation13 + $0x74c] sm:$0xf0] }
 0x364   :  { %6888 = vmatpush.bf16.msra.mxu1 %v10868_v63  ;;  %6876 = vmatpush.bf16.msra.mxu0 %v10724_v57  ;;  %v10263_v63 = vld [vmem:[#allocation13 + $0xe8] sm:$0xf]  ;;  %v4975_v21 = vadd.f32 %v4974_v17, %v13327_v22 }
 0x365   :  { %v10264_v24 = vor.u32 %v12061_v19, %v10263_v63  ;;  %v10216_v63 = vor.u32 %v12049_v7, %v10215_v56  ;;  %v10327_v17 = vld [vmem:[#allocation13 + $0x168] sm:$0xf]  ;;  %v12069_v56 = vld [vmem:[#allocation13 + $0x134] sm:$0xf0]  ;;  %v12246_v7 = vld [vmem:[#allocation13 + $0x6c4] sm:$0xf] }
 0x366   :  { %6800 = vmatpush.bf16.msra.mxu2 %v10944_v41  ;;  %v12276_v41 = vld [vmem:[#allocation13 + $0x7ac] sm:$0xf0]  ;;  %v4988_v22 = vadd.f32 %v4987_v3, %v4975_v21  ;;  %v10343_v3 = vld [vmem:[#allocation13 + $0x188] sm:$0xf]  ;;  %v12041_v21 = vld [vmem:[#allocation13 + $0x54] sm:$0xf0] }
 0x367   :  { %v11120_v57 = vor.u32 %v12276_v41, %v11119_v8  ;;  %v10344_v19 = vor.u32 %v12081_v35, %v10343_v3  ;;  %v10199_v8 = vld [vmem:[#allocation13 + $0x68] sm:$0xf]  ;;  %v12045_v41 = vld [vmem:[#allocation13 + $0x74] sm:$0xf0]  ;;  %v11009_v3 = vld [vmem:[#allocation13 + $0x6d0] sm:$0xf0] }
 0x368   :  { %6889 = vmatpush.bf16.msra.mxu1 %v10852_v37  ;;  %6877 = vmatpush.bf16.msra.mxu0 %v10708_v28  ;;  %v10660_v37 = vor.u32 %v12158_v54, %v10657_v18  ;;  %v10375_v28 = vld [vmem:[#allocation13 + $0x1c8] sm:$0xf]  ;;  %v10436_v18 = vor.u32 %v12102_v53, %v10433_v12  ;;  %v10200_v42 = vor.u32 %v12045_v41, %v10199_v8  ;;  %v12037_v53 = vld [vmem:[#allocation13 + $0x34] sm:$0xf0]  ;;  %v10625_v35 = vld [vmem:[#allocation13 + $0x3d0] sm:$0xf0] }
 0x369   :  { %6810 = vmatpush.bf16.msra.mxu3 %v11120_v57  ;;  %v12077_v57 = vld [vmem:[#allocation13 + $0x174] sm:$0xf0]  ;;  %v10295_v12 = vld [vmem:[#allocation13 + $0x128] sm:$0xf]  ;;  %v11012_v8 = vor.u32 %v12246_v7, %v11009_v3 }
 0x36a   :  { %6801 = vmatpush.bf16.msra.mxu2 %v10928_v59  ;;  %v10788_v59 = vor.u32 %v12190_v0, %v10785_v33  ;;  %v10417_v0 = vld [vmem:[#allocation13 + $0x230] sm:$0xf0]  ;;  %v11072_v33 = vor.u32 %v12264_v62, %v11071_v60  ;;  %v10168_v60 = vor.u32 %v12037_v53, %v10167_v52  ;;  %v10151_v62 = vld [vmem:[#allocation13 + $0x8] sm:$0xf]  ;;  %v12065_v41 = vld [vmem:[#allocation13 + $0x114] sm:$0xf0] }
 0x36b   :  { %v4976_v20 = vpop.f32.mrf.mxu2  ;;  %v12213_v52 = vld [vmem:[#allocation13 + $0x5b4] sm:$0xf0]  ;;  %v12138_v53 = vld [vmem:[#allocation13 + $0x364] sm:$0xf] }
 0x36c   :  { %6890 = vmatpush.bf16.msra.mxu1 %v10836_v38  ;;  %6878 = vmatpush.bf16.msra.mxu0 %v10692_v45  ;;  %v12089_v38 = vld [vmem:[#allocation13 + $0x1d4] sm:$0xf0]  ;;  %v10231_v45 = vld [vmem:[#allocation13 + $0xa8] sm:$0xf] }
 0x36d   :  { %v10376_v4 = vor.u32 %v12089_v38, %v10375_v28  ;;  %v10183_v28 = vld [vmem:[#allocation13 + $0x48] sm:$0xf]  ;;  %v10328_v38 = vor.u32 %v12077_v57, %v10327_v17  ;;  %v12242_v17 = vld [vmem:[#allocation13 + $0x6a4] sm:$0xf] }
 0x36e   :  { %6802 = vmatpush.bf16.msra.mxu2 %v10912_v32  ;;  %v4989_v32 = vpop.f32.mrf.mxu3  ;;  %v10775_v57 = vld [vmem:[#allocation13 + $0x4e8] sm:$0xf] }
 0x370   :  { %6891 = vmatpush.bf16.msra.mxu1 %v10820_v30  ;;  %6879 = vmatpush.bf16.msra.mxu0 %v10676_v36  ;;  %v12085_v30 = vld [vmem:[#allocation13 + $0x1b4] sm:$0xf0]  ;;  %v5001_v36 = vadd.f32 %v13309_v47, %v4988_v22 }
 0x371   :  { %v10360_v54 = vor.u32 %v12085_v30, %v10359_v26  ;;  %v10184_v26 = vor.u32 %v12041_v21, %v10183_v28  ;;  %v12396_v22 = vld [vmem:[#allocation11] sm:$0xff] }
 0x372   :  { %6847 = vmatpush.bf16.msrb.mxu2 %v10516_v51  ;;  %v11104_v51 = vor.u32 %v12272_v16, %v11103_v9  ;;  %v5014_v47 = vadd.f32 %v13311_v49, %v5001_v36  ;;  %v12073_v9 = vld [vmem:[#allocation13 + $0x154] sm:$0xf0]  ;;  %v12250_v16 = vld [vmem:[#allocation13 + $0x6e4] sm:$0xf]  ;;  %v11025_v49 = vld [vmem:[#allocation13 + $0x6f0] sm:$0xf0] }
 0x373   :  { %v5026_v48 = vpop.f32.mrf.mxu2  ;;  %v1447_v20 = vperm.slane %v12396_v22, 7  ;;  %v11028_v13 = vor.u32 %v12250_v16, %v11025_v49  ;;  %v10977_v16 = vld [vmem:[#allocation13 + $0x690] sm:$0xf0]  ;;  %v10759_v49 = vld [vmem:[#allocation13 + $0x4c8] sm:$0xf] }
 0x374   :  { %6892 = vmatpush.bf16.msra.mxu1 %v10804_v27  ;;  %6880 = vmatpush.bf16.msra.mxu0 %v10660_v37  ;;  %v12098_v27 = vld [vmem:[#allocation13 + $0x224] sm:$0xf]  ;;  %v11055_v37 = vld [vmem:[#allocation13 + $0x720] sm:$0xf]  ;;  %v5027_v39 = vadd.f32 %v5026_v48, %v5014_v47  ;;  %v10993_v47 = vld [vmem:[#allocation13 + $0x6b0] sm:$0xf0] }
 0x375   :  { %6811 = vmatpush.bf16.msra.mxu3 %v11104_v51  ;;  %v10420_v2 = vor.u32 %v12098_v27, %v10417_v0  ;;  %v12256_v51 = vld [vmem:[#allocation13 + $0x70c] sm:$0xf0]  ;;  %v12033_v27 = vld [vmem:[#allocation13 + $0x14] sm:$0xf0]  ;;  %v10279_v0 = vld [vmem:[#allocation13 + $0x108] sm:$0xf]  ;;  %v10996_v21 = vor.u32 %v12242_v17, %v10993_v47 }
 0x376   :  { %6848 = vmatpush.bf16.msrb.mxu2 %v10500_v31  ;;  %v10232_v31 = vor.u32 %v12053_v43, %v10231_v45  ;;  %v5153_v32 = vmul.f32 0.01, %v5027_v39  ;;  %v10641_v45 = vld [vmem:[#allocation13 + $0x3f0] sm:$0xf0]  ;;  %v12221_v48 = vld [vmem:[#allocation13 + $0x5f4] sm:$0xf0]  ;;  %v10280_v28 = vor.u32 %v12065_v41, %v10279_v0 }
 0x377   :  { %6881 = vmatmul.bf16.vlgmr.msra.gmra.mxu0 %v13303_v46 }
 0x378   :  { %6893 = vmatpush.bf16.msra.mxu1 %v10788_v59  ;;  %6925 = vmatpush.bf16.msrb.mxu0 %v10264_v24  ;;  %v13341_v1 = vpop.f32.mrf.mxu1  ;;  %v12094_v59 = vld [vmem:[#allocation13 + $0x204] sm:$0xf]  ;;  %v10401_v24 = vld [vmem:[#allocation13 + $0x210] sm:$0xf0]  ;;  %v5161_v43 = vmax.f32 %v5027_v39, %v5153_v32  ;;  %v10152_v39 = vor.u32 %v12033_v27, %v10151_v62  ;;  %v10855_v62 = vld [vmem:[#allocation13 + $0x588] sm:$0xf] }
 0x379   :  { %6812 = vmatpush.bf16.msra.mxu3 %v11088_v5  ;;  %v10404_v55 = vor.u32 %v12094_v59, %v10401_v24  ;;  %v12146_v59 = vld [vmem:[#allocation13 + $0x3a4] sm:$0xf]  ;;  %v10609_v24 = vld [vmem:[#allocation13 + $0x3b0] sm:$0xf0]  ;;  %v12209_v27 = vld [vmem:[#allocation13 + $0x594] sm:$0xf0] }
 0x37a   :  { %6849 = vmatpush.bf16.msrb.mxu2 %v10484_v44  ;;  %v13339_v44 = vpop.f32.mrf.mxu0  ;;  %v13344_v5 = vpack.c.bf16 %v5161_v43, %v5161_v43  ;;  %v10856_v47 = vor.u32 %v12209_v27, %v10855_v62  ;;  %v10663_v62 = vld [vmem:[#allocation13 + $0x408] sm:$0xf]  ;;  %v12161_v27 = vld [vmem:[#allocation13 + $0x414] sm:$0xf0] }
 0x37b   :  { %6894 = vmatmul.bf16.vlgmr.msra.gmra.mxu1 %v13307_v29  ;;  %v5028_v36 = vpop.f32.mrf.mxu2 }
 0x37c   :  { %6938 = vmatpush.bf16.msrb.mxu1 %v10392_v25  ;;  %6926 = vmatpush.bf16.msrb.mxu0 %v10248_v14  ;;  %v11056_v25 = vor.u32 %v12260_v23, %v11055_v37  ;;  %v11040_v14 = vor.u32 %v12256_v51, %v11039_v61  ;;  %v12189_v37 = vld [vmem:[#allocation13 + $0x4f4] sm:$0xf0]  ;;  %v10903_v23 = vld [vmem:[#allocation13 + $0x5e8] sm:$0xf]  ;;  %v12230_v36 = vld [vmem:[#allocation13 + $0x644] sm:$0xf] }
 0x37d   :  { %6813 = vmatpush.bf16.msra.mxu3 %v11072_v33  ;;  %6803 = vmatmul.bf16.vlgmr.msra.gmra.mxu2 %v13344_v5  ;;  %v10887_v61 = vld [vmem:[#allocation13 + $0x5c8] sm:$0xf]  ;;  %v12217_v51 = vld [vmem:[#allocation13 + $0x5d4] sm:$0xf0] }
 0x37e   :  { %6850 = vmatpush.bf16.msrb.mxu2 %v10468_v34  ;;  %v10311_v34 = vld [vmem:[#allocation13 + $0x148] sm:$0xf]  ;;  %v10888_v22 = vor.u32 %v12217_v51, %v10887_v61  ;;  %v12169_v51 = vld [vmem:[#allocation13 + $0x454] sm:$0xf0] }
 0x37f   :  { %v10312_v30 = vor.u32 %v12073_v9, %v10311_v34  ;;  %v10776_v34 = vor.u32 %v12189_v37, %v10775_v57  ;;  %v12238_v9 = vld [vmem:[#allocation13 + $0x684] sm:$0xf]  ;;  %v10929_v57 = vld [vmem:[#allocation13 + $0x630] sm:$0xf0]  ;;  %v10711_v37 = vld [vmem:[#allocation13 + $0x468] sm:$0xf] }
 0x380   :  { %6939 = vmatpush.bf16.msrb.mxu1 %v10376_v4  ;;  %6927 = vmatpush.bf16.msrb.mxu0 %v10232_v31  ;;  %v12154_v4 = vld [vmem:[#allocation13 + $0x3e4] sm:$0xf]  ;;  %v10695_v61 = vld [vmem:[#allocation13 + $0x448] sm:$0xf] }
 0x381   :  { %6814 = vmatpush.bf16.msra.mxu3 %v11056_v25 }
 0x382   :  { %6851 = vmatpush.bf16.msrb.mxu2 %v10452_v40  ;;  %v10644_v40 = vor.u32 %v12154_v4, %v10641_v45  ;;  %v5106_v31 = vpop.f32.mrf.mxu0  ;;  %v10980_v45 = vor.u32 %v12238_v9, %v10977_v16 }
 0x384   :  { %6940 = vmatpush.bf16.msrb.mxu1 %v10360_v54  ;;  %6928 = vmatpush.bf16.msrb.mxu0 %v10216_v63  ;;  %v5119_v54 = vpop.f32.mrf.mxu1  ;;  %v5039_v63 = vpop.f32.mrf.mxu3 }
 0x385   :  { %6815 = vmatpush.bf16.msra.mxu3 %v11040_v14  ;;  %v10593_v14 = vld [vmem:[#allocation13 + $0x390] sm:$0xf0]  ;;  %v13353_v54 = vld [vmem:[#allocation14] sm:$0xf] }
 0x386   :  { %6852 = vmatpush.bf16.msrb.mxu2 %v10436_v18  ;;  %v12150_v18 = vld [vmem:[#allocation13 + $0x3c4] sm:$0xf] }
 0x387   :  { %v10628_v33 = vor.u32 %v12150_v18, %v10625_v35  ;;  %v10945_v18 = vld [vmem:[#allocation13 + $0x650] sm:$0xf0]  ;;  %v10727_v35 = vld [vmem:[#allocation13 + $0x488] sm:$0xf] }
 0x388   :  { %6941 = vmatpush.bf16.msrb.mxu1 %v10344_v19  ;;  %6929 = vmatpush.bf16.msrb.mxu0 %v10200_v42  ;;  %v10296_v19 = vor.u32 %v12069_v56, %v10295_v12  ;;  %v10612_v42 = vor.u32 %v12146_v59, %v10609_v24  ;;  %v10577_v12 = vld [vmem:[#allocation13 + $0x370] sm:$0xf0]  ;;  %v10839_v59 = vld [vmem:[#allocation13 + $0x568] sm:$0xf]  ;;  %v12205_v24 = vld [vmem:[#allocation13 + $0x574] sm:$0xf0] }
 0x389   :  { %6860 = vmatpush.bf16.msrb.mxu3 %v10644_v40  ;;  %v10961_v40 = vld [vmem:[#allocation13 + $0x670] sm:$0xf0]  ;;  %v10580_v56 = vor.u32 %v12138_v53, %v10577_v12  ;;  %v12165_v12 = vld [vmem:[#allocation13 + $0x434] sm:$0xf0] }
 0x38a   :  { %6853 = vmatpush.bf16.msrb.mxu2 %v10420_v2  ;;  %v5040_v2 = vadd.f32 %v5039_v63, %v1447_v20  ;;  %v12234_v20 = vld [vmem:[#allocation13 + $0x664] sm:$0xf] }
 0x38b   :  { %v10964_v31 = vor.u32 %v12234_v20, %v10961_v40  ;;  %v12134_v63 = vld [vmem:[#allocation13 + $0x344] sm:$0xf] }
 0x38c   :  { %6942 = vmatpush.bf16.msrb.mxu1 %v10328_v38  ;;  %6930 = vmatpush.bf16.msrb.mxu0 %v10184_v26  ;;  %v5053_v25 = vadd.f32 %v13331_v15, %v5040_v2  ;;  %v10904_v38 = vor.u32 %v12221_v48, %v10903_v23  ;;  %v12142_v15 = vld [vmem:[#allocation13 + $0x384] sm:$0xf]  ;;  %v5041_v4 = vpop.f32.mrf.mxu3  ;;  %v12173_v48 = vld [vmem:[#allocation13 + $0x474] sm:$0xf0] }
 0x38d   :  { %6861 = vmatpush.bf16.msrb.mxu3 %v10628_v33  ;;  %v10596_v43 = vor.u32 %v12142_v15, %v10593_v14  ;;  %v5429_v33 = vperm.slane %v13353_v54, 0  ;;  %v12226_v2 = vld [vmem:[#allocation13 + $0x624] sm:$0xf]  ;;  %v10712_v16 = vor.u32 %v12173_v48, %v10711_v37  ;;  %v10823_v15 = vld [vmem:[#allocation13 + $0x548] sm:$0xf] }
 0x38e   :  { %6854 = vmatpush.bf16.msrb.mxu2 %v10404_v55  ;;  %v13349_v32 = vadd.f32 %v13333_v10, %v5053_v25  ;;  %v12185_v55 = vld [vmem:[#allocation13 + $0x4d4] sm:$0xf0]  ;;  %v10743_v10 = vld [vmem:[#allocation13 + $0x4a8] sm:$0xf] }
 0x38f   :  { %v10760_v26 = vor.u32 %v12185_v55, %v10759_v49  ;;  %v10840_v49 = vor.u32 %v12205_v24, %v10839_v59  ;;  %v10913_v55 = vld [vmem:[#allocation13 + $0x610] sm:$0xf0]  ;;  %v12201_v14 = vld [vmem:[#allocation13 + $0x554] sm:$0xf0]  ;;  %v10519_v4 = vld [vmem:[#allocation13 + $0x2e8] sm:$0xf] }
 0x390   :  { %6943 = vmatpush.bf16.msrb.mxu1 %v10312_v30  ;;  %6931 = vmatpush.bf16.msrb.mxu0 %v10168_v60  ;;  %v12181_v30 = vld [vmem:[#allocation13 + $0x4b4] sm:$0xf0] }
 0x391   :  { %6862 = vmatpush.bf16.msrb.mxu3 %v10612_v42  ;;  %v10744_v7 = vor.u32 %v12181_v30, %v10743_v10  ;;  %v12177_v60 = vld [vmem:[#allocation13 + $0x494] sm:$0xf0]  ;;  %6855 = vmatmul.bf16.vlgmr.msrb.gmra.mxu2 %v13320_v58  ;;  %v12130_v42 = vld [vmem:[#allocation13 + $0x324] sm:$0xf]  ;;  %v10696_v10 = vor.u32 %v12169_v51, %v10695_v61  ;;  %v10824_v30 = vor.u32 %v12201_v14, %v10823_v15  ;;  %v12051_v14 = vld [vmem:[#allocation13 + $0xac] sm:$0xf] }
 0x392   :  { %6899 = vmatpush.bf16.msra.mxu2 %v11028_v13  ;;  %v10871_v13 = vld [vmem:[#allocation13 + $0x5a8] sm:$0xf]  ;;  %v10728_v17 = vor.u32 %v12177_v60, %v10727_v35  ;;  %v12109_v15 = vld [vmem:[#allocation13 + $0x274] sm:$0xf0] }
 0x393   :  { %v10872_v3 = vor.u32 %v12213_v52, %v10871_v13  ;;  %v10679_v13 = vld [vmem:[#allocation13 + $0x428] sm:$0xf] }
 0x394   :  { %6944 = vmatpush.bf16.msrb.mxu1 %v10296_v19  ;;  %6932 = vmatpush.bf16.msrb.mxu0 %v10152_v39  ;;  %v13356_v0 = vpop.f32.mrf.mxu2  ;;  %v10561_v19 = vld [vmem:[#allocation13 + $0x350] sm:$0xf0]  ;;  %v6726_v23 = vpop.f32.mrf.mxu0  ;;  %v10680_v35 = vor.u32 %v12165_v12, %v10679_v13  ;;  %v10217_v13 = vld [vmem:[#allocation13 + $0x98] sm:$0xf0] }
 0x395   :  { %6863 = vmatpush.bf16.msrb.mxu3 %v10596_v43  ;;  %v10564_v41 = vor.u32 %v12134_v63, %v10561_v19  ;;  %v6727_v25 = vadd.f32 %v6726_v23, %v5429_v33  ;;  %v12125_v43 = vld [vmem:[#allocation13 + $0x2f4] sm:$0xf0]  ;;  %v10791_v63 = vld [vmem:[#allocation13 + $0x508] sm:$0xf]  ;;  %v5079_v37 = vadd.f32 %v13356_v0, %v13349_v32  ;;  %v10664_v23 = vor.u32 %v12161_v27, %v10663_v62  ;;  %v10345_v12 = vld [vmem:[#allocation13 + $0x198] sm:$0xf0] }
 0x396   :  { %6900 = vmatpush.bf16.msra.mxu2 %v11012_v8  ;;  %v10948_v8 = vor.u32 %v12230_v36, %v10945_v18  ;;  %v10520_v53 = vor.u32 %v12125_v43, %v10519_v4  ;;  %v12121_v36 = vld [vmem:[#allocation13 + $0x2d4] sm:$0xf0]  ;;  %v10233_v4 = vld [vmem:[#allocation13 + $0xb8] sm:$0xf0]  ;;  %v12043_v62 = vld [vmem:[#allocation13 + $0x6c] sm:$0xf] }
 0x397   :  { %6933 = vmatmul.bf16.vlgmr.msrb.gmra.mxu0 %v13284_v11  ;;  %v12193_v19 = vld [vmem:[#allocation13 + $0x514] sm:$0xf0]  ;;  %v10361_v43 = vld [vmem:[#allocation13 + $0x1b8] sm:$0xf0] }
 0x398   :  { %6945 = vmatpush.bf16.msrb.mxu1 %v10280_v28  ;;  %6977 = vmatpush.bf16.msra.mxu0 %v10776_v34  ;;  %v6739_v39 = vpop.f32.mrf.mxu1  ;;  %v10545_v28 = vld [vmem:[#allocation13 + $0x330] sm:$0xf0]  ;;  %v12222_v34 = vld [vmem:[#allocation13 + $0x604] sm:$0xf]  ;;  %v10792_v48 = vor.u32 %v12193_v19, %v10791_v63  ;;  %v10201_v27 = vld [vmem:[#allocation13 + $0x78] sm:$0xf0] }
 0x399   :  { %6864 = vmatpush.bf16.msrb.mxu3 %v10580_v56  ;;  %v13359_v9 = vadd.f32 %v6739_v39, %v6727_v25  ;;  %v10916_v20 = vor.u32 %v12222_v34, %v10913_v55  ;;  %v12197_v56 = vld [vmem:[#allocation13 + $0x534] sm:$0xf0]  ;;  %v10471_v25 = vld [vmem:[#allocation13 + $0x288] sm:$0xf]  ;;  %v10249_v34 = vld [vmem:[#allocation13 + $0xd8] sm:$0xf0] }
 0x39a   :  { %6901 = vmatpush.bf16.msra.mxu2 %v10996_v21  ;;  %v10932_v21 = vor.u32 %v12226_v2, %v10929_v57  ;;  %v12091_v2 = vld [vmem:[#allocation13 + $0x1ec] sm:$0xf]  ;;  %v10393_v57 = vld [vmem:[#allocation13 + $0x1f8] sm:$0xf0]  ;;  %v10455_v55 = vld [vmem:[#allocation13 + $0x268] sm:$0xf] }
 0x39b   :  { %6946 = vmatmul.bf16.vlgmr.msrb.gmra.mxu1 %v13286_v50  ;;  %v10329_v63 = vld [vmem:[#allocation13 + $0x178] sm:$0xf0] }
 0x39c   :  { %6990 = vmatpush.bf16.msra.mxu1 %v10904_v38  ;;  %6978 = vmatpush.bf16.msra.mxu0 %v10760_v26  ;;  %v10548_v38 = vor.u32 %v12130_v42, %v10545_v28  ;;  %v12126_v26 = vld [vmem:[#allocation13 + $0x304] sm:$0xf]  ;;  %v6728_v52 = vpop.f32.mrf.mxu0  ;;  %v10396_v42 = vor.u32 %v12091_v2, %v10393_v57  ;;  %v12113_v28 = vld [vmem:[#allocation13 + $0x294] sm:$0xf0]  ;;  %v10407_v2 = vld [vmem:[#allocation13 + $0x208] sm:$0xf] }
 0x39d   :  { %6865 = vmatpush.bf16.msrb.mxu3 %v10564_v41  ;;  %v12117_v41 = vld [vmem:[#allocation13 + $0x2b4] sm:$0xf0]  ;;  %v10472_v32 = vor.u32 %v12113_v28, %v10471_v25  ;;  %v11031_v28 = vld [vmem:[#allocation13 + $0x6e8] sm:$0xf] }
 0x39e   :  { %6902 = vmatpush.bf16.msra.mxu2 %v10980_v45  ;;  %v5080_v45 = vpop.f32.mrf.mxu2  ;;  %v12097_v57 = vld [vmem:[#allocation13 + $0x214] sm:$0xf0] }
 0x39f   :  { %v12083_v45 = vld [vmem:[#allocation13 + $0x1ac] sm:$0xf] }
 0x3a0   :  { %6991 = vmatpush.bf16.msra.mxu1 %v10888_v22  ;;  %6979 = vmatpush.bf16.msra.mxu0 %v10744_v7  ;;  %v10529_v22 = vld [vmem:[#allocation13 + $0x310] sm:$0xf0]  ;;  %v6741_v7 = vpop.f32.mrf.mxu1 }
 0x3a1   :  { %6866 = vmatpush.bf16.msrb.mxu3 %v10548_v38  ;;  %v10532_v40 = vor.u32 %v12126_v26, %v10529_v22  ;;  %v12087_v38 = vld [vmem:[#allocation13 + $0x1cc] sm:$0xf]  ;;  %v10456_v26 = vor.u32 %v12109_v15, %v10455_v55  ;;  %v10236_v22 = vor.u32 %v12051_v14, %v10233_v4  ;;  %v10169_v14 = vld [vmem:[#allocation13 + $0x38] sm:$0xf0] }
 0x3a2   :  { %6903 = vmatpush.bf16.msra.mxu2 %v10964_v31  ;;  %v10807_v31 = vld [vmem:[#allocation13 + $0x528] sm:$0xf]  ;;  %v12035_v15 = vld [vmem:[#allocation13 + $0x2c] sm:$0xf] }
 0x3a3   :  { %v10808_v60 = vor.u32 %v12197_v56, %v10807_v31  ;;  %v12067_v4 = vld [vmem:[#allocation13 + $0x12c] sm:$0xf] }
 0x3a4   :  { %6992 = vmatpush.bf16.msra.mxu1 %v10872_v3  ;;  %6980 = vmatpush.bf16.msra.mxu0 %v10728_v17  ;;  %v10503_v3 = vld [vmem:[#allocation13 + $0x2c8] sm:$0xf]  ;;  %v5091_v18 = vpop.f32.mrf.mxu3  ;;  %v12059_v17 = vld [vmem:[#allocation13 + $0xec] sm:$0xf] }
 0x3a5   :  { %6867 = vmatpush.bf16.msrb.mxu3 %v10532_v40  ;;  %v10504_v33 = vor.u32 %v12121_v36, %v10503_v3  ;;  %v5092_v39 = vadd.f32 %v5091_v18, %v5079_v37  ;;  %v10364_v40 = vor.u32 %v12083_v45, %v10361_v43  ;;  %v10423_v36 = vld [vmem:[#allocation13 + $0x228] sm:$0xf] }
 0x3a6   :  { %6904 = vmatpush.bf16.msra.mxu2 %v10948_v8  ;;  %v10487_v8 = vld [vmem:[#allocation13 + $0x2a8] sm:$0xf] }
 0x3a7   :  { %v10488_v59 = vor.u32 %v12117_v41, %v10487_v8  ;;  %v5105_v61 = vadd.f32 %v13339_v44, %v5092_v39  ;;  %v12282_v8 = vld [vmem:[#allocation13 + $0x7e4] sm:$0xf]  ;;  %v11153_v41 = vld [vmem:[#allocation13 + $0x7f0] sm:$0xf0] }
 0x3a8   :  { %6993 = vmatpush.bf16.msra.mxu1 %v10856_v47  ;;  %6981 = vmatpush.bf16.msra.mxu0 %v10712_v16  ;;  %v10265_v47 = vld [vmem:[#allocation13 + $0xf8] sm:$0xf0]  ;;  %v11156_v39 = vor.u32 %v12282_v8, %v11153_v41 }
 0x3a9   :  { %v10268_v24 = vor.u32 %v12059_v17, %v10265_v47  ;;  %v10377_v16 = vld [vmem:[#allocation13 + $0x1d8] sm:$0xf0]  ;;  %v5118_v44 = vadd.f32 %v13341_v1, %v5105_v61  ;;  %v10204_v47 = vor.u32 %v12043_v62, %v10201_v27  ;;  %v12270_v27 = vld [vmem:[#allocation13 + $0x784] sm:$0xf] }
 0x3aa   :  { %6905 = vmatpush.bf16.msra.mxu2 %v10932_v21  ;;  %v12055_v21 = vld [vmem:[#allocation13 + $0xcc] sm:$0xf]  ;;  %v10380_v51 = vor.u32 %v12087_v38, %v10377_v16  ;;  %v12278_v38 = vld [vmem:[#allocation13 + $0x7c4] sm:$0xf]  ;;  %v11137_v16 = vld [vmem:[#allocation13 + $0x7d0] sm:$0xf0] }
 0x3ab   :  { %v10252_v0 = vor.u32 %v12055_v21, %v10249_v34  ;;  %v12253_v21 = vld [vmem:[#allocation13 + $0x6f4] sm:$0xf0]  ;;  %v11140_v43 = vor.u32 %v12278_v38, %v11137_v16  ;;  %v12179_v16 = vld [vmem:[#allocation13 + $0x4ac] sm:$0xf] }
 0x3ac   :  { %6994 = vmatpush.bf16.msra.mxu1 %v10840_v49  ;;  %6982 = vmatpush.bf16.msra.mxu0 %v10696_v10  ;;  %v5093_v49 = vpop.f32.mrf.mxu3  ;;  %v12105_v10 = vld [vmem:[#allocation13 + $0x254] sm:$0xf0] }
 0x3ad   :  { %v12237_v38 = vld [vmem:[#allocation13 + $0x674] sm:$0xf0] }
 0x3ae   :  { %6906 = vmatpush.bf16.msra.mxu2 %v10916_v20  ;;  %v10439_v20 = vld [vmem:[#allocation13 + $0x248] sm:$0xf] }
 0x3af   :  { %v10440_v7 = vor.u32 %v12105_v10, %v10439_v20  ;;  %v12249_v20 = vld [vmem:[#allocation13 + $0x6d4] sm:$0xf0]  ;;  %v10172_v10 = vor.u32 %v12035_v15, %v10169_v14  ;;  %v11073_v15 = vld [vmem:[#allocation13 + $0x750] sm:$0xf0] }
 0x3b0   :  { %6995 = vmatpush.bf16.msra.mxu1 %v10824_v30  ;;  %6983 = vmatpush.bf16.msra.mxu0 %v10680_v35  ;;  %v12047_v30 = vld [vmem:[#allocation13 + $0x8c] sm:$0xf] }
 0x3b1   :  { %6907 = vmatmul.bf16.vlgmr.msra.gmra.mxu2 %v13344_v5  ;;  %v10220_v3 = vor.u32 %v12047_v30, %v10217_v13  ;;  %v12031_v30 = vld [vmem:[#allocation13 + $0xc] sm:$0xf] }
 0x3b2   :  { %6951 = vmatpush.bf16.msrb.mxu2 %v10520_v53  ;;  %v12079_v53 = vld [vmem:[#allocation13 + $0x18c] sm:$0xf] }
 0x3b3   :  { %v10348_v35 = vor.u32 %v12079_v53, %v10345_v12  ;;  %v10153_v53 = vld [vmem:[#allocation13 + $0x18] sm:$0xf0]  ;;  %v12063_v12 = vld [vmem:[#allocation13 + $0x10c] sm:$0xf] }
 0x3b4   :  { %6996 = vmatpush.bf16.msra.mxu1 %v10808_v60  ;;  %6984 = vmatpush.bf16.msra.mxu0 %v10664_v23  ;;  %v5130_v52 = vpop.f32.mrf.mxu2  ;;  %v5143_v56 = vpop.f32.mrf.mxu3  ;;  %v12101_v60 = vld [vmem:[#allocation13 + $0x234] sm:$0xf0]  ;;  %v10156_v62 = vor.u32 %v12031_v30, %v10153_v53  ;;  %v11057_v53 = vld [vmem:[#allocation13 + $0x730] sm:$0xf0] }
 0x3b5   :  { %v5131_v31 = vadd.f32 %v5130_v52, %v5118_v44  ;;  %v13368_v1 = vpop.f32.mrf.mxu0  ;;  %v10424_v17 = vor.u32 %v12101_v60, %v10423_v36  ;;  %v11121_v44 = vld [vmem:[#allocation13 + $0x7b0] sm:$0xf0]  ;;  %v12187_v36 = vld [vmem:[#allocation13 + $0x4ec] sm:$0xf]  ;;  %v10905_v60 = vld [vmem:[#allocation13 + $0x5f8] sm:$0xf0] }
 0x3b6   :  { %6952 = vmatpush.bf16.msrb.mxu2 %v10504_v33  ;;  %v12075_v33 = vld [vmem:[#allocation13 + $0x16c] sm:$0xf] }
 0x3b7   :  { %6985 = vmatmul.bf16.vlgmr.msra.gmra.mxu0 %v13303_v46  ;;  %v5144_v18 = vadd.f32 %v5143_v56, %v5131_v31  ;;  %v10332_v23 = vor.u32 %v12075_v33, %v10329_v63  ;;  %v10281_v31 = vld [vmem:[#allocation13 + $0x118] sm:$0xf0]  ;;  %v11105_v33 = vld [vmem:[#allocation13 + $0x790] sm:$0xf0] }
 0x3b8   :  { %6997 = vmatpush.bf16.msra.mxu1 %v10792_v48  ;;  %7029 = vmatpush.bf16.msrb.mxu0 %v10268_v24  ;;  %v12039_v48 = vld [vmem:[#allocation13 + $0x4c] sm:$0xf]  ;;  %v13372_v55 = vpop.f32.mrf.mxu1 }
 0x3b9   :  { %v5154_v19 = vmul.f32 0.01, %v5144_v18  ;;  %v12071_v24 = vld [vmem:[#allocation13 + $0x14c] sm:$0xf] }
 0x3ba   :  { %6953 = vmatpush.bf16.msrb.mxu2 %v10488_v59  ;;  %v10185_v59 = vld [vmem:[#allocation13 + $0x58] sm:$0xf0] }
 0x3bb   :  { %6998 = vmatmul.bf16.vlgmr.msra.gmra.mxu1 %v13307_v29  ;;  %v5162_v37 = vmax.f32 %v5144_v18, %v5154_v19  ;;  %v10777_v18 = vld [vmem:[#allocation13 + $0x4f8] sm:$0xf0]  ;;  %v10284_v19 = vor.u32 %v12063_v12, %v10281_v31  ;;  %v10935_v31 = vld [vmem:[#allocation13 + $0x628] sm:$0xf] }
 0x3bc   :  { %7042 = vmatpush.bf16.msrb.mxu1 %v10396_v42  ;;  %7030 = vmatpush.bf16.msrb.mxu0 %v10252_v0  ;;  %v5132_v25 = vpop.f32.mrf.mxu2  ;;  %v10313_v42 = vld [vmem:[#allocation13 + $0x158] sm:$0xf0]  ;;  %v5145_v49 = vpop.f32.mrf.mxu3  ;;  %v10188_v0 = vor.u32 %v12039_v48, %v10185_v59  ;;  %v10780_v41 = vor.u32 %v12187_v36, %v10777_v18  ;;  %v12215_v48 = vld [vmem:[#allocation13 + $0x5cc] sm:$0xf]  ;;  %v12229_v36 = vld [vmem:[#allocation13 + $0x634] sm:$0xf0] }
 0x3bd   :  { %v13370_v34 = vpack.c.bf16 %v5162_v37, %v5162_v37  ;;  %v10316_v61 = vor.u32 %v12071_v24, %v10313_v42  ;;  %v6780_v45 = vpop.f32.mrf.mxu0  ;;  %v11108_v37 = vor.u32 %v12270_v27, %v11105_v33  ;;  %v10889_v59 = vld [vmem:[#allocation13 + $0x5d8] sm:$0xf0]  ;;  %v12266_v24 = vld [vmem:[#allocation13 + $0x764] sm:$0xf]  ;;  %v11089_v25 = vld [vmem:[#allocation13 + $0x770] sm:$0xf0] }
 0x3be   :  { %6954 = vmatpush.bf16.msrb.mxu2 %v10472_v32  ;;  %v10408_v32 = vor.u32 %v12097_v57, %v10407_v2  ;;  %v12241_v2 = vld [vmem:[#allocation13 + $0x694] sm:$0xf0]  ;;  %v12183_v57 = vld [vmem:[#allocation13 + $0x4cc] sm:$0xf]  ;;  %v11092_v49 = vor.u32 %v12266_v24, %v11089_v25 }
 0x3bf   :  { %6816 = vmatmul.bf16.vlgmr.msra.gmra.mxu3 %v13370_v34  ;;  %v12171_v18 = vld [vmem:[#allocation13 + $0x46c] sm:$0xf]  ;;  %v12225_v24 = vld [vmem:[#allocation13 + $0x614] sm:$0xf0] }
 0x3c0   :  { %7043 = vmatpush.bf16.msrb.mxu1 %v10380_v51  ;;  %7031 = vmatpush.bf16.msrb.mxu0 %v10236_v22  ;;  %v11032_v51 = vor.u32 %v12253_v21, %v11031_v28  ;;  %v11015_v22 = vld [vmem:[#allocation13 + $0x6c8] sm:$0xf]  ;;  %v6793_v63 = vpop.f32.mrf.mxu1  ;;  %v10892_v28 = vor.u32 %v12215_v48, %v10889_v59  ;;  %v12203_v27 = vld [vmem:[#allocation13 + $0x56c] sm:$0xf] }
 0x3c1   :  { %6912 = vmatpush.bf16.msra.mxu3 %v11156_v39  ;;  %v11016_v52 = vor.u32 %v12249_v20, %v11015_v22  ;;  %v10967_v21 = vld [vmem:[#allocation13 + $0x668] sm:$0xf]  ;;  %v12175_v22 = vld [vmem:[#allocation13 + $0x48c] sm:$0xf] }
 0x3c2   :  { %6955 = vmatpush.bf16.msrb.mxu2 %v10456_v26  ;;  %v10297_v26 = vld [vmem:[#allocation13 + $0x138] sm:$0xf0]  ;;  %v10968_v14 = vor.u32 %v12237_v38, %v10967_v21  ;;  %v10919_v59 = vld [vmem:[#allocation13 + $0x608] sm:$0xf]  ;;  %v12167_v25 = vld [vmem:[#allocation13 + $0x44c] sm:$0xf] }
 0x3c3   :  { %v10300_v13 = vor.u32 %v12067_v4, %v10297_v26  ;;  %v10951_v26 = vld [vmem:[#allocation13 + $0x648] sm:$0xf]  ;;  %v12199_v21 = vld [vmem:[#allocation13 + $0x54c] sm:$0xf]  ;;  %v10825_v38 = vld [vmem:[#allocation13 + $0x558] sm:$0xf0] }
 0x3c4   :  { %7044 = vmatpush.bf16.msrb.mxu1 %v10364_v40  ;;  %7032 = vmatpush.bf16.msrb.mxu0 %v10220_v3  ;;  %v12274_v40 = vld [vmem:[#allocation13 + $0x7a4] sm:$0xf]  ;;  %v12245_v3 = vld [vmem:[#allocation13 + $0x6b4] sm:$0xf0] }
 0x3c5   :  { %6913 = vmatpush.bf16.msra.mxu3 %v11140_v43  ;;  %v11124_v56 = vor.u32 %v12274_v40, %v11121_v44  ;;  %v10729_v44 = vld [vmem:[#allocation13 + $0x498] sm:$0xf0] }
 0x3c6   :  { %6956 = vmatpush.bf16.msrb.mxu2 %v10440_v7  ;;  %v10999_v7 = vld [vmem:[#allocation13 + $0x6a8] sm:$0xf] }
 0x3c7   :  { %v11000_v8 = vor.u32 %v12245_v3, %v10999_v7  ;;  %v10732_v7 = vor.u32 %v12175_v22, %v10729_v44  ;;  %v10505_v44 = vld [vmem:[#allocation13 + $0x2d8] sm:$0xf0] }
 0x3c8   :  { %7045 = vmatpush.bf16.msrb.mxu1 %v10348_v35  ;;  %7033 = vmatpush.bf16.msrb.mxu0 %v10204_v47  ;;  %v12219_v35 = vld [vmem:[#allocation13 + $0x5ec] sm:$0xf]  ;;  %v10983_v47 = vld [vmem:[#allocation13 + $0x688] sm:$0xf] }
 0x3c9   :  { %6914 = vmatpush.bf16.msra.mxu3 %v11124_v56  ;;  %v10984_v39 = vor.u32 %v12241_v2, %v10983_v47  ;;  %v10647_v2 = vld [vmem:[#allocation13 + $0x3e8] sm:$0xf] }
 0x3ca   :  { %6957 = vmatpush.bf16.msrb.mxu2 %v10424_v17  ;;  %v10908_v17 = vor.u32 %v12219_v35, %v10905_v60  ;;  %v10713_v35 = vld [vmem:[#allocation13 + $0x478] sm:$0xf0] }
 0x3cb   :  { %v10716_v47 = vor.u32 %v12171_v18, %v10713_v35  ;;  %v10599_v18 = vld [vmem:[#allocation13 + $0x388] sm:$0xf]  ;;  %v12145_v35 = vld [vmem:[#allocation13 + $0x394] sm:$0xf0] }
 0x3cc   :  { %7046 = vmatpush.bf16.msrb.mxu1 %v10332_v23  ;;  %7034 = vmatpush.bf16.msrb.mxu0 %v10188_v0  ;;  %v10761_v23 = vld [vmem:[#allocation13 + $0x4d8] sm:$0xf0]  ;;  %v12211_v0 = vld [vmem:[#allocation13 + $0x5ac] sm:$0xf] }
 0x3cd   :  { %v10764_v42 = vor.u32 %v12183_v57, %v10761_v23  ;;  %6915 = vmatpush.bf16.msra.mxu3 %v11108_v37  ;;  %v12157_v57 = vld [vmem:[#allocation13 + $0x3f4] sm:$0xf0] }
 0x3ce   :  { %6958 = vmatpush.bf16.msrb.mxu2 %v10408_v32  ;;  %v10745_v32 = vld [vmem:[#allocation13 + $0x4b8] sm:$0xf0] }
 0x3cf   :  { %6868 = vmatmul.bf16.vlgmr.msrb.gmra.mxu3 %v13318_v6  ;;  %v10748_v45 = vor.u32 %v12179_v16, %v10745_v32  ;;  %v10648_v16 = vor.u32 %v12157_v57, %v10647_v2  ;;  %v10521_v32 = vld [vmem:[#allocation13 + $0x2f8] sm:$0xf0]  ;;  %v10567_v57 = vld [vmem:[#allocation13 + $0x348] sm:$0xf] }
 0x3d0   :  { %7047 = vmatpush.bf16.msrb.mxu1 %v10316_v61  ;;  %7035 = vmatpush.bf16.msrb.mxu0 %v10172_v10  ;;  %v10873_v61 = vld [vmem:[#allocation13 + $0x5b8] sm:$0xf0]  ;;  %v12207_v10 = vld [vmem:[#allocation13 + $0x58c] sm:$0xf] }
 0x3d1   :  { %6959 = vmatmul.bf16.vlgmr.msrb.gmra.mxu2 %v13320_v58  ;;  %v10876_v43 = vor.u32 %v12211_v0, %v10873_v61  ;;  %6916 = vmatpush.bf16.msra.mxu3 %v11092_v49  ;;  %v12123_v49 = vld [vmem:[#allocation13 + $0x2ec] sm:$0xf]  ;;  %v10920_v0 = vor.u32 %v12225_v24, %v10919_v59  ;;  %v10631_v61 = vld [vmem:[#allocation13 + $0x3c8] sm:$0xf]  ;;  %v10457_v2 = vld [vmem:[#allocation13 + $0x278] sm:$0xf0] }
 0x3d2   :  { %7003 = vmatpush.bf16.msra.mxu2 %v11032_v51  ;;  %v12262_v51 = vld [vmem:[#allocation13 + $0x744] sm:$0xf]  ;;  %v12103_v24 = vld [vmem:[#allocation13 + $0x24c] sm:$0xf] }
 0x3d3   :  { %v11076_v40 = vor.u32 %v12262_v51, %v11073_v15  ;;  %v12153_v51 = vld [vmem:[#allocation13 + $0x3d4] sm:$0xf0] }
 0x3d4   :  { %7048 = vmatpush.bf16.msrb.mxu1 %v10300_v13  ;;  %7036 = vmatpush.bf16.msrb.mxu0 %v10156_v62  ;;  %v6765_v4 = vpop.f32.mrf.mxu3  ;;  %v6752_v20 = vpop.f32.mrf.mxu2  ;;  %v5430_v13 = vperm.slane %v13353_v54, 1 }
 0x3d5   :  { %v6753_v30 = vadd.f32 %v6752_v20, %v13359_v9  ;;  %v6830_v60 = vpop.f32.mrf.mxu0  ;;  %6917 = vmatpush.bf16.msra.mxu3 %v11076_v40  ;;  %v10841_v9 = vld [vmem:[#allocation13 + $0x578] sm:$0xf0]  ;;  %v10632_v20 = vor.u32 %v12153_v51, %v10631_v61  ;;  %v12119_v40 = vld [vmem:[#allocation13 + $0x2cc] sm:$0xf]  ;;  %v12285_v61 = vld [vmem:[#allocation13 + $0x7f4] sm:$0xf0] }
 0x3d6   :  { %7004 = vmatpush.bf16.msra.mxu2 %v11016_v52  ;;  %v12258_v52 = vld [vmem:[#allocation13 + $0x724] sm:$0xf]  ;;  %v6831_v33 = vadd.f32 %v6830_v60, %v5430_v13  ;;  %v10844_v48 = vor.u32 %v12203_v27, %v10841_v9  ;;  %v10600_v9 = vor.u32 %v12145_v35, %v10599_v18  ;;  %v12301_v18 = vld [vmem:[#allocation16 + $0x74] sm:$0xf0] }
 0x3d7   :  { %7037 = vmatmul.bf16.vlgmr.msrb.gmra.mxu0 %v13284_v11  ;;  %v12233_v11 = vld [vmem:[#allocation13 + $0x654] sm:$0xf0]  ;;  %v6766_v56 = vadd.f32 %v6765_v4, %v6753_v30  ;;  %v11060_v62 = vor.u32 %v12258_v52, %v11057_v53  ;;  %v12163_v4 = vld [vmem:[#allocation13 + $0x42c] sm:$0xf]  ;;  %v10508_v53 = vor.u32 %v12119_v40, %v10505_v44 }
 0x3d8   :  { %7049 = vmatpush.bf16.msrb.mxu1 %v10284_v19  ;;  %7081 = vmatpush.bf16.msra.mxu0 %v10780_v41  ;;  %v10952_v12 = vor.u32 %v12233_v11, %v10951_v26  ;;  %v6843_v63 = vpop.f32.mrf.mxu1  ;;  %v12254_v19 = vld [vmem:[#allocation13 + $0x704] sm:$0xf]  ;;  %v12195_v26 = vld [vmem:[#allocation13 + $0x52c] sm:$0xf]  ;;  %v10809_v11 = vld [vmem:[#allocation13 + $0x538] sm:$0xf0] }
 0x3d9   :  { %v6779_v41 = vadd.f32 %v13368_v1, %v6766_v56  ;;  %v13382_v37 = vadd.f32 %v6843_v63, %v6831_v33  ;;  %6918 = vmatpush.bf16.msra.mxu3 %v11060_v62  ;;  %v10812_v13 = vor.u32 %v12195_v26, %v10809_v11  ;;  %v12159_v52 = vld [vmem:[#allocation13 + $0x40c] sm:$0xf]  ;;  %v10793_v56 = vld [vmem:[#allocation13 + $0x518] sm:$0xf0]  ;;  %v11143_v26 = vld [vmem:[#allocation13 + $0x7c8] sm:$0xf] }
 0x3da   :  { %7005 = vmatpush.bf16.msra.mxu2 %v11000_v8  ;;  %v11041_v8 = vld [vmem:[#allocation13 + $0x710] sm:$0xf0]  ;;  %v12111_v33 = vld [vmem:[#allocation13 + $0x28c] sm:$0xf]  ;;  %v10473_v63 = vld [vmem:[#allocation13 + $0x298] sm:$0xf0] }
 0x3db   :  { %7050 = vmatmul.bf16.vlgmr.msrb.gmra.mxu1 %v13286_v50  ;;  %v10857_v50 = vld [vmem:[#allocation13 + $0x598] sm:$0xf0]  ;;  %v11044_v1 = vor.u32 %v12254_v19, %v11041_v8  ;;  %v10583_v19 = vld [vmem:[#allocation13 + $0x368] sm:$0xf]  ;;  %v12141_v8 = vld [vmem:[#allocation13 + $0x374] sm:$0xf0] }
 0x3dc   :  { %7094 = vmatpush.bf16.msra.mxu1 %v10908_v17  ;;  %7082 = vmatpush.bf16.msra.mxu0 %v10764_v42  ;;  %v10860_v3 = vor.u32 %v12207_v10, %v10857_v50  ;;  %v10936_v17 = vor.u32 %v12229_v36, %v10935_v31  ;;  %v6767_v23 = vpop.f32.mrf.mxu3  ;;  %v6754_v42 = vpop.f32.mrf.mxu2  ;;  %v10615_v10 = vld [vmem:[#allocation13 + $0x3a8] sm:$0xf]  ;;  %v12149_v50 = vld [vmem:[#allocation13 + $0x3b4] sm:$0xf0]  ;;  %v12191_v31 = vld [vmem:[#allocation13 + $0x50c] sm:$0xf] }
 0x3dd   :  { %6919 = vmatpush.bf16.msra.mxu3 %v11044_v1  ;;  %v10489_v36 = vld [vmem:[#allocation13 + $0x2b8] sm:$0xf0]  ;;  %v10796_v62 = vor.u32 %v12191_v31, %v10793_v56  ;;  %v12137_v23 = vld [vmem:[#allocation13 + $0x354] sm:$0xf0]  ;;  %v10551_v42 = vld [vmem:[#allocation13 + $0x328] sm:$0xf] }
 0x3de   :  { %7006 = vmatpush.bf16.msra.mxu2 %v10984_v39  ;;  %v13385_v39 = vadd.f32 %v13372_v55, %v6779_v41  ;;  %v6832_v55 = vpop.f32.mrf.mxu0  ;;  %v10476_v41 = vor.u32 %v12111_v33, %v10473_v63  ;;  %v10568_v59 = vor.u32 %v12137_v23, %v10567_v57  ;;  %v12133_v1 = vld [vmem:[#allocation13 + $0x334] sm:$0xf0]  ;;  %v12243_v31 = vld [vmem:[#allocation13 + $0x6ac] sm:$0xf]  ;;  %v11001_v56 = vld [vmem:[#allocation13 + $0x6b8] sm:$0xf0] }
 0x3df   :  { %v12281_v11 = vld [vmem:[#allocation13 + $0x7d4] sm:$0xf0]  ;;  %v11095_v33 = vld [vmem:[#allocation13 + $0x768] sm:$0xf] }
 0x3e0   :  { %7095 = vmatpush.bf16.msra.mxu1 %v10892_v28  ;;  %7083 = vmatpush.bf16.msra.mxu0 %v10748_v45  ;;  %v10697_v28 = vld [vmem:[#allocation13 + $0x458] sm:$0xf0]  ;;  %v10524_v45 = vor.u32 %v12123_v49, %v10521_v32  ;;  %v6845_v22 = vpop.f32.mrf.mxu1  ;;  %v12129_v32 = vld [vmem:[#allocation13 + $0x314] sm:$0xf0]  ;;  %v11079_v57 = vld [vmem:[#allocation13 + $0x748] sm:$0xf] }
 0x3e1   :  { %v10700_v15 = vor.u32 %v12167_v25, %v10697_v28  ;;  %6964 = vmatpush.bf16.msrb.mxu3 %v10648_v16  ;;  %v10441_v25 = vld [vmem:[#allocation13 + $0x258] sm:$0xf0]  ;;  %v12099_v16 = vld [vmem:[#allocation13 + $0x22c] sm:$0xf]  ;;  %v12269_v63 = vld [vmem:[#allocation13 + $0x774] sm:$0xf0] }
 0x3e2   :  { %7007 = vmatpush.bf16.msra.mxu2 %v10968_v14  ;;  %v10828_v14 = vor.u32 %v12199_v21, %v10825_v38  ;;  %6920 = vmatmul.bf16.vlgmr.msra.gmra.mxu3 %v13370_v34  ;;  %v10444_v28 = vor.u32 %v12103_v24, %v10441_v25  ;;  %v10552_v38 = vor.u32 %v12133_v1, %v10551_v42  ;;  %v12265_v23 = vld [vmem:[#allocation13 + $0x754] sm:$0xf0]  ;;  %v5431_v1 = vperm.slane %v13353_v54, 2 }
 0x3e4   :  { %7096 = vmatpush.bf16.msra.mxu1 %v10876_v43  ;;  %7084 = vmatpush.bf16.msra.mxu0 %v10732_v7  ;;  %v10681_v43 = vld [vmem:[#allocation13 + $0x438] sm:$0xf0]  ;;  %v10616_v7 = vor.u32 %v12149_v50, %v10615_v10  ;;  %v11144_v10 = vor.u32 %v12281_v11, %v11143_v26  ;;  %v12247_v50 = vld [vmem:[#allocation13 + $0x6cc] sm:$0xf]  ;;  %v12257_v26 = vld [vmem:[#allocation13 + $0x714] sm:$0xf0] }
 0x3e5   :  { %v10684_v30 = vor.u32 %v12163_v4, %v10681_v43  ;;  %6965 = vmatpush.bf16.msrb.mxu3 %v10632_v20  ;;  %v10409_v4 = vld [vmem:[#allocation13 + $0x218] sm:$0xf0]  ;;  %v11191_v11 = vld [vmem:[#allocation16 + $0x30] sm:$0xf] }
 0x3e6   :  { %7008 = vmatpush.bf16.msra.mxu2 %v10952_v12  ;;  %v10665_v12 = vld [vmem:[#allocation13 + $0x418] sm:$0xf0] }
 0x3e7   :  { %v10668_v60 = vor.u32 %v12159_v52, %v10665_v12  ;;  %v11033_v43 = vld [vmem:[#allocation13 + $0x6f8] sm:$0xf0]  ;;  %v12277_v52 = vld [vmem:[#allocation13 + $0x7b4] sm:$0xf0] }
 0x3e8   :  { %7097 = vmatpush.bf16.msra.mxu1 %v10860_v3  ;;  %7085 = vmatpush.bf16.msra.mxu0 %v10716_v47  ;;  %v12115_v3 = vld [vmem:[#allocation13 + $0x2ac] sm:$0xf] }
 0x3e9   :  { %v10492_v27 = vor.u32 %v12115_v3, %v10489_v36  ;;  %6966 = vmatpush.bf16.msrb.mxu3 %v10616_v7  ;;  %v12107_v47 = vld [vmem:[#allocation13 + $0x26c] sm:$0xf]  ;;  %v11111_v7 = vld [vmem:[#allocation13 + $0x788] sm:$0xf]  ;;  %v12273_v3 = vld [vmem:[#allocation13 + $0x794] sm:$0xf0] }
 0x3ea   :  { %7009 = vmatpush.bf16.msra.mxu2 %v10936_v17  ;;  %v10584_v17 = vor.u32 %v12141_v8, %v10583_v19  ;;  %v11223_v36 = vld [vmem:[#allocation16 + $0x70] sm:$0xf]  ;;  %v11215_v19 = vld [vmem:[#allocation16 + $0x60] sm:$0xf]  ;;  %v12299_v8 = vld [vmem:[#allocation16 + $0x64] sm:$0xf0] }
 0x3eb   :  { %v11224_v35 = vor.u32 %v12301_v18, %v11223_v36 }
 0x3ec   :  { %7098 = vmatpush.bf16.msra.mxu1 %v10844_v48  ;;  %7086 = vmatpush.bf16.msra.mxu0 %v10700_v15  ;;  %v10460_v48 = vor.u32 %v12107_v47, %v10457_v2  ;;  %v12235_v47 = vld [vmem:[#allocation13 + $0x66c] sm:$0xf]  ;;  %v10969_v2 = vld [vmem:[#allocation13 + $0x678] sm:$0xf0] }
 0x3ed   :  { %6967 = vmatpush.bf16.msrb.mxu3 %v10600_v9  ;;  %v10985_v9 = vld [vmem:[#allocation13 + $0x698] sm:$0xf0]  ;;  %v10972_v42 = vor.u32 %v12235_v47, %v10969_v2  ;;  %v11167_v47 = vld [vmem:[#allocation16] sm:$0xf]  ;;  %v12287_v2 = vld [vmem:[#allocation16 + $0x4] sm:$0xf0] }
 0x3ee   :  { %7010 = vmatpush.bf16.msra.mxu2 %v10920_v0  ;;  %v11159_v0 = vld [vmem:[#allocation13 + $0x7e8] sm:$0xf] }
 0x3ef   :  { %v11160_v55 = vor.u32 %v12285_v61, %v11159_v0  ;;  %v12295_v0 = vld [vmem:[#allocation16 + $0x44] sm:$0xf0] }
 0x3f0   :  { %7099 = vmatpush.bf16.msra.mxu1 %v10828_v14  ;;  %7087 = vmatpush.bf16.msra.mxu0 %v10684_v30  ;;  %v12095_v14 = vld [vmem:[#allocation13 + $0x20c] sm:$0xf]  ;;  %v11017_v30 = vld [vmem:[#allocation13 + $0x6d8] sm:$0xf0] }
 0x3f1   :  { %7011 = vmatmul.bf16.vlgmr.msra.gmra.mxu2 %v13344_v5  ;;  %6968 = vmatpush.bf16.msrb.mxu3 %v10584_v17  ;;  %v10412_v22 = vor.u32 %v12095_v14, %v10409_v4  ;;  %v12227_v4 = vld [vmem:[#allocation13 + $0x62c] sm:$0xf] }
 0x3f2   :  { %7055 = vmatpush.bf16.msrb.mxu2 %v10524_v45  ;;  %v12251_v45 = vld [vmem:[#allocation13 + $0x6ec] sm:$0xf] }
 0x3f3   :  { %v11036_v40 = vor.u32 %v12251_v45, %v11033_v43  ;;  %v11047_v45 = vld [vmem:[#allocation13 + $0x708] sm:$0xf] }
 0x3f4   :  { %7100 = vmatpush.bf16.msra.mxu1 %v10812_v13  ;;  %7088 = vmatpush.bf16.msra.mxu0 %v10668_v60  ;;  %v13391_v21 = vpop.f32.mrf.mxu0  ;;  %v11127_v13 = vld [vmem:[#allocation13 + $0x7a8] sm:$0xf]  ;;  %v11004_v60 = vor.u32 %v12243_v31, %v11001_v56  ;;  %v11183_v31 = vld [vmem:[#allocation16 + $0x20] sm:$0xf]  ;;  %v12151_v56 = vld [vmem:[#allocation13 + $0x3cc] sm:$0xf] }
 0x3f5   :  { %6969 = vmatpush.bf16.msrb.mxu3 %v10568_v59  ;;  %v11128_v12 = vor.u32 %v12277_v52, %v11127_v13  ;;  %v12297_v59 = vld [vmem:[#allocation16 + $0x54] sm:$0xf0]  ;;  %v11048_v13 = vor.u32 %v12257_v26, %v11047_v45  ;;  %v12223_v52 = vld [vmem:[#allocation13 + $0x60c] sm:$0xf] }
 0x3f6   :  { %7056 = vmatpush.bf16.msrb.mxu2 %v10508_v53  ;;  %v11020_v53 = vor.u32 %v12247_v50, %v11017_v30  ;;  %v12131_v26 = vld [vmem:[#allocation13 + $0x32c] sm:$0xf] }
 0x3f7   :  { %7089 = vmatmul.bf16.vlgmr.msra.gmra.mxu0 %v13303_v46  ;;  %v10425_v46 = vld [vmem:[#allocation13 + $0x238] sm:$0xf0] }
 0x3f8   :  { %7101 = vmatpush.bf16.msra.mxu1 %v10796_v62  ;;  %v13393_v49 = vpop.f32.mrf.mxu1  ;;  %v10428_v51 = vor.u32 %v12099_v16, %v10425_v46  ;;  %v11112_v62 = vor.u32 %v12273_v3, %v11111_v7  ;;  %7535 = vmatpush.bf16.msrb.mxu0 %v11224_v35  ;;  %v10953_v16 = vld [vmem:[#allocation13 + $0x658] sm:$0xf0]  ;;  %v11063_v46 = vld [vmem:[#allocation13 + $0x728] sm:$0xf]  ;;  %v12291_v3 = vld [vmem:[#allocation16 + $0x24] sm:$0xf0] }
 0x3f9   :  { %6970 = vmatpush.bf16.msrb.mxu3 %v10552_v38  ;;  %v12231_v38 = vld [vmem:[#allocation13 + $0x64c] sm:$0xf]  ;;  %v10633_v7 = vld [vmem:[#allocation13 + $0x3d8] sm:$0xf0]  ;;  %v11184_v18 = vor.u32 %v12291_v3, %v11183_v31  ;;  %v11263_v31 = vld [vmem:[#allocation16 + $0xc0] sm:$0xf] }
 0x3fa   :  { %7057 = vmatpush.bf16.msrb.mxu2 %v10492_v27  ;;  %v12239_v27 = vld [vmem:[#allocation13 + $0x68c] sm:$0xf] }
 0x3fb   :  { %7102 = vmatmul.bf16.vlgmr.msra.gmra.mxu1 %v13307_v29  ;;  %v10535_v29 = vld [vmem:[#allocation13 + $0x308] sm:$0xf]  ;;  %v10988_v17 = vor.u32 %v12239_v27, %v10985_v9  ;;  %v11175_v27 = vld [vmem:[#allocation16 + $0x10] sm:$0xf]  ;;  %v12289_v9 = vld [vmem:[#allocation16 + $0x14] sm:$0xf0] }
 0x3fc   :  { %v10536_v15 = vor.u32 %v12129_v32, %v10535_v29  ;;  %v6884_v20 = vpop.f32.mrf.mxu0  ;;  %v12261_v29 = vld [vmem:[#allocation13 + $0x734] sm:$0xf0]  ;;  %v11199_v32 = vld [vmem:[#allocation16 + $0x40] sm:$0xf]  ;;  %v12311_v3 = vld [vmem:[#allocation16 + $0xc4] sm:$0xf0] }
 0x3fd   :  { %v11200_v61 = vor.u32 %v12295_v0, %v11199_v32  ;;  %v11064_v14 = vor.u32 %v12261_v29, %v11063_v46  ;;  %v12155_v20 = vld [vmem:[#allocation13 + $0x3ec] sm:$0xf]  ;;  %v12298_v46 = vld [vmem:[#allocation16 + $0x64] sm:$0xf]  ;;  %v11217_v29 = vld [vmem:[#allocation16 + $0x68] sm:$0xf0] }
 0x3fe   :  { %7058 = vmatpush.bf16.msrb.mxu2 %v10476_v41  ;;  %6971 = vmatpush.bf16.msrb.mxu3 %v10536_v15  ;;  %v11216_v41 = vor.u32 %v12299_v8, %v11215_v19  ;;  %v11176_v19 = vor.u32 %v12289_v9, %v11175_v27  ;;  %v11220_v0 = vor.u32 %v12298_v46, %v11217_v29  ;;  %v11177_v46 = vld [vmem:[#allocation16 + $0x18] sm:$0xf0]  ;;  %v11239_v29 = vld [vmem:[#allocation16 + $0x90] sm:$0xf] }
 0x400   :  { %v6897_v44 = vpop.f32.mrf.mxu1  ;;  %7536 = vmatpush.bf16.msrb.mxu0 %v11216_v41  ;;  %v13397_v25 = vpop.f32.mrf.mxu2 }
 0x401   :  { %6972 = vmatmul.bf16.vlgmr.msrb.gmra.mxu3 %v13318_v6 }
 0x402   :  { %7059 = vmatpush.bf16.msrb.mxu2 %v10460_v48  ;;  %7016 = vmatpush.bf16.msra.mxu3 %v11160_v55  ;;  %v11207_v48 = vld [vmem:[#allocation16 + $0x50] sm:$0xf]  ;;  %v10937_v55 = vld [vmem:[#allocation13 + $0x638] sm:$0xf0] }
 0x403   :  { %v11208_v24 = vor.u32 %v12297_v59, %v11207_v48  ;;  %v10940_v30 = vor.u32 %v12227_v4, %v10937_v55  ;;  %v12300_v48 = vld [vmem:[#allocation16 + $0x74] sm:$0xf]  ;;  %v11225_v59 = vld [vmem:[#allocation16 + $0x78] sm:$0xf0] }
 0x404   :  { %v12296_v4 = vld [vmem:[#allocation16 + $0x54] sm:$0xf]  ;;  %v11209_v55 = vld [vmem:[#allocation16 + $0x58] sm:$0xf0] }
 0x405   :  { %7537 = vmatpush.bf16.msrb.mxu0 %v11208_v24  ;;  %v11228_v24 = vor.u32 %v12300_v48, %v11225_v59  ;;  %v12275_v48 = vld [vmem:[#allocation13 + $0x7ac] sm:$0xf]  ;;  %v11129_v59 = vld [vmem:[#allocation13 + $0x7b8] sm:$0xf0] }
 0x406   :  { %7060 = vmatpush.bf16.msrb.mxu2 %v10444_v28  ;;  %7017 = vmatpush.bf16.msra.mxu3 %v11144_v10  ;;  %v11080_v28 = vor.u32 %v12265_v23, %v11079_v57  ;;  %v10601_v57 = vld [vmem:[#allocation13 + $0x398] sm:$0xf0]  ;;  %v11168_v23 = vor.u32 %v12287_v2, %v11167_v47  ;;  %v12279_v47 = vld [vmem:[#allocation13 + $0x7cc] sm:$0xf] }
 0x407   :  { %v11145_v2 = vld [vmem:[#allocation13 + $0x7d8] sm:$0xf0] }
 0x408   :  { %v6806_v50 = vpop.f32.mrf.mxu2 }
 0x409   :  { %7538 = vmatpush.bf16.msrb.mxu0 %v11200_v61  ;;  %v12135_v61 = vld [vmem:[#allocation13 + $0x34c] sm:$0xf] }
 0x40a   :  { %7061 = vmatpush.bf16.msrb.mxu2 %v10428_v51  ;;  %7018 = vmatpush.bf16.msra.mxu3 %v11128_v12  ;;  %v10956_v51 = vor.u32 %v12231_v38, %v10953_v16  ;;  %v10585_v38 = vld [vmem:[#allocation13 + $0x378] sm:$0xf0] }
 0x40e   :  { %7062 = vmatpush.bf16.msrb.mxu2 %v10412_v22  ;;  %7019 = vmatpush.bf16.msra.mxu3 %v11112_v62  ;;  %v12293_v22 = vld [vmem:[#allocation16 + $0x34] sm:$0xf0]  ;;  %v10636_v62 = vor.u32 %v12151_v56, %v10633_v7 }
 0x40f   :  { %v11192_v44 = vor.u32 %v12293_v22, %v11191_v11  ;;  %v11271_v11 = vld [vmem:[#allocation16 + $0xd0] sm:$0xf]  ;;  %v10553_v22 = vld [vmem:[#allocation13 + $0x338] sm:$0xf0] }
 0x411   :  { %7063 = vmatmul.bf16.vlgmr.msrb.gmra.mxu2 %v13320_v58  ;;  %v11096_v58 = vor.u32 %v12269_v63, %v11095_v33  ;;  %7539 = vmatpush.bf16.msrb.mxu0 %v11192_v44  ;;  %v12147_v33 = vld [vmem:[#allocation13 + $0x3ac] sm:$0xf]  ;;  %v10617_v63 = vld [vmem:[#allocation13 + $0x3b8] sm:$0xf0] }
 0x412   :  { %7107 = vmatpush.bf16.msra.mxu2 %v11036_v40  ;;  %v10649_v40 = vld [vmem:[#allocation13 + $0x3f8] sm:$0xf0] }
 0x413   :  { %7020 = vmatpush.bf16.msra.mxu3 %v11096_v58  ;;  %v10652_v12 = vor.u32 %v12155_v20, %v10649_v40  ;;  %v12143_v58 = vld [vmem:[#allocation13 + $0x38c] sm:$0xf]  ;;  %v12313_v20 = vld [vmem:[#allocation16 + $0xd4] sm:$0xf0]  ;;  %v12294_v40 = vld [vmem:[#allocation16 + $0x44] sm:$0xf] }
 0x414   :  { %v6934_v15 = vpop.f32.mrf.mxu0  ;;  %v6856_v8 = vpop.f32.mrf.mxu2  ;;  %v11272_v50 = vor.u32 %v12313_v20, %v11271_v11  ;;  %v12267_v20 = vld [vmem:[#allocation13 + $0x76c] sm:$0xf] }
 0x415   :  { %v6935_v54 = vadd.f32 %v6934_v15, %v5431_v1  ;;  %7540 = vmatpush.bf16.msrb.mxu0 %v11184_v18  ;;  %v13404_v41 = vadd.f32 %v6856_v8, %v13382_v37  ;;  %v12139_v1 = vld [vmem:[#allocation13 + $0x36c] sm:$0xf]  ;;  %v12317_v37 = vld [vmem:[#allocation16 + $0xf4] sm:$0xf0]  ;;  %v11279_v15 = vld [vmem:[#allocation16 + $0xe0] sm:$0xf] }
 0x416   :  { %7108 = vmatpush.bf16.msra.mxu2 %v11020_v53  ;;  %v10921_v53 = vld [vmem:[#allocation13 + $0x618] sm:$0xf0]  ;;  %v11193_v18 = vld [vmem:[#allocation16 + $0x38] sm:$0xf0]  ;;  %v12290_v8 = vld [vmem:[#allocation16 + $0x24] sm:$0xf] }
 0x417   :  { %7021 = vmatpush.bf16.msra.mxu3 %v11080_v28  ;;  %v10924_v36 = vor.u32 %v12223_v52, %v10921_v53  ;;  %v11287_v28 = vld [vmem:[#allocation16 + $0xf0] sm:$0xf]  ;;  %v10556_v52 = vor.u32 %v12131_v26, %v10553_v22  ;;  %v12127_v53 = vld [vmem:[#allocation13 + $0x30c] sm:$0xf]  ;;  %v11289_v26 = vld [vmem:[#allocation16 + $0xf8] sm:$0xf0] }
 0x418   :  { %v6947_v43 = vpop.f32.mrf.mxu1  ;;  %v11288_v16 = vor.u32 %v12317_v37, %v11287_v28  ;;  %v11148_v37 = vor.u32 %v12279_v47, %v11145_v2  ;;  %v12310_v47 = vld [vmem:[#allocation16 + $0xc4] sm:$0xf]  ;;  %v11265_v2 = vld [vmem:[#allocation16 + $0xc8] sm:$0xf0] }
 0x419   :  { %v13400_v10 = vadd.f32 %v6947_v43, %v6935_v54  ;;  %7541 = vmatpush.bf16.msrb.mxu0 %v11176_v19  ;;  %v11212_v54 = vor.u32 %v12296_v4, %v11209_v55  ;;  %v12309_v19 = vld [vmem:[#allocation16 + $0xb4] sm:$0xf0] }
 0x41a   :  { %7109 = vmatpush.bf16.msra.mxu2 %v11004_v60  ;;  %7548 = vmatpush.bf16.msrb.mxu1 %v11288_v16  ;;  %v12288_v16 = vld [vmem:[#allocation16 + $0x14] sm:$0xf]  ;;  %v11113_v55 = vld [vmem:[#allocation13 + $0x798] sm:$0xf0] }
 0x41b   :  { %7022 = vmatpush.bf16.msra.mxu3 %v11064_v14  ;;  %v12315_v14 = vld [vmem:[#allocation16 + $0xe4] sm:$0xf0] }
 0x41c   :  { %v6936_v35 = vpop.f32.mrf.mxu0  ;;  %v6858_v32 = vpop.f32.mrf.mxu2  ;;  %v11280_v45 = vor.u32 %v12315_v14, %v11279_v15  ;;  %v11132_v15 = vor.u32 %v12275_v48, %v11129_v59  ;;  %v12271_v14 = vld [vmem:[#allocation13 + $0x78c] sm:$0xf]  ;;  %v11049_v59 = vld [vmem:[#allocation13 + $0x718] sm:$0xf0] }
 0x41d   :  { %7542 = vmatpush.bf16.msrb.mxu0 %v11168_v23  ;;  %v12283_v35 = vld [vmem:[#allocation13 + $0x7ec] sm:$0xf]  ;;  %v11180_v32 = vor.u32 %v12288_v16, %v11177_v46  ;;  %v11116_v22 = vor.u32 %v12271_v14, %v11113_v55  ;;  %v12304_v14 = vld [vmem:[#allocation16 + $0x94] sm:$0xf] }
 0x41e   :  { %7110 = vmatpush.bf16.msra.mxu2 %v10988_v17  ;;  %v10620_v17 = vor.u32 %v12147_v33, %v10617_v63  ;;  %7549 = vmatpush.bf16.msrb.mxu1 %v11280_v45  ;;  %v11255_v33 = vld [vmem:[#allocation16 + $0xb0] sm:$0xf]  ;;  %v11231_v45 = vld [vmem:[#allocation16 + $0x80] sm:$0xf]  ;;  %v12255_v48 = vld [vmem:[#allocation13 + $0x70c] sm:$0xf] }
 0x41f   :  { %7023 = vmatpush.bf16.msra.mxu3 %v11048_v13 }
 0x420   :  { %v6949_v60 = vpop.f32.mrf.mxu1 }
 0x421   :  { %7587 = vmatpush.bf16.msra.mxu0 %v11228_v24  ;;  %v11161_v60 = vld [vmem:[#allocation13 + $0x7f8] sm:$0xf0]  ;;  %v11247_v24 = vld [vmem:[#allocation16 + $0xa0] sm:$0xf] }
 0x422   :  { %7111 = vmatpush.bf16.msra.mxu2 %v10972_v42  ;;  %7024 = vmatmul.bf16.vlgmr.msra.gmra.mxu3 %v13370_v34  ;;  %v10604_v42 = vor.u32 %v12143_v58, %v10601_v57  ;;  %v11164_v63 = vor.u32 %v12283_v35, %v11161_v60  ;;  %v11256_v57 = vor.u32 %v12309_v19, %v11255_v33  ;;  %v12312_v60 = vld [vmem:[#allocation16 + $0xd4] sm:$0xf]  ;;  %v12397_v19 = vld [vmem:[#allocation14] sm:$0xf] }
 0x423   :  { %7068 = vmatpush.bf16.msrb.mxu3 %v10652_v12  ;;  %v10537_v12 = vld [vmem:[#allocation13 + $0x318] sm:$0xf0]  ;;  %7550 = vmatpush.bf16.msrb.mxu1 %v11272_v50  ;;  %v12314_v50 = vld [vmem:[#allocation16 + $0xe4] sm:$0xf] }
 0x424   :  { %v10540_v9 = vor.u32 %v12127_v53, %v10537_v12 }
 0x425   :  { %7588 = vmatpush.bf16.msra.mxu0 %v11220_v0  ;;  %v12305_v0 = vld [vmem:[#allocation16 + $0x94] sm:$0xf0] }
 0x426   :  { %7112 = vmatpush.bf16.msra.mxu2 %v10956_v51  ;;  %v10569_v51 = vld [vmem:[#allocation13 + $0x358] sm:$0xf0] }
 0x427   :  { %7069 = vmatpush.bf16.msrb.mxu3 %v10636_v62  ;;  %v10572_v43 = vor.u32 %v12135_v61, %v10569_v51  ;;  %v11264_v62 = vor.u32 %v12311_v3, %v11263_v31  ;;  %v11169_v61 = vld [vmem:[#allocation16 + $0x8] sm:$0xf0]  ;;  %v11240_v51 = vor.u32 %v12305_v0, %v11239_v29  ;;  %v12263_v31 = vld [vmem:[#allocation13 + $0x74c] sm:$0xf]  ;;  %v11081_v3 = vld [vmem:[#allocation13 + $0x758] sm:$0xf0] }
 0x428   :  { %v11084_v35 = vor.u32 %v12263_v31, %v11081_v3  ;;  %v12306_v29 = vld [vmem:[#allocation16 + $0xa4] sm:$0xf]  ;;  %v12327_v3 = vld [vmem:[#allocation16 + $0x144] sm:$0xf0] }
 0x429   :  { %7589 = vmatpush.bf16.msra.mxu0 %v11212_v54  ;;  %7551 = vmatpush.bf16.msrb.mxu1 %v11264_v62  ;;  %v12303_v54 = vld [vmem:[#allocation16 + $0x84] sm:$0xf0]  ;;  %v11273_v62 = vld [vmem:[#allocation16 + $0xd8] sm:$0xf0] }
 0x42a   :  { %7113 = vmatpush.bf16.msra.mxu2 %v10940_v30  ;;  %v11201_v30 = vld [vmem:[#allocation16 + $0x48] sm:$0xf0]  ;;  %v11232_v11 = vor.u32 %v12303_v54, %v11231_v45  ;;  %v11276_v33 = vor.u32 %v12312_v60, %v11273_v62 }
 0x42b   :  { %7070 = vmatpush.bf16.msrb.mxu3 %v10620_v17  ;;  %v11204_v13 = vor.u32 %v12294_v40, %v11201_v30  ;;  %v11185_v17 = vld [vmem:[#allocation16 + $0x28] sm:$0xf0] }
 0x42c   :  { %v11188_v23 = vor.u32 %v12290_v8, %v11185_v17  ;;  %v11281_v30 = vld [vmem:[#allocation16 + $0xe8] sm:$0xf0] }
 0x42d   :  { %7590 = vmatpush.bf16.msra.mxu0 %v11204_v13  ;;  %7552 = vmatpush.bf16.msrb.mxu1 %v11256_v57  ;;  %v6805_v13 = vadd.f32 %v13397_v25, %v13385_v39  ;;  %v11284_v53 = vor.u32 %v12314_v50, %v11281_v30  ;;  %v5432_v39 = vperm.slane %v12397_v19, 3  ;;  %v12331_v50 = vld [vmem:[#allocation16 + $0x164] sm:$0xf0] }
 0x42e   :  { %7114 = vmatpush.bf16.msra.mxu2 %v10924_v36  ;;  %v12292_v36 = vld [vmem:[#allocation16 + $0x34] sm:$0xf]  ;;  %v12323_v19 = vld [vmem:[#allocation16 + $0x124] sm:$0xf0] }
 0x42f   :  { %7071 = vmatpush.bf16.msrb.mxu3 %v10604_v42  ;;  %v11196_v27 = vor.u32 %v12292_v36, %v11193_v18  ;;  %v12307_v42 = vld [vmem:[#allocation16 + $0xa4] sm:$0xf0] }
 0x431   :  { %7115 = vmatmul.bf16.vlgmr.msra.gmra.mxu2 %v13344_v5  ;;  %v10588_v5 = vor.u32 %v12139_v1, %v10585_v38  ;;  %7591 = vmatpush.bf16.msra.mxu0 %v11196_v27  ;;  %v11248_v38 = vor.u32 %v12307_v42, %v11247_v24  ;;  %v12259_v27 = vld [vmem:[#allocation13 + $0x72c] sm:$0xf]  ;;  %v11268_v24 = vor.u32 %v12310_v47, %v11265_v2  ;;  %v12321_v47 = vld [vmem:[#allocation16 + $0x114] sm:$0xf0] }
 0x433   :  { %7072 = vmatpush.bf16.msrb.mxu3 %v10588_v5  ;;  %v12286_v5 = vld [vmem:[#allocation16 + $0x4] sm:$0xf]  ;;  %7553 = vmatpush.bf16.msrb.mxu1 %v11248_v38  ;;  %v11257_v38 = vld [vmem:[#allocation16 + $0xb8] sm:$0xf0] }
 0x434   :  { %v13407_v44 = vpop.f32.mrf.mxu2  ;;  %v13409_v56 = vpop.f32.mrf.mxu0  ;;  %v11172_v4 = vor.u32 %v12286_v5, %v11169_v61  ;;  %v11351_v5 = vld [vmem:[#allocation16 + $0x170] sm:$0xf]  ;;  %v12333_v61 = vld [vmem:[#allocation16 + $0x174] sm:$0xf0] }
 0x435   :  { %7592 = vmatpush.bf16.msra.mxu0 %v11188_v23  ;;  %v11352_v55 = vor.u32 %v12333_v61, %v11351_v5  ;;  %v12326_v5 = vld [vmem:[#allocation16 + $0x144] sm:$0xf]  ;;  %v11329_v61 = vld [vmem:[#allocation16 + $0x148] sm:$0xf0] }
 0x437   :  { %7073 = vmatpush.bf16.msrb.mxu3 %v10572_v43  ;;  %v12316_v43 = vld [vmem:[#allocation16 + $0xf4] sm:$0xf]  ;;  %7554 = vmatpush.bf16.msrb.mxu1 %v11240_v51 }
 0x438   :  { %v13411_v7 = vpop.f32.mrf.mxu1  ;;  %v11292_v40 = vor.u32 %v12316_v43, %v11289_v26  ;;  %7561 = vmatpush.bf16.msrb.mxu2 %v11352_v55  ;;  %v12302_v43 = vld [vmem:[#allocation16 + $0x84] sm:$0xf]  ;;  %v11233_v26 = vld [vmem:[#allocation16 + $0x88] sm:$0xf0]  ;;  %v11321_v55 = vld [vmem:[#allocation16 + $0x138] sm:$0xf0] }
 0x439   :  { %7593 = vmatpush.bf16.msra.mxu0 %v11180_v32  ;;  %v11249_v32 = vld [vmem:[#allocation16 + $0xa8] sm:$0xf0] }
 0x43a   :  { %v11252_v0 = vor.u32 %v12306_v29, %v11249_v32  ;;  %v11337_v29 = vld [vmem:[#allocation16 + $0x158] sm:$0xf0] }
 0x43b   :  { %7074 = vmatpush.bf16.msrb.mxu3 %v10556_v52  ;;  %7555 = vmatpush.bf16.msrb.mxu1 %v11232_v11 }
 0x43c   :  { %v6910_v58 = vpop.f32.mrf.mxu2  ;;  %v6988_v1 = vpop.f32.mrf.mxu0 }
 0x43d   :  { %7594 = vmatpush.bf16.msra.mxu0 %v11172_v4  ;;  %v11241_v4 = vld [vmem:[#allocation16 + $0x98] sm:$0xf0] }
 0x43e   :  { %v11244_v54 = vor.u32 %v12304_v14, %v11241_v4  ;;  %v12324_v4 = vld [vmem:[#allocation16 + $0x134] sm:$0xf] }
 0x43f   :  { %7075 = vmatpush.bf16.msrb.mxu3 %v10540_v9  ;;  %7600 = vmatpush.bf16.msra.mxu1 %v11292_v40  ;;  %v11065_v9 = vld [vmem:[#allocation13 + $0x738] sm:$0xf0] }
 0x440   :  { %v7001_v28 = vpop.f32.mrf.mxu1  ;;  %v11068_v58 = vor.u32 %v12259_v27, %v11065_v9  ;;  %v11319_v27 = vld [vmem:[#allocation16 + $0x130] sm:$0xf]  ;;  %v12325_v9 = vld [vmem:[#allocation16 + $0x134] sm:$0xf0] }
 0x442   :  { %7076 = vmatmul.bf16.vlgmr.msrb.gmra.mxu3 %v13318_v6  ;;  %v11097_v6 = vld [vmem:[#allocation13 + $0x778] sm:$0xf0]  ;;  %v6817_v12 = vpop.f32.mrf.mxu3 }
 0x443   :  { %7120 = vmatpush.bf16.msra.mxu3 %v11164_v63  ;;  %v11100_v52 = vor.u32 %v12267_v20, %v11097_v6  ;;  %v6818_v36 = vadd.f32 %v6817_v12, %v6805_v13  ;;  %7601 = vmatpush.bf16.msra.mxu1 %v11284_v53  ;;  %v11343_v6 = vld [vmem:[#allocation16 + $0x160] sm:$0xf] }
 0x444   :  { %v11344_v30 = vor.u32 %v12331_v50, %v11343_v6  ;;  %v12349_v6 = vld [vmem:[#allocation16 + $0x1f4] sm:$0xf0] }
 0x445   :  { %v7133_v18 = vmul.f32 0.01, %v6818_v36 }
 0x446   :  { %7562 = vmatpush.bf16.msrb.mxu2 %v11344_v30 }
 0x447   :  { %7121 = vmatpush.bf16.msra.mxu3 %v11148_v37  ;;  %v7137_v63 = vmax.f32 %v6818_v36, %v7133_v18  ;;  %7602 = vmatpush.bf16.msra.mxu1 %v11276_v33  ;;  %v11052_v37 = vor.u32 %v12255_v48, %v11049_v59  ;;  %v11320_v33 = vor.u32 %v12325_v9, %v11319_v27  ;;  %v11295_v48 = vld [vmem:[#allocation16 + $0x100] sm:$0xf]  ;;  %v12319_v59 = vld [vmem:[#allocation16 + $0x104] sm:$0xf0] }
 0x449   :  { %v7141_v8 = vpack.c.bf16 %v7137_v63, %v7137_v63 }
 0x44a   :  { %v6819_v23 = vpop.f32.mrf.mxu3 }
 0x44b   :  { %7122 = vmatpush.bf16.msra.mxu3 %v11132_v15  ;;  %7543 = vmatmul.bf16.vlgmr.msrb.gmra.mxu0 %v7141_v8 }
 0x44c   :  { %7603 = vmatpush.bf16.msra.mxu1 %v11268_v24  ;;  %v12332_v24 = vld [vmem:[#allocation16 + $0x174] sm:$0xf] }
 0x44f   :  { %7123 = vmatpush.bf16.msra.mxu3 %v11116_v22  ;;  %v11236_v22 = vor.u32 %v12302_v43, %v11233_v26  ;;  %v12322_v43 = vld [vmem:[#allocation16 + $0x124] sm:$0xf]  ;;  %v11313_v26 = vld [vmem:[#allocation16 + $0x128] sm:$0xf0] }
 0x452   :  { %v6869_v15 = vpop.f32.mrf.mxu3 }
 0x453   :  { %7124 = vmatpush.bf16.msra.mxu3 %v11100_v52  ;;  %v6870_v11 = vadd.f32 %v6869_v15, %v13404_v41  ;;  %v12329_v52 = vld [vmem:[#allocation16 + $0x154] sm:$0xf0]  ;;  %v11327_v41 = vld [vmem:[#allocation16 + $0x140] sm:$0xf]  ;;  %v11332_v15 = vor.u32 %v12326_v5, %v11329_v61  ;;  %v11401_v5 = vld [vmem:[#allocation16 + $0x1d8] sm:$0xf0] }
 0x454   :  { %v6960_v25 = vpop.f32.mrf.mxu2  ;;  %v7038_v57 = vpop.f32.mrf.mxu0 }
 0x455   :  { %v13417_v17 = vadd.f32 %v6960_v25, %v13400_v10  ;;  %v7039_v42 = vadd.f32 %v7038_v57, %v5432_v39  ;;  %v12308_v10 = vld [vmem:[#allocation16 + $0xb4] sm:$0xf]  ;;  %v6883_v40 = vadd.f32 %v13391_v21, %v6870_v11  ;;  %v11328_v21 = vor.u32 %v12327_v3, %v11327_v41  ;;  %v12347_v41 = vld [vmem:[#allocation16 + $0x1e4] sm:$0xf0] }
 0x456   :  { %v11260_v16 = vor.u32 %v12308_v10, %v11257_v38  ;;  %v12330_v10 = vld [vmem:[#allocation16 + $0x164] sm:$0xf]  ;;  %v11345_v38 = vld [vmem:[#allocation16 + $0x168] sm:$0xf0]  ;;  %v11316_v11 = vor.u32 %v12322_v43, %v11313_v26 }
 0x457   :  { %7125 = vmatpush.bf16.msra.mxu3 %v11084_v35  ;;  %v6896_v13 = vadd.f32 %v13393_v49, %v6883_v40  ;;  %v11415_v40 = vld [vmem:[#allocation16 + $0x1f0] sm:$0xf]  ;;  %v12338_v43 = vld [vmem:[#allocation16 + $0x1a4] sm:$0xf] }
 0x458   :  { %v7051_v1 = vpop.f32.mrf.mxu1  ;;  %7604 = vmatpush.bf16.msra.mxu1 %v11260_v16  ;;  %v11348_v16 = vor.u32 %v12330_v10, %v11345_v38  ;;  %v11416_v30 = vor.u32 %v12349_v6, %v11415_v40  ;;  %v11417_v10 = vld [vmem:[#allocation16 + $0x1f8] sm:$0xf0]  ;;  %v12336_v40 = vld [vmem:[#allocation16 + $0x194] sm:$0xf] }
 0x459   :  { %v13419_v28 = vadd.f32 %v7051_v1, %v7039_v42  ;;  %v6909_v12 = vadd.f32 %v13407_v44, %v6896_v13  ;;  %v11311_v44 = vld [vmem:[#allocation16 + $0x120] sm:$0xf]  ;;  %v11353_v42 = vld [vmem:[#allocation16 + $0x178] sm:$0xf0]  ;;  %v11296_v1 = vor.u32 %v12319_v59, %v11295_v48  ;;  %v11367_v48 = vld [vmem:[#allocation16 + $0x190] sm:$0xf] }
 0x45a   :  { %v6871_v20 = vpop.f32.mrf.mxu3  ;;  %v11312_v25 = vor.u32 %v12323_v19, %v11311_v44  ;;  %v12337_v59 = vld [vmem:[#allocation16 + $0x194] sm:$0xf0]  ;;  %v11369_v6 = vld [vmem:[#allocation16 + $0x198] sm:$0xf0] }
 0x45b   :  { %7126 = vmatpush.bf16.msra.mxu3 %v11068_v58  ;;  %7595 = vmatmul.bf16.vlgmr.msra.gmra.mxu0 %v7141_v8  ;;  %v11303_v58 = vld [vmem:[#allocation16 + $0x110] sm:$0xf]  ;;  %v11305_v20 = vld [vmem:[#allocation16 + $0x118] sm:$0xf0] }
 0x45c   :  { %v6962_v46 = vpop.f32.mrf.mxu2  ;;  %v7040_v51 = vpop.f32.mrf.mxu0  ;;  %7605 = vmatpush.bf16.msra.mxu1 %v11252_v0  ;;  %v11304_v23 = vor.u32 %v12321_v47, %v11303_v58  ;;  %v11375_v58 = vld [vmem:[#allocation16 + $0x1a0] sm:$0xf]  ;;  %v12339_v47 = vld [vmem:[#allocation16 + $0x1a4] sm:$0xf0] }
 0x45d   :  { %v12328_v46 = vld [vmem:[#allocation16 + $0x154] sm:$0xf] }
 0x45e   :  { %v11340_v32 = vor.u32 %v12328_v46, %v11337_v29  ;;  %v12346_v46 = vld [vmem:[#allocation16 + $0x1e4] sm:$0xf]  ;;  %v11409_v29 = vld [vmem:[#allocation16 + $0x1e8] sm:$0xf0] }
 0x45f   :  { %7127 = vmatpush.bf16.msra.mxu3 %v11052_v37  ;;  %v11356_v37 = vor.u32 %v12332_v24, %v11353_v42  ;;  %v11368_v24 = vor.u32 %v12337_v59, %v11367_v48  ;;  %v11359_v42 = vld [vmem:[#allocation16 + $0x180] sm:$0xf] }
 0x460   :  { %v7053_v45 = vpop.f32.mrf.mxu1  ;;  %7606 = vmatpush.bf16.msra.mxu1 %v11244_v54  ;;  %v12353_v48 = vld [vmem:[#allocation19 + $0x18] sm:$0xff] }
 0x461   :  { %v11324_v45 = vor.u32 %v12324_v4, %v11321_v55  ;;  %v11393_v4 = vld [vmem:[#allocation16 + $0x1c8] sm:$0xf0] }
 0x462   :  { %7128 = vmatmul.bf16.vlgmr.msra.gmra.mxu3 %v13370_v34  ;;  %v11335_v34 = vld [vmem:[#allocation16 + $0x150] sm:$0xf] }
 0x463   :  { %v11336_v53 = vor.u32 %v12329_v52, %v11335_v34  ;;  %7574 = vmatpush.bf16.msrb.mxu3 %v11416_v30  ;;  %v11297_v34 = vld [vmem:[#allocation16 + $0x108] sm:$0xf0] }
 0x464   :  { %7607 = vmatpush.bf16.msra.mxu1 %v11236_v22  ;;  %v12320_v22 = vld [vmem:[#allocation16 + $0x114] sm:$0xf] }
 0x465   :  { %v6921_v31 = vpop.f32.mrf.mxu3  ;;  %7563 = vmatpush.bf16.msrb.mxu2 %v11336_v53  ;;  %v11308_v13 = vor.u32 %v12320_v22, %v11305_v20 }
 0x466   :  { %v6922_v36 = vadd.f32 %v6921_v31, %v6909_v12  ;;  %v11407_v31 = vld [vmem:[#allocation16 + $0x1e0] sm:$0xf] }
 0x467   :  { %v11408_v3 = vor.u32 %v12347_v41, %v11407_v31 }
 0x468   :  { %v7134_v35 = vmul.f32 0.01, %v6922_v36 }
 0x469   :  { %7564 = vmatpush.bf16.msrb.mxu2 %v11328_v21  ;;  %7575 = vmatpush.bf16.msrb.mxu3 %v11408_v3  ;;  %v11399_v21 = vld [vmem:[#allocation16 + $0x1d0] sm:$0xf] }
 0x46a   :  { %v7138_v49 = vmax.f32 %v6922_v36, %v7134_v35  ;;  %v12345_v35 = vld [vmem:[#allocation16 + $0x1d4] sm:$0xf0] }
 0x46b   :  { %v11400_v27 = vor.u32 %v12345_v35, %v11399_v21 }
 0x46c   :  { %v7142_v63 = vpack.c.bf16 %v7138_v49, %v7138_v49 }
 0x46d   :  { %v6923_v39 = vpop.f32.mrf.mxu3  ;;  %7565 = vmatpush.bf16.msrb.mxu2 %v11320_v33  ;;  %v11391_v33 = vld [vmem:[#allocation16 + $0x1c0] sm:$0xf]  ;;  %7576 = vmatpush.bf16.msrb.mxu3 %v11400_v27 }
 0x46e   :  { %7556 = vmatmul.bf16.vlgmr.msrb.gmra.mxu1 %v7142_v63 }
 0x471   :  { %7566 = vmatpush.bf16.msrb.mxu2 %v11312_v25  ;;  %v11383_v25 = vld [vmem:[#allocation16 + $0x1b0] sm:$0xf] }
 0x474   :  { %v13426_v18 = vpop.f32.mrf.mxu2  ;;  %v13428_v60 = vpop.f32.mrf.mxu0 }
 0x475   :  { %7567 = vmatpush.bf16.msrb.mxu2 %v11304_v23 }
 0x478   :  { %v13430_v62 = vpop.f32.mrf.mxu1 }
 0x479   :  { %7568 = vmatpush.bf16.msrb.mxu2 %v11296_v1  ;;  %v12335_v1 = vld [vmem:[#allocation16 + $0x184] sm:$0xf0] }
 0x47a   :  { %v11360_v38 = vor.u32 %v12335_v1, %v11359_v42 }
 0x47c   :  { %v7014_v8 = vpop.f32.mrf.mxu2  ;;  %v7092_v2 = vpop.f32.mrf.mxu0 }
 0x47d   :  { %7613 = vmatpush.bf16.msra.mxu2 %v11356_v37  ;;  %v12341_v8 = vld [vmem:[#allocation16 + $0x1b4] sm:$0xf0]  ;;  %v12348_v37 = vld [vmem:[#allocation16 + $0x1f4] sm:$0xf] }
 0x47e   :  { %7608 = vmatmul.bf16.vlgmr.msra.gmra.mxu1 %v7142_v63  ;;  %v12343_v63 = vld [vmem:[#allocation16 + $0x1c4] sm:$0xf0] }
 0x47f   :  { %v11392_v44 = vor.u32 %v12343_v63, %v11391_v33  ;;  %v7209_v33 = vld [vmem:[#allocation17] sm:$0x3] }
 0x480   :  { %v7105_v57 = vpop.f32.mrf.mxu1  ;;  %v7211_v63 = vperm.slane %v7209_v33, 0 }
 0x481   :  { %7614 = vmatpush.bf16.msra.mxu2 %v11348_v16  ;;  %7577 = vmatpush.bf16.msrb.mxu3 %v11392_v44  ;;  %v11420_v16 = vor.u32 %v12348_v37, %v11417_v10  ;;  %v12351_v37 = vld [vmem:[#allocation19 + $0x8] sm:$0xff] }
 0x482   :  { %v12363_v10 = vld [vmem:[#allocation19 + $0x68] sm:$0xff] }
 0x484   :  { %v6973_v0 = vpop.f32.mrf.mxu3 }
 0x485   :  { %7615 = vmatpush.bf16.msra.mxu2 %v11340_v32  ;;  %v6974_v52 = vadd.f32 %v6973_v0, %v13417_v17  ;;  %v11412_v32 = vor.u32 %v12346_v46, %v11409_v29  ;;  %v12344_v0 = vld [vmem:[#allocation16 + $0x1d4] sm:$0xf]  ;;  %v12361_v46 = vld [vmem:[#allocation19 + $0x58] sm:$0xff] }
 0x486   :  { %v11404_v61 = vor.u32 %v12344_v0, %v11401_v5  ;;  %v12360_v29 = vld [vmem:[#allocation19 + $0x50] sm:$0xff]  ;;  %v12358_v0 = vld [vmem:[#allocation19 + $0x40] sm:$0xff] }
 0x487   :  { %v6987_v12 = vadd.f32 %v13409_v56, %v6974_v52 }
 0x489   :  { %7616 = vmatpush.bf16.msra.mxu2 %v11332_v15  ;;  %v7000_v36 = vadd.f32 %v13411_v7, %v6987_v12  ;;  %v11384_v7 = vor.u32 %v12341_v8, %v11383_v25  ;;  %v12342_v15 = vld [vmem:[#allocation16 + $0x1c4] sm:$0xf] }
 0x48a   :  { %v11396_v55 = vor.u32 %v12342_v15, %v11393_v4 }
 0x48b   :  { %v7013_v49 = vadd.f32 %v13426_v18, %v7000_v36  ;;  %7578 = vmatpush.bf16.msrb.mxu3 %v11384_v7  ;;  %v11376_v18 = vor.u32 %v12339_v47, %v11375_v58  ;;  %v12357_v7 = vld [vmem:[#allocation19 + $0x38] sm:$0xff]  ;;  %v12356_v47 = vld [vmem:[#allocation19 + $0x30] sm:$0xff] }
 0x48c   :  { %v6975_v54 = vpop.f32.mrf.mxu3  ;;  %v12365_v58 = vld [vmem:[#allocation19 + $0x78] sm:$0xff]  ;;  %7777 = vmatpush.bf16.msrb.mxu0 %v12357_v7 }
 0x48d   :  { %7617 = vmatpush.bf16.msra.mxu2 %v11324_v45  ;;  %v12340_v45 = vld [vmem:[#allocation16 + $0x1b4] sm:$0xf]  ;;  %v11385_v54 = vld [vmem:[#allocation16 + $0x1b8] sm:$0xf0]  ;;  %7790 = vmatpush.bf16.msrb.mxu1 %v12365_v58 }
 0x48e   :  { %v11388_v26 = vor.u32 %v12340_v45, %v11385_v54 }
 0x48f   :  { %7579 = vmatpush.bf16.msrb.mxu3 %v11376_v18 }
 0x490   :  { %7778 = vmatpush.bf16.msrb.mxu0 %v12356_v47 }
 0x491   :  { %7618 = vmatpush.bf16.msra.mxu2 %v11316_v11  ;;  %v11377_v11 = vld [vmem:[#allocation16 + $0x1a8] sm:$0xf0] }
 0x492   :  { %v11380_v20 = vor.u32 %v12338_v43, %v11377_v11 }
 0x493   :  { %7580 = vmatpush.bf16.msrb.mxu3 %v11368_v24  ;;  %v12352_v24 = vld [vmem:[#allocation19 + $0x10] sm:$0xff] }
 0x494   :  { %v7064_v51 = vpop.f32.mrf.mxu2 }
 0x495   :  { %v13433_v14 = vadd.f32 %v7064_v51, %v13419_v28  ;;  %v12318_v28 = vld [vmem:[#allocation16 + $0x104] sm:$0xf]  ;;  %7619 = vmatpush.bf16.msra.mxu2 %v11308_v13 }
 0x496   :  { %v11300_v53 = vor.u32 %v12318_v28, %v11297_v34  ;;  %v12334_v28 = vld [vmem:[#allocation16 + $0x184] sm:$0xf]  ;;  %v11361_v34 = vld [vmem:[#allocation16 + $0x188] sm:$0xf0] }
 0x497   :  { %7581 = vmatpush.bf16.msrb.mxu3 %v11360_v38  ;;  %v11364_v52 = vor.u32 %v12334_v28, %v11361_v34  ;;  %v12350_v38 = vld [vmem:[#allocation19] sm:$0xff] }
 0x499   :  { %7620 = vmatpush.bf16.msra.mxu2 %v11300_v53 }
 0x49b   :  { %7626 = vmatpush.bf16.msra.mxu3 %v11420_v16  ;;  %v12362_v16 = vld [vmem:[#allocation19 + $0x60] sm:$0xff] }
 0x49c   :  { %v7066_v50 = vpop.f32.mrf.mxu2 }
 0x49d   :  { %v11372_v50 = vor.u32 %v12336_v40, %v11369_v6 }
 0x49f   :  { %7627 = vmatpush.bf16.msra.mxu3 %v11412_v32  ;;  %v12359_v32 = vld [vmem:[#allocation19 + $0x48] sm:$0xff] }
 0x4a3   :  { %7628 = vmatpush.bf16.msra.mxu3 %v11404_v61 }
 0x4a5   :  { %v7025_v9 = vpop.f32.mrf.mxu3 }
 0x4a6   :  { %v7026_v17 = vadd.f32 %v7025_v9, %v7013_v49 }
 0x4a7   :  { %7629 = vmatpush.bf16.msra.mxu3 %v11396_v55 }
 0x4a8   :  { %v7135_v19 = vmul.f32 0.01, %v7026_v17 }
 0x4aa   :  { %v7139_v39 = vmax.f32 %v7026_v17, %v7135_v19 }
 0x4ab   :  { %7630 = vmatpush.bf16.msra.mxu3 %v11388_v26 }
 0x4ac   :  { %v7143_v2 = vpack.c.bf16 %v7139_v39, %v7139_v39  ;;  %v7212_v39 = vperm.slane %v7209_v33, 1 }
 0x4ad   :  { %v7027_v57 = vpop.f32.mrf.mxu3 }
 0x4ae   :  { %7569 = vmatmul.bf16.vlgmr.msrb.gmra.mxu2 %v7143_v2  ;;  %v12355_v57 = vld [vmem:[#allocation19 + $0x28] sm:$0xff] }
 0x4af   :  { %7631 = vmatpush.bf16.msra.mxu3 %v11380_v20  ;;  %7779 = vmatpush.bf16.msrb.mxu0 %v12355_v57 }
 0x4b3   :  { %7632 = vmatpush.bf16.msra.mxu3 %v11372_v50 }
 0x4b4   :  { %v13439_v56 = vpop.f32.mrf.mxu2 }
 0x4b7   :  { %7633 = vmatpush.bf16.msra.mxu3 %v11364_v52 }
 0x4bc   :  { %v7118_v23 = vpop.f32.mrf.mxu2 }
 0x4bd   :  { %v12354_v23 = vld [vmem:[#allocation19 + $0x20] sm:$0xff] }
 0x4be   :  { %7621 = vmatmul.bf16.vlgmr.msra.gmra.mxu2 %v7143_v2  ;;  %v12364_v2 = vld [vmem:[#allocation19 + $0x70] sm:$0xff]  ;;  %7780 = vmatpush.bf16.msrb.mxu0 %v12354_v23 }
 0x4bf   :  { %7791 = vmatpush.bf16.msrb.mxu1 %v12364_v2 }
 0x4c2   :  { %7781 = vmatpush.bf16.msrb.mxu0 %v12353_v48 }
 0x4c3   :  { %7792 = vmatpush.bf16.msrb.mxu1 %v12363_v10 }
 0x4c5   :  { %v7077_v51 = vpop.f32.mrf.mxu3 }
 0x4c6   :  { %v7078_v13 = vadd.f32 %v7077_v51, %v13433_v14  ;;  %7782 = vmatpush.bf16.msrb.mxu0 %v12352_v24 }
 0x4c7   :  { %7793 = vmatpush.bf16.msrb.mxu1 %v12362_v16 }
 0x4c8   :  { %v7544_v30 = vpop.f32.mrf.mxu0  ;;  %v7091_v53 = vadd.f32 %v13428_v60, %v7078_v13 }
 0x4c9   :  { %v7545_v17 = vadd.f32 %v7544_v30, %v7211_v63  ;;  %v12387_v30 = vld [vmem:[#allocation20] ss:$0 sm:$0xff] }
 0x4ca   :  { %v7104_v31 = vadd.f32 %v13430_v62, %v7091_v53  ;;  %7783 = vmatpush.bf16.msrb.mxu0 %v12351_v37  ;;  %v12388_v53 = vld [vmem:[#allocation22] ss:$0 sm:$0xff] }
 0x4cb   :  { %7794 = vmatpush.bf16.msrb.mxu1 %v12361_v46 }
 0x4cc   :  { %v7117_v41 = vadd.f32 %v13439_v56, %v7104_v31 }
 0x4cd   :  { %v7079_v22 = vpop.f32.mrf.mxu3 }
 0x4ce   :  { %7784 = vmatpush.bf16.msrb.mxu0 %v12350_v38 }
 0x4cf   :  { %7795 = vmatpush.bf16.msrb.mxu1 %v12360_v29 }
 0x4d0   :  { %v7546_v12 = vpop.f32.mrf.mxu0 }
 0x4d3   :  { %7796 = vmatpush.bf16.msrb.mxu1 %v12359_v32 }
 0x4d7   :  { %7797 = vmatpush.bf16.msrb.mxu1 %v12358_v0 }
 0x4d8   :  { %v7596_v21 = vpop.f32.mrf.mxu0 }
 0x4d9   :  { %v7597_v62 = vadd.f32 %v7596_v21, %v7212_v39 }
 0x4e0   :  { %v7598_v14 = vpop.f32.mrf.mxu0 }
 0x4e5   :  { %v7129_v3 = vpop.f32.mrf.mxu3 }
 0x4e6   :  { %v7130_v36 = vadd.f32 %v7129_v3, %v7117_v41  ;;  %v12389_v3 = vld [vmem:[#allocation3] ss:$0 sm:$0xff] }
 0x4e8   :  { %v7136_v35 = vmul.f32 0.01, %v7130_v36 }
 0x4ea   :  { %v7140_v49 = vmax.f32 %v7130_v36, %v7136_v35 }
 0x4eb   :  { %v7557_v44 = vpop.f32.mrf.mxu1 }
 0x4ec   :  { %v7144_v27 = vpack.c.bf16 %v7140_v49, %v7140_v49  ;;  %v7558_v60 = vadd.f32 %v7557_v44, %v7545_v17 }
 0x4ed   :  { %v7131_v9 = vpop.f32.mrf.mxu3 }
 0x4ee   :  { %7582 = vmatmul.bf16.vlgmr.msrb.gmra.mxu3 %v7144_v27 }
 0x4f3   :  { %v7559_v19 = vpop.f32.mrf.mxu1 }
 0x4fb   :  { %v7609_v25 = vpop.f32.mrf.mxu1 }
 0x4fc   :  { %v7610_v56 = vadd.f32 %v7609_v25, %v7597_v62 }
 0x4fe   :  { %7634 = vmatmul.bf16.vlgmr.msra.gmra.mxu3 %v7144_v27 }
 0x503   :  { %v7611_v8 = vpop.f32.mrf.mxu1 }
 0x531   :  { %v7570_v18 = vpop.f32.mrf.mxu2 }
 0x532   :  { %v7571_v5 = vadd.f32 %v7570_v18, %v7558_v60 }
 0x539   :  { %v7572_v59 = vpop.f32.mrf.mxu2 }
 0x541   :  { %v7622_v42 = vpop.f32.mrf.mxu2 }
 0x542   :  { %v7623_v54 = vadd.f32 %v7622_v42, %v7610_v56 }
 0x549   :  { %v7624_v1 = vpop.f32.mrf.mxu2 }
 0x571   :  { %v7583_v61 = vpop.f32.mrf.mxu3 }
 0x572   :  { %v7584_v51 = vadd.f32 %v7583_v61, %v7571_v5 }
 0x574   :  { %v7639_v15 = vmul.f32 0.01, %v7584_v51 }
 0x576   :  { %v7641_v4 = vmax.f32 %v7584_v51, %v7639_v15 }
 0x578   :  { %v7643_v55 = vpack.c.bf16 %v7641_v4, %v7641_v4 }
 0x579   :  { %v7585_v45 = vpop.f32.mrf.mxu3 }
 0x57a   :  { %7785 = vmatmul.bf16.vlgmr.msrb.gmra.mxu0 %v7643_v55 }
 0x581   :  { %v7635_v43 = vpop.f32.mrf.mxu3 }
 0x582   :  { %v7636_v26 = vadd.f32 %v7635_v43, %v7623_v54 }
 0x584   :  { %v7640_v11 = vmul.f32 0.01, %v7636_v26 }
 0x586   :  { %v7642_v22 = vmax.f32 %v7636_v26, %v7640_v11 }
 0x588   :  { %v7644_v20 = vpack.c.bf16 %v7642_v22, %v7642_v22 }
 0x589   :  { %v7637_v40 = vpop.f32.mrf.mxu3 }
 0x58a   :  { %7798 = vmatmul.bf16.vlgmr.msrb.gmra.mxu1 %v7644_v20 }
 0x5f7   :  { %v7786_v6 = vpop.f32.mrf.mxu0 }
 0x5f8   :  { %v7787_v13 = vadd.f32 %v12387_v30, %v7786_v6 }
 0x5ff   :  { %v7788_v50 = vpop.f32.mrf.mxu0 }
 0x607   :  { %v7799_v28 = vpop.f32.mrf.mxu1 }
 0x608   :  { %v7800_v34 = vadd.f32 %v7799_v28, %v7787_v13 }
 0x60a   :  { %v7803_v52 = vmul.f32 0.01, %v7800_v34 }
 0x60c   :  { %v7804_v12 = vmax.f32 %v7800_v34, %v7803_v52 }
 0x60e   :  { %v7809_v31 = vmul.f32 %v12388_v53, %v7804_v12 }
 0x60f   :  { %v7801_v41 = vpop.f32.mrf.mxu1 }
 0x610   :  { %7810 = vadd.xlane.f32.xlu2 %v7809_v31 }
 0x683   :  { %v7811_v36 = vpop.xlane.xlu2 %7810 }
 0x684   :  { %v7816_v21 = vadd.f32 %v12389_v3, %v7811_v36 }
 0x686   :  { %v11485_v35 = vmul.f32 -1.442695, %v7816_v21 }
 0x688   :  { %12390 = vpow2.f32 %v11485_v35 }
 0x68e   :  { %v12391_v49 = vpop.eup %12390 }
 0x68f   :  { %v7820_v27 = vadd.f32 1.0, %v12391_v49 }
 0x691   :  { %12392 = vrcp.f32 %v7820_v27  ;;  %v7832_v63 = vand.u32 2147483648, %v7820_v27  ;;  %v7830_v44 = vand.u32 2147483647, %v7820_v27  ;;  %vm7826_vm4 = vweird.f32 %v7820_v27 }
 0x693   :  { %v7833_v19 = vor.u32 1.1754944e-38, %v7832_v63  ;;  %vm7831_vm6 = vcmp.eq.f32.partialorder %v7830_v44, 8.507059e+37 }
 0x697   :  { %v12393_v9 = vpop.eup %12392 }
 0x698   :  { %v7822_v14 = vmul.f32 %v12393_v9, %v7820_v27  ;;  %vm7827_vm3 = vweird.f32 %v12393_v9 }
 0x699   :  { %vm7828_vm5 = vmor %vm7826_vm4, %vm7827_vm3 }
 0x69a   :  { %v7823_v33 = vsub.f32 1.0, %v7822_v14 }
 0x69c   :  { %v7824_v17 = vmul.f32 %v12393_v9, %v7823_v33 }
 0x69e   :  { %v7825_v60 = vadd.f32 %v12393_v9, %v7824_v17 }
 0x6a0   :  { %v7829_v39 = vsel %vm7828_vm5, %v12393_v9, %v7825_v60 }
 0x6a1   :  { %v7834_v62 = vsel %vm7831_vm6, %v7833_v19, %v7829_v39 }
 0x6a2   :  { %7836 = vxpose.xlu0.b32.start.end [1/1] (short) (narrow) %v7834_v62, 8 }
 0x746   :  { %v7852_v25 = vpop.trf.xlu0 }
 0x747   :  { %7869 = vst.msk [vmem:[#allocation23] sm:$0x1] %vm7868_vm7, %v7852_v25 }
 0x748   :  { %7880 = dma.vmem_to_hbm [thread:$0]  %s7876_s16, 16, %s7878_s2, [#allocation6]  }
 0x749   :  { %12676 = dma.done.wait [#allocation6], 16  }
 0x74a   :  { %12677 = vsyncadd [#allocation6], 4294967280 }
 0x74b   :  { %7885 = vsyncpa [#allocation5], 1 }
 0x74c   :  { %7886 = vsyncpa [#allocation12], 1 }
 0x74d   :  { %7887 = vsyncpa [#allocation15], 1 }
 0x74e   :  { %7888 = vsyncpa [#allocation18], 1 }
 0x74f   :  { %7889 = vsyncpa [#allocation21], 1 }
 0x750   :  { %7890 = vsyncpa [#allocation6], 1 }
 0x751   :  { %7891 = vsyncpa [#allocation7], 1 }
 0x752   :  { %7892 = vsyncpa [#allocation9], 1 }

</bundles_post_ra>
